<compile_context>
chip_gen: v7x
topology: tpu7x:2x2x1
jax: 0.10.0
libtpu: 0.0.40
codegen_flags: <defaults>
</compile_context>

<pallas_src>
import functools
import math

import jax
import jax.numpy as jnp
from jax.experimental import pallas as pl
from jax.experimental.pallas import tpu as pltpu

_LN_EPS = 1e-6


def _pick_tile(hw):
    # largest spatial tile (multiple of 8) that divides H*W; fall back to the full extent.
    for t in (2048, 1024, 512, 256, 128, 64, 32, 16, 8):
        if hw % t == 0:
            return t
    return hw


# ------------------ K1: LayerNorm1 + 1x1 conv (c -> 2c, pre-split halves) ------------------
def _ln_conv1_kernel(x_ref, ln1w_ref, ln1b_ref, w1a_ref, w1b_ref, b1a_ref, b1b_ref,
                     ua_ref, ub_ref, *, eps):
    x = x_ref[0].astype(jnp.float32)                        # (T, C)
    mu = jnp.mean(x, axis=-1, keepdims=True)
    var = jnp.mean((x - mu) ** 2, axis=-1, keepdims=True)
    xn = (x - mu) / jnp.sqrt(var + eps)
    xn = xn * ln1w_ref[...] + ln1b_ref[...]
    ua_ref[0] = jnp.dot(xn, w1a_ref[...], preferred_element_type=jnp.float32) + b1a_ref[...]
    ub_ref[0] = jnp.dot(xn, w1b_ref[...], preferred_element_type=jnp.float32) + b1b_ref[...]


# ------- K2: depthwise 3x3 DO-Conv + SimpleGate + global avg-pool + SCA (conv1d + conv3) -------
def _dw_gate_pool_kernel(ua_ref, ub_ref, dowa_ref, dowb_ref, b2a_ref, b2b_ref,
                         wsca_ref, w3_ref, b3_ref, attn_ref, *, H, W, C):
    def dwconv(up, dow_ref, bias_ref):                      # up: (H+2, W+2, C), zero-padded
        acc = jnp.zeros((H, W, C), jnp.float32)
        for idx in range(9):                                # static unroll over 3x3 taps
            dy, dx = idx // 3, idx % 3
            acc = acc + up[dy:dy + H, dx:dx + W, :] * dow_ref[idx:idx + 1, :]
        return acc + bias_ref[...]

    va = dwconv(ua_ref[0].astype(jnp.float32), dowa_ref, b2a_ref)
    vb = dwconv(ub_ref[0].astype(jnp.float32), dowb_ref, b2b_ref)
    g = va * vb                                             # SimpleGate, (H, W, C)
    s = jnp.sum(jnp.sum(g, axis=1, keepdims=True), axis=0, keepdims=True)   # (1, 1, C)
    mean_c = s[0] * (1.0 / (H * W))                         # (1, C): global average pool
    # ECA conv1d on a length-1 pooled sequence == matmul with its center tap; then 1x1 conv3.
    a1 = jnp.dot(mean_c, wsca_ref[...], preferred_element_type=jnp.float32)
    a2 = jnp.dot(a1, w3_ref[...], preferred_element_type=jnp.float32) + b3_ref[...]
    attn_ref[0] = a2


# -------- K3: y = inp + attn*beta ; LN2 ; conv4 (split) ; SimpleGate ; conv5 ; +gamma --------
def _ffn_kernel(x_ref, attn_ref, beta_ref, ln2w_ref, ln2b_ref, w4a_ref, w4b_ref,
                b4a_ref, b4b_ref, w5_ref, b5_ref, gamma_ref, out_ref, *, eps):
    xin = x_ref[0].astype(jnp.float32)                      # (T, C)
    a2 = attn_ref[0].astype(jnp.float32)                    # (1, C)
    y = xin + a2 * beta_ref[...]
    mu = jnp.mean(y, axis=-1, keepdims=True)
    var = jnp.mean((y - mu) ** 2, axis=-1, keepdims=True)
    yn = (y - mu) / jnp.sqrt(var + eps)
    yn = yn * ln2w_ref[...] + ln2b_ref[...]
    ga = jnp.dot(yn, w4a_ref[...], preferred_element_type=jnp.float32) + b4a_ref[...]
    gb = jnp.dot(yn, w4b_ref[...], preferred_element_type=jnp.float32) + b4b_ref[...]
    z = jnp.dot(ga * gb, w5_ref[...], preferred_element_type=jnp.float32) + b5_ref[...]
    out_ref[0] = (y + z * gamma_ref[...]).astype(out_ref.dtype)


# ------------------------------------ wrapper ------------------------------------
def nafblock_forward(inp, p):
    """inp: (B, C, H, W).  p: parameter dict (see __main__).  Returns (B, C, H, W)."""
    B, C, H, W = inp.shape
    dw = 2 * C
    HW = H * W
    T = _pick_tile(HW)
    nT = HW // T
    hp = jax.lax.Precision.HIGHEST

    # ---- parameter folding / layout plumbing (tiny, XLA) ----
    w1t = p["w1"].T                                        # (C, 2C), columns = conv1 outputs
    w1a_t, w1b_t = w1t[:, :C], w1t[:, C:]
    b1a, b1b = p["b1"][:C].reshape(1, C), p["b1"][C:].reshape(1, C)

    # DO-Conv weight folding (done inside forward() in PyTorch): DoW = einsum(D+D_diag, W)
    mn = 9
    d_eff = p["D"] + jnp.tile(jnp.eye(mn, dtype=p["D"].dtype)[None], (dw, 1, 1))
    w_r = p["W_do"].reshape(1, dw, mn)
    dow = jnp.einsum("ims,ois->oim", d_eff, w_r, precision=hp)[0]       # (2C, 9)
    dow_taps = dow.T                                                    # (9, 2C), tap = 3*dy+dx
    dow_a, dow_b = dow_taps[:, :C], dow_taps[:, C:]
    b2a, b2b = p["b2"][:C].reshape(1, C), p["b2"][C:].reshape(1, C)

    k = p["w_sca2"].shape[-1]
    wsca_t = p["w_sca2"][:, :, (k - 1) // 2].T             # (C, C): center tap (seq len is 1)
    w3_t = p["w3"].T
    b3 = p["b3"].reshape(1, C)
    beta = p["beta"].reshape(1, C)
    ln1w, ln1b = p["ln1_w"].reshape(1, C), p["ln1_b"].reshape(1, C)
    ln2w, ln2b = p["ln2_w"].reshape(1, C), p["ln2_b"].reshape(1, C)
    w4t = p["w4"].T                                        # (C, 2C)
    w4a_t, w4b_t = w4t[:, :C], w4t[:, C:]
    b4a, b4b = p["b4"][:C].reshape(1, C), p["b4"][C:].reshape(1, C)
    w5_t = p["w5"].T
    b5 = p["b5"].reshape(1, C)
    gamma = p["gamma"].reshape(1, C)

    # NCHW -> (B, H*W, C): channels on lanes, pixels on sublanes (MXU-friendly 1x1 convs).
    # No dtype upcast in the wrapper; kernels cast per-tile in VMEM.
    x_flat = jnp.transpose(inp, (0, 2, 3, 1)).reshape(B, HW, C)

    par2 = pltpu.CompilerParams(dimension_semantics=("parallel", "parallel"))
    par1 = pltpu.CompilerParams(dimension_semantics=("parallel",))

    row_spec = pl.BlockSpec((1, C), lambda b, t: (0, 0))
    mat_spec = pl.BlockSpec((C, C), lambda b, t: (0, 0))
    tile_spec = pl.BlockSpec((1, T, C), lambda b, t: (b, t, 0))

    # ---- K1 ----
    ua, ub = pl.pallas_call(
        functools.partial(_ln_conv1_kernel, eps=_LN_EPS),
        out_shape=(jax.ShapeDtypeStruct((B, HW, C), jnp.float32),
                   jax.ShapeDtypeStruct((B, HW, C), jnp.float32)),
        grid=(B, nT),
        in_specs=[tile_spec, row_spec, row_spec, mat_spec, mat_spec, row_spec, row_spec],
        out_specs=(tile_spec, tile_spec),
        compiler_params=par2,
    )(x_flat, ln1w, ln1b, w1a_t, w1b_t, b1a, b1b)

    # ---- K2 ----
    # TODO(synk): for very large H*W, halo-tile the spatial dims instead of one image per step.
    ua_p = jnp.pad(ua.reshape(B, H, W, C), ((0, 0), (1, 1), (1, 1), (0, 0)))
    ub_p = jnp.pad(ub.reshape(B, H, W, C), ((0, 0), (1, 1), (1, 1), (0, 0)))

    img_spec = pl.BlockSpec((1, H + 2, W + 2, C), lambda b: (b, 0, 0, 0))
    vec_spec = pl.BlockSpec((1, C), lambda b: (0, 0))
    sq_spec = pl.BlockSpec((C, C), lambda b: (0, 0))
    tap_spec = pl.BlockSpec((9, C), lambda b: (0, 0))

    attn = pl.pallas_call(
        functools.partial(_dw_gate_pool_kernel, H=H, W=W, C=C),
        out_shape=jax.ShapeDtypeStruct((B, 1, C), jnp.float32),
        grid=(B,),
        in_specs=[img_spec, img_spec, tap_spec, tap_spec, vec_spec, vec_spec,
                  sq_spec, sq_spec, vec_spec],
        out_specs=pl.BlockSpec((1, 1, C), lambda b: (b, 0, 0)),
        compiler_params=par1,
    )(ua_p, ub_p, dow_a, dow_b, b2a, b2b, wsca_t, w3_t, b3)

    # ---- K3 ----
    attn_spec = pl.BlockSpec((1, 1, C), lambda b, t: (b, 0, 0))
    out_flat = pl.pallas_call(
        functools.partial(_ffn_kernel, eps=_LN_EPS),
        out_shape=jax.ShapeDtypeStruct((B, HW, C), inp.dtype),
        grid=(B, nT),
        in_specs=[tile_spec, attn_spec, row_spec, row_spec, row_spec,
                  mat_spec, mat_spec, row_spec, row_spec, mat_spec, row_spec, row_spec],
        out_specs=tile_spec,
        compiler_params=par2,
    )(x_flat, attn, beta, ln2w, ln2b, w4a_t, w4b_t, b4a, b4b, w5_t, b5, gamma)

    return jnp.transpose(out_flat.reshape(B, H, W, C), (0, 3, 1, 2))


# ------------------------------ pure-JAX reference (NCHW) ------------------------------
def nafblock_ref(inp, p, eps=_LN_EPS):
    B, C, H, W = inp.shape
    dw = 2 * C
    hp = jax.lax.Precision.HIGHEST
    x = inp
    mu = jnp.mean(x, axis=1, keepdims=True)
    var = jnp.mean((x - mu) ** 2, axis=1, keepdims=True)
    xn = (x - mu) / jnp.sqrt(var + eps)
    xn = p["ln1_w"][None, :, None, None] * xn + p["ln1_b"][None, :, None, None]
    z = jnp.einsum("oc,bchw->bohw", p["w1"], xn, precision=hp) + p["b1"][None, :, None, None]
    d_eff = p["D"] + jnp.tile(jnp.eye(9, dtype=p["D"].dtype)[None], (dw, 1, 1))
    w_r = p["W_do"].reshape(1, dw, 9)
    dow = jnp.einsum("ims,ois->oim", d_eff, w_r, precision=hp).reshape(dw, 1, 3, 3)
    v = jax.lax.conv_general_dilated(z, dow, (1, 1), ((1, 1), (1, 1)),
                                     dimension_numbers=("NCHW", "OIHW", "NCHW"),
                                     feature_group_count=dw, precision=hp)
    v = v + p["b2"][None, :, None, None]
    g = v[:, :C] * v[:, C:]
    pool = jnp.mean(g, axis=(2, 3))                                   # (B, C)
    k = p["w_sca2"].shape[-1]
    pad = (k - 1) // 2
    a1 = jax.lax.conv_general_dilated(pool[:, :, None], p["w_sca2"], (1,), ((pad, pad),),
                                      dimension_numbers=("NCH", "OIH", "NCH"),
                                      precision=hp)[:, :, 0]
    a2 = jnp.einsum("oi,bi->bo", p["w3"], a1, precision=hp) + p["b3"][None, :]
    y = inp + a2[:, :, None, None] * p["beta"][None, :, None, None]
    mu2 = jnp.mean(y, axis=1, keepdims=True)
    var2 = jnp.mean((y - mu2) ** 2, axis=1, keepdims=True)
    yn = (y - mu2) / jnp.sqrt(var2 + eps)
    yn = p["ln2_w"][None, :, None, None] * yn + p["ln2_b"][None, :, None, None]
    u = jnp.einsum("oc,bchw->bohw", p["w4"], yn, precision=hp) + p["b4"][None, :, None, None]
    g2 = u[:, :C] * u[:, C:]
    z2 = jnp.einsum("oc,bchw->bohw", p["w5"], g2, precision=hp) + p["b5"][None, :, None, None]
    return y + z2 * p["gamma"][None, :, None, None]


if __name__ == "__main__":
    B, C, H, W = 2, 8, 16, 16
    dw = 2 * C
    t = int(abs((math.log(C, 2) + 1) / 2))          # dw_channel//2 == C
    k_size = t if t % 2 else t + 1                   # -> 3 for C=8 (exercises the ECA conv path)

    key = jax.random.PRNGKey(0)
    keys = jax.random.split(key, 20)

    def rnd(kk, shape, scale):
        return scale * jax.random.normal(kk, shape, dtype=jnp.float32)

    # beta/gamma/D are zero-initialized in PyTorch; randomized here so the test exercises
    # the full computation (forward semantics are parameter-generic).
    params = dict(
        ln1_w=1.0 + rnd(keys[0], (C,), 0.1), ln1_b=rnd(keys[1], (C,), 0.1),
        w1=rnd(keys[2], (dw, C), 0.3), b1=rnd(keys[3], (dw,), 0.1),
        W_do=rnd(keys[4], (dw, 1, 9), 0.3), D=rnd(keys[5], (dw, 9, 9), 0.1),
        b2=rnd(keys[6], (dw,), 0.1),
        w_sca2=rnd(keys[7], (C, C, k_size), 0.3),
        w3=rnd(keys[8], (C, C), 0.3), b3=rnd(keys[9], (C,), 0.1),
        beta=rnd(keys[10], (C,), 0.5),
        ln2_w=1.0 + rnd(keys[11], (C,), 0.1), ln2_b=rnd(keys[12], (C,), 0.1),
        w4=rnd(keys[13], (dw, C), 0.3), b4=rnd(keys[14], (dw,), 0.1),
        w5=rnd(keys[15], (C, C), 0.3), b5=rnd(keys[16], (C,), 0.1),
        gamma=rnd(keys[17], (C,), 0.5),
    )
    inp = jax.random.normal(keys[18], (B, C, H, W), dtype=jnp.float32)

    out = jax.block_until_ready(jax.jit(nafblock_forward)(inp, params))
    ref = jax.block_until_ready(nafblock_ref(inp, params))

    assert out.shape == ref.shape, (out.shape, ref.shape)
    max_err = float(jnp.max(jnp.abs(out - ref)))
    assert jnp.allclose(out, ref, atol=5e-3, rtol=5e-3), ("max_abs_err", max_err)
    print("KERNEL_OK")
</pallas_src>

<mosaic_0001>
module attributes {stable_mosaic.version = 11 : i64} {
  func.func @_ln_conv1_kernel(%arg0: i32, %arg1: i32, %arg2: memref<1x256x8xf32, #tpu.memory_space<vmem>>, %arg3: memref<1x8xf32, #tpu.memory_space<vmem>>, %arg4: memref<1x8xf32, #tpu.memory_space<vmem>>, %arg5: memref<8x8xf32, #tpu.memory_space<vmem>>, %arg6: memref<8x8xf32, #tpu.memory_space<vmem>>, %arg7: memref<1x8xf32, #tpu.memory_space<vmem>>, %arg8: memref<1x8xf32, #tpu.memory_space<vmem>>, %arg9: memref<1x256x8xf32, #tpu.memory_space<vmem>>, %arg10: memref<1x256x8xf32, #tpu.memory_space<vmem>>) attributes {dimension_semantics = [#tpu.dimension_semantics<parallel>, #tpu.dimension_semantics<parallel>], iteration_bounds = array<i64: 2, 1>, scalar_prefetch = 0 : i64, scratch_operands = 0 : i64, tpu.core_type = #tpu.core_type<tc>, window_params = [{transform_indices = @transform_0, window_bounds = array<i64: 1, 256, 8>}, {pipeline_mode = #tpu.pipeline_mode<synchronous>, transform_indices = @transform_1, window_bounds = array<i64: 1, 8>}, {pipeline_mode = #tpu.pipeline_mode<synchronous>, transform_indices = @transform_2, window_bounds = array<i64: 1, 8>}, {pipeline_mode = #tpu.pipeline_mode<synchronous>, transform_indices = @transform_3, window_bounds = array<i64: 8, 8>}, {pipeline_mode = #tpu.pipeline_mode<synchronous>, transform_indices = @transform_4, window_bounds = array<i64: 8, 8>}, {pipeline_mode = #tpu.pipeline_mode<synchronous>, transform_indices = @transform_5, window_bounds = array<i64: 1, 8>}, {pipeline_mode = #tpu.pipeline_mode<synchronous>, transform_indices = @transform_6, window_bounds = array<i64: 1, 8>}, {transform_indices = @transform_7, window_bounds = array<i64: 1, 256, 8>}, {transform_indices = @transform_8, window_bounds = array<i64: 1, 256, 8>}]} {
    %c0 = arith.constant 0 : index
    %c0_0 = arith.constant 0 : index
    %c0_1 = arith.constant 0 : index
    %0 = vector.load %arg2[%c0, %c0_0, %c0_1] : memref<1x256x8xf32, #tpu.memory_space<vmem>>, vector<1x256x8xf32>
    %1 = vector.shape_cast %0 : vector<1x256x8xf32> to vector<256x8xf32>
    %cst = arith.constant dense<0.000000e+00> : vector<256xf32>
    %2 = vector.multi_reduction <add>, %1, %cst [1] : vector<256x8xf32> to vector<256xf32>
    %3 = vector.shape_cast %2 : vector<256xf32> to vector<256x1xf32>
    %cst_2 = arith.constant 8.000000e+00 : f32
    %4 = vector.broadcast %cst_2 : f32 to vector<256x1xf32>
    %5 = arith.divf %3, %4 : vector<256x1xf32>
    %6 = vector.broadcast %5 : vector<256x1xf32> to vector<256x8xf32>
    %7 = arith.subf %1, %6 : vector<256x8xf32>
    %8 = arith.mulf %7, %7 : vector<256x8xf32>
    %cst_3 = arith.constant dense<0.000000e+00> : vector<256xf32>
    %9 = vector.multi_reduction <add>, %8, %cst_3 [1] : vector<256x8xf32> to vector<256xf32>
    %10 = vector.shape_cast %9 : vector<256xf32> to vector<256x1xf32>
    %cst_4 = arith.constant 8.000000e+00 : f32
    %11 = vector.broadcast %cst_4 : f32 to vector<256x1xf32>
    %12 = arith.divf %10, %11 : vector<256x1xf32>
    %13 = vector.broadcast %5 : vector<256x1xf32> to vector<256x8xf32>
    %14 = arith.subf %1, %13 : vector<256x8xf32>
    %cst_5 = arith.constant 9.99999997E-7 : f32
    %15 = vector.broadcast %cst_5 : f32 to vector<256x1xf32>
    %16 = arith.addf %12, %15 : vector<256x1xf32>
    %17 = math.sqrt %16 : vector<256x1xf32>
    %18 = vector.broadcast %17 : vector<256x1xf32> to vector<256x8xf32>
    %19 = arith.divf %14, %18 : vector<256x8xf32>
    %c0_6 = arith.constant 0 : index
    %c0_7 = arith.constant 0 : index
    %20 = vector.load %arg3[%c0_6, %c0_7] : memref<1x8xf32, #tpu.memory_space<vmem>>, vector<1x8xf32>
    %21 = vector.broadcast %20 : vector<1x8xf32> to vector<256x8xf32>
    %22 = arith.mulf %19, %21 : vector<256x8xf32>
    %c0_8 = arith.constant 0 : index
    %c0_9 = arith.constant 0 : index
    %23 = vector.load %arg4[%c0_8, %c0_9] : memref<1x8xf32, #tpu.memory_space<vmem>>, vector<1x8xf32>
    %24 = vector.broadcast %23 : vector<1x8xf32> to vector<256x8xf32>
    %25 = arith.addf %22, %24 : vector<256x8xf32>
    %c0_10 = arith.constant 0 : index
    %c0_11 = arith.constant 0 : index
    %26 = vector.load %arg5[%c0_10, %c0_11] : memref<8x8xf32, #tpu.memory_space<vmem>>, vector<8x8xf32>
    %cst_12 = arith.constant dense<0.000000e+00> : vector<256x8xf32>
    %27 = tpu.matmul %25, %26, %cst_12 {dimension_numbers = #tpu.dot_dimension_numbers<[1], [0], [0], [1], [0, 0, 1, 1], [], []>} : vector<256x8xf32>, vector<8x8xf32>, vector<256x8xf32> -> vector<256x8xf32>
    %c0_13 = arith.constant 0 : index
    %c0_14 = arith.constant 0 : index
    %28 = vector.load %arg7[%c0_13, %c0_14] : memref<1x8xf32, #tpu.memory_space<vmem>>, vector<1x8xf32>
    %29 = vector.broadcast %28 : vector<1x8xf32> to vector<256x8xf32>
    %30 = arith.addf %27, %29 : vector<256x8xf32>
    %c0_15 = arith.constant 0 : index
    %c0_16 = arith.constant 0 : index
    %c0_17 = arith.constant 0 : index
    %31 = vector.load %arg9[%c0_15, %c0_16, %c0_17] : memref<1x256x8xf32, #tpu.memory_space<vmem>>, vector<1x256x8xf32>
    %32 = vector.shape_cast %31 : vector<1x256x8xf32> to vector<256x8xf32>
    %33 = vector.shape_cast %30 : vector<256x8xf32> to vector<1x256x8xf32>
    tpu.vector_store %arg9[%c0_15, %c0_16, %c0_17], %33 {strides = array<i32>} : memref<1x256x8xf32, #tpu.memory_space<vmem>>, vector<1x256x8xf32>,
    %c0_18 = arith.constant 0 : index
    %c0_19 = arith.constant 0 : index
    %34 = vector.load %arg6[%c0_18, %c0_19] : memref<8x8xf32, #tpu.memory_space<vmem>>, vector<8x8xf32>
    %cst_20 = arith.constant dense<0.000000e+00> : vector<256x8xf32>
    %35 = tpu.matmul %25, %34, %cst_20 {dimension_numbers = #tpu.dot_dimension_numbers<[1], [0], [0], [1], [0, 0, 1, 1], [], []>} : vector<256x8xf32>, vector<8x8xf32>, vector<256x8xf32> -> vector<256x8xf32>
    %c0_21 = arith.constant 0 : index
    %c0_22 = arith.constant 0 : index
    %36 = vector.load %arg8[%c0_21, %c0_22] : memref<1x8xf32, #tpu.memory_space<vmem>>, vector<1x8xf32>
    %37 = vector.broadcast %36 : vector<1x8xf32> to vector<256x8xf32>
    %38 = arith.addf %35, %37 : vector<256x8xf32>
    %c0_23 = arith.constant 0 : index
    %c0_24 = arith.constant 0 : index
    %c0_25 = arith.constant 0 : index
    %39 = vector.load %arg10[%c0_23, %c0_24, %c0_25] : memref<1x256x8xf32, #tpu.memory_space<vmem>>, vector<1x256x8xf32>
    %40 = vector.shape_cast %39 : vector<1x256x8xf32> to vector<256x8xf32>
    %41 = vector.shape_cast %38 : vector<256x8xf32> to vector<1x256x8xf32>
    tpu.vector_store %arg10[%c0_23, %c0_24, %c0_25], %41 {strides = array<i32>} : memref<1x256x8xf32, #tpu.memory_space<vmem>>, vector<1x256x8xf32>,
    return
  }
  func.func @transform_0(%arg0: i32, %arg1: i32) -> (i32, i32, i32) {
    %c0_i32 = arith.constant 0 : i32
    %c0_i32_0 = arith.constant 0 : i32
    return %arg0, %arg1, %c0_i32 : i32, i32, i32
  }
  func.func @transform_1(%arg0: i32, %arg1: i32) -> (i32, i32) {
    %c0_i32 = arith.constant 0 : i32
    %c0_i32_0 = arith.constant 0 : i32
    %c0_i32_1 = arith.constant 0 : i32
    return %c0_i32, %c0_i32_0 : i32, i32
  }
  func.func @transform_2(%arg0: i32, %arg1: i32) -> (i32, i32) {
    %c0_i32 = arith.constant 0 : i32
    %c0_i32_0 = arith.constant 0 : i32
    %c0_i32_1 = arith.constant 0 : i32
    return %c0_i32, %c0_i32_0 : i32, i32
  }
  func.func @transform_3(%arg0: i32, %arg1: i32) -> (i32, i32) {
    %c0_i32 = arith.constant 0 : i32
    %c0_i32_0 = arith.constant 0 : i32
    %c0_i32_1 = arith.constant 0 : i32
    return %c0_i32, %c0_i32_0 : i32, i32
  }
  func.func @transform_4(%arg0: i32, %arg1: i32) -> (i32, i32) {
    %c0_i32 = arith.constant 0 : i32
    %c0_i32_0 = arith.constant 0 : i32
    %c0_i32_1 = arith.constant 0 : i32
    return %c0_i32, %c0_i32_0 : i32, i32
  }
  func.func @transform_5(%arg0: i32, %arg1: i32) -> (i32, i32) {
    %c0_i32 = arith.constant 0 : i32
    %c0_i32_0 = arith.constant 0 : i32
    %c0_i32_1 = arith.constant 0 : i32
    return %c0_i32, %c0_i32_0 : i32, i32
  }
  func.func @transform_6(%arg0: i32, %arg1: i32) -> (i32, i32) {
    %c0_i32 = arith.constant 0 : i32
    %c0_i32_0 = arith.constant 0 : i32
    %c0_i32_1 = arith.constant 0 : i32
    return %c0_i32, %c0_i32_0 : i32, i32
  }
  func.func @transform_7(%arg0: i32, %arg1: i32) -> (i32, i32, i32) {
    %c0_i32 = arith.constant 0 : i32
    %c0_i32_0 = arith.constant 0 : i32
    return %arg0, %arg1, %c0_i32 : i32, i32, i32
  }
  func.func @transform_8(%arg0: i32, %arg1: i32) -> (i32, i32, i32) {
    %c0_i32 = arith.constant 0 : i32
    %c0_i32_0 = arith.constant 0 : i32
    return %arg0, %arg1, %c0_i32 : i32, i32, i32
  }
}

module attributes {stable_mosaic.version = 11 : i64} {
  func.func @_ffn_kernel(%arg0: i32, %arg1: i32, %arg2: memref<1x256x8xf32, #tpu.memory_space<vmem>>, %arg3: memref<1x1x8xf32, #tpu.memory_space<vmem>>, %arg4: memref<1x8xf32, #tpu.memory_space<vmem>>, %arg5: memref<1x8xf32, #tpu.memory_space<vmem>>, %arg6: memref<1x8xf32, #tpu.memory_space<vmem>>, %arg7: memref<8x8xf32, #tpu.memory_space<vmem>>, %arg8: memref<8x8xf32, #tpu.memory_space<vmem>>, %arg9: memref<1x8xf32, #tpu.memory_space<vmem>>, %arg10: memref<1x8xf32, #tpu.memory_space<vmem>>, %arg11: memref<8x8xf32, #tpu.memory_space<vmem>>, %arg12: memref<1x8xf32, #tpu.memory_space<vmem>>, %arg13: memref<1x8xf32, #tpu.memory_space<vmem>>, %arg14: memref<1x256x8xf32, #tpu.memory_space<vmem>>) attributes {dimension_semantics = [#tpu.dimension_semantics<parallel>, #tpu.dimension_semantics<parallel>], iteration_bounds = array<i64: 2, 1>, scalar_prefetch = 0 : i64, scratch_operands = 0 : i64, tpu.core_type = #tpu.core_type<tc>, window_params = [{transform_indices = @transform_0, window_bounds = array<i64: 1, 256, 8>}, {transform_indices = @transform_1, window_bounds = array<i64: 1, 1, 8>}, {pipeline_mode = #tpu.pipeline_mode<synchronous>, transform_indices = @transform_2, window_bounds = array<i64: 1, 8>}, {pipeline_mode = #tpu.pipeline_mode<synchronous>, transform_indices = @transform_3, window_bounds = array<i64: 1, 8>}, {pipeline_mode = #tpu.pipeline_mode<synchronous>, transform_indices = @transform_4, window_bounds = array<i64: 1, 8>}, {pipeline_mode = #tpu.pipeline_mode<synchronous>, transform_indices = @transform_5, window_bounds = array<i64: 8, 8>}, {pipeline_mode = #tpu.pipeline_mode<synchronous>, transform_indices = @transform_6, window_bounds = array<i64: 8, 8>}, {pipeline_mode = #tpu.pipeline_mode<synchronous>, transform_indices = @transform_7, window_bounds = array<i64: 1, 8>}, {pipeline_mode = #tpu.pipeline_mode<synchronous>, transform_indices = @transform_8, window_bounds = array<i64: 1, 8>}, {pipeline_mode = #tpu.pipeline_mode<synchronous>, transform_indices = @transform_9, window_bounds = array<i64: 8, 8>}, {pipeline_mode = #tpu.pipeline_mode<synchronous>, transform_indices = @transform_10, window_bounds = array<i64: 1, 8>}, {pipeline_mode = #tpu.pipeline_mode<synchronous>, transform_indices = @transform_11, window_bounds = array<i64: 1, 8>}, {transform_indices = @transform_12, window_bounds = array<i64: 1, 256, 8>}]} {
    %c0 = arith.constant 0 : index
    %c0_0 = arith.constant 0 : index
    %c0_1 = arith.constant 0 : index
    %0 = vector.load %arg2[%c0, %c0_0, %c0_1] : memref<1x256x8xf32, #tpu.memory_space<vmem>>, vector<1x256x8xf32>
    %1 = vector.shape_cast %0 : vector<1x256x8xf32> to vector<256x8xf32>
    %c0_2 = arith.constant 0 : index
    %c0_3 = arith.constant 0 : index
    %c0_4 = arith.constant 0 : index
    %2 = vector.load %arg3[%c0_2, %c0_3, %c0_4] : memref<1x1x8xf32, #tpu.memory_space<vmem>>, vector<1x1x8xf32>
    %3 = vector.shape_cast %2 : vector<1x1x8xf32> to vector<1x8xf32>
    %c0_5 = arith.constant 0 : index
    %c0_6 = arith.constant 0 : index
    %4 = vector.load %arg4[%c0_5, %c0_6] : memref<1x8xf32, #tpu.memory_space<vmem>>, vector<1x8xf32>
    %5 = arith.mulf %3, %4 : vector<1x8xf32>
    %6 = vector.broadcast %5 : vector<1x8xf32> to vector<256x8xf32>
    %7 = arith.addf %1, %6 : vector<256x8xf32>
    %cst = arith.constant dense<0.000000e+00> : vector<256xf32>
    %8 = vector.multi_reduction <add>, %7, %cst [1] : vector<256x8xf32> to vector<256xf32>
    %9 = vector.shape_cast %8 : vector<256xf32> to vector<256x1xf32>
    %cst_7 = arith.constant 8.000000e+00 : f32
    %10 = vector.broadcast %cst_7 : f32 to vector<256x1xf32>
    %11 = arith.divf %9, %10 : vector<256x1xf32>
    %12 = vector.broadcast %11 : vector<256x1xf32> to vector<256x8xf32>
    %13 = arith.subf %7, %12 : vector<256x8xf32>
    %14 = arith.mulf %13, %13 : vector<256x8xf32>
    %cst_8 = arith.constant dense<0.000000e+00> : vector<256xf32>
    %15 = vector.multi_reduction <add>, %14, %cst_8 [1] : vector<256x8xf32> to vector<256xf32>
    %16 = vector.shape_cast %15 : vector<256xf32> to vector<256x1xf32>
    %cst_9 = arith.constant 8.000000e+00 : f32
    %17 = vector.broadcast %cst_9 : f32 to vector<256x1xf32>
    %18 = arith.divf %16, %17 : vector<256x1xf32>
    %19 = vector.broadcast %11 : vector<256x1xf32> to vector<256x8xf32>
    %20 = arith.subf %7, %19 : vector<256x8xf32>
    %cst_10 = arith.constant 9.99999997E-7 : f32
    %21 = vector.broadcast %cst_10 : f32 to vector<256x1xf32>
    %22 = arith.addf %18, %21 : vector<256x1xf32>
    %23 = math.sqrt %22 : vector<256x1xf32>
    %24 = vector.broadcast %23 : vector<256x1xf32> to vector<256x8xf32>
    %25 = arith.divf %20, %24 : vector<256x8xf32>
    %c0_11 = arith.constant 0 : index
    %c0_12 = arith.constant 0 : index
    %26 = vector.load %arg5[%c0_11, %c0_12] : memref<1x8xf32, #tpu.memory_space<vmem>>, vector<1x8xf32>
    %27 = vector.broadcast %26 : vector<1x8xf32> to vector<256x8xf32>
    %28 = arith.mulf %25, %27 : vector<256x8xf32>
    %c0_13 = arith.constant 0 : index
    %c0_14 = arith.constant 0 : index
    %29 = vector.load %arg6[%c0_13, %c0_14] : memref<1x8xf32, #tpu.memory_space<vmem>>, vector<1x8xf32>
    %30 = vector.broadcast %29 : vector<1x8xf32> to vector<256x8xf32>
    %31 = arith.addf %28, %30 : vector<256x8xf32>
    %c0_15 = arith.constant 0 : index
    %c0_16 = arith.constant 0 : index
    %32 = vector.load %arg7[%c0_15, %c0_16] : memref<8x8xf32, #tpu.memory_space<vmem>>, vector<8x8xf32>
    %cst_17 = arith.constant dense<0.000000e+00> : vector<256x8xf32>
    %33 = tpu.matmul %31, %32, %cst_17 {dimension_numbers = #tpu.dot_dimension_numbers<[1], [0], [0], [1], [0, 0, 1, 1], [], []>} : vector<256x8xf32>, vector<8x8xf32>, vector<256x8xf32> -> vector<256x8xf32>
    %c0_18 = arith.constant 0 : index
    %c0_19 = arith.constant 0 : index
    %34 = vector.load %arg9[%c0_18, %c0_19] : memref<1x8xf32, #tpu.memory_space<vmem>>, vector<1x8xf32>
    %35 = vector.broadcast %34 : vector<1x8xf32> to vector<256x8xf32>
    %36 = arith.addf %33, %35 : vector<256x8xf32>
    %c0_20 = arith.constant 0 : index
    %c0_21 = arith.constant 0 : index
    %37 = vector.load %arg8[%c0_20, %c0_21] : memref<8x8xf32, #tpu.memory_space<vmem>>, vector<8x8xf32>
    %cst_22 = arith.constant dense<0.000000e+00> : vector<256x8xf32>
    %38 = tpu.matmul %31, %37, %cst_22 {dimension_numbers = #tpu.dot_dimension_numbers<[1], [0], [0], [1], [0, 0, 1, 1], [], []>} : vector<256x8xf32>, vector<8x8xf32>, vector<256x8xf32> -> vector<256x8xf32>
    %c0_23 = arith.constant 0 : index
    %c0_24 = arith.constant 0 : index
    %39 = vector.load %arg10[%c0_23, %c0_24] : memref<1x8xf32, #tpu.memory_space<vmem>>, vector<1x8xf32>
    %40 = vector.broadcast %39 : vector<1x8xf32> to vector<256x8xf32>
    %41 = arith.addf %38, %40 : vector<256x8xf32>
    %42 = arith.mulf %36, %41 : vector<256x8xf32>
    %c0_25 = arith.constant 0 : index
    %c0_26 = arith.constant 0 : index
    %43 = vector.load %arg11[%c0_25, %c0_26] : memref<8x8xf32, #tpu.memory_space<vmem>>, vector<8x8xf32>
    %cst_27 = arith.constant dense<0.000000e+00> : vector<256x8xf32>
    %44 = tpu.matmul %42, %43, %cst_27 {dimension_numbers = #tpu.dot_dimension_numbers<[1], [0], [0], [1], [0, 0, 1, 1], [], []>} : vector<256x8xf32>, vector<8x8xf32>, vector<256x8xf32> -> vector<256x8xf32>
    %c0_28 = arith.constant 0 : index
    %c0_29 = arith.constant 0 : index
    %45 = vector.load %arg12[%c0_28, %c0_29] : memref<1x8xf32, #tpu.memory_space<vmem>>, vector<1x8xf32>
    %46 = vector.broadcast %45 : vector<1x8xf32> to vector<256x8xf32>
    %47 = arith.addf %44, %46 : vector<256x8xf32>
    %c0_30 = arith.constant 0 : index
    %c0_31 = arith.constant 0 : index
    %48 = vector.load %arg13[%c0_30, %c0_31] : memref<1x8xf32, #tpu.memory_space<vmem>>, vector<1x8xf32>
    %49 = vector.broadcast %48 : vector<1x8xf32> to vector<256x8xf32>
    %50 = arith.mulf %47, %49 : vector<256x8xf32>
    %51 = arith.addf %7, %50 : vector<256x8xf32>
    %c0_32 = arith.constant 0 : index
    %c0_33 = arith.constant 0 : index
    %c0_34 = arith.constant 0 : index
    %52 = vector.load %arg14[%c0_32, %c0_33, %c0_34] : memref<1x256x8xf32, #tpu.memory_space<vmem>>, vector<1x256x8xf32>
    %53 = vector.shape_cast %52 : vector<1x256x8xf32> to vector<256x8xf32>
    %54 = vector.shape_cast %51 : vector<256x8xf32> to vector<1x256x8xf32>
    tpu.vector_store %arg14[%c0_32, %c0_33, %c0_34], %54 {strides = array<i32>} : memref<1x256x8xf32, #tpu.memory_space<vmem>>, vector<1x256x8xf32>,
    return
  }
  func.func @transform_0(%arg0: i32, %arg1: i32) -> (i32, i32, i32) {
    %c0_i32 = arith.constant 0 : i32
    %c0_i32_0 = arith.constant 0 : i32
    return %arg0, %arg1, %c0_i32 : i32, i32, i32
  }
  func.func @transform_1(%arg0: i32, %arg1: i32) -> (i32, i32, i32) {
    %c0_i32 = arith.constant 0 : i32
    %c0_i32_0 = arith.constant 0 : i32
    %c0_i32_1 = arith.constant 0 : i32
    return %arg0, %c0_i32, %c0_i32_0 : i32, i32, i32
  }
  func.func @transform_2(%arg0: i32, %arg1: i32) -> (i32, i32) {
    %c0_i32 = arith.constant 0 : i32
    %c0_i32_0 = arith.constant 0 : i32
    %c0_i32_1 = arith.constant 0 : i32
    return %c0_i32, %c0_i32_0 : i32, i32
  }
  func.func @transform_3(%arg0: i32, %arg1: i32) -> (i32, i32) {
    %c0_i32 = arith.constant 0 : i32
    %c0_i32_0 = arith.constant 0 : i32
    %c0_i32_1 = arith.constant 0 : i32
    return %c0_i32, %c0_i32_0 : i32, i32
  }
  func.func @transform_4(%arg0: i32, %arg1: i32) -> (i32, i32) {
    %c0_i32 = arith.constant 0 : i32
    %c0_i32_0 = arith.constant 0 : i32
    %c0_i32_1 = arith.constant 0 : i32
    return %c0_i32, %c0_i32_0 : i32, i32
  }
  func.func @transform_5(%arg0: i32, %arg1: i32) -> (i32, i32) {
    %c0_i32 = arith.constant 0 : i32
    %c0_i32_0 = arith.constant 0 : i32
    %c0_i32_1 = arith.constant 0 : i32
    return %c0_i32, %c0_i32_0 : i32, i32
  }
  func.func @transform_6(%arg0: i32, %arg1: i32) -> (i32, i32) {
    %c0_i32 = arith.constant 0 : i32
    %c0_i32_0 = arith.constant 0 : i32
    %c0_i32_1 = arith.constant 0 : i32
    return %c0_i32, %c0_i32_0 : i32, i32
  }
  func.func @transform_7(%arg0: i32, %arg1: i32) -> (i32, i32) {
    %c0_i32 = arith.constant 0 : i32
    %c0_i32_0 = arith.constant 0 : i32
    %c0_i32_1 = arith.constant 0 : i32
    return %c0_i32, %c0_i32_0 : i32, i32
  }
  func.func @transform_8(%arg0: i32, %arg1: i32) -> (i32, i32) {
    %c0_i32 = arith.constant 0 : i32
    %c0_i32_0 = arith.constant 0 : i32
    %c0_i32_1 = arith.constant 0 : i32
    return %c0_i32, %c0_i32_0 : i32, i32
  }
  func.func @transform_9(%arg0: i32, %arg1: i32) -> (i32, i32) {
    %c0_i32 = arith.constant 0 : i32
    %c0_i32_0 = arith.constant 0 : i32
    %c0_i32_1 = arith.constant 0 : i32
    return %c0_i32, %c0_i32_0 : i32, i32
  }
  func.func @transform_10(%arg0: i32, %arg1: i32) -> (i32, i32) {
    %c0_i32 = arith.constant 0 : i32
    %c0_i32_0 = arith.constant 0 : i32
    %c0_i32_1 = arith.constant 0 : i32
    return %c0_i32, %c0_i32_0 : i32, i32
  }
  func.func @transform_11(%arg0: i32, %arg1: i32) -> (i32, i32) {
    %c0_i32 = arith.constant 0 : i32
    %c0_i32_0 = arith.constant 0 : i32
    %c0_i32_1 = arith.constant 0 : i32
    return %c0_i32, %c0_i32_0 : i32, i32
  }
  func.func @transform_12(%arg0: i32, %arg1: i32) -> (i32, i32, i32) {
    %c0_i32 = arith.constant 0 : i32
    %c0_i32_0 = arith.constant 0 : i32
    return %arg0, %arg1, %c0_i32 : i32, i32, i32
  }
}

module attributes {stable_mosaic.version = 11 : i64} {
  func.func @_dw_gate_pool_kernel(%arg0: i32, %arg1: memref<1x18x18x8xf32, #tpu.memory_space<vmem>>, %arg2: memref<1x18x18x8xf32, #tpu.memory_space<vmem>>, %arg3: memref<9x8xf32, #tpu.memory_space<vmem>>, %arg4: memref<9x8xf32, #tpu.memory_space<vmem>>, %arg5: memref<1x8xf32, #tpu.memory_space<vmem>>, %arg6: memref<1x8xf32, #tpu.memory_space<vmem>>, %arg7: memref<8x8xf32, #tpu.memory_space<vmem>>, %arg8: memref<8x8xf32, #tpu.memory_space<vmem>>, %arg9: memref<1x8xf32, #tpu.memory_space<vmem>>, %arg10: memref<1x1x8xf32, #tpu.memory_space<vmem>>) attributes {dimension_semantics = [#tpu.dimension_semantics<parallel>], iteration_bounds = array<i64: 2>, scalar_prefetch = 0 : i64, scratch_operands = 0 : i64, tpu.core_type = #tpu.core_type<tc>, window_params = [{transform_indices = @transform_0, window_bounds = array<i64: 1, 18, 18, 8>}, {transform_indices = @transform_1, window_bounds = array<i64: 1, 18, 18, 8>}, {pipeline_mode = #tpu.pipeline_mode<synchronous>, transform_indices = @transform_2, window_bounds = array<i64: 9, 8>}, {pipeline_mode = #tpu.pipeline_mode<synchronous>, transform_indices = @transform_3, window_bounds = array<i64: 9, 8>}, {pipeline_mode = #tpu.pipeline_mode<synchronous>, transform_indices = @transform_4, window_bounds = array<i64: 1, 8>}, {pipeline_mode = #tpu.pipeline_mode<synchronous>, transform_indices = @transform_5, window_bounds = array<i64: 1, 8>}, {pipeline_mode = #tpu.pipeline_mode<synchronous>, transform_indices = @transform_6, window_bounds = array<i64: 8, 8>}, {pipeline_mode = #tpu.pipeline_mode<synchronous>, transform_indices = @transform_7, window_bounds = array<i64: 8, 8>}, {pipeline_mode = #tpu.pipeline_mode<synchronous>, transform_indices = @transform_8, window_bounds = array<i64: 1, 8>}, {transform_indices = @transform_9, window_bounds = array<i64: 1, 1, 8>}]} {
    %c0 = arith.constant 0 : index
    %c0_0 = arith.constant 0 : index
    %c0_1 = arith.constant 0 : index
    %c0_2 = arith.constant 0 : index
    %0 = vector.load %arg1[%c0, %c0_0, %c0_1, %c0_2] : memref<1x18x18x8xf32, #tpu.memory_space<vmem>>, vector<1x18x18x8xf32>
    %1 = vector.shape_cast %0 : vector<1x18x18x8xf32> to vector<18x18x8xf32>
    %cst = arith.constant 0.000000e+00 : f32
    %2 = vector.broadcast %cst : f32 to vector<16x16x8xf32>
    %3 = vector.extract_strided_slice %1 {offsets = [0, 0, 0], sizes = [16, 16, 8], strides = [1, 1, 1]} : vector<18x18x8xf32> to vector<16x16x8xf32>
    %c0_3 = arith.constant 0 : index
    %c0_4 = arith.constant 0 : index
    %4 = vector.load %arg3[%c0_3, %c0_4] : memref<9x8xf32, #tpu.memory_space<vmem>>, vector<1x8xf32>
    %5 = vector.shape_cast %4 : vector<1x8xf32> to vector<1x1x8xf32>
    %6 = vector.broadcast %5 : vector<1x1x8xf32> to vector<16x16x8xf32>
    %7 = arith.mulf %3, %6 : vector<16x16x8xf32>
    %8 = arith.addf %2, %7 : vector<16x16x8xf32>
    %9 = vector.extract_strided_slice %1 {offsets = [0, 1, 0], sizes = [16, 16, 8], strides = [1, 1, 1]} : vector<18x18x8xf32> to vector<16x16x8xf32>
    %c1 = arith.constant 1 : index
    %c0_5 = arith.constant 0 : index
    %10 = vector.load %arg3[%c1, %c0_5] : memref<9x8xf32, #tpu.memory_space<vmem>>, vector<1x8xf32>
    %11 = vector.shape_cast %10 : vector<1x8xf32> to vector<1x1x8xf32>
    %12 = vector.broadcast %11 : vector<1x1x8xf32> to vector<16x16x8xf32>
    %13 = arith.mulf %9, %12 : vector<16x16x8xf32>
    %14 = arith.addf %8, %13 : vector<16x16x8xf32>
    %15 = vector.extract_strided_slice %1 {offsets = [0, 2, 0], sizes = [16, 16, 8], strides = [1, 1, 1]} : vector<18x18x8xf32> to vector<16x16x8xf32>
    %c2 = arith.constant 2 : index
    %c0_6 = arith.constant 0 : index
    %16 = vector.load %arg3[%c2, %c0_6] : memref<9x8xf32, #tpu.memory_space<vmem>>, vector<1x8xf32>
    %17 = vector.shape_cast %16 : vector<1x8xf32> to vector<1x1x8xf32>
    %18 = vector.broadcast %17 : vector<1x1x8xf32> to vector<16x16x8xf32>
    %19 = arith.mulf %15, %18 : vector<16x16x8xf32>
    %20 = arith.addf %14, %19 : vector<16x16x8xf32>
    %21 = vector.extract_strided_slice %1 {offsets = [1, 0, 0], sizes = [16, 16, 8], strides = [1, 1, 1]} : vector<18x18x8xf32> to vector<16x16x8xf32>
    %c3 = arith.constant 3 : index
    %c0_7 = arith.constant 0 : index
    %22 = vector.load %arg3[%c3, %c0_7] : memref<9x8xf32, #tpu.memory_space<vmem>>, vector<1x8xf32>
    %23 = vector.shape_cast %22 : vector<1x8xf32> to vector<1x1x8xf32>
    %24 = vector.broadcast %23 : vector<1x1x8xf32> to vector<16x16x8xf32>
    %25 = arith.mulf %21, %24 : vector<16x16x8xf32>
    %26 = arith.addf %20, %25 : vector<16x16x8xf32>
    %27 = vector.extract_strided_slice %1 {offsets = [1, 1, 0], sizes = [16, 16, 8], strides = [1, 1, 1]} : vector<18x18x8xf32> to vector<16x16x8xf32>
    %c4 = arith.constant 4 : index
    %c0_8 = arith.constant 0 : index
    %28 = vector.load %arg3[%c4, %c0_8] : memref<9x8xf32, #tpu.memory_space<vmem>>, vector<1x8xf32>
    %29 = vector.shape_cast %28 : vector<1x8xf32> to vector<1x1x8xf32>
    %30 = vector.broadcast %29 : vector<1x1x8xf32> to vector<16x16x8xf32>
    %31 = arith.mulf %27, %30 : vector<16x16x8xf32>
    %32 = arith.addf %26, %31 : vector<16x16x8xf32>
    %33 = vector.extract_strided_slice %1 {offsets = [1, 2, 0], sizes = [16, 16, 8], strides = [1, 1, 1]} : vector<18x18x8xf32> to vector<16x16x8xf32>
    %c5 = arith.constant 5 : index
    %c0_9 = arith.constant 0 : index
    %34 = vector.load %arg3[%c5, %c0_9] : memref<9x8xf32, #tpu.memory_space<vmem>>, vector<1x8xf32>
    %35 = vector.shape_cast %34 : vector<1x8xf32> to vector<1x1x8xf32>
    %36 = vector.broadcast %35 : vector<1x1x8xf32> to vector<16x16x8xf32>
    %37 = arith.mulf %33, %36 : vector<16x16x8xf32>
    %38 = arith.addf %32, %37 : vector<16x16x8xf32>
    %39 = vector.extract_strided_slice %1 {offsets = [2, 0, 0], sizes = [16, 16, 8], strides = [1, 1, 1]} : vector<18x18x8xf32> to vector<16x16x8xf32>
    %c6 = arith.constant 6 : index
    %c0_10 = arith.constant 0 : index
    %40 = vector.load %arg3[%c6, %c0_10] : memref<9x8xf32, #tpu.memory_space<vmem>>, vector<1x8xf32>
    %41 = vector.shape_cast %40 : vector<1x8xf32> to vector<1x1x8xf32>
    %42 = vector.broadcast %41 : vector<1x1x8xf32> to vector<16x16x8xf32>
    %43 = arith.mulf %39, %42 : vector<16x16x8xf32>
    %44 = arith.addf %38, %43 : vector<16x16x8xf32>
    %45 = vector.extract_strided_slice %1 {offsets = [2, 1, 0], sizes = [16, 16, 8], strides = [1, 1, 1]} : vector<18x18x8xf32> to vector<16x16x8xf32>
    %c7 = arith.constant 7 : index
    %c0_11 = arith.constant 0 : index
    %46 = vector.load %arg3[%c7, %c0_11] : memref<9x8xf32, #tpu.memory_space<vmem>>, vector<1x8xf32>
    %47 = vector.shape_cast %46 : vector<1x8xf32> to vector<1x1x8xf32>
    %48 = vector.broadcast %47 : vector<1x1x8xf32> to vector<16x16x8xf32>
    %49 = arith.mulf %45, %48 : vector<16x16x8xf32>
    %50 = arith.addf %44, %49 : vector<16x16x8xf32>
    %51 = vector.extract_strided_slice %1 {offsets = [2, 2, 0], sizes = [16, 16, 8], strides = [1, 1, 1]} : vector<18x18x8xf32> to vector<16x16x8xf32>
    %c8 = arith.constant 8 : index
    %c0_12 = arith.constant 0 : index
    %52 = vector.load %arg3[%c8, %c0_12] : memref<9x8xf32, #tpu.memory_space<vmem>>, vector<1x8xf32>
    %53 = vector.shape_cast %52 : vector<1x8xf32> to vector<1x1x8xf32>
    %54 = vector.broadcast %53 : vector<1x1x8xf32> to vector<16x16x8xf32>
    %55 = arith.mulf %51, %54 : vector<16x16x8xf32>
    %56 = arith.addf %50, %55 : vector<16x16x8xf32>
    %c0_13 = arith.constant 0 : index
    %c0_14 = arith.constant 0 : index
    %57 = vector.load %arg5[%c0_13, %c0_14] : memref<1x8xf32, #tpu.memory_space<vmem>>, vector<1x8xf32>
    %58 = vector.shape_cast %57 : vector<1x8xf32> to vector<1x1x8xf32>
    %59 = vector.broadcast %58 : vector<1x1x8xf32> to vector<16x16x8xf32>
    %60 = arith.addf %56, %59 : vector<16x16x8xf32>
    %c0_15 = arith.constant 0 : index
    %c0_16 = arith.constant 0 : index
    %c0_17 = arith.constant 0 : index
    %c0_18 = arith.constant 0 : index
    %61 = vector.load %arg2[%c0_15, %c0_16, %c0_17, %c0_18] : memref<1x18x18x8xf32, #tpu.memory_space<vmem>>, vector<1x18x18x8xf32>
    %62 = vector.shape_cast %61 : vector<1x18x18x8xf32> to vector<18x18x8xf32>
    %cst_19 = arith.constant 0.000000e+00 : f32
    %63 = vector.broadcast %cst_19 : f32 to vector<16x16x8xf32>
    %64 = vector.extract_strided_slice %62 {offsets = [0, 0, 0], sizes = [16, 16, 8], strides = [1, 1, 1]} : vector<18x18x8xf32> to vector<16x16x8xf32>
    %c0_20 = arith.constant 0 : index
    %c0_21 = arith.constant 0 : index
    %65 = vector.load %arg4[%c0_20, %c0_21] : memref<9x8xf32, #tpu.memory_space<vmem>>, vector<1x8xf32>
    %66 = vector.shape_cast %65 : vector<1x8xf32> to vector<1x1x8xf32>
    %67 = vector.broadcast %66 : vector<1x1x8xf32> to vector<16x16x8xf32>
    %68 = arith.mulf %64, %67 : vector<16x16x8xf32>
    %69 = arith.addf %63, %68 : vector<16x16x8xf32>
    %70 = vector.extract_strided_slice %62 {offsets = [0, 1, 0], sizes = [16, 16, 8], strides = [1, 1, 1]} : vector<18x18x8xf32> to vector<16x16x8xf32>
    %c1_22 = arith.constant 1 : index
    %c0_23 = arith.constant 0 : index
    %71 = vector.load %arg4[%c1_22, %c0_23] : memref<9x8xf32, #tpu.memory_space<vmem>>, vector<1x8xf32>
    %72 = vector.shape_cast %71 : vector<1x8xf32> to vector<1x1x8xf32>
    %73 = vector.broadcast %72 : vector<1x1x8xf32> to vector<16x16x8xf32>
    %74 = arith.mulf %70, %73 : vector<16x16x8xf32>
    %75 = arith.addf %69, %74 : vector<16x16x8xf32>
    %76 = vector.extract_strided_slice %62 {offsets = [0, 2, 0], sizes = [16, 16, 8], strides = [1, 1, 1]} : vector<18x18x8xf32> to vector<16x16x8xf32>
    %c2_24 = arith.constant 2 : index
    %c0_25 = arith.constant 0 : index
    %77 = vector.load %arg4[%c2_24, %c0_25] : memref<9x8xf32, #tpu.memory_space<vmem>>, vector<1x8xf32>
    %78 = vector.shape_cast %77 : vector<1x8xf32> to vector<1x1x8xf32>
    %79 = vector.broadcast %78 : vector<1x1x8xf32> to vector<16x16x8xf32>
    %80 = arith.mulf %76, %79 : vector<16x16x8xf32>
    %81 = arith.addf %75, %80 : vector<16x16x8xf32>
    %82 = vector.extract_strided_slice %62 {offsets = [1, 0, 0], sizes = [16, 16, 8], strides = [1, 1, 1]} : vector<18x18x8xf32> to vector<16x16x8xf32>
    %c3_26 = arith.constant 3 : index
    %c0_27 = arith.constant 0 : index
    %83 = vector.load %arg4[%c3_26, %c0_27] : memref<9x8xf32, #tpu.memory_space<vmem>>, vector<1x8xf32>
    %84 = vector.shape_cast %83 : vector<1x8xf32> to vector<1x1x8xf32>
    %85 = vector.broadcast %84 : vector<1x1x8xf32> to vector<16x16x8xf32>
    %86 = arith.mulf %82, %85 : vector<16x16x8xf32>
    %87 = arith.addf %81, %86 : vector<16x16x8xf32>
    %88 = vector.extract_strided_slice %62 {offsets = [1, 1, 0], sizes = [16, 16, 8], strides = [1, 1, 1]} : vector<18x18x8xf32> to vector<16x16x8xf32>
    %c4_28 = arith.constant 4 : index
    %c0_29 = arith.constant 0 : index
    %89 = vector.load %arg4[%c4_28, %c0_29] : memref<9x8xf32, #tpu.memory_space<vmem>>, vector<1x8xf32>
    %90 = vector.shape_cast %89 : vector<1x8xf32> to vector<1x1x8xf32>
    %91 = vector.broadcast %90 : vector<1x1x8xf32> to vector<16x16x8xf32>
    %92 = arith.mulf %88, %91 : vector<16x16x8xf32>
    %93 = arith.addf %87, %92 : vector<16x16x8xf32>
    %94 = vector.extract_strided_slice %62 {offsets = [1, 2, 0], sizes = [16, 16, 8], strides = [1, 1, 1]} : vector<18x18x8xf32> to vector<16x16x8xf32>
    %c5_30 = arith.constant 5 : index
    %c0_31 = arith.constant 0 : index
    %95 = vector.load %arg4[%c5_30, %c0_31] : memref<9x8xf32, #tpu.memory_space<vmem>>, vector<1x8xf32>
    %96 = vector.shape_cast %95 : vector<1x8xf32> to vector<1x1x8xf32>
    %97 = vector.broadcast %96 : vector<1x1x8xf32> to vector<16x16x8xf32>
    %98 = arith.mulf %94, %97 : vector<16x16x8xf32>
    %99 = arith.addf %93, %98 : vector<16x16x8xf32>
    %100 = vector.extract_strided_slice %62 {offsets = [2, 0, 0], sizes = [16, 16, 8], strides = [1, 1, 1]} : vector<18x18x8xf32> to vector<16x16x8xf32>
    %c6_32 = arith.constant 6 : index
    %c0_33 = arith.constant 0 : index
    %101 = vector.load %arg4[%c6_32, %c0_33] : memref<9x8xf32, #tpu.memory_space<vmem>>, vector<1x8xf32>
    %102 = vector.shape_cast %101 : vector<1x8xf32> to vector<1x1x8xf32>
    %103 = vector.broadcast %102 : vector<1x1x8xf32> to vector<16x16x8xf32>
    %104 = arith.mulf %100, %103 : vector<16x16x8xf32>
    %105 = arith.addf %99, %104 : vector<16x16x8xf32>
    %106 = vector.extract_strided_slice %62 {offsets = [2, 1, 0], sizes = [16, 16, 8], strides = [1, 1, 1]} : vector<18x18x8xf32> to vector<16x16x8xf32>
    %c7_34 = arith.constant 7 : index
    %c0_35 = arith.constant 0 : index
    %107 = vector.load %arg4[%c7_34, %c0_35] : memref<9x8xf32, #tpu.memory_space<vmem>>, vector<1x8xf32>
    %108 = vector.shape_cast %107 : vector<1x8xf32> to vector<1x1x8xf32>
    %109 = vector.broadcast %108 : vector<1x1x8xf32> to vector<16x16x8xf32>
    %110 = arith.mulf %106, %109 : vector<16x16x8xf32>
    %111 = arith.addf %105, %110 : vector<16x16x8xf32>
    %112 = vector.extract_strided_slice %62 {offsets = [2, 2, 0], sizes = [16, 16, 8], strides = [1, 1, 1]} : vector<18x18x8xf32> to vector<16x16x8xf32>
    %c8_36 = arith.constant 8 : index
    %c0_37 = arith.constant 0 : index
    %113 = vector.load %arg4[%c8_36, %c0_37] : memref<9x8xf32, #tpu.memory_space<vmem>>, vector<1x8xf32>
    %114 = vector.shape_cast %113 : vector<1x8xf32> to vector<1x1x8xf32>
    %115 = vector.broadcast %114 : vector<1x1x8xf32> to vector<16x16x8xf32>
    %116 = arith.mulf %112, %115 : vector<16x16x8xf32>
    %117 = arith.addf %111, %116 : vector<16x16x8xf32>
    %c0_38 = arith.constant 0 : index
    %c0_39 = arith.constant 0 : index
    %118 = vector.load %arg6[%c0_38, %c0_39] : memref<1x8xf32, #tpu.memory_space<vmem>>, vector<1x8xf32>
    %119 = vector.shape_cast %118 : vector<1x8xf32> to vector<1x1x8xf32>
    %120 = vector.broadcast %119 : vector<1x1x8xf32> to vector<16x16x8xf32>
    %121 = arith.addf %117, %120 : vector<16x16x8xf32>
    %122 = arith.mulf %60, %121 : vector<16x16x8xf32>
    %cst_40 = arith.constant dense<0.000000e+00> : vector<16x8xf32>
    %123 = vector.multi_reduction <add>, %122, %cst_40 [1] : vector<16x16x8xf32> to vector<16x8xf32>
    %124 = vector.shape_cast %123 : vector<16x8xf32> to vector<16x1x8xf32>
    %cst_41 = arith.constant dense<0.000000e+00> : vector<1x8xf32>
    %125 = vector.multi_reduction <add>, %124, %cst_41 [0] : vector<16x1x8xf32> to vector<1x8xf32>
    %126 = vector.shape_cast %125 : vector<1x8xf32> to vector<1x1x8xf32>
    %127 = vector.shape_cast %126 : vector<1x1x8xf32> to vector<1x8xf32>
    %cst_42 = arith.constant 3.906250e-03 : f32
    %128 = vector.broadcast %cst_42 : f32 to vector<1x8xf32>
    %129 = arith.mulf %127, %128 : vector<1x8xf32>
    %c0_43 = arith.constant 0 : index
    %c0_44 = arith.constant 0 : index
    %130 = vector.load %arg7[%c0_43, %c0_44] : memref<8x8xf32, #tpu.memory_space<vmem>>, vector<8x8xf32>
    %cst_45 = arith.constant dense<0.000000e+00> : vector<1x8xf32>
    %131 = tpu.matmul %129, %130, %cst_45 {dimension_numbers = #tpu.dot_dimension_numbers<[1], [0], [0], [1], [0, 0, 1, 1], [], []>} : vector<1x8xf32>, vector<8x8xf32>, vector<1x8xf32> -> vector<1x8xf32>
    %c0_46 = arith.constant 0 : index
    %c0_47 = arith.constant 0 : index
    %132 = vector.load %arg8[%c0_46, %c0_47] : memref<8x8xf32, #tpu.memory_space<vmem>>, vector<8x8xf32>
    %cst_48 = arith.constant dense<0.000000e+00> : vector<1x8xf32>
    %133 = tpu.matmul %131, %132, %cst_48 {dimension_numbers = #tpu.dot_dimension_numbers<[1], [0], [0], [1], [0, 0, 1, 1], [], []>} : vector<1x8xf32>, vector<8x8xf32>, vector<1x8xf32> -> vector<1x8xf32>
    %c0_49 = arith.constant 0 : index
    %c0_50 = arith.constant 0 : index
    %134 = vector.load %arg9[%c0_49, %c0_50] : memref<1x8xf32, #tpu.memory_space<vmem>>, vector<1x8xf32>
    %135 = arith.addf %133, %134 : vector<1x8xf32>
    %c0_51 = arith.constant 0 : index
    %c0_52 = arith.constant 0 : index
    %c0_53 = arith.constant 0 : index
    %136 = vector.load %arg10[%c0_51, %c0_52, %c0_53] : memref<1x1x8xf32, #tpu.memory_space<vmem>>, vector<1x1x8xf32>
    %137 = vector.shape_cast %136 : vector<1x1x8xf32> to vector<1x8xf32>
    %138 = vector.shape_cast %135 : vector<1x8xf32> to vector<1x1x8xf32>
    tpu.vector_store %arg10[%c0_51, %c0_52, %c0_53], %138 {strides = array<i32>} : memref<1x1x8xf32, #tpu.memory_space<vmem>>, vector<1x1x8xf32>,
    return
  }
  func.func @transform_0(%arg0: i32) -> (i32, i32, i32, i32) {
    %c0_i32 = arith.constant 0 : i32
    %c0_i32_0 = arith.constant 0 : i32
    %c0_i32_1 = arith.constant 0 : i32
    %c0_i32_2 = arith.constant 0 : i32
    return %arg0, %c0_i32, %c0_i32_0, %c0_i32_1 : i32, i32, i32, i32
  }
  func.func @transform_1(%arg0: i32) -> (i32, i32, i32, i32) {
    %c0_i32 = arith.constant 0 : i32
    %c0_i32_0 = arith.constant 0 : i32
    %c0_i32_1 = arith.constant 0 : i32
    %c0_i32_2 = arith.constant 0 : i32
    return %arg0, %c0_i32, %c0_i32_0, %c0_i32_1 : i32, i32, i32, i32
  }
  func.func @transform_2(%arg0: i32) -> (i32, i32) {
    %c0_i32 = arith.constant 0 : i32
    %c0_i32_0 = arith.constant 0 : i32
    %c0_i32_1 = arith.constant 0 : i32
    return %c0_i32, %c0_i32_0 : i32, i32
  }
  func.func @transform_3(%arg0: i32) -> (i32, i32) {
    %c0_i32 = arith.constant 0 : i32
    %c0_i32_0 = arith.constant 0 : i32
    %c0_i32_1 = arith.constant 0 : i32
    return %c0_i32, %c0_i32_0 : i32, i32
  }
  func.func @transform_4(%arg0: i32) -> (i32, i32) {
    %c0_i32 = arith.constant 0 : i32
    %c0_i32_0 = arith.constant 0 : i32
    %c0_i32_1 = arith.constant 0 : i32
    return %c0_i32, %c0_i32_0 : i32, i32
  }
  func.func @transform_5(%arg0: i32) -> (i32, i32) {
    %c0_i32 = arith.constant 0 : i32
    %c0_i32_0 = arith.constant 0 : i32
    %c0_i32_1 = arith.constant 0 : i32
    return %c0_i32, %c0_i32_0 : i32, i32
  }
  func.func @transform_6(%arg0: i32) -> (i32, i32) {
    %c0_i32 = arith.constant 0 : i32
    %c0_i32_0 = arith.constant 0 : i32
    %c0_i32_1 = arith.constant 0 : i32
    return %c0_i32, %c0_i32_0 : i32, i32
  }
  func.func @transform_7(%arg0: i32) -> (i32, i32) {
    %c0_i32 = arith.constant 0 : i32
    %c0_i32_0 = arith.constant 0 : i32
    %c0_i32_1 = arith.constant 0 : i32
    return %c0_i32, %c0_i32_0 : i32, i32
  }
  func.func @transform_8(%arg0: i32) -> (i32, i32) {
    %c0_i32 = arith.constant 0 : i32
    %c0_i32_0 = arith.constant 0 : i32
    %c0_i32_1 = arith.constant 0 : i32
    return %c0_i32, %c0_i32_0 : i32, i32
  }
  func.func @transform_9(%arg0: i32) -> (i32, i32, i32) {
    %c0_i32 = arith.constant 0 : i32
    %c0_i32_0 = arith.constant 0 : i32
    %c0_i32_1 = arith.constant 0 : i32
    return %arg0, %c0_i32, %c0_i32_0 : i32, i32, i32
  }
}

</mosaic_0001>

<bundles_post_ra>
// kernel: nafblock_forward.3
= control target key start
LH: loop header
LB: loop body
LE: loop exit
PB: predicated region body
PF: predicated region fallthrough
CT: control target
= control target key end

     0   :  { %s2355_s27 = smov 0   ;;  %s2357_s28 = smov 0   ;;  %s3568_s0 = inlined_call_operand.vmem [shape: f32[2,256,8], index: 0, kind: input, shape index: {}]   ;;  %s3569_s1 = inlined_call_operand.vmem [shape: f32[1,8], index: 1, kind: input, shape index: {}]   ;;  %s3570_s2 = inlined_call_operand.vmem [shape: f32[1,8], index: 2, kind: input, shape index: {}]   ;;  %s3571_s3 = inlined_call_operand.vmem [shape: f32[8,8], index: 3, kind: input, shape index: {}]   ;;  %s3572_s4 = inlined_call_operand.vmem [shape: f32[8,8], index: 4, kind: input, shape index: {}]   ;;  %s3573_s5 = inlined_call_operand.vmem [shape: f32[1,8], index: 5, kind: input, shape index: {}]   ;;  %s3574_s6 = inlined_call_operand.vmem [shape: f32[1,8], index: 6, kind: input, shape index: {}]   ;;  %s3575_s7 = inlined_call_operand.vmem [shape: f32[2,256,8], index: 7, kind: output, shape index: {0}]   ;;  %s3576_s8 = inlined_call_operand.vmem [shape: f32[2,256,8], index: 8, kind: output, shape index: {1}]  }
   0x1   :  { %s2359_s29 = smov 0  }
   0x2 LB: > { %s31_s30 = sadd.s32 1, %s2304_s28  ;;  %p1888_p0 = scmp.ge.s32.totalorder %s2308_s29, 1  ;;  %s2308_s29 = sphi %s2359_s29, %s19_s29   ;;  %s2304_s28 = sphi %s2357_s28, %s3592_s28   ;;  %s2300_s27 = sphi %s2355_s27, %s3591_s27  }
   0x3   : > { %p33_p1 = scmp.ge.s32.totalorder %s31_s30, 2  ;;  %p288_p2 = scmp.lt.s32.totalorder %s2308_s29, 3 }
   0x5   : > { %s3594_s30 = smov (%p33_p1, %s31_s30), 0  ;;  %p289_p3 = pnand %p1888_p0, %p288_p2 }
   0x7   : > { %292 = sbr.rel (%p289_p3) target bundleno = 660 (0x294), region = 48 }
   0xe   : > { %p340_p4 = scmp.lt.s32.totalorder %s2300_s27, 1  ;;  %vm401_vm0 = vcmask 64512  }
  0x10   : > { %s3596_s27 = smov (!%p340_p4, %s2300_s27), 1 }
  0x11   : > { %s2373_s9 = sshll.u32 %s3596_s27, 8 }
  0x12   : > { %s2379_s12 = scalar_lea.vmem %s3568_s0, %s2373_s9  ;;  %s3359_s27 = scalar_lea.vmem %s3575_s7, %s2373_s9 }
  0x13   : > { %v2382_v0 = vld [vmem:[%s2379_s12] sm:$0xff]  ;;  %v2385_v1 = vld [vmem:[%s2379_s12 + $0x10] sm:$0xff]  ;;  %v2388_v2 = vld [vmem:[%s2379_s12 + $0x8] sm:$0xff] }
  0x14   : > { %v402_v3 = vsel %vm401_vm0, %v2382_v0, 0.0  ;;  %v408_v4 = vsel %vm401_vm0, %v2385_v1, 0.0  ;;  %v2395_v5 = vld [vmem:[%s2379_s12 + $0x18] sm:$0xff]  ;;  %v405_v6 = vsel %vm401_vm0, %v2388_v2, 0.0  ;;  %v2402_v8 = vld [vmem:[%s2379_s12 + $0x20] sm:$0xff]  ;;  %v2405_v9 = vld [vmem:[%s2379_s12 + $0x28] sm:$0xff] }
  0x15   : > { %403 = vadd.xlane.f32.xlu0 %v402_v3  ;;  %409 = vadd.xlane.f32.xlu1 %v408_v4  ;;  %v411_v7 = vsel %vm401_vm0, %v2395_v5, 0.0  ;;  %v414_v10 = vsel %vm401_vm0, %v2402_v8, 0.0  ;;  %v417_v11 = vsel %vm401_vm0, %v2405_v9, 0.0  ;;  %v2412_v12 = vld [vmem:[%s2379_s12 + $0x30] sm:$0xff]  ;;  %v2415_v13 = vld [vmem:[%s2379_s12 + $0x38] sm:$0xff]  ;;  %v2422_v16 = vld [vmem:[%s2379_s12 + $0x40] sm:$0xff] }
  0x16   : > { %v420_v14 = vsel %vm401_vm0, %v2412_v12, 0.0  ;;  %v423_v15 = vsel %vm401_vm0, %v2415_v13, 0.0  ;;  %v2425_v17 = vld [vmem:[%s2379_s12 + $0x48] sm:$0xff]  ;;  %v426_v18 = vsel %vm401_vm0, %v2422_v16, 0.0  ;;  %v2432_v20 = vld [vmem:[%s2379_s12 + $0x50] sm:$0xff]  ;;  %v2435_v21 = vld [vmem:[%s2379_s12 + $0x58] sm:$0xff] }
  0x17   : > { %v429_v19 = vsel %vm401_vm0, %v2425_v17, 0.0  ;;  %v432_v22 = vsel %vm401_vm0, %v2432_v20, 0.0  ;;  %v435_v23 = vsel %vm401_vm0, %v2435_v21, 0.0  ;;  %v2442_v24 = vld [vmem:[%s2379_s12 + $0x60] sm:$0xff]  ;;  %v2445_v25 = vld [vmem:[%s2379_s12 + $0x68] sm:$0xff]  ;;  %v2452_v28 = vld [vmem:[%s2379_s12 + $0x70] sm:$0xff] }
  0x18   : > { %v438_v26 = vsel %vm401_vm0, %v2442_v24, 0.0  ;;  %v441_v27 = vsel %vm401_vm0, %v2445_v25, 0.0  ;;  %v2455_v29 = vld [vmem:[%s2379_s12 + $0x78] sm:$0xff]  ;;  %v444_v30 = vsel %vm401_vm0, %v2452_v28, 0.0  ;;  %v2462_v32 = vld [vmem:[%s2379_s12 + $0x80] sm:$0xff]  ;;  %v2465_v33 = vld [vmem:[%s2379_s12 + $0x88] sm:$0xff] }
  0x19   : > { %406 = vadd.xlane.f32.xlu0 %v405_v6  ;;  %412 = vadd.xlane.f32.xlu1 %v411_v7  ;;  %v447_v31 = vsel %vm401_vm0, %v2455_v29, 0.0  ;;  %v450_v34 = vsel %vm401_vm0, %v2462_v32, 0.0  ;;  %v453_v35 = vsel %vm401_vm0, %v2465_v33, 0.0  ;;  %v2472_v36 = vld [vmem:[%s2379_s12 + $0x90] sm:$0xff]  ;;  %v2475_v37 = vld [vmem:[%s2379_s12 + $0x98] sm:$0xff]  ;;  %v2482_v40 = vld [vmem:[%s2379_s12 + $0xa0] sm:$0xff] }
  0x1a   : > { %v456_v38 = vsel %vm401_vm0, %v2472_v36, 0.0  ;;  %v459_v39 = vsel %vm401_vm0, %v2475_v37, 0.0  ;;  %v2485_v41 = vld [vmem:[%s2379_s12 + $0xa8] sm:$0xff]  ;;  %v462_v42 = vsel %vm401_vm0, %v2482_v40, 0.0  ;;  %v2492_v44 = vld [vmem:[%s2379_s12 + $0xb0] sm:$0xff]  ;;  %v2495_v45 = vld [vmem:[%s2379_s12 + $0xb8] sm:$0xff] }
  0x1b   : > { %v465_v43 = vsel %vm401_vm0, %v2485_v41, 0.0  ;;  %v468_v46 = vsel %vm401_vm0, %v2492_v44, 0.0  ;;  %v471_v47 = vsel %vm401_vm0, %v2495_v45, 0.0  ;;  %v2502_v48 = vld [vmem:[%s2379_s12 + $0xc0] sm:$0xff]  ;;  %v2505_v49 = vld [vmem:[%s2379_s12 + $0xc8] sm:$0xff]  ;;  %v2512_v52 = vld [vmem:[%s2379_s12 + $0xd0] sm:$0xff] }
  0x1c   : > { %v474_v50 = vsel %vm401_vm0, %v2502_v48, 0.0  ;;  %v477_v51 = vsel %vm401_vm0, %v2505_v49, 0.0  ;;  %v2515_v53 = vld [vmem:[%s2379_s12 + $0xd8] sm:$0xff]  ;;  %v480_v54 = vsel %vm401_vm0, %v2512_v52, 0.0  ;;  %v2522_v56 = vld [vmem:[%s2379_s12 + $0xe0] sm:$0xff]  ;;  %v2525_v57 = vld [vmem:[%s2379_s12 + $0xe8] sm:$0xff] }
  0x1d   : > { %415 = vadd.xlane.f32.xlu0 %v414_v10  ;;  %418 = vadd.xlane.f32.xlu1 %v417_v11  ;;  %v483_v55 = vsel %vm401_vm0, %v2515_v53, 0.0  ;;  %v486_v58 = vsel %vm401_vm0, %v2522_v56, 0.0  ;;  %v489_v59 = vsel %vm401_vm0, %v2525_v57, 0.0  ;;  %v2532_v60 = vld [vmem:[%s2379_s12 + $0xf0] sm:$0xff]  ;;  %v2535_v61 = vld [vmem:[%s2379_s12 + $0xf8] sm:$0xff]  ;;  %s3365_s12 = scalar_lea.vmem %s3576_s8, %s2373_s9 }
  0x1e   : > { %v492_v62 = vsel %vm401_vm0, %v2532_v60, 0.0  ;;  %v495_v63 = vsel %vm401_vm0, %v2535_v61, 0.0 }
  0x21   : > { %421 = vadd.xlane.f32.xlu0 %v420_v14  ;;  %424 = vadd.xlane.f32.xlu1 %v423_v15 }
  0x25   : > { %427 = vadd.xlane.f32.xlu0 %v426_v18  ;;  %430 = vadd.xlane.f32.xlu1 %v429_v19 }
  0x29   : > { %433 = vadd.xlane.f32.xlu0 %v432_v22  ;;  %436 = vadd.xlane.f32.xlu1 %v435_v23 }
  0x2d   : > { %439 = vadd.xlane.f32.xlu0 %v438_v26  ;;  %442 = vadd.xlane.f32.xlu1 %v441_v27 }
  0x31   : > { %445 = vadd.xlane.f32.xlu0 %v444_v30  ;;  %448 = vadd.xlane.f32.xlu1 %v447_v31 }
  0x35   : > { %451 = vadd.xlane.f32.xlu0 %v450_v34  ;;  %454 = vadd.xlane.f32.xlu1 %v453_v35 }
  0x39   : > { %457 = vadd.xlane.f32.xlu0 %v456_v38  ;;  %460 = vadd.xlane.f32.xlu1 %v459_v39 }
  0x3d   : > { %463 = vadd.xlane.f32.xlu0 %v462_v42  ;;  %466 = vadd.xlane.f32.xlu1 %v465_v43 }
  0x41   : > { %469 = vadd.xlane.f32.xlu0 %v468_v46  ;;  %472 = vadd.xlane.f32.xlu1 %v471_v47 }
  0x45   : > { %475 = vadd.xlane.f32.xlu0 %v474_v50  ;;  %478 = vadd.xlane.f32.xlu1 %v477_v51 }
  0x49   : > { %481 = vadd.xlane.f32.xlu0 %v480_v54  ;;  %484 = vadd.xlane.f32.xlu1 %v483_v55 }
  0x4d   : > { %487 = vadd.xlane.f32.xlu0 %v486_v58  ;;  %490 = vadd.xlane.f32.xlu1 %v489_v59 }
  0x51   : > { %493 = vadd.xlane.f32.xlu0 %v492_v62  ;;  %496 = vadd.xlane.f32.xlu1 %v495_v63 }
  0xa2   : > { %v404_v3 = vpop.xlane.xlu0 %403  ;;  %v410_v4 = vpop.xlane.xlu1 %409 }
  0xa3   : > { %v499_v6 = vmul.f32 0.125, %v404_v3  ;;  %v501_v7 = vmul.f32 0.125, %v410_v4 }
  0xa5   : > { %v2542_v10 = vsub.f32 %v2382_v0, %v499_v6  ;;  %v2545_v11 = vsub.f32 %v2385_v1, %v501_v7 }
  0xa6   : > { %v407_v14 = vpop.xlane.xlu0 %406  ;;  %v413_v15 = vpop.xlane.xlu1 %412 }
  0xa7   : > { %v500_v18 = vmul.f32 0.125, %v407_v14  ;;  %v502_v19 = vmul.f32 0.125, %v413_v15  ;;  %v563_v22 = vmul.f32 %v2542_v10, %v2542_v10  ;;  %v565_v23 = vmul.f32 %v2545_v11, %v2545_v11 }
  0xa9   : > { %v2552_v26 = vsub.f32 %v2388_v2, %v500_v18  ;;  %v2555_v27 = vsub.f32 %v2395_v5, %v502_v19  ;;  %v595_v0 = vsel %vm401_vm0, %v563_v22, 0.0  ;;  %v601_v31 = vsel %vm401_vm0, %v565_v23, 0.0 }
  0xaa   : > { %596 = vadd.xlane.f32.xlu0 %v595_v0  ;;  %v416_v1 = vpop.xlane.xlu0 %415  ;;  %v419_v30 = vpop.xlane.xlu1 %418 }
  0xab   : > { %v503_v34 = vmul.f32 0.125, %v416_v1  ;;  %v504_v35 = vmul.f32 0.125, %v419_v30  ;;  %v564_v38 = vmul.f32 %v2552_v26, %v2552_v26  ;;  %v566_v39 = vmul.f32 %v2555_v27, %v2555_v27 }
  0xad   : > { %v2564_v2 = vsub.f32 %v2402_v8, %v503_v34  ;;  %v2567_v5 = vsub.f32 %v2405_v9, %v504_v35  ;;  %v598_v42 = vsel %vm401_vm0, %v564_v38, 0.0  ;;  %v604_v47 = vsel %vm401_vm0, %v566_v39, 0.0 }
  0xae   : > { %602 = vadd.xlane.f32.xlu0 %v601_v31  ;;  %599 = vadd.xlane.f32.xlu1 %v598_v42  ;;  %v422_v43 = vpop.xlane.xlu0 %421  ;;  %v425_v46 = vpop.xlane.xlu1 %424 }
  0xaf   : > { %v505_v50 = vmul.f32 0.125, %v422_v43  ;;  %v506_v51 = vmul.f32 0.125, %v425_v46  ;;  %v567_v54 = vmul.f32 %v2564_v2, %v2564_v2  ;;  %v568_v8 = vmul.f32 %v2567_v5, %v2567_v5 }
  0xb1   : > { %v2576_v55 = vsub.f32 %v2412_v12, %v505_v50  ;;  %v2579_v9 = vsub.f32 %v2415_v13, %v506_v51  ;;  %v607_v58 = vsel %vm401_vm0, %v567_v54, 0.0  ;;  %v610_v63 = vsel %vm401_vm0, %v568_v8, 0.0 }
  0xb2   : > { %605 = vadd.xlane.f32.xlu1 %v604_v47  ;;  %608 = vadd.xlane.f32.xlu0 %v607_v58  ;;  %v428_v59 = vpop.xlane.xlu0 %427  ;;  %v431_v62 = vpop.xlane.xlu1 %430 }
  0xb3   : > { %v507_v3 = vmul.f32 0.125, %v428_v59  ;;  %v508_v4 = vmul.f32 0.125, %v431_v62  ;;  %v569_v6 = vmul.f32 %v2576_v55, %v2576_v55  ;;  %v570_v12 = vmul.f32 %v2579_v9, %v2579_v9 }
  0xb5   : > { %v2588_v7 = vsub.f32 %v2422_v16, %v507_v3  ;;  %v2591_v13 = vsub.f32 %v2425_v17, %v508_v4  ;;  %v613_v14 = vsel %vm401_vm0, %v569_v6, 0.0  ;;  %v616_v19 = vsel %vm401_vm0, %v570_v12, 0.0 }
  0xb6   : > { %611 = vadd.xlane.f32.xlu1 %v610_v63  ;;  %614 = vadd.xlane.f32.xlu0 %v613_v14  ;;  %v434_v15 = vpop.xlane.xlu0 %433  ;;  %v437_v18 = vpop.xlane.xlu1 %436 }
  0xb7   : > { %v509_v22 = vmul.f32 0.125, %v434_v15  ;;  %v510_v23 = vmul.f32 0.125, %v437_v18  ;;  %v571_v0 = vmul.f32 %v2588_v7, %v2588_v7  ;;  %v572_v16 = vmul.f32 %v2591_v13, %v2591_v13 }
  0xb9   : > { %v2600_v1 = vsub.f32 %v2432_v20, %v509_v22  ;;  %v2603_v17 = vsub.f32 %v2435_v21, %v510_v23  ;;  %v619_v30 = vsel %vm401_vm0, %v571_v0, 0.0  ;;  %v622_v35 = vsel %vm401_vm0, %v572_v16, 0.0 }
  0xba   : > { %617 = vadd.xlane.f32.xlu1 %v616_v19  ;;  %620 = vadd.xlane.f32.xlu0 %v619_v30  ;;  %v440_v31 = vpop.xlane.xlu0 %439  ;;  %v443_v34 = vpop.xlane.xlu1 %442 }
  0xbb   : > { %v511_v38 = vmul.f32 0.125, %v440_v31  ;;  %v512_v39 = vmul.f32 0.125, %v443_v34  ;;  %v573_v42 = vmul.f32 %v2600_v1, %v2600_v1  ;;  %v574_v20 = vmul.f32 %v2603_v17, %v2603_v17 }
  0xbd   : > { %v2612_v43 = vsub.f32 %v2442_v24, %v511_v38  ;;  %v2615_v21 = vsub.f32 %v2445_v25, %v512_v39  ;;  %v625_v46 = vsel %vm401_vm0, %v573_v42, 0.0  ;;  %v628_v51 = vsel %vm401_vm0, %v574_v20, 0.0 }
  0xbe   : > { %623 = vadd.xlane.f32.xlu1 %v622_v35  ;;  %626 = vadd.xlane.f32.xlu0 %v625_v46  ;;  %v446_v47 = vpop.xlane.xlu0 %445  ;;  %v449_v50 = vpop.xlane.xlu1 %448 }
  0xbf   : > { %v513_v54 = vmul.f32 0.125, %v446_v47  ;;  %v514_v8 = vmul.f32 0.125, %v449_v50  ;;  %v575_v58 = vmul.f32 %v2612_v43, %v2612_v43  ;;  %v576_v24 = vmul.f32 %v2615_v21, %v2615_v21 }
  0xc1   : > { %v2624_v59 = vsub.f32 %v2452_v28, %v513_v54  ;;  %v2627_v25 = vsub.f32 %v2455_v29, %v514_v8  ;;  %v631_v62 = vsel %vm401_vm0, %v575_v58, 0.0  ;;  %v634_v4 = vsel %vm401_vm0, %v576_v24, 0.0 }
  0xc2   : > { %629 = vadd.xlane.f32.xlu1 %v628_v51  ;;  %632 = vadd.xlane.f32.xlu0 %v631_v62  ;;  %v452_v63 = vpop.xlane.xlu0 %451  ;;  %v455_v3 = vpop.xlane.xlu1 %454 }
  0xc3   : > { %v515_v6 = vmul.f32 0.125, %v452_v63  ;;  %v516_v12 = vmul.f32 0.125, %v455_v3  ;;  %v577_v14 = vmul.f32 %v2624_v59, %v2624_v59  ;;  %v578_v28 = vmul.f32 %v2627_v25, %v2627_v25 }
  0xc5   : > { %v2636_v15 = vsub.f32 %v2462_v32, %v515_v6  ;;  %v2639_v29 = vsub.f32 %v2465_v33, %v516_v12  ;;  %v637_v18 = vsel %vm401_vm0, %v577_v14, 0.0  ;;  %v640_v23 = vsel %vm401_vm0, %v578_v28, 0.0 }
  0xc6   : > { %635 = vadd.xlane.f32.xlu1 %v634_v4  ;;  %638 = vadd.xlane.f32.xlu0 %v637_v18  ;;  %v458_v19 = vpop.xlane.xlu0 %457  ;;  %v461_v22 = vpop.xlane.xlu1 %460 }
  0xc7   : > { %v517_v0 = vmul.f32 0.125, %v458_v19  ;;  %v518_v16 = vmul.f32 0.125, %v461_v22  ;;  %v579_v30 = vmul.f32 %v2636_v15, %v2636_v15  ;;  %v580_v32 = vmul.f32 %v2639_v29, %v2639_v29 }
  0xc9   : > { %v2648_v31 = vsub.f32 %v2472_v36, %v517_v0  ;;  %v2651_v33 = vsub.f32 %v2475_v37, %v518_v16  ;;  %v643_v34 = vsel %vm401_vm0, %v579_v30, 0.0  ;;  %v646_v39 = vsel %vm401_vm0, %v580_v32, 0.0 }
  0xca   : > { %641 = vadd.xlane.f32.xlu1 %v640_v23  ;;  %644 = vadd.xlane.f32.xlu0 %v643_v34  ;;  %v464_v35 = vpop.xlane.xlu0 %463  ;;  %v467_v38 = vpop.xlane.xlu1 %466 }
  0xcb   : > { %v519_v42 = vmul.f32 0.125, %v464_v35  ;;  %v520_v20 = vmul.f32 0.125, %v467_v38  ;;  %v581_v46 = vmul.f32 %v2648_v31, %v2648_v31  ;;  %v582_v36 = vmul.f32 %v2651_v33, %v2651_v33 }
  0xcd   : > { %v2660_v47 = vsub.f32 %v2482_v40, %v519_v42  ;;  %v2663_v37 = vsub.f32 %v2485_v41, %v520_v20  ;;  %v649_v50 = vsel %vm401_vm0, %v581_v46, 0.0  ;;  %v652_v8 = vsel %vm401_vm0, %v582_v36, 0.0 }
  0xce   : > { %647 = vadd.xlane.f32.xlu1 %v646_v39  ;;  %650 = vadd.xlane.f32.xlu0 %v649_v50  ;;  %v470_v51 = vpop.xlane.xlu0 %469  ;;  %v473_v54 = vpop.xlane.xlu1 %472 }
  0xcf   : > { %v521_v58 = vmul.f32 0.125, %v470_v51  ;;  %v522_v24 = vmul.f32 0.125, %v473_v54  ;;  %v583_v62 = vmul.f32 %v2660_v47, %v2660_v47  ;;  %v584_v40 = vmul.f32 %v2663_v37, %v2663_v37 }
  0xd1   : > { %v2672_v63 = vsub.f32 %v2492_v44, %v521_v58  ;;  %v2675_v41 = vsub.f32 %v2495_v45, %v522_v24  ;;  %v655_v3 = vsel %vm401_vm0, %v583_v62, 0.0  ;;  %v658_v12 = vsel %vm401_vm0, %v584_v40, 0.0 }
  0xd2   : > { %653 = vadd.xlane.f32.xlu1 %v652_v8  ;;  %656 = vadd.xlane.f32.xlu0 %v655_v3  ;;  %v476_v4 = vpop.xlane.xlu0 %475  ;;  %v479_v6 = vpop.xlane.xlu1 %478 }
  0xd3   : > { %v523_v14 = vmul.f32 0.125, %v476_v4  ;;  %v524_v28 = vmul.f32 0.125, %v479_v6  ;;  %v585_v18 = vmul.f32 %v2672_v63, %v2672_v63  ;;  %v586_v44 = vmul.f32 %v2675_v41, %v2675_v41 }
  0xd5   : > { %v2684_v19 = vsub.f32 %v2502_v48, %v523_v14  ;;  %v2687_v45 = vsub.f32 %v2505_v49, %v524_v28  ;;  %v661_v22 = vsel %vm401_vm0, %v585_v18, 0.0  ;;  %v664_v16 = vsel %vm401_vm0, %v586_v44, 0.0  ;;  %v1482_v44 = vld [vmem:[%s3572_s4] sm:$0xff] }
  0xd6   : > { %659 = vadd.xlane.f32.xlu1 %v658_v12  ;;  %662 = vadd.xlane.f32.xlu0 %v661_v22  ;;  %v482_v23 = vpop.xlane.xlu0 %481  ;;  %v485_v0 = vpop.xlane.xlu1 %484 }
  0xd7   : > { %v525_v30 = vmul.f32 0.125, %v482_v23  ;;  %v526_v32 = vmul.f32 0.125, %v485_v0  ;;  %v587_v34 = vmul.f32 %v2684_v19, %v2684_v19  ;;  %v588_v48 = vmul.f32 %v2687_v45, %v2687_v45  ;;  %2084 = vmatprep.subr.mxu1 %v1482_v44 }
  0xd8   : > { %2085 = vmatpush3.msra.mxu1 %v1482_v44 }
  0xd9   : > { %v2696_v35 = vsub.f32 %v2512_v52, %v525_v30  ;;  %v2699_v49 = vsub.f32 %v2515_v53, %v526_v32  ;;  %v667_v38 = vsel %vm401_vm0, %v587_v34, 0.0  ;;  %v670_v20 = vsel %vm401_vm0, %v588_v48, 0.0 }
  0xda   : > { %665 = vadd.xlane.f32.xlu1 %v664_v16  ;;  %668 = vadd.xlane.f32.xlu0 %v667_v38  ;;  %v488_v39 = vpop.xlane.xlu0 %487  ;;  %v491_v42 = vpop.xlane.xlu1 %490 }
  0xdb   : > { %v527_v46 = vmul.f32 0.125, %v488_v39  ;;  %v528_v36 = vmul.f32 0.125, %v491_v42  ;;  %v589_v50 = vmul.f32 %v2696_v35, %v2696_v35  ;;  %v590_v52 = vmul.f32 %v2699_v49, %v2699_v49 }
  0xdd   : > { %v2708_v51 = vsub.f32 %v2522_v56, %v527_v46  ;;  %v2711_v53 = vsub.f32 %v2525_v57, %v528_v36  ;;  %v673_v54 = vsel %vm401_vm0, %v589_v50, 0.0  ;;  %v676_v24 = vsel %vm401_vm0, %v590_v52, 0.0 }
  0xde   : > { %671 = vadd.xlane.f32.xlu1 %v670_v20  ;;  %674 = vadd.xlane.f32.xlu0 %v673_v54  ;;  %v494_v8 = vpop.xlane.xlu0 %493  ;;  %v497_v58 = vpop.xlane.xlu1 %496 }
  0xdf   : > { %3581 = vst [vmem:[#allocation2_spill] sm:$0xff] %v2708_v51  ;;  %3582 = vst [vmem:[#allocation3_spill] sm:$0xff] %v2711_v53  ;;  %v529_v62 = vmul.f32 0.125, %v494_v8  ;;  %v530_v40 = vmul.f32 0.125, %v497_v58  ;;  %v591_v3 = vmul.f32 %v2708_v51, %v2708_v51  ;;  %v592_v56 = vmul.f32 %v2711_v53, %v2711_v53 }
  0xe1   : > { %v2720_v4 = vsub.f32 %v2532_v60, %v529_v62  ;;  %v2723_v57 = vsub.f32 %v2535_v61, %v530_v40  ;;  %v679_v6 = vsel %vm401_vm0, %v591_v3, 0.0  ;;  %v682_v12 = vsel %vm401_vm0, %v592_v56, 0.0  ;;  %v1121_v61 = vld [vmem:[%s3571_s3] sm:$0xff] }
  0xe2   : > { %677 = vadd.xlane.f32.xlu1 %v676_v24  ;;  %680 = vadd.xlane.f32.xlu0 %v679_v6 }
  0xe3   : > { %3583 = vst [vmem:[#allocation4_spill] sm:$0xff] %v2720_v4  ;;  %3584 = vst [vmem:[#allocation5_spill] sm:$0xff] %v2723_v57  ;;  %v593_v14 = vmul.f32 %v2720_v4, %v2720_v4  ;;  %v594_v28 = vmul.f32 %v2723_v57, %v2723_v57  ;;  %2034 = vmatprep.subr.mxu0 %v1121_v61 }
  0xe4   : > { %2035 = vmatpush3.msra.mxu0 %v1121_v61 }
  0xe5   : > { %v685_v18 = vsel %vm401_vm0, %v593_v14, 0.0  ;;  %v688_v60 = vsel %vm401_vm0, %v594_v28, 0.0 }
  0xe6   : > { %683 = vadd.xlane.f32.xlu1 %v682_v12  ;;  %686 = vadd.xlane.f32.xlu0 %v685_v18 }
  0xea   : > { %689 = vadd.xlane.f32.xlu1 %v688_v60 }
 0x137   : > { %v597_v22 = vpop.xlane.xlu0 %596 }
 0x138   : > { %v691_v23 = vmul.f32 0.125, %v597_v22 }
 0x13a   : > { %v2739_v30 = vadd.f32 1e-06, %v691_v23 }
 0x13b   : > { %v600_v0 = vpop.xlane.xlu1 %599  ;;  %v603_v16 = vpop.xlane.xlu0 %602 }
 0x13c   : > { %v692_v32 = vmul.f32 0.125, %v600_v0  ;;  %v693_v34 = vmul.f32 0.125, %v603_v16  ;;  %2158 = vrsqrt.f32 %v2739_v30  ;;  %vm757_vm1 = vcmp.eq.f32.partialorder %v2739_v30, inf }
 0x13d   : > { %v760_v61 = vand.u32 2147483648, %v2739_v30  ;;  %vm759_vm2 = vcmp.eq.f32.partialorder %v2739_v30, 0.0 }
 0x13e   : > { %v2741_v48 = vadd.f32 1e-06, %v692_v32  ;;  %v2743_v38 = vadd.f32 1e-06, %v693_v34 }
 0x13f   : > { %v606_v39 = vpop.xlane.xlu1 %605  ;;  %v609_v42 = vpop.xlane.xlu0 %608 }
 0x140   : > { %2160 = vrsqrt.f32 %v2741_v48  ;;  %v694_v20 = vmul.f32 0.125, %v606_v39  ;;  %v695_v46 = vmul.f32 0.125, %v609_v42  ;;  %vm764_vm3 = vcmp.eq.f32.partialorder %v2741_v48, inf }
 0x141   : > { %2162 = vrsqrt.f32 %v2743_v38  ;;  %vm766_vm4 = vcmp.eq.f32.partialorder %v2741_v48, 0.0  ;;  %v767_v34 = vand.u32 2147483648, %v2741_v48  ;;  %vm771_vm5 = vcmp.eq.f32.partialorder %v2743_v38, inf }
 0x142   : > { %v2748_v52 = vadd.f32 1e-06, %v694_v20  ;;  %v2750_v54 = vadd.f32 1e-06, %v695_v46  ;;  %vm773_vm6 = vcmp.eq.f32.partialorder %v2743_v38, 0.0 }
 0x143   : > { %v612_v36 = vpop.xlane.xlu1 %611  ;;  %v615_v50 = vpop.xlane.xlu0 %614 }
 0x144   : > { %v696_v8 = vmul.f32 0.125, %v612_v36  ;;  %v697_v58 = vmul.f32 0.125, %v615_v50  ;;  %2164 = vrsqrt.f32 %v2748_v52  ;;  %v774_v36 = vand.u32 2147483648, %v2743_v38 }
 0x145   : > { %2166 = vrsqrt.f32 %v2750_v54  ;;  %vm778_vm7 = vcmp.eq.f32.partialorder %v2748_v52, inf  ;;  %vm780_vm8 = vcmp.eq.f32.partialorder %v2748_v52, 0.0  ;;  %vm785_vm9 = vcmp.eq.f32.partialorder %v2750_v54, inf }
 0x146   : > { %v2754_v40 = vadd.f32 1e-06, %v696_v8  ;;  %v2756_v3 = vadd.f32 1e-06, %v697_v58  ;;  %v2159_v6 = vpop.eup %2158  ;;  %vm787_vm10 = vcmp.eq.f32.partialorder %v2750_v54, 0.0 }
 0x147   : > { %v618_v24 = vpop.xlane.xlu1 %617  ;;  %v621_v62 = vpop.xlane.xlu0 %620  ;;  %v756_v22 = vmul.f32 %v2159_v6, %v2739_v30  ;;  %v781_v6 = vand.u32 2147483648, %v2748_v52 }
 0x148   : > { %v698_v56 = vmul.f32 0.125, %v618_v24  ;;  %2168 = vrsqrt.f32 %v2754_v40  ;;  %v699_v12 = vmul.f32 0.125, %v621_v62  ;;  %vm792_vm11 = vcmp.eq.f32.partialorder %v2754_v40, inf }
 0x149   : > { %2170 = vrsqrt.f32 %v2756_v3  ;;  %v758_v24 = vsel %vm757_vm1, %v2739_v30, %v756_v22  ;;  %vm794_vm12 = vcmp.eq.f32.partialorder %v2754_v40, 0.0  ;;  %v795_v4 = vand.u32 2147483648, %v2754_v40 }
 0x14a   : > { %v2161_v14 = vpop.eup %2160  ;;  %v2762_v44 = vadd.f32 1e-06, %v698_v56  ;;  %v2769_v32 = vadd.f32 1e-06, %v699_v12  ;;  %vm799_vm13 = vcmp.eq.f32.partialorder %v2756_v3, inf  ;;  %vm801_vm14 = vcmp.eq.f32.partialorder %v2756_v3, 0.0 }
 0x14b   : > { %v624_v28 = vpop.xlane.xlu1 %623  ;;  %v627_v18 = vpop.xlane.xlu0 %626  ;;  %v763_v16 = vmul.f32 %v2161_v14, %v2741_v48  ;;  %v788_v14 = vand.u32 2147483648, %v2750_v54 }
 0x14c   : > { %v2163_v60 = vpop.eup %2162  ;;  %v700_v23 = vmul.f32 0.125, %v624_v28  ;;  %v701_v0 = vmul.f32 0.125, %v627_v18  ;;  %2172 = vrsqrt.f32 %v2762_v44  ;;  %vm806_vm15 = vcmp.eq.f32.partialorder %v2762_v44, inf }
 0x14d   : > { %v770_v39 = vmul.f32 %v2163_v60, %v2743_v38  ;;  %v765_v56 = vsel %vm764_vm3, %v2741_v48, %v763_v16  ;;  %2174 = vrsqrt.f32 %v2769_v32  ;;  %vm808_vm1 = vcmp.eq.f32.partialorder %v2762_v44, 0.0 }
 0x14e   : > { %v2165_v46 = vpop.eup %2164  ;;  %v2780_v8 = vadd.f32 1e-06, %v700_v23  ;;  %v2782_v58 = vadd.f32 1e-06, %v701_v0  ;;  %v761_v0 = vsel %vm759_vm2, %v760_v61, %v758_v24  ;;  %vm813_vm2 = vcmp.eq.f32.partialorder %v2769_v32, inf }
 0x14f   : > { %v630_v42 = vpop.xlane.xlu1 %629  ;;  %v633_v20 = vpop.xlane.xlu0 %632  ;;  %v777_v50 = vmul.f32 %v2165_v46, %v2748_v52  ;;  %v772_v12 = vsel %vm771_vm5, %v2743_v38, %v770_v39  ;;  %v768_v39 = vsel %vm766_vm4, %v767_v34, %v765_v56  ;;  %v802_v38 = vand.u32 2147483648, %v2756_v3 }
 0x150   : > { %v2167_v62 = vpop.eup %2166  ;;  %2176 = vrsqrt.f32 %v2780_v8  ;;  %v702_v28 = vmul.f32 0.125, %v630_v42  ;;  %v703_v46 = vmul.f32 0.125, %v633_v20  ;;  %vm815_vm3 = vcmp.eq.f32.partialorder %v2769_v32, 0.0 }
 0x151   : > { %v779_v22 = vsel %vm778_vm7, %v2748_v52, %v777_v50  ;;  %2178 = vrsqrt.f32 %v2782_v58  ;;  %v784_v42 = vmul.f32 %v2167_v62, %v2750_v54  ;;  %v775_v50 = vsel %vm773_vm6, %v774_v36, %v772_v12 }
 0x152   : > { %v2169_v60 = vpop.eup %2168  ;;  %v782_v30 = vsel %vm780_vm8, %v781_v6, %v779_v22  ;;  %v2818_v61 = vadd.f32 1e-06, %v702_v28  ;;  %2180 = vrcp.f32 %v761_v0  ;;  %v2826_v52 = vadd.f32 1e-06, %v703_v46 }
 0x153   : > { %v636_v18 = vpop.xlane.xlu1 %635  ;;  %v639_v23 = vpop.xlane.xlu0 %638  ;;  %v791_v57 = vmul.f32 %v2169_v60, %v2754_v40  ;;  %2182 = vrcp.f32 %v768_v39  ;;  %v786_v24 = vsel %vm785_vm9, %v2750_v54, %v784_v42  ;;  %v809_v28 = vand.u32 2147483648, %v2762_v44 }
 0x154   : > { %v2171_v16 = vpop.eup %2170  ;;  %v704_v20 = vmul.f32 0.125, %v636_v18  ;;  %2184 = vrcp.f32 %v775_v50  ;;  %v705_v56 = vmul.f32 0.125, %v639_v23  ;;  %v789_v60 = vsel %vm787_vm10, %v788_v14, %v786_v24 }
 0x155   : > { %v798_v48 = vmul.f32 %v2171_v16, %v2756_v3  ;;  %2186 = vrcp.f32 %v782_v30  ;;  %v793_v62 = vsel %vm792_vm11, %v2754_v40, %v791_v57  ;;  %v816_v39 = vand.u32 2147483648, %v2769_v32 }
 0x156   : > { %v2173_v36 = vpop.eup %2172  ;;  %2188 = vrsqrt.f32 %v2818_v61  ;;  %v2841_v22 = vadd.f32 1e-06, %v704_v20  ;;  %v796_v16 = vsel %vm794_vm12, %v795_v4, %v793_v62  ;;  %vm820_vm4 = vcmp.eq.f32.partialorder %v2780_v8, inf }
 0x157   : > { %v642_v34 = vpop.xlane.xlu1 %641  ;;  %v645_v6 = vpop.xlane.xlu0 %644  ;;  %v800_v12 = vsel %vm799_vm13, %v2756_v3, %v798_v48  ;;  %v805_v57 = vmul.f32 %v2173_v36, %v2762_v44  ;;  %2190 = vrsqrt.f32 %v2826_v52  ;;  %v2852_v14 = vadd.f32 1e-06, %v705_v56 }
 0x158   : > { %v2175_v18 = vpop.eup %2174  ;;  %v706_v23 = vmul.f32 0.125, %v642_v34  ;;  %v803_v54 = vsel %vm801_vm14, %v802_v38, %v800_v12  ;;  %2192 = vrsqrt.f32 %v2841_v22  ;;  %vm822_vm5 = vcmp.eq.f32.partialorder %v2780_v8, 0.0 }
 0x159   : > { %2194 = vrcp.f32 %v789_v60  ;;  %v812_v4 = vmul.f32 %v2175_v18, %v2769_v32  ;;  %v707_v40 = vmul.f32 0.125, %v645_v6  ;;  %v807_v50 = vsel %vm806_vm15, %v2762_v44, %v805_v57 }
 0x15a   : > { %v2177_v0 = vpop.eup %2176  ;;  %2196 = vrcp.f32 %v796_v16  ;;  %v2860_v30 = vadd.f32 1e-06, %v706_v23  ;;  %v823_v38 = vand.u32 2147483648, %v2780_v8  ;;  %vm827_vm6 = vcmp.eq.f32.partialorder %v2782_v58, inf }
 0x15b   : > { %v648_v42 = vpop.xlane.xlu1 %647  ;;  %v2179_v46 = vpop.eup %2178  ;;  %v819_v3 = vmul.f32 %v2177_v0, %v2780_v8  ;;  %2198 = vrcp.f32 %v803_v54  ;;  %vm829_vm7 = vcmp.eq.f32.partialorder %v2782_v58, 0.0  ;;  %v830_v24 = vand.u32 2147483648, %v2782_v58 }
 0x15c   : > { %v651_v48 = vpop.xlane.xlu0 %650  ;;  %v2181_v34 = vpop.eup %2180  ;;  %v826_v20 = vmul.f32 %v2179_v46, %v2782_v58  ;;  %vm834_vm8 = vcmp.eq.f32.partialorder %v2818_v61, inf  ;;  %2200 = vrsqrt.f32 %v2852_v14  ;;  %v810_v56 = vsel %vm808_vm1, %v809_v28, %v807_v50  ;;  %v2888_v28 = vld [vmem:[%s3569_s1] ss:$0 sm:$0xff] }
 0x15d   : > { %v2183_v36 = vpop.eup %2182  ;;  %v814_v6 = vsel %vm813_vm2, %v2769_v32, %v812_v4  ;;  %v2876_v12 = vadd.f32 1e-06, %v707_v40  ;;  %v708_v18 = vmul.f32 0.125, %v648_v42  ;;  %v821_v23 = vsel %vm820_vm4, %v2780_v8, %v819_v3 }
 0x15e   : > { %v2869_v62 = vpop.eup %2184  ;;  %2202 = vrsqrt.f32 %v2860_v30  ;;  %v709_v0 = vmul.f32 0.125, %v651_v48  ;;  %v980_v44 = vmul.f32 %v2181_v34, %v2542_v10  ;;  %v828_v42 = vsel %vm827_vm6, %v2782_v58, %v826_v20 }
 0x15f   : > { %v654_v60 = vpop.xlane.xlu1 %653  ;;  %v2878_v57 = vpop.eup %2186  ;;  %vm836_vm9 = vcmp.eq.f32.partialorder %v2818_v61, 0.0  ;;  %v837_v46 = vand.u32 2147483648, %v2818_v61  ;;  %2204 = vrsqrt.f32 %v2876_v12  ;;  %v817_v54 = vsel %vm815_vm3, %v816_v39, %v814_v6 }
 0x160   : > { %v2189_v16 = vpop.eup %2188  ;;  %vm841_vm10 = vcmp.eq.f32.partialorder %v2826_v52, inf  ;;  %v2900_v4 = vadd.f32 1e-06, %v708_v18  ;;  %v710_v40 = vmul.f32 0.125, %v654_v60  ;;  %v657_v50 = vpop.xlane.xlu0 %656  ;;  %2206 = vrcp.f32 %v810_v56  ;;  %v2915_v56 = vld [vmem:[%s3570_s2] ss:$0 sm:$0xff] }
 0x161   : > { %v833_v10 = vmul.f32 %v2189_v16, %v2818_v61  ;;  %v2191_v3 = vpop.eup %2190  ;;  %v824_v48 = vsel %vm822_vm5, %v823_v38, %v821_v23  ;;  %v844_v34 = vand.u32 2147483648, %v2826_v52  ;;  %v1050_v20 = vmul.f32 %v2888_v28, %v980_v44 }
 0x162   : > { %v2193_v53 = vpop.eup %2192  ;;  %v831_v32 = vsel %vm829_vm7, %v830_v24, %v828_v42  ;;  %vm848_vm11 = vcmp.eq.f32.partialorder %v2841_v22, inf  ;;  %2208 = vrsqrt.f32 %v2900_v4  ;;  %v2910_v39 = vadd.f32 1e-06, %v709_v0 }
 0x163   : > { %v2917_v8 = vpop.eup %2194  ;;  %2210 = vrcp.f32 %v817_v54  ;;  %vm843_vm12 = vcmp.eq.f32.partialorder %v2826_v52, 0.0  ;;  %vm850_vm13 = vcmp.eq.f32.partialorder %v2841_v22, 0.0  ;;  %v851_v58 = vand.u32 2147483648, %v2841_v22  ;;  %v660_v42 = vpop.xlane.xlu1 %659 }
 0x164   : > { %v711_v38 = vmul.f32 0.125, %v657_v50  ;;  %v2922_v24 = vpop.eup %2196  ;;  %2212 = vrcp.f32 %v824_v48  ;;  %v835_v6 = vsel %vm834_vm8, %v2818_v61, %v833_v10  ;;  %vm855_vm14 = vcmp.eq.f32.partialorder %v2852_v14, inf }
 0x165   : > { %v2928_v18 = vadd.f32 1e-06, %v710_v40  ;;  %v982_v60 = vmul.f32 %v2183_v36, %v2552_v26  ;;  %v2931_v23 = vpop.eup %2198  ;;  %2214 = vrcp.f32 %v831_v32  ;;  %v840_v0 = vmul.f32 %v2191_v3, %v2826_v52  ;;  %v663_v3 = vpop.xlane.xlu0 %662 }
 0x166   : > { %v847_v44 = vmul.f32 %v2193_v53, %v2841_v22  ;;  %v1089_v16 = vadd.f32 %v2915_v56, %v1050_v20  ;;  %v2201_v54 = vpop.eup %2200  ;;  %v858_v50 = vand.u32 2147483648, %v2852_v14  ;;  %vm862_vm15 = vcmp.eq.f32.partialorder %v2860_v30, inf }
 0x167   : > { %2216 = vrsqrt.f32 %v2910_v39  ;;  %v838_v26 = vsel %vm836_vm9, %v837_v46, %v835_v6  ;;  %vm857_vm1 = vcmp.eq.f32.partialorder %v2852_v14, 0.0  ;;  %vm869_vm2 = vcmp.eq.f32.partialorder %v2876_v12, inf }
 0x168   : > { %2036 = vmatprep.mubr.msk.f32.mxu0 %vm401_vm0, %v1089_v16  ;;  %2086 = vmatprep.mubr.msk.f32.mxu1 %vm401_vm0, %v1089_v16  ;;  %v2947_v36 = vadd.f32 1e-06, %v711_v38  ;;  %v2203_v40 = vpop.eup %2202  ;;  %vm864_vm3 = vcmp.eq.f32.partialorder %v2860_v30, 0.0  ;;  %vm876_vm4 = vcmp.eq.f32.partialorder %v2900_v4, inf  ;;  %2218 = vrsqrt.f32 %v2928_v18 }
 0x169   : > { %v1051_v61 = vmul.f32 %v2888_v28, %v982_v60  ;;  %v984_v46 = vmul.f32 %v2869_v62, %v2545_v11  ;;  %v2205_v48 = vpop.eup %2204  ;;  %v842_v20 = vsel %vm841_vm10, %v2826_v52, %v840_v0  ;;  %v849_v32 = vsel %vm848_vm11, %v2841_v22, %v847_v44 }
 0x16a   : > { %v854_v38 = vmul.f32 %v2201_v54, %v2852_v14  ;;  %vm871_vm5 = vcmp.eq.f32.partialorder %v2876_v12, 0.0  ;;  %2220 = vrsqrt.f32 %v2947_v36  ;;  %v861_v6 = vmul.f32 %v2203_v40, %v2860_v30  ;;  %v2967_v62 = vpop.eup %2206  ;;  %v666_v54 = vpop.xlane.xlu1 %665 }
 0x16b   : > { %2222 = vrcp.f32 %v838_v26  ;;  %vm878_vm6 = vcmp.eq.f32.partialorder %v2900_v4, 0.0  ;;  %v879_v11 = vand.u32 2147483648, %v2900_v4  ;;  %v868_v60 = vmul.f32 %v2205_v48, %v2876_v12 }
 0x16c   : > { %v1090_v0 = vadd.f32 %v2915_v56, %v1051_v61  ;;  %v1052_v44 = vmul.f32 %v2888_v28, %v984_v46  ;;  %v712_v16 = vmul.f32 0.125, %v660_v42  ;;  %v2209_v53 = vpop.eup %2208  ;;  %v845_v26 = vsel %vm843_vm12, %v844_v34, %v842_v20 }
 0x16d   : > { %v852_v40 = vsel %vm850_vm13, %v851_v58, %v849_v32  ;;  %v713_v10 = vmul.f32 0.125, %v663_v3  ;;  %v986_v51 = vmul.f32 %v2878_v57, %v2555_v27  ;;  %v2980_v48 = vpop.eup %2210  ;;  %v856_v42 = vsel %vm855_vm14, %v2852_v14, %v854_v38 }
 0x16e   : > { %v875_v61 = vmul.f32 %v2209_v53, %v2900_v4  ;;  %vm883_vm7 = vcmp.eq.f32.partialorder %v2910_v39, inf  ;;  %2037 = vmatmul.mubr.msk.f32.vlgmr.msra.gmra.mrb[0].mxu0 %vm401_vm0, %v1090_v0  ;;  %2087 = vmatmul.mubr.msk.f32.vlgmr.msra.gmra.mrb[0].mxu1 %vm401_vm0, %v1090_v0  ;;  %v1091_v52 = vadd.f32 %v2915_v56, %v1052_v44  ;;  %v2990_v22 = vpop.eup %2212  ;;  %v863_v27 = vsel %vm862_vm15, %v2860_v30, %v861_v6  ;;  %v669_v53 = vpop.xlane.xlu0 %668 }
 0x16f   : > { %v2995_v57 = vadd.f32 1e-06, %v712_v16  ;;  %v2997_v34 = vadd.f32 1e-06, %v713_v10  ;;  %v1053_v58 = vmul.f32 %v2888_v28, %v986_v51  ;;  %v3000_v46 = vpop.eup %2214  ;;  %2224 = vrcp.f32 %v845_v26  ;;  %v672_v44 = vpop.xlane.xlu1 %671 }
 0x170   : > { %v870_v3 = vsel %vm869_vm2, %v2876_v12, %v868_v60  ;;  %vm885_vm8 = vcmp.eq.f32.partialorder %v2910_v39, 0.0  ;;  %2039 = vmatprep.mubr.msk.f32.mxu0 %vm401_vm0, %v1091_v52  ;;  %2089 = vmatprep.mubr.msk.f32.mxu1 %vm401_vm0, %v1091_v52  ;;  %v988_v10 = vmul.f32 %v2917_v8, %v2564_v2  ;;  %v714_v20 = vmul.f32 0.125, %v666_v54 }
 0x171   : > { %v2217_v32 = vpop.eup %2216  ;;  %v859_v51 = vsel %vm857_vm1, %v858_v50, %v856_v42  ;;  %v877_v38 = vsel %vm876_vm4, %v2900_v4, %v875_v61  ;;  %v886_v6 = vand.u32 2147483648, %v2910_v39  ;;  %2226 = vrsqrt.f32 %v2995_v57 }
 0x172   : > { %2228 = vrcp.f32 %v852_v40  ;;  %v3585_v60 = vand.u32 2147483648, %v2860_v30  ;;  %v882_v2 = vmul.f32 %v2217_v32, %v2910_v39  ;;  %v715_v8 = vmul.f32 0.125, %v669_v53  ;;  %v2219_v14 = vpop.eup %2218  ;;  %v675_v53 = vpop.xlane.xlu0 %674 }
 0x173   : > { %v3586_v50 = vand.u32 2147483648, %v2876_v12  ;;  %vm890_vm9 = vcmp.eq.f32.partialorder %v2928_v18, inf  ;;  %2230 = vrsqrt.f32 %v2997_v34  ;;  %v1092_v54 = vadd.f32 %v2915_v56, %v1053_v58 }
 0x174   : > { %v866_v0 = vsel %vm864_vm3, %v3585_v60, %v863_v27  ;;  %v2221_v26 = vpop.eup %2220  ;;  %2232 = vrcp.f32 %v859_v51  ;;  %v880_v30 = vsel %vm878_vm6, %v879_v11, %v877_v38  ;;  %vm892_vm10 = vcmp.eq.f32.partialorder %v2928_v18, 0.0 }
 0x175   : > { %v873_v16 = vsel %vm871_vm5, %v3586_v50, %v870_v3  ;;  %v1054_v40 = vmul.f32 %v2888_v28, %v988_v10  ;;  %v3033_v42 = vadd.f32 1e-06, %v714_v20  ;;  %v3035_v61 = vpop.eup %2222  ;;  %2234 = vrcp.f32 %v866_v0  ;;  %2040 = vmatmul.mubr.msk.f32.gmra.mrb[2].mxu0 %vm401_vm0, %v1092_v54  ;;  %2090 = vmatmul.mubr.msk.f32.gmra.mrb[2].mxu1 %vm401_vm0, %v1092_v54  ;;  %v678_v10 = vpop.xlane.xlu1 %677 }
 0x176   : > { %v889_v12 = vmul.f32 %v2219_v14, %v2928_v18  ;;  %v896_v52 = vmul.f32 %v2221_v26, %v2947_v36  ;;  %v990_v4 = vmul.f32 %v2922_v24, %v2567_v5  ;;  %2236 = vrcp.f32 %v873_v16 }
 0x177   : > { %v884_v11 = vsel %vm883_vm7, %v2910_v39, %v882_v2  ;;  %v1093_v27 = vadd.f32 %v2915_v56, %v1054_v40  ;;  %v3047_v58 = vadd.f32 1e-06, %v715_v8  ;;  %v893_v3 = vand.u32 2147483648, %v2928_v18 }
 0x178   : > { %vm897_vm11 = vcmp.eq.f32.partialorder %v2947_v36, inf  ;;  %vm899_vm12 = vcmp.eq.f32.partialorder %v2947_v36, 0.0  ;;  %2238 = vrsqrt.f32 %v3033_v42  ;;  %v900_v5 = vand.u32 2147483648, %v2947_v36 }
 0x179   : > { %2240 = vrcp.f32 %v880_v30  ;;  %vm904_vm13 = vcmp.eq.f32.partialorder %v2995_v57, inf  ;;  %v907_v24 = vand.u32 2147483648, %v2995_v57  ;;  %2042 = vmatprep.mubr.msk.f32.mxu0 %vm401_vm0, %v1093_v27  ;;  %2092 = vmatprep.mubr.msk.f32.mxu1 %vm401_vm0, %v1093_v27  ;;  %v887_v20 = vsel %vm885_vm8, %v886_v6, %v884_v11  ;;  %v3066_v60 = vpop.eup %2224 }
 0x17a   : > { %v891_v32 = vsel %vm890_vm9, %v2928_v18, %v889_v12  ;;  %v898_v51 = vsel %vm897_vm11, %v2947_v36, %v896_v52  ;;  %vm906_vm14 = vcmp.eq.f32.partialorder %v2995_v57, 0.0  ;;  %v1055_v38 = vmul.f32 %v2888_v28, %v990_v4 }
 0x17b   : > { %2242 = vrsqrt.f32 %v3047_v58  ;;  %v992_v0 = vmul.f32 %v2931_v23, %v2576_v55  ;;  %v716_v2 = vmul.f32 0.125, %v672_v44  ;;  %v717_v39 = vmul.f32 0.125, %v675_v53  ;;  %v2227_v6 = vpop.eup %2226  ;;  %v681_v44 = vpop.xlane.xlu0 %680 }
 0x17c   : > { %v1094_v8 = vadd.f32 %v2915_v56, %v1055_v38  ;;  %v994_v14 = vmul.f32 %v2967_v62, %v2579_v9  ;;  %v996_v50 = vmul.f32 %v2980_v48, %v2588_v7  ;;  %v718_v16 = vmul.f32 0.125, %v678_v10  ;;  %v3076_v54 = vpop.eup %2228 }
 0x17d   : > { %v903_v26 = vmul.f32 %v2227_v6, %v2995_v57  ;;  %vm911_vm15 = vcmp.eq.f32.partialorder %v2997_v34, inf  ;;  %v1056_v55 = vmul.f32 %v2888_v28, %v992_v0  ;;  %v3081_v23 = vadd.f32 1e-06, %v716_v2  ;;  %v2231_v30 = vpop.eup %2230 }
 0x17e   : > { %2244 = vrcp.f32 %v887_v20  ;;  %v894_v9 = vsel %vm892_vm10, %v893_v3, %v891_v32  ;;  %2043 = vmatmul.mubr.msk.f32.gmra.mrb[4].mxu0 %vm401_vm0, %v1094_v8  ;;  %2093 = vmatmul.mubr.msk.f32.gmra.mrb[4].mxu1 %vm401_vm0, %v1094_v8  ;;  %v3087_v7 = vadd.f32 1e-06, %v717_v39  ;;  %v1057_v62 = vmul.f32 %v2888_v28, %v994_v14  ;;  %v3090_v48 = vpop.eup %2232  ;;  %v684_v32 = vpop.xlane.xlu1 %683 }
 0x17f   : > { %v901_v40 = vsel %vm899_vm12, %v900_v5, %v898_v51  ;;  %v1095_v12 = vadd.f32 %v2915_v56, %v1056_v55  ;;  %2246 = vrsqrt.f32 %v3081_v23  ;;  %v1058_v18 = vmul.f32 %v2888_v28, %v996_v50  ;;  %v3097_v52 = vpop.eup %2234 }
 0x180   : > { %v905_v4 = vsel %vm904_vm13, %v2995_v57, %v903_v26  ;;  %v910_v11 = vmul.f32 %v2231_v30, %v2997_v34  ;;  %v3103_v27 = vadd.f32 1e-06, %v718_v16  ;;  %v719_v53 = vmul.f32 0.125, %v681_v44  ;;  %v3105_v3 = vpop.eup %2236  ;;  %v687_v16 = vpop.xlane.xlu0 %686 }
 0x181   : > { %2248 = vrcp.f32 %v894_v9  ;;  %vm913_vm1 = vcmp.eq.f32.partialorder %v2997_v34, 0.0  ;;  %v914_v36 = vand.u32 2147483648, %v2997_v34  ;;  %vm918_vm2 = vcmp.eq.f32.partialorder %v3033_v42, inf  ;;  %2045 = vmatprep.mubr.msk.f32.mxu0 %vm401_vm0, %v1095_v12  ;;  %2095 = vmatprep.mubr.msk.f32.mxu1 %vm401_vm0, %v1095_v12 }
 0x182   : > { %v2239_v5 = vpop.eup %2238  ;;  %vm920_vm3 = vcmp.eq.f32.partialorder %v3033_v42, 0.0  ;;  %v921_v10 = vand.u32 2147483648, %v3033_v42  ;;  %vm925_vm4 = vcmp.eq.f32.partialorder %v3047_v58, inf  ;;  %2250 = vrsqrt.f32 %v3087_v7 }
 0x183   : > { %v1096_v20 = vadd.f32 %v2915_v56, %v1057_v62  ;;  %v3117_v51 = vpop.eup %2240  ;;  %2252 = vrcp.f32 %v901_v40  ;;  %v908_v38 = vsel %vm906_vm14, %v907_v24, %v905_v4  ;;  %v928_v0 = vand.u32 2147483648, %v3047_v58  ;;  %v690_v4 = vpop.xlane.xlu1 %689 }
 0x184   : > { %v1097_v2 = vadd.f32 %v2915_v56, %v1058_v18  ;;  %v912_v39 = vsel %vm911_vm15, %v2997_v34, %v910_v11  ;;  %v917_v6 = vmul.f32 %v2239_v5, %v3033_v42  ;;  %vm927_vm5 = vcmp.eq.f32.partialorder %v3047_v58, 0.0 }
 0x185   : > { %2046 = vmatmul.mubr.msk.f32.gmra.mrb[6].mxu0 %vm401_vm0, %v1096_v20  ;;  %2096 = vmatmul.mubr.msk.f32.gmra.mrb[6].mxu1 %vm401_vm0, %v1096_v20  ;;  %2254 = vrsqrt.f32 %v3103_v27  ;;  %v3131_v57 = vadd.f32 1e-06, %v719_v53  ;;  %v2243_v24 = vpop.eup %2242  ;;  %vm932_vm6 = vcmp.eq.f32.partialorder %v3081_v23, inf  ;;  %v998_v8 = vmul.f32 %v2990_v22, %v2591_v13 }
 0x186   : > { %2048 = vmatprep.mubr.msk.f32.mxu0 %vm401_vm0, %v1097_v2  ;;  %2098 = vmatprep.mubr.msk.f32.mxu1 %vm401_vm0, %v1097_v2  ;;  %v1000_v14 = vmul.f32 %v3000_v46, %v2600_v1  ;;  %v720_v50 = vmul.f32 0.125, %v684_v32  ;;  %v924_v26 = vmul.f32 %v2243_v24, %v3047_v58  ;;  %vm934_vm7 = vcmp.eq.f32.partialorder %v3081_v23, 0.0 }
 0x187   : > { %v935_v55 = vand.u32 2147483648, %v3081_v23  ;;  %2256 = vrsqrt.f32 %v3131_v57  ;;  %v915_v44 = vsel %vm913_vm1, %v914_v36, %v912_v39  ;;  %vm939_vm8 = vcmp.eq.f32.partialorder %v3087_v7, inf }
 0x188   : > { %2258 = vrcp.f32 %v908_v38  ;;  %v1059_v13 = vmul.f32 %v2888_v28, %v998_v8  ;;  %v3148_v22 = vpop.eup %2244  ;;  %v919_v1 = vsel %vm918_vm2, %v3033_v42, %v917_v6  ;;  %v1060_v46 = vmul.f32 %v2888_v28, %v1000_v14 }
 0x189   : > { %v3154_v30 = vadd.f32 1e-06, %v720_v50  ;;  %v721_v9 = vmul.f32 0.125, %v687_v16  ;;  %v2247_v62 = vpop.eup %2246  ;;  %v942_v40 = vand.u32 2147483648, %v3087_v7  ;;  %v1002_v12 = vmul.f32 %v3035_v61, %v2603_v17 }
 0x18a   : > { %v1098_v34 = vadd.f32 %v2915_v56, %v1059_v13  ;;  %v1004_v18 = vmul.f32 %v3066_v60, %v2612_v43  ;;  %2260 = vrcp.f32 %v915_v44  ;;  %v926_v11 = vsel %vm925_vm4, %v3047_v58, %v924_v26 }
 0x18b   : > { %v931_v53 = vmul.f32 %v2247_v62, %v3081_v23  ;;  %vm941_vm9 = vcmp.eq.f32.partialorder %v3087_v7, 0.0  ;;  %v1099_v36 = vadd.f32 %v2915_v56, %v1060_v46  ;;  %v3168_v5 = vpop.eup %2248  ;;  %v922_v17 = vsel %vm920_vm3, %v921_v10, %v919_v1 }
 0x18c   : > { %vm946_vm10 = vcmp.eq.f32.partialorder %v3103_v27, inf  ;;  %2049 = vmatmul.mubr.msk.f32.gmra.mrb[8].mxu0 %vm401_vm0, %v1098_v34  ;;  %2099 = vmatmul.mubr.msk.f32.gmra.mrb[8].mxu1 %vm401_vm0, %v1098_v34  ;;  %2262 = vrsqrt.f32 %v3154_v30  ;;  %v3176_v43 = vadd.f32 1e-06, %v721_v9  ;;  %v2251_v61 = vpop.eup %2250  ;;  %v1061_v42 = vmul.f32 %v2888_v28, %v1002_v12 }
 0x18d   : > { %v933_v60 = vsel %vm932_vm6, %v3081_v23, %v931_v53  ;;  %2051 = vmatprep.mubr.msk.f32.mxu0 %vm401_vm0, %v1099_v36  ;;  %2101 = vmatprep.mubr.msk.f32.mxu1 %vm401_vm0, %v1099_v36  ;;  %v1062_v10 = vmul.f32 %v2888_v28, %v1004_v18  ;;  %v722_v20 = vmul.f32 0.125, %v690_v4  ;;  %v2253_v32 = vpop.eup %2252  ;;  %v929_v38 = vsel %vm927_vm5, %v928_v0, %v926_v11 }
 0x18e   : > { %v938_v2 = vmul.f32 %v2251_v61, %v3087_v7  ;;  %vm948_vm11 = vcmp.eq.f32.partialorder %v3103_v27, 0.0  ;;  %2264 = vrsqrt.f32 %v3176_v43  ;;  %v936_v6 = vsel %vm934_vm7, %v935_v55, %v933_v60 }
 0x18f   : > { %v2255_v39 = vpop.eup %2254  ;;  %v949_v24 = vand.u32 2147483648, %v3103_v27  ;;  %vm953_vm12 = vcmp.eq.f32.partialorder %v3131_v57, inf  ;;  %v1100_v8 = vadd.f32 %v2915_v56, %v1061_v42  ;;  %2266 = vrcp.f32 %v922_v17 }
 0x190   : > { %v945_v58 = vmul.f32 %v2255_v39, %v3103_v27  ;;  %v1101_v0 = vadd.f32 %v2915_v56, %v1062_v10  ;;  %v3197_v14 = vadd.f32 1e-06, %v722_v20  ;;  %2268 = vrcp.f32 %v929_v38 }
 0x191   : > { %v2257_v50 = vpop.eup %2256  ;;  %v940_v23 = vsel %vm939_vm8, %v3087_v7, %v938_v2  ;;  %2052 = vmatmul.mubr.msk.f32.gmra.mrb[10].mxu0 %vm401_vm0, %v1100_v8  ;;  %2102 = vmatmul.mubr.msk.f32.gmra.mrb[10].mxu1 %vm401_vm0, %v1100_v8  ;;  %v1006_v16 = vmul.f32 %v3076_v54, %v2615_v21  ;;  %v1008_v26 = vmul.f32 %v3090_v48, %v2624_v59  ;;  %2270 = vrcp.f32 %v936_v6 }
 0x192   : > { %v2259_v55 = vpop.eup %2258  ;;  %v947_v44 = vsel %vm946_vm10, %v3103_v27, %v945_v58  ;;  %v952_v13 = vmul.f32 %v2257_v50, %v3131_v57  ;;  %vm955_vm13 = vcmp.eq.f32.partialorder %v3131_v57, 0.0  ;;  %2054 = vmatprep.mubr.msk.f32.mxu0 %vm401_vm0, %v1101_v0  ;;  %2104 = vmatprep.mubr.msk.f32.mxu1 %vm401_vm0, %v1101_v0  ;;  %v956_v1 = vand.u32 2147483648, %v3131_v57 }
 0x193   : > { %vm960_vm14 = vcmp.eq.f32.partialorder %v3154_v30, inf  ;;  %vm962_vm15 = vcmp.eq.f32.partialorder %v3154_v30, 0.0  ;;  %2272 = vrsqrt.f32 %v3197_v14  ;;  %v943_v21 = vsel %vm941_vm9, %v942_v40, %v940_v23 }
 0x194   : > { %v954_v59 = vsel %vm953_vm12, %v3131_v57, %v952_v13  ;;  %v1063_v54 = vmul.f32 %v2888_v28, %v1006_v16  ;;  %v1064_v48 = vmul.f32 %v2888_v28, %v1008_v26  ;;  %v2261_v46 = vpop.eup %2260  ;;  %v950_v9 = vsel %vm948_vm11, %v949_v24, %v947_v44 }
 0x195   : > { %v1010_v62 = vmul.f32 %v3097_v52, %v2627_v25  ;;  %v1012_v34 = vmul.f32 %v3105_v3, %v2636_v15  ;;  %v1014_v7 = vmul.f32 %v3117_v51, %v2639_v29  ;;  %v957_v12 = vsel %vm955_vm13, %v956_v1, %v954_v59 }
 0x196   : > { %v2263_v40 = vpop.eup %2262  ;;  %v1102_v18 = vadd.f32 %v2915_v56, %v1063_v54  ;;  %v1103_v4 = vadd.f32 %v2915_v56, %v1064_v48  ;;  %v1016_v27 = vmul.f32 %v3148_v22, %v2648_v31  ;;  %2274 = vrcp.f32 %v943_v21 }
 0x197   : > { %v959_v11 = vmul.f32 %v2263_v40, %v3154_v30  ;;  %v1065_v25 = vmul.f32 %v2888_v28, %v1010_v62  ;;  %v1066_v15 = vmul.f32 %v2888_v28, %v1012_v34  ;;  %v1067_v52 = vmul.f32 %v2888_v28, %v1014_v7  ;;  %v3588_v40 = vld [vmem:[#allocation3_spill] sm:$0xff] }
 0x198   : > { %v2265_v29 = vpop.eup %2264  ;;  %2055 = vmatmul.mubr.msk.f32.gmra.mrb[12].mxu0 %vm401_vm0, %v1102_v18  ;;  %2105 = vmatmul.mubr.msk.f32.gmra.mrb[12].mxu1 %vm401_vm0, %v1102_v18  ;;  %v1068_v3 = vmul.f32 %v2888_v28, %v1016_v27  ;;  %v1018_v51 = vmul.f32 %v3168_v5, %v2651_v33  ;;  %v1020_v31 = vmul.f32 %v2253_v32, %v2660_v47  ;;  %v963_v22 = vand.u32 2147483648, %v3154_v30 }
 0x199   : > { %v961_v57 = vsel %vm960_vm14, %v3154_v30, %v959_v11  ;;  %v966_v53 = vmul.f32 %v2265_v29, %v3176_v43  ;;  %2057 = vmatprep.mubr.msk.f32.mxu0 %vm401_vm0, %v1103_v4  ;;  %2107 = vmatprep.mubr.msk.f32.mxu1 %vm401_vm0, %v1103_v4  ;;  %v1104_v36 = vadd.f32 %v2915_v56, %v1065_v25  ;;  %v2267_v17 = vpop.eup %2266  ;;  %vm967_vm1 = vcmp.eq.f32.partialorder %v3176_v43, inf  ;;  %v3589_v11 = vld [vmem:[#allocation4_spill] sm:$0xff]  ;;  %v3590_v29 = vld [vmem:[#allocation5_spill] sm:$0xff] }
 0x19a   : > { %vm969_vm2 = vcmp.eq.f32.partialorder %v3176_v43, 0.0  ;;  %v970_v33 = vand.u32 2147483648, %v3176_v43  ;;  %v1105_v47 = vadd.f32 %v2915_v56, %v1066_v15  ;;  %v2269_v5 = vpop.eup %2268  ;;  %2276 = vrcp.f32 %v950_v9  ;;  %v3587_v9 = vld [vmem:[#allocation2_spill] sm:$0xff] }
 0x19b   : > { %v968_v61 = vsel %vm967_vm1, %v3176_v43, %v966_v53  ;;  %v1069_v60 = vmul.f32 %v2888_v28, %v1018_v51  ;;  %v1070_v42 = vmul.f32 %v2888_v28, %v1020_v31  ;;  %v2271_v10 = vpop.eup %2270  ;;  %2278 = vrcp.f32 %v957_v12 }
 0x19c   : > { %v964_v20 = vsel %vm962_vm15, %v963_v22, %v961_v57  ;;  %2058 = vmatmul.mubr.msk.f32.gmra.mrb[14].mxu0 %vm401_vm0, %v1104_v36  ;;  %2108 = vmatmul.mubr.msk.f32.gmra.mrb[14].mxu1 %vm401_vm0, %v1104_v36  ;;  %v1106_v32 = vadd.f32 %v2915_v56, %v1067_v52  ;;  %v1022_v38 = vmul.f32 %v2259_v55, %v2663_v37  ;;  %vm974_vm3 = vcmp.eq.f32.partialorder %v3197_v14, inf }
 0x19d   : > { %v2273_v2 = vpop.eup %2272  ;;  %v971_v39 = vsel %vm969_vm2, %v970_v33, %v968_v61  ;;  %2060 = vmatprep.mubr.msk.f32.mxu0 %vm401_vm0, %v1105_v47  ;;  %2110 = vmatprep.mubr.msk.f32.mxu1 %vm401_vm0, %v1105_v47  ;;  %v1107_v6 = vadd.f32 %v2915_v56, %v1068_v3  ;;  %v1024_v30 = vmul.f32 %v2261_v46, %v2672_v63  ;;  %vm976_vm4 = vcmp.eq.f32.partialorder %v3197_v14, 0.0 }
 0x19e   : > { %v973_v24 = vmul.f32 %v2273_v2, %v3197_v14  ;;  %2280 = vrcp.f32 %v964_v20  ;;  %v977_v37 = vand.u32 2147483648, %v3197_v14  ;;  %v1108_v43 = vadd.f32 %v2915_v56, %v1069_v60 }
 0x19f   : > { %v1109_v8 = vadd.f32 %v2915_v56, %v1070_v42  ;;  %2282 = vrcp.f32 %v971_v39  ;;  %v1071_v63 = vmul.f32 %v2888_v28, %v1022_v38  ;;  %v1026_v0 = vmul.f32 %v2267_v17, %v2675_v41  ;;  %v3353_v17 = vld [vmem:[%s3574_s6] ss:$0 sm:$0xff] }
 0x1a0   : > { %v975_v58 = vsel %vm974_vm3, %v3197_v14, %v973_v24  ;;  %2061 = vmatmul.mubr.msk.f32.gmra.mrb[16].mxu0 %vm401_vm0, %v1106_v32  ;;  %2111 = vmatmul.mubr.msk.f32.gmra.mrb[16].mxu1 %vm401_vm0, %v1106_v32  ;;  %v1072_v23 = vmul.f32 %v2888_v28, %v1024_v30  ;;  %v1028_v16 = vmul.f32 %v2269_v5, %v2684_v19  ;;  %v2275_v26 = vpop.eup %2274 }
 0x1a1   : > { %v978_v50 = vsel %vm976_vm4, %v977_v37, %v975_v58  ;;  %2063 = vmatprep.mubr.msk.f32.mxu0 %vm401_vm0, %v1107_v6  ;;  %2113 = vmatprep.mubr.msk.f32.mxu1 %vm401_vm0, %v1107_v6  ;;  %v1110_v14 = vadd.f32 %v2915_v56, %v1071_v63  ;;  %v1073_v55 = vmul.f32 %v2888_v28, %v1026_v0 }
 0x1a2   : > { %2284 = vrcp.f32 %v978_v50  ;;  %v1030_v41 = vmul.f32 %v2271_v10, %v2687_v45  ;;  %v1111_v13 = vadd.f32 %v2915_v56, %v1072_v23  ;;  %v1074_v19 = vmul.f32 %v2888_v28, %v1028_v16 }
 0x1a3   : > { %v1032_v1 = vmul.f32 %v2275_v26, %v2696_v35  ;;  %v1112_v59 = vadd.f32 %v2915_v56, %v1073_v55 }
 0x1a4   : > { %2064 = vmatmul.mubr.msk.f32.gmra.mrb[18].mxu0 %vm401_vm0, %v1108_v43  ;;  %2114 = vmatmul.mubr.msk.f32.gmra.mrb[18].mxu1 %vm401_vm0, %v1108_v43  ;;  %v2277_v44 = vpop.eup %2276  ;;  %v1075_v45 = vmul.f32 %v2888_v28, %v1030_v41  ;;  %v1113_v46 = vadd.f32 %v2915_v56, %v1074_v19 }
 0x1a5   : > { %2066 = vmatprep.mubr.msk.f32.mxu0 %vm401_vm0, %v1109_v8  ;;  %2116 = vmatprep.mubr.msk.f32.mxu1 %vm401_vm0, %v1109_v8  ;;  %v2279_v21 = vpop.eup %2278  ;;  %v1034_v54 = vmul.f32 %v2277_v44, %v2699_v49  ;;  %v1076_v35 = vmul.f32 %v2888_v28, %v1032_v1 }
 0x1a6   : > { %v1036_v62 = vmul.f32 %v2279_v21, %v3587_v9  ;;  %v1114_v7 = vadd.f32 %v2915_v56, %v1075_v45 }
 0x1a7   : > { %v1077_v49 = vmul.f32 %v2888_v28, %v1034_v54  ;;  %v1115_v4 = vadd.f32 %v2915_v56, %v1076_v35 }
 0x1a8   : > { %2067 = vmatmul.mubr.msk.f32.gmra.mrb[20].mxu0 %vm401_vm0, %v1110_v14  ;;  %2117 = vmatmul.mubr.msk.f32.gmra.mrb[20].mxu1 %vm401_vm0, %v1110_v14  ;;  %v2281_v48 = vpop.eup %2280  ;;  %v1078_v27 = vmul.f32 %v2888_v28, %v1036_v62 }
 0x1a9   : > { %2069 = vmatprep.mubr.msk.f32.mxu0 %vm401_vm0, %v1111_v13  ;;  %2119 = vmatprep.mubr.msk.f32.mxu1 %vm401_vm0, %v1111_v13  ;;  %v2283_v34 = vpop.eup %2282  ;;  %v1038_v12 = vmul.f32 %v2281_v48, %v3588_v40  ;;  %v1116_v15 = vadd.f32 %v2915_v56, %v1077_v49 }
 0x1aa   : > { %v1040_v25 = vmul.f32 %v2283_v34, %v3589_v11  ;;  %v1117_v51 = vadd.f32 %v2915_v56, %v1078_v27 }
 0x1ab   : > { %v1079_v52 = vmul.f32 %v2888_v28, %v1038_v12 }
 0x1ac   : > { %2070 = vmatmul.mubr.msk.f32.gmra.mrb[22].mxu0 %vm401_vm0, %v1112_v59  ;;  %2120 = vmatmul.mubr.msk.f32.gmra.mrb[22].mxu1 %vm401_vm0, %v1112_v59  ;;  %v2285_v18 = vpop.eup %2284  ;;  %v1080_v31 = vmul.f32 %v2888_v28, %v1040_v25 }
 0x1ad   : > { %2072 = vmatprep.mubr.msk.f32.mxu0 %vm401_vm0, %v1113_v46  ;;  %2122 = vmatprep.mubr.msk.f32.mxu1 %vm401_vm0, %v1113_v46  ;;  %v1042_v3 = vmul.f32 %v2285_v18, %v3590_v29  ;;  %v1118_v57 = vadd.f32 %v2915_v56, %v1079_v52 }
 0x1ae   : > { %v1119_v53 = vadd.f32 %v2915_v56, %v1080_v31 }
 0x1af   : > { %v1081_v22 = vmul.f32 %v2888_v28, %v1042_v3  ;;  %v3348_v28 = vld [vmem:[%s3573_s5] ss:$0 sm:$0xff] }
 0x1b0   : > { %2073 = vmatmul.mubr.msk.f32.gmra.mrb[24].mxu0 %vm401_vm0, %v1114_v7  ;;  %2123 = vmatmul.mubr.msk.f32.gmra.mrb[24].mxu1 %vm401_vm0, %v1114_v7 }
 0x1b1   : > { %2075 = vmatprep.mubr.msk.f32.mxu0 %vm401_vm0, %v1115_v4  ;;  %2125 = vmatprep.mubr.msk.f32.mxu1 %vm401_vm0, %v1115_v4  ;;  %v1120_v36 = vadd.f32 %v2915_v56, %v1081_v22 }
 0x1b4   : > { %2076 = vmatmul.mubr.msk.f32.gmra.mrb[26].mxu0 %vm401_vm0, %v1116_v15  ;;  %2126 = vmatmul.mubr.msk.f32.gmra.mrb[26].mxu1 %vm401_vm0, %v1116_v15 }
 0x1b5   : > { %2078 = vmatprep.mubr.msk.f32.mxu0 %vm401_vm0, %v1117_v51  ;;  %2128 = vmatprep.mubr.msk.f32.mxu1 %vm401_vm0, %v1117_v51 }
 0x1b8   : > { %2079 = vmatmul.mubr.msk.f32.gmra.mrb[28].mxu0 %vm401_vm0, %v1118_v57  ;;  %2129 = vmatmul.mubr.msk.f32.gmra.mrb[28].mxu1 %vm401_vm0, %v1118_v57 }
 0x1b9   : > { %2081 = vmatprep.mubr.msk.f32.mxu0 %vm401_vm0, %v1119_v53  ;;  %2131 = vmatprep.mubr.msk.f32.mxu1 %vm401_vm0, %v1119_v53 }
 0x1bc   : > { %2082 = vmatmul.mubr.msk.f32.gmra.mrb[30].mxu0 %vm401_vm0, %v1120_v36  ;;  %2132 = vmatmul.mubr.msk.f32.gmra.mrb[30].mxu1 %vm401_vm0, %v1120_v36 }
 0x241   : > { %v2038_v56 = vpop.f32.mrb[0].mxu0  ;;  %v2088_v33 = vpop.f32.mrb[0].mxu1 }
 0x242   : > { %v1297_v47 = vadd.f32 %v2038_v56, %v3348_v28  ;;  %v1562_v5 = vadd.f32 %v2088_v33, %v3353_v17  ;;  %v1291_v61 = vpop.f32.mrb[1].mxu0  ;;  %v1556_v60 = vpop.f32.mrb[1].mxu1 }
 0x243   : > { %v1292_v42 = vadd.f32 %v3348_v28, %v1291_v61  ;;  %v1557_v10 = vadd.f32 %v3353_v17, %v1556_v60 }
 0x244   : > { %1451 = vst.msk [vmem:[%s3359_s27 + $0x8] sm:$0xff] %vm401_vm0, %v1297_v47  ;;  %1716 = vst.msk [vmem:[%s3365_s12 + $0x8] sm:$0xff] %vm401_vm0, %v1562_v5 }
 0x245   : > { %1450 = vst.msk [vmem:[%s3359_s27] sm:$0xff] %vm401_vm0, %v1292_v42  ;;  %1715 = vst.msk [vmem:[%s3365_s12] sm:$0xff] %vm401_vm0, %v1557_v10 }
 0x248   : > { %v2041_v20 = vpop.f32.mrb[2].mxu0  ;;  %v2091_v32 = vpop.f32.mrb[2].mxu1 }
 0x249   : > { %v1307_v38 = vadd.f32 %v2041_v20, %v3348_v28  ;;  %v1572_v2 = vadd.f32 %v2091_v32, %v3353_v17  ;;  %v1301_v39 = vpop.f32.mrb[3].mxu0  ;;  %v1566_v6 = vpop.f32.mrb[3].mxu1 }
 0x24a   : > { %v1302_v30 = vadd.f32 %v3348_v28, %v1301_v39  ;;  %v1567_v24 = vadd.f32 %v3353_v17, %v1566_v6 }
 0x24b   : > { %1453 = vst.msk [vmem:[%s3359_s27 + $0x18] sm:$0xff] %vm401_vm0, %v1307_v38  ;;  %1718 = vst.msk [vmem:[%s3365_s12 + $0x18] sm:$0xff] %vm401_vm0, %v1572_v2 }
 0x24c   : > { %1452 = vst.msk [vmem:[%s3359_s27 + $0x10] sm:$0xff] %vm401_vm0, %v1302_v30  ;;  %1717 = vst.msk [vmem:[%s3365_s12 + $0x10] sm:$0xff] %vm401_vm0, %v1567_v24 }
 0x251   : > { %v2044_v37 = vpop.f32.mrb[4].mxu0  ;;  %v2094_v43 = vpop.f32.mrb[4].mxu1 }
 0x252   : > { %v1317_v8 = vadd.f32 %v2044_v37, %v3348_v28  ;;  %v1582_v58 = vadd.f32 %v2094_v43, %v3353_v17  ;;  %v1311_v63 = vpop.f32.mrb[5].mxu0  ;;  %v1576_v0 = vpop.f32.mrb[5].mxu1 }
 0x253   : > { %v1312_v50 = vadd.f32 %v3348_v28, %v1311_v63  ;;  %v1577_v23 = vadd.f32 %v3353_v17, %v1576_v0 }
 0x254   : > { %1455 = vst.msk [vmem:[%s3359_s27 + $0x28] sm:$0xff] %vm401_vm0, %v1317_v8  ;;  %1720 = vst.msk [vmem:[%s3365_s12 + $0x28] sm:$0xff] %vm401_vm0, %v1582_v58 }
 0x255   : > { %1454 = vst.msk [vmem:[%s3359_s27 + $0x20] sm:$0xff] %vm401_vm0, %v1312_v50  ;;  %1719 = vst.msk [vmem:[%s3365_s12 + $0x20] sm:$0xff] %vm401_vm0, %v1577_v23 }
 0x258   : > { %v2047_v16 = vpop.f32.mrb[6].mxu0  ;;  %v2097_v26 = vpop.f32.mrb[6].mxu1 }
 0x259   : > { %v1327_v14 = vadd.f32 %v2047_v16, %v3348_v28  ;;  %v1592_v55 = vadd.f32 %v2097_v26, %v3353_v17  ;;  %v1321_v41 = vpop.f32.mrb[7].mxu0  ;;  %v1586_v44 = vpop.f32.mrb[7].mxu1 }
 0x25a   : > { %v1322_v13 = vadd.f32 %v3348_v28, %v1321_v41  ;;  %v1587_v19 = vadd.f32 %v3353_v17, %v1586_v44 }
 0x25b   : > { %1457 = vst.msk [vmem:[%s3359_s27 + $0x38] sm:$0xff] %vm401_vm0, %v1327_v14  ;;  %1722 = vst.msk [vmem:[%s3365_s12 + $0x38] sm:$0xff] %vm401_vm0, %v1592_v55 }
 0x25c   : > { %1456 = vst.msk [vmem:[%s3359_s27 + $0x30] sm:$0xff] %vm401_vm0, %v1322_v13  ;;  %1721 = vst.msk [vmem:[%s3365_s12 + $0x30] sm:$0xff] %vm401_vm0, %v1587_v19 }
 0x25f   : > { %v2050_v1 = vpop.f32.mrb[8].mxu0  ;;  %v2100_v21 = vpop.f32.mrb[8].mxu1 }
 0x260   : > { %v1337_v59 = vadd.f32 %v2050_v1, %v3348_v28  ;;  %v1602_v45 = vadd.f32 %v2100_v21, %v3353_v17  ;;  %v1331_v54 = vpop.f32.mrb[9].mxu0  ;;  %v1596_v48 = vpop.f32.mrb[9].mxu1 }
 0x261   : > { %v1332_v46 = vadd.f32 %v3348_v28, %v1331_v54  ;;  %v1597_v35 = vadd.f32 %v3353_v17, %v1596_v48 }
 0x262   : > { %1459 = vst.msk [vmem:[%s3359_s27 + $0x48] sm:$0xff] %vm401_vm0, %v1337_v59  ;;  %1724 = vst.msk [vmem:[%s3365_s12 + $0x48] sm:$0xff] %vm401_vm0, %v1602_v45 }
 0x263   : > { %1458 = vst.msk [vmem:[%s3359_s27 + $0x40] sm:$0xff] %vm401_vm0, %v1332_v46  ;;  %1723 = vst.msk [vmem:[%s3365_s12 + $0x40] sm:$0xff] %vm401_vm0, %v1597_v35 }
 0x264   : > { %v2053_v9 = vpop.f32.mrb[10].mxu0  ;;  %v2103_v62 = vpop.f32.mrb[10].mxu1 }
 0x265   : > { %v1347_v34 = vadd.f32 %v2053_v9, %v3348_v28  ;;  %v1612_v7 = vadd.f32 %v2103_v62, %v3353_v17  ;;  %v1341_v49 = vpop.f32.mrb[11].mxu0  ;;  %v1606_v40 = vpop.f32.mrb[11].mxu1 }
 0x266   : > { %v1342_v12 = vadd.f32 %v3348_v28, %v1341_v49  ;;  %v1607_v18 = vadd.f32 %v3353_v17, %v1606_v40 }
 0x267   : > { %1461 = vst.msk [vmem:[%s3359_s27 + $0x58] sm:$0xff] %vm401_vm0, %v1347_v34  ;;  %1726 = vst.msk [vmem:[%s3365_s12 + $0x58] sm:$0xff] %vm401_vm0, %v1612_v7 }
 0x268   : > { %1460 = vst.msk [vmem:[%s3359_s27 + $0x50] sm:$0xff] %vm401_vm0, %v1342_v12  ;;  %1725 = vst.msk [vmem:[%s3365_s12 + $0x50] sm:$0xff] %vm401_vm0, %v1607_v18 }
 0x26b   : > { %v2056_v4 = vpop.f32.mrb[12].mxu0  ;;  %v2106_v27 = vpop.f32.mrb[12].mxu1 }
 0x26c   : > { %v1357_v11 = vadd.f32 %v2056_v4, %v3348_v28  ;;  %v1622_v25 = vadd.f32 %v2106_v27, %v3353_v17  ;;  %v1351_v15 = vpop.f32.mrb[13].mxu0  ;;  %v1616_v52 = vpop.f32.mrb[13].mxu1 }
 0x26d   : > { %v1352_v29 = vadd.f32 %v3348_v28, %v1351_v15  ;;  %v1617_v3 = vadd.f32 %v3353_v17, %v1616_v52 }
 0x26e   : > { %1463 = vst.msk [vmem:[%s3359_s27 + $0x68] sm:$0xff] %vm401_vm0, %v1357_v11  ;;  %1728 = vst.msk [vmem:[%s3365_s12 + $0x68] sm:$0xff] %vm401_vm0, %v1622_v25 }
 0x26f   : > { %1462 = vst.msk [vmem:[%s3359_s27 + $0x60] sm:$0xff] %vm401_vm0, %v1352_v29  ;;  %1727 = vst.msk [vmem:[%s3365_s12 + $0x60] sm:$0xff] %vm401_vm0, %v1617_v3  ;;  %v2059_v51 = vpop.f32.mrb[14].mxu0  ;;  %v2109_v31 = vpop.f32.mrb[14].mxu1 }
 0x270   : > { %v1367_v57 = vadd.f32 %v2059_v51, %v3348_v28  ;;  %v1632_v22 = vadd.f32 %v2109_v31, %v3353_v17  ;;  %v1361_v53 = vpop.f32.mrb[15].mxu0  ;;  %v1626_v36 = vpop.f32.mrb[15].mxu1 }
 0x271   : > { %v1362_v56 = vadd.f32 %v3348_v28, %v1361_v53  ;;  %v1627_v33 = vadd.f32 %v3353_v17, %v1626_v36 }
 0x272   : > { %1465 = vst.msk [vmem:[%s3359_s27 + $0x78] sm:$0xff] %vm401_vm0, %v1367_v57  ;;  %1730 = vst.msk [vmem:[%s3365_s12 + $0x78] sm:$0xff] %vm401_vm0, %v1632_v22 }
 0x273   : > { %1464 = vst.msk [vmem:[%s3359_s27 + $0x70] sm:$0xff] %vm401_vm0, %v1362_v56  ;;  %1729 = vst.msk [vmem:[%s3365_s12 + $0x70] sm:$0xff] %vm401_vm0, %v1627_v33  ;;  %v2062_v47 = vpop.f32.mrb[16].mxu0  ;;  %v2112_v5 = vpop.f32.mrb[16].mxu1 }
 0x274   : > { %v1377_v61 = vadd.f32 %v2062_v47, %v3348_v28  ;;  %v1642_v60 = vadd.f32 %v2112_v5, %v3353_v17  ;;  %v1371_v42 = vpop.f32.mrb[17].mxu0  ;;  %v1636_v10 = vpop.f32.mrb[17].mxu1 }
 0x275   : > { %v1372_v20 = vadd.f32 %v3348_v28, %v1371_v42  ;;  %v1637_v32 = vadd.f32 %v3353_v17, %v1636_v10 }
 0x276   : > { %1467 = vst.msk [vmem:[%s3359_s27 + $0x88] sm:$0xff] %vm401_vm0, %v1377_v61  ;;  %1732 = vst.msk [vmem:[%s3365_s12 + $0x88] sm:$0xff] %vm401_vm0, %v1642_v60 }
 0x277   : > { %1466 = vst.msk [vmem:[%s3359_s27 + $0x80] sm:$0xff] %vm401_vm0, %v1372_v20  ;;  %1731 = vst.msk [vmem:[%s3365_s12 + $0x80] sm:$0xff] %vm401_vm0, %v1637_v32  ;;  %v2065_v38 = vpop.f32.mrb[18].mxu0  ;;  %v2115_v2 = vpop.f32.mrb[18].mxu1 }
 0x278   : > { %v1387_v39 = vadd.f32 %v2065_v38, %v3348_v28  ;;  %v1652_v6 = vadd.f32 %v2115_v2, %v3353_v17  ;;  %v1381_v30 = vpop.f32.mrb[19].mxu0  ;;  %v1646_v24 = vpop.f32.mrb[19].mxu1 }
 0x279   : > { %v1382_v37 = vadd.f32 %v3348_v28, %v1381_v30  ;;  %v1647_v43 = vadd.f32 %v3353_v17, %v1646_v24 }
 0x27a   : > { %1469 = vst.msk [vmem:[%s3359_s27 + $0x98] sm:$0xff] %vm401_vm0, %v1387_v39  ;;  %1734 = vst.msk [vmem:[%s3365_s12 + $0x98] sm:$0xff] %vm401_vm0, %v1652_v6 }
 0x27b   : > { %1468 = vst.msk [vmem:[%s3359_s27 + $0x90] sm:$0xff] %vm401_vm0, %v1382_v37  ;;  %1733 = vst.msk [vmem:[%s3365_s12 + $0x90] sm:$0xff] %vm401_vm0, %v1647_v43  ;;  %v2068_v8 = vpop.f32.mrb[20].mxu0  ;;  %v2118_v58 = vpop.f32.mrb[20].mxu1 }
 0x27c   : > { %v1397_v63 = vadd.f32 %v2068_v8, %v3348_v28  ;;  %v1662_v0 = vadd.f32 %v2118_v58, %v3353_v17  ;;  %v1391_v50 = vpop.f32.mrb[21].mxu0  ;;  %v1656_v23 = vpop.f32.mrb[21].mxu1 }
 0x27d   : > { %v1392_v16 = vadd.f32 %v3348_v28, %v1391_v50  ;;  %v1657_v26 = vadd.f32 %v3353_v17, %v1656_v23 }
 0x27e   : > { %1471 = vst.msk [vmem:[%s3359_s27 + $0xa8] sm:$0xff] %vm401_vm0, %v1397_v63  ;;  %1736 = vst.msk [vmem:[%s3365_s12 + $0xa8] sm:$0xff] %vm401_vm0, %v1662_v0 }
 0x27f   : > { %1470 = vst.msk [vmem:[%s3359_s27 + $0xa0] sm:$0xff] %vm401_vm0, %v1392_v16  ;;  %1735 = vst.msk [vmem:[%s3365_s12 + $0xa0] sm:$0xff] %vm401_vm0, %v1657_v26  ;;  %v2071_v14 = vpop.f32.mrb[22].mxu0  ;;  %v2121_v55 = vpop.f32.mrb[22].mxu1 }
 0x280   : > { %v1407_v41 = vadd.f32 %v2071_v14, %v3348_v28  ;;  %v1672_v44 = vadd.f32 %v2121_v55, %v3353_v17  ;;  %v1401_v13 = vpop.f32.mrb[23].mxu0  ;;  %v1666_v19 = vpop.f32.mrb[23].mxu1 }
 0x281   : > { %v1402_v1 = vadd.f32 %v3348_v28, %v1401_v13  ;;  %v1667_v21 = vadd.f32 %v3353_v17, %v1666_v19 }
 0x282   : > { %1473 = vst.msk [vmem:[%s3359_s27 + $0xb8] sm:$0xff] %vm401_vm0, %v1407_v41  ;;  %1738 = vst.msk [vmem:[%s3365_s12 + $0xb8] sm:$0xff] %vm401_vm0, %v1672_v44 }
 0x283   : > { %1472 = vst.msk [vmem:[%s3359_s27 + $0xb0] sm:$0xff] %vm401_vm0, %v1402_v1  ;;  %1737 = vst.msk [vmem:[%s3365_s12 + $0xb0] sm:$0xff] %vm401_vm0, %v1667_v21  ;;  %v2074_v59 = vpop.f32.mrb[24].mxu0  ;;  %v2124_v45 = vpop.f32.mrb[24].mxu1 }
 0x284   : > { %v1417_v54 = vadd.f32 %v2074_v59, %v3348_v28  ;;  %v1682_v48 = vadd.f32 %v2124_v45, %v3353_v17  ;;  %v1411_v46 = vpop.f32.mrb[25].mxu0  ;;  %v1676_v35 = vpop.f32.mrb[25].mxu1 }
 0x285   : > { %v1412_v9 = vadd.f32 %v3348_v28, %v1411_v46  ;;  %v1677_v62 = vadd.f32 %v3353_v17, %v1676_v35 }
 0x286   : > { %1475 = vst.msk [vmem:[%s3359_s27 + $0xc8] sm:$0xff] %vm401_vm0, %v1417_v54  ;;  %1740 = vst.msk [vmem:[%s3365_s12 + $0xc8] sm:$0xff] %vm401_vm0, %v1682_v48 }
 0x287   : > { %1474 = vst.msk [vmem:[%s3359_s27 + $0xc0] sm:$0xff] %vm401_vm0, %v1412_v9  ;;  %1739 = vst.msk [vmem:[%s3365_s12 + $0xc0] sm:$0xff] %vm401_vm0, %v1677_v62  ;;  %v2077_v34 = vpop.f32.mrb[26].mxu0  ;;  %v2127_v7 = vpop.f32.mrb[26].mxu1 }
 0x288   : > { %v1427_v49 = vadd.f32 %v2077_v34, %v3348_v28  ;;  %v1692_v40 = vadd.f32 %v2127_v7, %v3353_v17  ;;  %v1421_v12 = vpop.f32.mrb[27].mxu0  ;;  %v1686_v18 = vpop.f32.mrb[27].mxu1 }
 0x289   : > { %v1422_v4 = vadd.f32 %v3348_v28, %v1421_v12  ;;  %v1687_v27 = vadd.f32 %v3353_v17, %v1686_v18 }
 0x28a   : > { %1477 = vst.msk [vmem:[%s3359_s27 + $0xd8] sm:$0xff] %vm401_vm0, %v1427_v49  ;;  %1742 = vst.msk [vmem:[%s3365_s12 + $0xd8] sm:$0xff] %vm401_vm0, %v1692_v40 }
 0x28b   : > { %1476 = vst.msk [vmem:[%s3359_s27 + $0xd0] sm:$0xff] %vm401_vm0, %v1422_v4  ;;  %1741 = vst.msk [vmem:[%s3365_s12 + $0xd0] sm:$0xff] %vm401_vm0, %v1687_v27  ;;  %v2080_v11 = vpop.f32.mrb[28].mxu0  ;;  %v2130_v25 = vpop.f32.mrb[28].mxu1 }
 0x28c   : > { %v1437_v15 = vadd.f32 %v2080_v11, %v3348_v28  ;;  %v1702_v52 = vadd.f32 %v2130_v25, %v3353_v17  ;;  %v1431_v29 = vpop.f32.mrb[29].mxu0  ;;  %v1696_v3 = vpop.f32.mrb[29].mxu1 }
 0x28d   : > { %v1432_v51 = vadd.f32 %v3348_v28, %v1431_v29  ;;  %v1697_v31 = vadd.f32 %v3353_v17, %v1696_v3 }
 0x28e   : > { %1479 = vst.msk [vmem:[%s3359_s27 + $0xe8] sm:$0xff] %vm401_vm0, %v1437_v15  ;;  %1744 = vst.msk [vmem:[%s3365_s12 + $0xe8] sm:$0xff] %vm401_vm0, %v1702_v52 }
 0x28f   : > { %1478 = vst.msk [vmem:[%s3359_s27 + $0xe0] sm:$0xff] %vm401_vm0, %v1432_v51  ;;  %1743 = vst.msk [vmem:[%s3365_s12 + $0xe0] sm:$0xff] %vm401_vm0, %v1697_v31  ;;  %v2083_v57 = vpop.f32.mrb[30].mxu0  ;;  %v2133_v22 = vpop.f32.mrb[30].mxu1 }
 0x290   : > { %v1447_v53 = vadd.f32 %v2083_v57, %v3348_v28  ;;  %v1712_v36 = vadd.f32 %v2133_v22, %v3353_v17  ;;  %v1441_v56 = vpop.f32.mrb[31].mxu0  ;;  %v1706_v33 = vpop.f32.mrb[31].mxu1 }
 0x291   : > { %v1442_v47 = vadd.f32 %v3348_v28, %v1441_v56  ;;  %v1707_v5 = vadd.f32 %v3353_v17, %v1706_v33 }
 0x292   : > { %1481 = vst.msk [vmem:[%s3359_s27 + $0xf8] sm:$0xff] %vm401_vm0, %v1447_v53  ;;  %1746 = vst.msk [vmem:[%s3365_s12 + $0xf8] sm:$0xff] %vm401_vm0, %v1712_v36 }
 0x293   : > { %1480 = vst.msk [vmem:[%s3359_s27 + $0xf0] sm:$0xff] %vm401_vm0, %v1442_v47  ;;  %1745 = vst.msk [vmem:[%s3365_s12 + $0xf0] sm:$0xff] %vm401_vm0, %v1707_v5 }
 0x294 PF: > { %s19_s29 = sadd.s32 1, %s2308_s29   ;;  %s3591_s27 = smov %s2304_s28 }
 0x295   : > { %p16_p5 = scmp.ge.s32.totalorder %s19_s29, 4   ;;  %s3592_s28 = smov %s3594_s30 }
 0x297   :  { %18 = sbr.rel (!%p16_p5) target bundleno = 2 (0x2), region = 90 }

// kernel: nafblock_forward.5
= control target key start
LH: loop header
LB: loop body
LE: loop exit
PB: predicated region body
PF: predicated region fallthrough
CT: control target
= control target key end

     0   :  { %s2989_s21 = smov 0   ;;  %s2991_s22 = smov 0   ;;  %s4362_s0 = inlined_call_operand.vmem [shape: f32[2,256,8], index: 0, kind: input, shape index: {}]   ;;  %s4363_s1 = inlined_call_operand.vmem [shape: f32[2,1,8], index: 1, kind: input, shape index: {}]   ;;  %s4364_s2 = inlined_call_operand.vmem [shape: f32[1,8], index: 2, kind: input, shape index: {}]   ;;  %s4365_s3 = inlined_call_operand.vmem [shape: f32[1,8], index: 3, kind: input, shape index: {}]   ;;  %s4366_s4 = inlined_call_operand.vmem [shape: f32[1,8], index: 4, kind: input, shape index: {}]   ;;  %s4367_s5 = inlined_call_operand.vmem [shape: f32[8,8], index: 5, kind: input, shape index: {}]   ;;  %s4368_s6 = inlined_call_operand.vmem [shape: f32[8,8], index: 6, kind: input, shape index: {}]   ;;  %s4369_s7 = inlined_call_operand.vmem [shape: f32[1,8], index: 7, kind: input, shape index: {}]   ;;  %s4370_s8 = inlined_call_operand.vmem [shape: f32[1,8], index: 8, kind: input, shape index: {}]   ;;  %s4371_s9 = inlined_call_operand.vmem [shape: f32[8,8], index: 9, kind: input, shape index: {}]   ;;  %s4372_s10 = inlined_call_operand.vmem [shape: f32[1,8], index: 10, kind: input, shape index: {}]   ;;  %s4373_s11 = inlined_call_operand.vmem [shape: f32[1,8], index: 11, kind: input, shape index: {}]   ;;  %s4374_s12 = inlined_call_operand.vmem [shape: f32[2,256,8], index: 12, kind: output, shape index: {}]  }
   0x1   :  { %s2993_s23 = smov 0  }
   0x2 LB: > { %s34_s24 = sadd.s32 1, %s2918_s22  ;;  %p2386_p0 = scmp.ge.s32.totalorder %s2922_s23, 1  ;;  %s2922_s23 = sphi %s2993_s23, %s22_s23   ;;  %s2918_s22 = sphi %s2991_s22, %s4493_s22   ;;  %s2914_s21 = sphi %s2989_s21, %s4492_s21  }
   0x3   : > { %p36_p1 = scmp.ge.s32.totalorder %s34_s24, 2  ;;  %p391_p2 = scmp.lt.s32.totalorder %s2922_s23, 3 }
   0x5   : > { %s4495_s24 = smov (%p36_p1, %s34_s24), 0  ;;  %p392_p3 = pnand %p2386_p0, %p391_p2 }
   0x7   : > { %395 = sbr.rel (%p392_p3) target bundleno = 921 (0x399), region = 68 }
   0xe   : > { %p445_p4 = scmp.lt.s32.totalorder %s2914_s21, 1  ;;  %v503_v0 = vlaneseq  ;;  %v500_v2 = vld [vmem:[%s4364_s2] sm:$0x1]  ;;  %vm540_vm0 = vcmask 64512  }
  0x10   : > { %s4497_s21 = smov (!%p445_p4, %s2914_s21), 1  ;;  %v504_v1 = vshrl.u32 %v503_v0, 7 }
  0x11   : > { %s2495_s27 = sshll.u32 %s4497_s21, 8  ;;  %s456_s30 = scalar_lea.vmem %s4363_s1, %s4497_s21 }
  0x12   : > { %v505_v3 = vsub.s32 0, %v504_v1  ;;  %s3022_s15 = scalar_lea.vmem %s4362_s0, %s2495_s27  ;;  %v499_v4 = vld [vmem:[%s456_s30] sm:$0x1]  ;;  %s4194_s28 = scalar_lea.vmem %s4374_s12, %s2495_s27 }
  0x13   : > { %v483_v5 = vld [vmem:[%s3022_s15 + $0x80] sm:$0xff]  ;;  %v501_v6 = vmul.f32 %v500_v2, %v499_v4  ;;  %v485_v7 = vld [vmem:[%s3022_s15 + $0x90] sm:$0xff]  ;;  %v484_v8 = vld [vmem:[%s3022_s15 + $0x88] sm:$0xff] }
  0x14   : > { %v486_v9 = vld [vmem:[%s3022_s15 + $0x98] sm:$0xff]  ;;  %v487_v15 = vld [vmem:[%s3022_s15 + $0xa0] sm:$0xff]  ;;  %v488_v16 = vld [vmem:[%s3022_s15 + $0xa8] sm:$0xff] }
  0x15   : > { %v3028_v10 = vrot.slane %v501_v6, %v505_v3  ;;  %v489_v23 = vld [vmem:[%s3022_s15 + $0xb0] sm:$0xff]  ;;  %v490_v24 = vld [vmem:[%s3022_s15 + $0xb8] sm:$0xff]  ;;  %v491_v29 = vld [vmem:[%s3022_s15 + $0xc0] sm:$0xff] }
  0x16   : > { %v492_v30 = vld [vmem:[%s3022_s15 + $0xc8] sm:$0xff]  ;;  %v493_v35 = vld [vmem:[%s3022_s15 + $0xd0] sm:$0xff]  ;;  %v494_v36 = vld [vmem:[%s3022_s15 + $0xd8] sm:$0xff] }
  0x17   : > { %v3031_v11 = vadd.f32 %v3028_v10, %v483_v5  ;;  %v3034_v12 = vadd.f32 %v3028_v10, %v485_v7  ;;  %v3037_v13 = vadd.f32 %v3028_v10, %v484_v8  ;;  %v3040_v14 = vadd.f32 %v3028_v10, %v486_v9  ;;  %v495_v41 = vld [vmem:[%s3022_s15 + $0xe0] sm:$0xff]  ;;  %v496_v42 = vld [vmem:[%s3022_s15 + $0xe8] sm:$0xff]  ;;  %v497_v47 = vld [vmem:[%s3022_s15 + $0xf0] sm:$0xff] }
  0x18   : > { %v3053_v21 = vadd.f32 %v3028_v10, %v487_v15  ;;  %v3056_v22 = vadd.f32 %v3028_v10, %v488_v16  ;;  %v3065_v27 = vadd.f32 %v3028_v10, %v489_v23  ;;  %v3068_v28 = vadd.f32 %v3028_v10, %v490_v24  ;;  %v498_v48 = vld [vmem:[%s3022_s15 + $0xf8] sm:$0xff]  ;;  %v467_v53 = vld [vmem:[%s3022_s15] sm:$0xff]  ;;  %v468_v54 = vld [vmem:[%s3022_s15 + $0x8] sm:$0xff] }
  0x19   : > { %4414 = vst [vmem:[#allocation2_spill] sm:$0xff] %v3031_v11  ;;  %4415 = vst [vmem:[#allocation3_spill] sm:$0xff] %v3034_v12  ;;  %v589_v17 = vsel %vm540_vm0, %v3031_v11, 0.0  ;;  %v595_v18 = vsel %vm540_vm0, %v3034_v12, 0.0  ;;  %v592_v19 = vsel %vm540_vm0, %v3037_v13, 0.0  ;;  %v598_v20 = vsel %vm540_vm0, %v3040_v14, 0.0 }
  0x1a   : > { %4416 = vst [vmem:[#allocation4_spill] sm:$0xff] %v3037_v13  ;;  %4417 = vst [vmem:[#allocation5_spill] sm:$0xff] %v3040_v14  ;;  %590 = vadd.xlane.f32.xlu0 %v589_v17  ;;  %596 = vadd.xlane.f32.xlu1 %v595_v18  ;;  %v601_v25 = vsel %vm540_vm0, %v3053_v21, 0.0  ;;  %v604_v26 = vsel %vm540_vm0, %v3056_v22, 0.0  ;;  %v607_v31 = vsel %vm540_vm0, %v3065_v27, 0.0  ;;  %v610_v32 = vsel %vm540_vm0, %v3068_v28, 0.0 }
  0x1b   : > { %4418 = vst [vmem:[#allocation6_spill] sm:$0xff] %v3053_v21  ;;  %4419 = vst [vmem:[#allocation7_spill] sm:$0xff] %v3056_v22  ;;  %v3077_v33 = vadd.f32 %v3028_v10, %v491_v29  ;;  %v3080_v34 = vadd.f32 %v3028_v10, %v492_v30  ;;  %v3089_v39 = vadd.f32 %v3028_v10, %v493_v35  ;;  %v469_v59 = vld [vmem:[%s3022_s15 + $0x10] sm:$0xff]  ;;  %v470_v60 = vld [vmem:[%s3022_s15 + $0x18] sm:$0xff] }
  0x1c   : > { %4420 = vst [vmem:[#allocation8_spill] sm:$0xff] %v3065_v27  ;;  %4421 = vst [vmem:[#allocation9_spill] sm:$0xff] %v3068_v28  ;;  %v3092_v40 = vadd.f32 %v3028_v10, %v494_v36  ;;  %v3101_v45 = vadd.f32 %v3028_v10, %v495_v41  ;;  %v3104_v46 = vadd.f32 %v3028_v10, %v496_v42  ;;  %v471_v1 = vld [vmem:[%s3022_s15 + $0x20] sm:$0xff]  ;;  %v472_v2 = vld [vmem:[%s3022_s15 + $0x28] sm:$0xff] }
  0x1d   : > { %4422 = vst [vmem:[#allocation10_spill] sm:$0xff] %v3077_v33  ;;  %4423 = vst [vmem:[#allocation11_spill] sm:$0xff] %v3080_v34  ;;  %v613_v37 = vsel %vm540_vm0, %v3077_v33, 0.0  ;;  %v616_v38 = vsel %vm540_vm0, %v3080_v34, 0.0  ;;  %v619_v43 = vsel %vm540_vm0, %v3089_v39, 0.0  ;;  %v3113_v51 = vadd.f32 %v3028_v10, %v497_v47  ;;  %v473_v7 = vld [vmem:[%s3022_s15 + $0x30] sm:$0xff] }
  0x1e   : > { %593 = vadd.xlane.f32.xlu0 %v592_v19  ;;  %599 = vadd.xlane.f32.xlu1 %v598_v20  ;;  %4424 = vst [vmem:[#allocation12_spill] sm:$0xff] %v3089_v39  ;;  %4425 = vst [vmem:[#allocation13_spill] sm:$0xff] %v3092_v40  ;;  %v622_v44 = vsel %vm540_vm0, %v3092_v40, 0.0  ;;  %v625_v49 = vsel %vm540_vm0, %v3101_v45, 0.0  ;;  %v628_v50 = vsel %vm540_vm0, %v3104_v46, 0.0  ;;  %v3116_v52 = vadd.f32 %v3028_v10, %v498_v48  ;;  %v474_v8 = vld [vmem:[%s3022_s15 + $0x38] sm:$0xff] }
  0x1f   : > { %4426 = vst [vmem:[#allocation14_spill] sm:$0xff] %v3101_v45  ;;  %4427 = vst [vmem:[#allocation15_spill] sm:$0xff] %v3104_v46  ;;  %v631_v55 = vsel %vm540_vm0, %v3113_v51, 0.0  ;;  %v3125_v57 = vadd.f32 %v3028_v10, %v467_v53  ;;  %v3128_v58 = vadd.f32 %v3028_v10, %v468_v54  ;;  %v3137_v63 = vadd.f32 %v3028_v10, %v469_v59  ;;  %v475_v18 = vld [vmem:[%s3022_s15 + $0x40] sm:$0xff]  ;;  %v476_v19 = vld [vmem:[%s3022_s15 + $0x48] sm:$0xff] }
  0x20   : > { %4428 = vst [vmem:[#allocation16_spill] sm:$0xff] %v3113_v51  ;;  %4429 = vst [vmem:[#allocation17_spill] sm:$0xff] %v3116_v52  ;;  %v634_v56 = vsel %vm540_vm0, %v3116_v52, 0.0  ;;  %v3140_v0 = vadd.f32 %v3028_v10, %v470_v60  ;;  %v3149_v5 = vadd.f32 %v3028_v10, %v471_v1  ;;  %v3152_v6 = vadd.f32 %v3028_v10, %v472_v2  ;;  %v478_v29 = vld [vmem:[%s3022_s15 + $0x58] sm:$0xff]  ;;  %v479_v36 = vld [vmem:[%s3022_s15 + $0x60] sm:$0xff] }
  0x21   : > { %4430 = vst [vmem:[#allocation18_spill] sm:$0xff] %v3125_v57  ;;  %4431 = vst [vmem:[#allocation19_spill] sm:$0xff] %v3128_v58  ;;  %v541_v61 = vsel %vm540_vm0, %v3125_v57, 0.0  ;;  %v544_v62 = vsel %vm540_vm0, %v3128_v58, 0.0  ;;  %v547_v3 = vsel %vm540_vm0, %v3137_v63, 0.0  ;;  %v3161_v16 = vadd.f32 %v3028_v10, %v473_v7  ;;  %v482_v47 = vld [vmem:[%s3022_s15 + $0x78] sm:$0xff] }
  0x22   : > { %602 = vadd.xlane.f32.xlu0 %v601_v25  ;;  %605 = vadd.xlane.f32.xlu1 %v604_v26  ;;  %4432 = vst [vmem:[#allocation20_spill] sm:$0xff] %v3137_v63  ;;  %4433 = vst [vmem:[#allocation21_spill] sm:$0xff] %v3140_v0  ;;  %v550_v4 = vsel %vm540_vm0, %v3140_v0, 0.0  ;;  %v553_v9 = vsel %vm540_vm0, %v3149_v5, 0.0  ;;  %v556_v15 = vsel %vm540_vm0, %v3152_v6, 0.0  ;;  %v3164_v17 = vadd.f32 %v3028_v10, %v474_v8  ;;  %v477_v26 = vld [vmem:[%s3022_s15 + $0x50] sm:$0xff] }
  0x23   : > { %4434 = vst [vmem:[#allocation22_spill] sm:$0xff] %v3149_v5  ;;  %4435 = vst [vmem:[#allocation23_spill] sm:$0xff] %v3152_v6  ;;  %v559_v20 = vsel %vm540_vm0, %v3161_v16, 0.0  ;;  %v3173_v24 = vadd.f32 %v3028_v10, %v475_v18  ;;  %v3176_v25 = vadd.f32 %v3028_v10, %v476_v19  ;;  %v3188_v35 = vadd.f32 %v3028_v10, %v478_v29 }
  0x24   : > { %4436 = vst [vmem:[#allocation24_spill] sm:$0xff] %v3161_v16  ;;  %4437 = vst [vmem:[#allocation25_spill] sm:$0xff] %v3164_v17  ;;  %v562_v23 = vsel %vm540_vm0, %v3164_v17, 0.0  ;;  %v3197_v42 = vadd.f32 %v3028_v10, %v479_v36  ;;  %v3212_v53 = vadd.f32 %v3028_v10, %v482_v47 }
  0x25   : > { %4438 = vst [vmem:[#allocation26_spill] sm:$0xff] %v3173_v24  ;;  %4439 = vst [vmem:[#allocation27_spill] sm:$0xff] %v3176_v25  ;;  %v565_v30 = vsel %vm540_vm0, %v3173_v24, 0.0  ;;  %v574_v41 = vsel %vm540_vm0, %v3188_v35, 0.0 }
  0x26   : > { %608 = vadd.xlane.f32.xlu0 %v607_v31  ;;  %611 = vadd.xlane.f32.xlu1 %v610_v32  ;;  %v568_v31 = vsel %vm540_vm0, %v3176_v25, 0.0  ;;  %v3185_v32 = vadd.f32 %v3028_v10, %v477_v26  ;;  %4441 = vst [vmem:[#allocation29_spill] sm:$0xff] %v3188_v35  ;;  %4442 = vst [vmem:[#allocation30_spill] sm:$0xff] %v3197_v42  ;;  %v577_v48 = vsel %vm540_vm0, %v3197_v42, 0.0 }
  0x27   : > { %4445 = vst [vmem:[#allocation33_spill] sm:$0xff] %v3212_v53 }
  0x28   : > { %4440 = vst [vmem:[#allocation28_spill] sm:$0xff] %v3185_v32 }
  0x2a   : > { %614 = vadd.xlane.f32.xlu0 %v613_v37  ;;  %617 = vadd.xlane.f32.xlu1 %v616_v38  ;;  %v480_v37 = vld [vmem:[%s3022_s15 + $0x68] sm:$0xff]  ;;  %v571_v38 = vsel %vm540_vm0, %v3185_v32, 0.0 }
  0x2e   : > { %620 = vadd.xlane.f32.xlu0 %v619_v43  ;;  %623 = vadd.xlane.f32.xlu1 %v622_v44  ;;  %v3200_v43 = vadd.f32 %v3028_v10, %v480_v37  ;;  %v481_v44 = vld [vmem:[%s3022_s15 + $0x70] sm:$0xff] }
  0x30   : > { %4443 = vst [vmem:[#allocation31_spill] sm:$0xff] %v3200_v43 }
  0x32   : > { %626 = vadd.xlane.f32.xlu0 %v625_v49  ;;  %629 = vadd.xlane.f32.xlu1 %v628_v50  ;;  %v580_v49 = vsel %vm540_vm0, %v3200_v43, 0.0  ;;  %v3209_v50 = vadd.f32 %v3028_v10, %v481_v44 }
  0x34   : > { %4444 = vst [vmem:[#allocation32_spill] sm:$0xff] %v3209_v50  ;;  %v583_v54 = vsel %vm540_vm0, %v3209_v50, 0.0 }
  0x36   : > { %632 = vadd.xlane.f32.xlu0 %v631_v55  ;;  %635 = vadd.xlane.f32.xlu1 %v634_v56  ;;  %v586_v55 = vsel %vm540_vm0, %v3212_v53, 0.0 }
  0x3a   : > { %542 = vadd.xlane.f32.xlu0 %v541_v61  ;;  %545 = vadd.xlane.f32.xlu1 %v544_v62 }
  0x3e   : > { %548 = vadd.xlane.f32.xlu0 %v547_v3  ;;  %551 = vadd.xlane.f32.xlu1 %v550_v4 }
  0x42   : > { %554 = vadd.xlane.f32.xlu0 %v553_v9  ;;  %557 = vadd.xlane.f32.xlu1 %v556_v15 }
  0x46   : > { %560 = vadd.xlane.f32.xlu0 %v559_v20  ;;  %563 = vadd.xlane.f32.xlu1 %v562_v23 }
  0x4a   : > { %566 = vadd.xlane.f32.xlu0 %v565_v30  ;;  %569 = vadd.xlane.f32.xlu1 %v568_v31 }
  0x4e   : > { %572 = vadd.xlane.f32.xlu0 %v571_v38  ;;  %575 = vadd.xlane.f32.xlu1 %v574_v41 }
  0x52   : > { %578 = vadd.xlane.f32.xlu0 %v577_v48  ;;  %581 = vadd.xlane.f32.xlu1 %v580_v49 }
  0x56   : > { %584 = vadd.xlane.f32.xlu0 %v583_v54  ;;  %587 = vadd.xlane.f32.xlu1 %v586_v55 }
  0xa7   : > { %v591_v56 = vpop.xlane.xlu0 %590  ;;  %v597_v59 = vpop.xlane.xlu1 %596 }
  0xa8   : > { %v654_v60 = vmul.f32 0.125, %v591_v56  ;;  %v656_v61 = vmul.f32 0.125, %v597_v59 }
  0xaa   : > { %v3219_v62 = vsub.f32 %v3031_v11, %v654_v60  ;;  %v3222_v10 = vsub.f32 %v3034_v12, %v656_v61 }
  0xab   : > { %v594_v1 = vpop.xlane.xlu0 %593  ;;  %v600_v2 = vpop.xlane.xlu1 %599 }
  0xac   : > { %v655_v3 = vmul.f32 0.125, %v594_v1  ;;  %v657_v4 = vmul.f32 0.125, %v600_v2  ;;  %v718_v7 = vmul.f32 %v3219_v62, %v3219_v62  ;;  %v720_v8 = vmul.f32 %v3222_v10, %v3222_v10 }
  0xae   : > { %v3229_v9 = vsub.f32 %v3037_v13, %v655_v3  ;;  %v3232_v15 = vsub.f32 %v3040_v14, %v657_v4  ;;  %v782_v18 = vsel %vm540_vm0, %v718_v7, 0.0  ;;  %v788_v23 = vsel %vm540_vm0, %v720_v8, 0.0 }
  0xaf   : > { %v603_v19 = vpop.xlane.xlu0 %602  ;;  %783 = vadd.xlane.f32.xlu0 %v782_v18  ;;  %v606_v20 = vpop.xlane.xlu1 %605 }
  0xb0   : > { %v658_v26 = vmul.f32 0.125, %v603_v19  ;;  %v659_v29 = vmul.f32 0.125, %v606_v20  ;;  %v719_v30 = vmul.f32 %v3229_v9, %v3229_v9  ;;  %v721_v31 = vmul.f32 %v3232_v15, %v3232_v15 }
  0xb2   : > { %v3241_v36 = vsub.f32 %v3053_v21, %v658_v26  ;;  %v3244_v37 = vsub.f32 %v3056_v22, %v659_v29  ;;  %v785_v38 = vsel %vm540_vm0, %v719_v30, 0.0  ;;  %v791_v47 = vsel %vm540_vm0, %v721_v31, 0.0 }
  0xb3   : > { %v609_v41 = vpop.xlane.xlu0 %608  ;;  %786 = vadd.xlane.f32.xlu1 %v785_v38  ;;  %789 = vadd.xlane.f32.xlu0 %v788_v23  ;;  %v612_v44 = vpop.xlane.xlu1 %611 }
  0xb4   : > { %v660_v48 = vmul.f32 0.125, %v609_v41  ;;  %v661_v49 = vmul.f32 0.125, %v612_v44  ;;  %v722_v54 = vmul.f32 %v3241_v36, %v3241_v36  ;;  %v723_v55 = vmul.f32 %v3244_v37, %v3244_v37 }
  0xb6   : > { %v3253_v56 = vsub.f32 %v3065_v27, %v660_v48  ;;  %v3256_v59 = vsub.f32 %v3068_v28, %v661_v49  ;;  %v794_v60 = vsel %vm540_vm0, %v722_v54, 0.0  ;;  %v797_v2 = vsel %vm540_vm0, %v723_v55, 0.0 }
  0xb7   : > { %v615_v61 = vpop.xlane.xlu0 %614  ;;  %792 = vadd.xlane.f32.xlu1 %v791_v47  ;;  %795 = vadd.xlane.f32.xlu0 %v794_v60  ;;  %v618_v1 = vpop.xlane.xlu1 %617 }
  0xb8   : > { %v662_v3 = vmul.f32 0.125, %v615_v61  ;;  %v663_v4 = vmul.f32 0.125, %v618_v1  ;;  %v724_v7 = vmul.f32 %v3253_v56, %v3253_v56  ;;  %v725_v8 = vmul.f32 %v3256_v59, %v3256_v59 }
  0xba   : > { %v3265_v18 = vsub.f32 %v3077_v33, %v662_v3  ;;  %v3268_v19 = vsub.f32 %v3080_v34, %v663_v4  ;;  %v800_v20 = vsel %vm540_vm0, %v724_v7, 0.0  ;;  %v803_v29 = vsel %vm540_vm0, %v725_v8, 0.0 }
  0xbb   : > { %v621_v23 = vpop.xlane.xlu0 %620  ;;  %798 = vadd.xlane.f32.xlu1 %v797_v2  ;;  %801 = vadd.xlane.f32.xlu0 %v800_v20  ;;  %v624_v26 = vpop.xlane.xlu1 %623 }
  0xbc   : > { %v664_v30 = vmul.f32 0.125, %v621_v23  ;;  %v665_v31 = vmul.f32 0.125, %v624_v26  ;;  %v726_v38 = vmul.f32 %v3265_v18, %v3265_v18  ;;  %v727_v41 = vmul.f32 %v3268_v19, %v3268_v19 }
  0xbe   : > { %v3277_v44 = vsub.f32 %v3089_v39, %v664_v30  ;;  %v3280_v47 = vsub.f32 %v3092_v40, %v665_v31  ;;  %v806_v48 = vsel %vm540_vm0, %v726_v38, 0.0  ;;  %v809_v55 = vsel %vm540_vm0, %v727_v41, 0.0 }
  0xbf   : > { %v627_v49 = vpop.xlane.xlu0 %626  ;;  %804 = vadd.xlane.f32.xlu1 %v803_v29  ;;  %807 = vadd.xlane.f32.xlu0 %v806_v48  ;;  %v630_v54 = vpop.xlane.xlu1 %629 }
  0xc0   : > { %v666_v60 = vmul.f32 0.125, %v627_v49  ;;  %v667_v61 = vmul.f32 0.125, %v630_v54  ;;  %v728_v1 = vmul.f32 %v3277_v44, %v3277_v44  ;;  %v729_v2 = vmul.f32 %v3280_v47, %v3280_v47 }
  0xc2   : > { %v3289_v3 = vsub.f32 %v3101_v45, %v666_v60  ;;  %v3292_v4 = vsub.f32 %v3104_v46, %v667_v61  ;;  %v812_v7 = vsel %vm540_vm0, %v728_v1, 0.0  ;;  %v815_v23 = vsel %vm540_vm0, %v729_v2, 0.0 }
  0xc3   : > { %v633_v8 = vpop.xlane.xlu0 %632  ;;  %810 = vadd.xlane.f32.xlu1 %v809_v55  ;;  %813 = vadd.xlane.f32.xlu0 %v812_v7  ;;  %v636_v20 = vpop.xlane.xlu1 %635 }
  0xc4   : > { %v668_v26 = vmul.f32 0.125, %v633_v8  ;;  %v669_v29 = vmul.f32 0.125, %v636_v20  ;;  %v730_v30 = vmul.f32 %v3289_v3, %v3289_v3  ;;  %v731_v31 = vmul.f32 %v3292_v4, %v3292_v4 }
  0xc6   : > { %v3301_v38 = vsub.f32 %v3113_v51, %v668_v26  ;;  %v3304_v41 = vsub.f32 %v3116_v52, %v669_v29  ;;  %v818_v48 = vsel %vm540_vm0, %v730_v30, 0.0  ;;  %v821_v54 = vsel %vm540_vm0, %v731_v31, 0.0 }
  0xc7   : > { %816 = vadd.xlane.f32.xlu1 %v815_v23  ;;  %819 = vadd.xlane.f32.xlu0 %v818_v48  ;;  %v543_v49 = vpop.xlane.xlu0 %542  ;;  %v546_v55 = vpop.xlane.xlu1 %545 }
  0xc8   : > { %v638_v60 = vmul.f32 0.125, %v543_v49  ;;  %v639_v61 = vmul.f32 0.125, %v546_v55  ;;  %v732_v1 = vmul.f32 %v3301_v38, %v3301_v38  ;;  %v733_v2 = vmul.f32 %v3304_v41, %v3304_v41 }
  0xca   : > { %v3313_v7 = vsub.f32 %v3125_v57, %v638_v60  ;;  %v3316_v8 = vsub.f32 %v3128_v58, %v639_v61  ;;  %v824_v20 = vsel %vm540_vm0, %v732_v1, 0.0  ;;  %v827_v26 = vsel %vm540_vm0, %v733_v2, 0.0 }
  0xcb   : > { %822 = vadd.xlane.f32.xlu1 %v821_v54  ;;  %825 = vadd.xlane.f32.xlu0 %v824_v20  ;;  %v549_v23 = vpop.xlane.xlu0 %548  ;;  %v552_v29 = vpop.xlane.xlu1 %551 }
  0xcc   : > { %v640_v30 = vmul.f32 0.125, %v549_v23  ;;  %v641_v31 = vmul.f32 0.125, %v552_v29  ;;  %v702_v48 = vmul.f32 %v3313_v7, %v3313_v7  ;;  %v703_v49 = vmul.f32 %v3316_v8, %v3316_v8 }
  0xce   : > { %v3325_v55 = vsub.f32 %v3137_v63, %v640_v30  ;;  %v3328_v60 = vsub.f32 %v3140_v0, %v641_v31  ;;  %v734_v54 = vsel %vm540_vm0, %v702_v48, 0.0  ;;  %v737_v1 = vsel %vm540_vm0, %v703_v49, 0.0 }
  0xcf   : > { %828 = vadd.xlane.f32.xlu1 %v827_v26  ;;  %735 = vadd.xlane.f32.xlu0 %v734_v54  ;;  %v555_v61 = vpop.xlane.xlu0 %554  ;;  %v558_v2 = vpop.xlane.xlu1 %557 }
  0xd0   : > { %v642_v20 = vmul.f32 0.125, %v555_v61  ;;  %v643_v23 = vmul.f32 0.125, %v558_v2  ;;  %v704_v29 = vmul.f32 %v3325_v55, %v3325_v55  ;;  %v705_v30 = vmul.f32 %v3328_v60, %v3328_v60 }
  0xd2   : > { %v3337_v51 = vsub.f32 %v3149_v5, %v642_v20  ;;  %v3340_v31 = vsub.f32 %v3152_v6, %v643_v23  ;;  %v740_v26 = vsel %vm540_vm0, %v704_v29, 0.0  ;;  %v743_v49 = vsel %vm540_vm0, %v705_v30, 0.0 }
  0xd3   : > { %738 = vadd.xlane.f32.xlu1 %v737_v1  ;;  %741 = vadd.xlane.f32.xlu0 %v740_v26  ;;  %v561_v48 = vpop.xlane.xlu0 %560  ;;  %v564_v54 = vpop.xlane.xlu1 %563 }
  0xd4   : > { %v644_v61 = vmul.f32 0.125, %v561_v48  ;;  %v645_v2 = vmul.f32 0.125, %v564_v54  ;;  %v706_v52 = vmul.f32 %v3337_v51, %v3337_v51  ;;  %v707_v20 = vmul.f32 %v3340_v31, %v3340_v31 }
  0xd6   : > { %v3349_v45 = vsub.f32 %v3161_v16, %v644_v61  ;;  %v3352_v23 = vsub.f32 %v3164_v17, %v645_v2  ;;  %v746_v1 = vsel %vm540_vm0, %v706_v52, 0.0  ;;  %v749_v30 = vsel %vm540_vm0, %v707_v20, 0.0 }
  0xd7   : > { %744 = vadd.xlane.f32.xlu1 %v743_v49  ;;  %747 = vadd.xlane.f32.xlu0 %v746_v1  ;;  %v567_v29 = vpop.xlane.xlu0 %566  ;;  %v570_v26 = vpop.xlane.xlu1 %569 }
  0xd8   : > { %v646_v48 = vmul.f32 0.125, %v567_v29  ;;  %v647_v54 = vmul.f32 0.125, %v570_v26  ;;  %v708_v46 = vmul.f32 %v3349_v45, %v3349_v45  ;;  %v709_v61 = vmul.f32 %v3352_v23, %v3352_v23 }
  0xda   : > { %v3361_v39 = vsub.f32 %v3173_v24, %v646_v48  ;;  %v3364_v2 = vsub.f32 %v3176_v25, %v647_v54  ;;  %v752_v52 = vsel %vm540_vm0, %v708_v46, 0.0  ;;  %v755_v20 = vsel %vm540_vm0, %v709_v61, 0.0 }
  0xdb   : > { %750 = vadd.xlane.f32.xlu1 %v749_v30  ;;  %753 = vadd.xlane.f32.xlu0 %v752_v52  ;;  %v573_v49 = vpop.xlane.xlu0 %572  ;;  %v576_v1 = vpop.xlane.xlu1 %575 }
  0xdc   : > { %v648_v29 = vmul.f32 0.125, %v573_v49  ;;  %v649_v26 = vmul.f32 0.125, %v576_v1  ;;  %v710_v40 = vmul.f32 %v3361_v39, %v3361_v39  ;;  %v711_v48 = vmul.f32 %v3364_v2, %v3364_v2 }
  0xde   : > { %v3373_v33 = vsub.f32 %v3185_v32, %v648_v29  ;;  %v3376_v54 = vsub.f32 %v3188_v35, %v649_v26  ;;  %v758_v46 = vsel %vm540_vm0, %v710_v40, 0.0  ;;  %v761_v61 = vsel %vm540_vm0, %v711_v48, 0.0 }
  0xdf   : > { %756 = vadd.xlane.f32.xlu1 %v755_v20  ;;  %759 = vadd.xlane.f32.xlu0 %v758_v46  ;;  %v579_v30 = vpop.xlane.xlu0 %578  ;;  %v582_v52 = vpop.xlane.xlu1 %581 }
  0xe0   : > { %4446 = vst [vmem:[#allocation34_spill] sm:$0xff] %v3373_v33  ;;  %4447 = vst [vmem:[#allocation35_spill] sm:$0xff] %v3376_v54  ;;  %v650_v49 = vmul.f32 0.125, %v579_v30  ;;  %v651_v1 = vmul.f32 0.125, %v582_v52  ;;  %v712_v34 = vmul.f32 %v3373_v33, %v3373_v33  ;;  %v713_v29 = vmul.f32 %v3376_v54, %v3376_v54 }
  0xe2   : > { %v3385_v27 = vsub.f32 %v3197_v42, %v650_v49  ;;  %v3388_v26 = vsub.f32 %v3200_v43, %v651_v1  ;;  %v764_v40 = vsel %vm540_vm0, %v712_v34, 0.0  ;;  %v767_v48 = vsel %vm540_vm0, %v713_v29, 0.0 }
  0xe3   : > { %762 = vadd.xlane.f32.xlu1 %v761_v61  ;;  %765 = vadd.xlane.f32.xlu0 %v764_v40  ;;  %v585_v20 = vpop.xlane.xlu0 %584  ;;  %v588_v46 = vpop.xlane.xlu1 %587 }
  0xe4   : > { %4448 = vst [vmem:[#allocation36_spill] sm:$0xff] %v3385_v27  ;;  %4449 = vst [vmem:[#allocation37_spill] sm:$0xff] %v3388_v26  ;;  %v652_v30 = vmul.f32 0.125, %v585_v20  ;;  %v653_v52 = vmul.f32 0.125, %v588_v46  ;;  %v714_v28 = vmul.f32 %v3385_v27, %v3385_v27  ;;  %v715_v49 = vmul.f32 %v3388_v26, %v3388_v26 }
  0xe6   : > { %v3397_v21 = vsub.f32 %v3209_v50, %v652_v30  ;;  %v3400_v1 = vsub.f32 %v3212_v53, %v653_v52  ;;  %v770_v34 = vsel %vm540_vm0, %v714_v28, 0.0  ;;  %v773_v61 = vsel %vm540_vm0, %v715_v49, 0.0  ;;  %v1260_v28 = vld [vmem:[%s4367_s5] sm:$0xff] }
  0xe7   : > { %768 = vadd.xlane.f32.xlu1 %v767_v48  ;;  %771 = vadd.xlane.f32.xlu0 %v770_v34  ;;  %v3416_v48 = vld [vmem:[%s4368_s6] sm:$0xff] }
  0xe8   : > { %4450 = vst [vmem:[#allocation38_spill] sm:$0xff] %v3397_v21  ;;  %4451 = vst [vmem:[#allocation39_spill] sm:$0xff] %v3400_v1  ;;  %v716_v29 = vmul.f32 %v3397_v21, %v3397_v21  ;;  %v717_v40 = vmul.f32 %v3400_v1, %v3400_v1  ;;  %2746 = vmatprep.subr.mxu1 %v1260_v28  ;;  %2596 = vmatprep.subr.mxu0 %v1260_v28 }
  0xe9   : > { %2747 = vmatpush3.msra.mxu1 %v1260_v28  ;;  %2597 = vmatpush3.msra.mxu0 %v1260_v28 }
  0xea   : > { %v776_v20 = vsel %vm540_vm0, %v716_v29, 0.0  ;;  %v779_v46 = vsel %vm540_vm0, %v717_v40, 0.0  ;;  %2646 = vmatprep.subr.mxu1 %v3416_v48 }
  0xeb   : > { %774 = vadd.xlane.f32.xlu1 %v773_v61  ;;  %777 = vadd.xlane.f32.xlu0 %v776_v20 }
  0xef   : > { %780 = vadd.xlane.f32.xlu1 %v779_v46 }
 0x13c   : > { %v784_v30 = vpop.xlane.xlu0 %783 }
 0x13d   : > { %v846_v52 = vmul.f32 0.125, %v784_v30 }
 0x13f   : > { %v878_v61 = vadd.f32 1e-06, %v846_v52 }
 0x140   : > { %v787_v49 = vpop.xlane.xlu1 %786  ;;  %v790_v34 = vpop.xlane.xlu0 %789 }
 0x141   : > { %v847_v29 = vmul.f32 0.125, %v787_v49  ;;  %2772 = vrsqrt.f32 %v878_v61  ;;  %v848_v46 = vmul.f32 0.125, %v790_v34  ;;  %vm1008_vm1 = vcmp.eq.f32.partialorder %v878_v61, inf }
 0x142   : > { %v1011_v25 = vand.u32 2147483648, %v878_v61  ;;  %vm1010_vm2 = vcmp.eq.f32.partialorder %v878_v61, 0.0 }
 0x143   : > { %v3419_v22 = vadd.f32 1e-06, %v847_v29  ;;  %v3421_v14 = vadd.f32 1e-06, %v848_v46 }
 0x144   : > { %v793_v40 = vpop.xlane.xlu1 %792  ;;  %v796_v20 = vpop.xlane.xlu0 %795 }
 0x145   : > { %v849_v11 = vmul.f32 0.125, %v793_v40  ;;  %2774 = vrsqrt.f32 %v3419_v22  ;;  %v850_v13 = vmul.f32 0.125, %v796_v20  ;;  %vm1015_vm3 = vcmp.eq.f32.partialorder %v3419_v22, inf }
 0x146   : > { %2776 = vrsqrt.f32 %v3421_v14  ;;  %vm1017_vm4 = vcmp.eq.f32.partialorder %v3419_v22, 0.0  ;;  %vm1022_vm5 = vcmp.eq.f32.partialorder %v3421_v14, inf  ;;  %vm1024_vm6 = vcmp.eq.f32.partialorder %v3421_v14, 0.0 }
 0x147   : > { %v3425_v52 = vadd.f32 1e-06, %v849_v11  ;;  %v3427_v42 = vadd.f32 1e-06, %v850_v13 }
 0x148   : > { %v799_v28 = vpop.xlane.xlu1 %798  ;;  %v802_v12 = vpop.xlane.xlu0 %801 }
 0x149   : > { %v851_v53 = vmul.f32 0.125, %v799_v28  ;;  %v852_v34 = vmul.f32 0.125, %v802_v12  ;;  %2778 = vrsqrt.f32 %v3425_v52  ;;  %vm1029_vm7 = vcmp.eq.f32.partialorder %v3425_v52, inf }
 0x14a   : > { %2780 = vrsqrt.f32 %v3427_v42  ;;  %vm1031_vm8 = vcmp.eq.f32.partialorder %v3425_v52, 0.0  ;;  %vm1036_vm9 = vcmp.eq.f32.partialorder %v3427_v42, inf  ;;  %vm1038_vm10 = vcmp.eq.f32.partialorder %v3427_v42, 0.0 }
 0x14b   : > { %v2773_v49 = vpop.eup %2772  ;;  %v3430_v40 = vadd.f32 1e-06, %v851_v53  ;;  %v3433_v20 = vadd.f32 1e-06, %v852_v34 }
 0x14c   : > { %v805_v50 = vpop.xlane.xlu1 %804  ;;  %v808_v30 = vpop.xlane.xlu0 %807  ;;  %v1007_v32 = vmul.f32 %v2773_v49, %v878_v61 }
 0x14d   : > { %v853_v46 = vmul.f32 0.125, %v805_v50  ;;  %v854_v24 = vmul.f32 0.125, %v808_v30  ;;  %2782 = vrsqrt.f32 %v3430_v40  ;;  %vm1043_vm11 = vcmp.eq.f32.partialorder %v3430_v40, inf }
 0x14e   : > { %v1009_v28 = vsel %vm1008_vm1, %v878_v61, %v1007_v32  ;;  %2784 = vrsqrt.f32 %v3433_v20  ;;  %vm1045_vm12 = vcmp.eq.f32.partialorder %v3430_v40, 0.0  ;;  %vm1050_vm13 = vcmp.eq.f32.partialorder %v3433_v20, inf }
 0x14f   : > { %v2775_v11 = vpop.eup %2774  ;;  %v3436_v12 = vadd.f32 1e-06, %v853_v46  ;;  %v1012_v34 = vsel %vm1010_vm2, %v1011_v25, %v1009_v28  ;;  %v3441_v5 = vadd.f32 1e-06, %v854_v24  ;;  %vm1052_vm14 = vcmp.eq.f32.partialorder %v3433_v20, 0.0 }
 0x150   : > { %v811_v29 = vpop.xlane.xlu1 %810  ;;  %v814_v43 = vpop.xlane.xlu0 %813  ;;  %v1014_v53 = vmul.f32 %v2775_v11, %v3419_v22 }
 0x151   : > { %v2777_v13 = vpop.eup %2776  ;;  %v855_v49 = vmul.f32 0.125, %v811_v29  ;;  %v856_v50 = vmul.f32 0.125, %v814_v43  ;;  %2786 = vrsqrt.f32 %v3436_v12  ;;  %v1018_v43 = vand.u32 2147483648, %v3419_v22 }
 0x152   : > { %v1021_v17 = vmul.f32 %v2777_v13, %v3421_v14  ;;  %2788 = vrcp.f32 %v1012_v34  ;;  %v1016_v25 = vsel %vm1015_vm3, %v3419_v22, %v1014_v53  ;;  %v1025_v13 = vand.u32 2147483648, %v3421_v14 }
 0x153   : > { %v3445_v30 = vadd.f32 1e-06, %v855_v49  ;;  %v2779_v29 = vpop.eup %2778  ;;  %v3449_v61 = vadd.f32 1e-06, %v856_v50  ;;  %2790 = vrsqrt.f32 %v3441_v5  ;;  %v1032_v53 = vand.u32 2147483648, %v3425_v52 }
 0x154   : > { %v817_v35 = vpop.xlane.xlu1 %816  ;;  %v820_v16 = vpop.xlane.xlu0 %819  ;;  %v1023_v28 = vsel %vm1022_vm5, %v3421_v14, %v1021_v17  ;;  %v1028_v50 = vmul.f32 %v2779_v29, %v3425_v52  ;;  %v1039_v22 = vand.u32 2147483648, %v3427_v42  ;;  %vm1057_vm15 = vcmp.eq.f32.partialorder %v3436_v12, inf }
 0x155   : > { %v857_v24 = vmul.f32 0.125, %v817_v35  ;;  %v2781_v11 = vpop.eup %2780  ;;  %v858_v49 = vmul.f32 0.125, %v820_v16  ;;  %2792 = vrsqrt.f32 %v3445_v30  ;;  %v1019_v35 = vsel %vm1017_vm4, %v1018_v43, %v1016_v25 }
 0x156   : > { %2794 = vrsqrt.f32 %v3449_v61  ;;  %v1026_v16 = vsel %vm1024_vm6, %v1025_v13, %v1023_v28  ;;  %v1035_v29 = vmul.f32 %v2781_v11, %v3427_v42  ;;  %v1030_v14 = vsel %vm1029_vm7, %v3425_v52, %v1028_v50 }
 0x157   : > { %v2783_v34 = vpop.eup %2782  ;;  %v3470_v6 = vadd.f32 1e-06, %v857_v24  ;;  %v3474_v43 = vadd.f32 1e-06, %v858_v49  ;;  %2796 = vrcp.f32 %v1019_v35  ;;  %v1046_v11 = vand.u32 2147483648, %v3430_v40 }
 0x158   : > { %v823_v32 = vpop.xlane.xlu1 %822  ;;  %v826_v46 = vpop.xlane.xlu0 %825  ;;  %2798 = vrcp.f32 %v1026_v16  ;;  %v1042_v24 = vmul.f32 %v2783_v34, %v3430_v40  ;;  %v1033_v16 = vsel %vm1031_vm8, %v1032_v53, %v1030_v14  ;;  %v1053_v34 = vand.u32 2147483648, %v3433_v20  ;;  %v3510_v14 = vld [vmem:[%s4365_s3] ss:$0 sm:$0xff] }
 0x159   : > { %v2785_v63 = vpop.eup %2784  ;;  %v859_v25 = vmul.f32 0.125, %v823_v32  ;;  %v1037_v32 = vsel %vm1036_vm9, %v3427_v42, %v1035_v29  ;;  %2800 = vrsqrt.f32 %v3470_v6  ;;  %v860_v50 = vmul.f32 0.125, %v826_v46 }
 0x15a   : > { %v1049_v49 = vmul.f32 %v2785_v63, %v3433_v20  ;;  %2802 = vrsqrt.f32 %v3474_v43  ;;  %vm1059_vm1 = vcmp.eq.f32.partialorder %v3436_v12, 0.0  ;;  %v1060_v63 = vand.u32 2147483648, %v3436_v12 }
 0x15b   : > { %v2787_v13 = vpop.eup %2786  ;;  %v3495_v0 = vadd.f32 1e-06, %v859_v25  ;;  %vm1064_vm2 = vcmp.eq.f32.partialorder %v3441_v5, inf  ;;  %v1040_v52 = vsel %vm1038_vm10, %v1039_v22, %v1037_v32  ;;  %v1044_v53 = vsel %vm1043_vm11, %v3430_v40, %v1042_v24 }
 0x15c   : > { %v829_v17 = vpop.xlane.xlu1 %828  ;;  %v3481_v28 = vpop.xlane.xlu0 %735  ;;  %v1056_v29 = vmul.f32 %v2787_v13, %v3436_v12  ;;  %2804 = vrcp.f32 %v1033_v16  ;;  %v1051_v1 = vsel %vm1050_vm13, %v3433_v20, %v1049_v49  ;;  %v3515_v42 = vadd.f32 1e-06, %v860_v50 }
 0x15d   : > { %v2789_v35 = vpop.eup %2788  ;;  %v861_v25 = vmul.f32 0.125, %v829_v17  ;;  %v1067_v13 = vand.u32 2147483648, %v3441_v5  ;;  %vm1071_vm3 = vcmp.eq.f32.partialorder %v3445_v30, inf  ;;  %v1074_v17 = vand.u32 2147483648, %v3445_v30 }
 0x15e   : > { %v2791_v46 = vpop.eup %2790  ;;  %v1151_v32 = vmul.f32 %v2789_v35, %v3219_v62  ;;  %2806 = vrsqrt.f32 %v3495_v0  ;;  %v1047_v16 = vsel %vm1045_vm12, %v1046_v11, %v1044_v53  ;;  %vm1066_vm4 = vcmp.eq.f32.partialorder %v3441_v5, 0.0  ;;  %v3540_v11 = vld [vmem:[%s4366_s4] ss:$0 sm:$0xff] }
 0x15f   : > { %v2793_v58 = vpop.eup %2792  ;;  %2808 = vrcp.f32 %v1040_v52  ;;  %vm1078_vm5 = vcmp.eq.f32.partialorder %v3449_v61, inf  ;;  %v1054_v62 = vsel %vm1052_vm14, %v1053_v34, %v1051_v1  ;;  %v1058_v50 = vsel %vm1057_vm15, %v3436_v12, %v1056_v29 }
 0x160   : > { %v739_v57 = vpop.xlane.xlu1 %738  ;;  %v742_v22 = vpop.xlane.xlu0 %741  ;;  %v1205_v49 = vmul.f32 %v3510_v14, %v1151_v32  ;;  %v1063_v35 = vmul.f32 %v2791_v46, %v3441_v5  ;;  %vm1073_vm6 = vcmp.eq.f32.partialorder %v3445_v30, 0.0  ;;  %vm1080_vm7 = vcmp.eq.f32.partialorder %v3449_v61, 0.0 }
 0x161   : > { %v2795_v24 = vpop.eup %2794  ;;  %v3535_v40 = vadd.f32 1e-06, %v861_v25  ;;  %v1070_v1 = vmul.f32 %v2793_v58, %v3445_v30  ;;  %2810 = vrsqrt.f32 %v3515_v42  ;;  %v831_v46 = vmul.f32 0.125, %v739_v57 }
 0x162   : > { %v2797_v20 = vpop.eup %2796  ;;  %v1077_v34 = vmul.f32 %v2795_v24, %v3449_v61  ;;  %2812 = vrcp.f32 %v1047_v16  ;;  %v1081_v29 = vand.u32 2147483648, %v3449_v61  ;;  %vm1085_vm8 = vcmp.eq.f32.partialorder %v3470_v6, inf }
 0x163   : > { %v2799_v53 = vpop.eup %2798  ;;  %v832_v25 = vmul.f32 0.125, %v742_v22  ;;  %2814 = vrcp.f32 %v1054_v62  ;;  %v1088_v21 = vand.u32 2147483648, %v3470_v6  ;;  %v3549_v26 = vadd.f32 %v3540_v11, %v1205_v49 }
 0x164   : > { %v745_v52 = vpop.xlane.xlu1 %744  ;;  %v2801_v32 = vpop.eup %2800  ;;  %v1061_v57 = vsel %vm1059_vm1, %v1060_v63, %v1058_v50  ;;  %v1065_v16 = vsel %vm1064_vm2, %v3441_v5, %v1063_v35  ;;  %vm1087_vm9 = vcmp.eq.f32.partialorder %v3470_v6, 0.0  ;;  %vm1092_vm10 = vcmp.eq.f32.partialorder %v3474_v43, inf }
 0x165   : > { %4452 = vst [vmem:[#allocation40_spill] sm:$0xff] %v3549_v26  ;;  %v833_v58 = vmul.f32 0.125, %v745_v52  ;;  %v748_v27 = vpop.xlane.xlu0 %747  ;;  %v2803_v24 = vpop.eup %2802  ;;  %v830_v22 = vmul.f32 0.125, %v3481_v28  ;;  %v1072_v49 = vsel %vm1071_vm3, %v3445_v30, %v1070_v1  ;;  %v1079_v62 = vsel %vm1078_vm5, %v3449_v61, %v1077_v34  ;;  %2622 = vmatprep.mubr.msk.f32.mxu1 %vm540_vm0, %v3549_v26 }
 0x166   : > { %vm1094_vm11 = vcmp.eq.f32.partialorder %v3474_v43, 0.0  ;;  %2816 = vrsqrt.f32 %v3535_v40  ;;  %v3567_v12 = vadd.f32 1e-06, %v831_v46  ;;  %v1084_v63 = vmul.f32 %v2801_v32, %v3470_v6  ;;  %v2805_v52 = vpop.eup %2804 }
 0x167   : > { %v3572_v28 = vadd.f32 1e-06, %v832_v25  ;;  %v1153_v50 = vmul.f32 %v2797_v20, %v3229_v9  ;;  %v1155_v35 = vmul.f32 %v2799_v53, %v3222_v10  ;;  %2818 = vrcp.f32 %v1061_v57 }
 0x168   : > { %v1091_v1 = vmul.f32 %v2803_v24, %v3474_v43  ;;  %v1095_v34 = vand.u32 2147483648, %v3474_v43  ;;  %v3578_v54 = vadd.f32 1e-06, %v833_v58  ;;  %v751_v46 = vpop.xlane.xlu1 %750  ;;  %v2807_v33 = vpop.eup %2806  ;;  %v1068_v26 = vsel %vm1066_vm4, %v1067_v13, %v1065_v16 }
 0x169   : > { %vm1099_vm12 = vcmp.eq.f32.partialorder %v3495_v0, inf  ;;  %v1102_v25 = vand.u32 2147483648, %v3495_v0  ;;  %v1206_v9 = vmul.f32 %v3510_v14, %v1153_v50  ;;  %v2809_v10 = vpop.eup %2808  ;;  %v1075_v20 = vsel %vm1073_vm6, %v1074_v17, %v1072_v49  ;;  %v754_v13 = vpop.xlane.xlu0 %753 }
 0x16a   : > { %v1082_v53 = vsel %vm1080_vm7, %v1081_v29, %v1079_v62  ;;  %vm1101_vm13 = vcmp.eq.f32.partialorder %v3495_v0, 0.0  ;;  %2820 = vrsqrt.f32 %v3567_v12  ;;  %v1207_v5 = vmul.f32 %v3510_v14, %v1155_v35 }
 0x16b   : > { %v1086_v32 = vsel %vm1085_vm8, %v3470_v6, %v1084_v63  ;;  %v3595_v58 = vadd.f32 1e-06, %v830_v22  ;;  %2822 = vrsqrt.f32 %v3572_v28  ;;  %v1157_v30 = vmul.f32 %v2805_v52, %v3232_v15  ;;  %v2811_v17 = vpop.eup %2810 }
 0x16c   : > { %v1093_v61 = vsel %vm1092_vm10, %v3474_v43, %v1091_v1  ;;  %v1098_v29 = vmul.f32 %v2807_v33, %v3495_v0  ;;  %2824 = vrsqrt.f32 %v3578_v54  ;;  %v3605_v24 = vadd.f32 %v3540_v11, %v1206_v9  ;;  %v2813_v57 = vpop.eup %2812 }
 0x16d   : > { %2826 = vrcp.f32 %v1068_v26  ;;  %vm1106_vm14 = vcmp.eq.f32.partialorder %v3515_v42, inf  ;;  %v834_v16 = vmul.f32 0.125, %v748_v27  ;;  %v3609_v22 = vadd.f32 %v3540_v11, %v1207_v5  ;;  %v2815_v15 = vpop.eup %2814  ;;  %v757_v26 = vpop.xlane.xlu1 %756 }
 0x16e   : > { %2828 = vrcp.f32 %v1075_v20  ;;  %v1089_v49 = vsel %vm1087_vm9, %v1088_v21, %v1086_v32  ;;  %vm1108_vm15 = vcmp.eq.f32.partialorder %v3515_v42, 0.0  ;;  %v1109_v33 = vand.u32 2147483648, %v3515_v42  ;;  %2623 = vmatmul.mubr.msk.f32.vlgmr.msra.gmra.mrb[0].mxu1 %vm540_vm0, %v3605_v24  ;;  %v760_v35 = vpop.xlane.xlu0 %759 }
 0x16f   : > { %vm1113_vm1 = vcmp.eq.f32.partialorder %v3535_v40, inf  ;;  %2830 = vrcp.f32 %v1082_v53  ;;  %v1096_v27 = vsel %vm1094_vm11, %v1095_v34, %v1093_v61  ;;  %v1105_v62 = vmul.f32 %v2811_v17, %v3515_v42  ;;  %2647 = vmatpush3.msra.mxu1 %v3416_v48  ;;  %2625 = vmatprep.mubr.msk.f32.mxu1 %vm540_vm0, %v3609_v22 }
 0x170   : > { %v1208_v21 = vmul.f32 %v3510_v14, %v1157_v30  ;;  %v2817_v6 = vpop.eup %2816  ;;  %v1100_v63 = vsel %vm1099_vm12, %v3495_v0, %v1098_v29  ;;  %2832 = vrsqrt.f32 %v3595_v58  ;;  %v835_v50 = vmul.f32 0.125, %v751_v46 }
 0x171   : > { %v1159_v43 = vmul.f32 %v2809_v10, %v3241_v36  ;;  %2834 = vrcp.f32 %v1089_v49  ;;  %v1116_v52 = vand.u32 2147483648, %v3535_v40  ;;  %v899_v48 = vand.u32 2147483648, %v3595_v58  ;;  %v2819_v34 = vpop.eup %2818  ;;  %v763_v17 = vpop.xlane.xlu1 %762 }
 0x172   : > { %v3632_v1 = vadd.f32 1e-06, %v834_v16  ;;  %2836 = vrcp.f32 %v1096_v27  ;;  %vm1115_vm2 = vcmp.eq.f32.partialorder %v3535_v40, 0.0  ;;  %v836_v9 = vmul.f32 0.125, %v754_v13 }
 0x173   : > { %v3636_v20 = vadd.f32 %v3540_v11, %v1208_v21  ;;  %v1209_v46 = vmul.f32 %v3510_v14, %v1159_v43  ;;  %v1103_v36 = vsel %vm1101_vm13, %v1102_v25, %v1100_v63  ;;  %v1107_v10 = vsel %vm1106_vm14, %v3515_v42, %v1105_v62 }
 0x174   : > { %v1112_v53 = vmul.f32 %v2817_v6, %v3535_v40  ;;  %vm903_vm3 = vcmp.eq.f32.partialorder %v3567_v12, inf  ;;  %v1161_v5 = vmul.f32 %v2813_v57, %v3244_v37  ;;  %v2821_v32 = vpop.eup %2820  ;;  %v3647_v13 = vadd.f32 1e-06, %v835_v50 }
 0x175   : > { %2626 = vmatmul.mubr.msk.f32.gmra.mrb[2].mxu1 %vm540_vm0, %v3636_v20  ;;  %v3652_v30 = vadd.f32 %v3540_v11, %v1209_v46  ;;  %v837_v0 = vmul.f32 0.125, %v757_v26  ;;  %v1163_v25 = vmul.f32 %v2815_v15, %v3253_v56  ;;  %v2823_v61 = vpop.eup %2822  ;;  %v906_v29 = vand.u32 2147483648, %v3567_v12  ;;  %v766_v15 = vpop.xlane.xlu0 %765 }
 0x176   : > { %vm910_vm4 = vcmp.eq.f32.partialorder %v3572_v28, inf  ;;  %2838 = vrsqrt.f32 %v3632_v1  ;;  %v838_v37 = vmul.f32 0.125, %v760_v35  ;;  %v2825_v57 = vpop.eup %2824  ;;  %v913_v16 = vand.u32 2147483648, %v3572_v28 }
 0x177   : > { %2840 = vrcp.f32 %v1103_v36  ;;  %v3659_v49 = vadd.f32 1e-06, %v836_v9  ;;  %2628 = vmatprep.mubr.msk.f32.mxu1 %vm540_vm0, %v3652_v30  ;;  %v1210_v56 = vmul.f32 %v3510_v14, %v1161_v5  ;;  %v2827_v26 = vpop.eup %2826  ;;  %v1110_v27 = vsel %vm1108_vm15, %v1109_v33, %v1107_v10 }
 0x178   : > { %v1114_v62 = vsel %vm1113_vm1, %v3535_v40, %v1112_v53  ;;  %v902_v21 = vmul.f32 %v2821_v32, %v3567_v12  ;;  %vm905_vm5 = vcmp.eq.f32.partialorder %v3567_v12, 0.0  ;;  %v1211_v6 = vmul.f32 %v3510_v14, %v1163_v25  ;;  %v2829_v63 = vpop.eup %2828  ;;  %v769_v32 = vpop.xlane.xlu1 %768 }
 0x179   : > { %v909_v50 = vmul.f32 %v2823_v61, %v3572_v28  ;;  %vm912_vm6 = vcmp.eq.f32.partialorder %v3572_v28, 0.0  ;;  %2842 = vrsqrt.f32 %v3647_v13  ;;  %v3675_v43 = vadd.f32 1e-06, %v837_v0  ;;  %v2831_v33 = vpop.eup %2830  ;;  %v772_v61 = vpop.xlane.xlu0 %771 }
 0x17a   : > { %v1165_v42 = vmul.f32 %v2819_v34, %v3256_v59  ;;  %v916_v35 = vmul.f32 %v2825_v57, %v3578_v54  ;;  %v3679_v9 = vadd.f32 1e-06, %v838_v37  ;;  %v3682_v46 = vadd.f32 %v3540_v11, %v1210_v56  ;;  %v2833_v10 = vpop.eup %2832 }
 0x17b   : > { %v839_v36 = vmul.f32 0.125, %v763_v17  ;;  %vm917_vm7 = vcmp.eq.f32.partialorder %v3578_v54, inf  ;;  %2844 = vrsqrt.f32 %v3659_v49  ;;  %v3687_v53 = vadd.f32 %v3540_v11, %v1211_v6  ;;  %v3689_v59 = vpop.eup %2834 }
 0x17c   : > { %v840_v5 = vmul.f32 0.125, %v766_v15  ;;  %2846 = vrcp.f32 %v1110_v27  ;;  %v1117_v34 = vsel %vm1115_vm2, %v1116_v52, %v1114_v62  ;;  %vm919_vm8 = vcmp.eq.f32.partialorder %v3578_v54, 0.0  ;;  %2629 = vmatmul.mubr.msk.f32.gmra.mrb[4].mxu1 %vm540_vm0, %v3682_v46  ;;  %v3697_v25 = vpop.eup %2836 }
 0x17d   : > { %v920_v0 = vand.u32 2147483648, %v3578_v54  ;;  %v904_v17 = vsel %vm903_vm3, %v3567_v12, %v902_v21  ;;  %2848 = vrsqrt.f32 %v3675_v43  ;;  %2631 = vmatprep.mubr.msk.f32.mxu1 %vm540_vm0, %v3687_v53  ;;  %v1212_v40 = vmul.f32 %v3510_v14, %v1165_v42 }
 0x17e   : > { %v1167_v52 = vmul.f32 %v2827_v26, %v3265_v18  ;;  %v911_v37 = vsel %vm910_vm4, %v3572_v28, %v909_v50  ;;  %v918_v57 = vsel %vm917_vm7, %v3578_v54, %v916_v35  ;;  %2850 = vrsqrt.f32 %v3679_v9 }
 0x17f   : > { %v3714_v56 = vadd.f32 1e-06, %v839_v36  ;;  %v3716_v15 = vadd.f32 1e-06, %v840_v5  ;;  %v3719_v27 = vadd.f32 %v3540_v11, %v1212_v40  ;;  %v841_v26 = vmul.f32 0.125, %v769_v32  ;;  %v775_v5 = vpop.xlane.xlu1 %774 }
 0x180   : > { %v1213_v18 = vmul.f32 %v3510_v14, %v1167_v52  ;;  %v2839_v62 = vpop.eup %2838  ;;  %v3723_v21 = vmul.f32 %v2833_v10, %v3595_v58  ;;  %vm924_vm9 = vcmp.eq.f32.partialorder %v3632_v1, inf  ;;  %v842_v6 = vmul.f32 0.125, %v772_v61  ;;  %v778_v61 = vpop.xlane.xlu0 %777 }
 0x181   : > { %v1169_v50 = vmul.f32 %v2829_v63, %v3268_v19  ;;  %v2841_v42 = vpop.eup %2840  ;;  %2852 = vrcp.f32 %v1117_v34  ;;  %v907_v35 = vsel %vm905_vm5, %v906_v29, %v904_v17  ;;  %vm926_vm10 = vcmp.eq.f32.partialorder %v3632_v1, 0.0  ;;  %2632 = vmatmul.mubr.msk.f32.gmra.mrb[6].mxu1 %vm540_vm0, %v3719_v27 }
 0x182   : > { %v3735_v36 = vadd.f32 %v3540_v11, %v1213_v18  ;;  %v1171_v10 = vmul.f32 %v2831_v33, %v3277_v44  ;;  %v914_v19 = vsel %vm912_vm6, %v913_v16, %v911_v37  ;;  %v921_v12 = vsel %vm919_vm8, %v920_v0, %v918_v57 }
 0x183   : > { %v927_v29 = vand.u32 2147483648, %v3632_v1  ;;  %2854 = vrsqrt.f32 %v3714_v56  ;;  %v2843_v63 = vpop.eup %2842  ;;  %v923_v32 = vmul.f32 %v2839_v62, %v3632_v1  ;;  %v3750_v44 = vadd.f32 1e-06, %v841_v26  ;;  %v781_v62 = vpop.xlane.xlu1 %780 }
 0x184   : > { %2856 = vrsqrt.f32 %v3716_v15  ;;  %2634 = vmatprep.mubr.msk.f32.mxu1 %vm540_vm0, %v3735_v36  ;;  %v1214_v28 = vmul.f32 %v3510_v14, %v1169_v50  ;;  %v3753_v16 = vadd.f32 1e-06, %v842_v6  ;;  %v1215_v54 = vmul.f32 %v3510_v14, %v1171_v10 }
 0x185   : > { %2858 = vrcp.f32 %v907_v35  ;;  %v843_v33 = vmul.f32 0.125, %v775_v5  ;;  %v2845_v34 = vpop.eup %2844  ;;  %vm931_vm11 = vcmp.eq.f32.partialorder %v3647_v13, inf  ;;  %v934_v0 = vand.u32 2147483648, %v3647_v13 }
 0x186   : > { %2860 = vrcp.f32 %v914_v19  ;;  %vm938_vm12 = vcmp.eq.f32.partialorder %v3659_v49, inf  ;;  %v2847_v17 = vpop.eup %2846  ;;  %v930_v40 = vmul.f32 %v2843_v63, %v3647_v13  ;;  %vm933_vm13 = vcmp.eq.f32.partialorder %v3647_v13, 0.0 }
 0x187   : > { %2862 = vrcp.f32 %v921_v12  ;;  %vm940_vm14 = vcmp.eq.f32.partialorder %v3659_v49, 0.0  ;;  %v3763_v52 = vadd.f32 %v3540_v11, %v1214_v28  ;;  %v2849_v37 = vpop.eup %2848  ;;  %v925_v57 = vsel %vm924_vm9, %v3632_v1, %v923_v32 }
 0x188   : > { %v941_v18 = vand.u32 2147483648, %v3659_v49  ;;  %2864 = vrsqrt.f32 %v3750_v44  ;;  %v3771_v26 = vadd.f32 %v3540_v11, %v1215_v54  ;;  %v2851_v6 = vpop.eup %2850  ;;  %vm896_vm15 = vcmp.eq.f32.partialorder %v3595_v58, inf }
 0x189   : > { %v937_v50 = vmul.f32 %v2845_v34, %v3659_v49  ;;  %vm945_vm1 = vcmp.eq.f32.partialorder %v3675_v43, inf  ;;  %2866 = vrsqrt.f32 %v3753_v16  ;;  %2635 = vmatmul.mubr.msk.f32.gmra.mrb[8].mxu1 %vm540_vm0, %v3763_v52  ;;  %v3779_v35 = vadd.f32 1e-06, %v843_v33 }
 0x18a   : > { %v948_v10 = vand.u32 2147483648, %v3675_v43  ;;  %2637 = vmatprep.mubr.msk.f32.mxu1 %vm540_vm0, %v3771_v26  ;;  %v844_v5 = vmul.f32 0.125, %v778_v61  ;;  %v1173_v19 = vmul.f32 %v3689_v59, %v3280_v47  ;;  %v1175_v12 = vmul.f32 %v3697_v25, %v3289_v3 }
 0x18b   : > { %v928_v63 = vsel %vm926_vm10, %v927_v29, %v925_v57  ;;  %v932_v32 = vsel %vm931_vm11, %v3647_v13, %v930_v40  ;;  %v845_v28 = vmul.f32 0.125, %v781_v62  ;;  %v1177_v54 = vmul.f32 %v2841_v42, %v3292_v4  ;;  %v2853_v33 = vpop.eup %2852 }
 0x18c   : > { %v944_v34 = vmul.f32 %v2849_v37, %v3675_v43  ;;  %vm947_vm2 = vcmp.eq.f32.partialorder %v3675_v43, 0.0  ;;  %v3796_v61 = vadd.f32 1e-06, %v844_v5  ;;  %v1216_v47 = vmul.f32 %v3510_v14, %v1173_v19 }
 0x18d   : > { %v1217_v3 = vmul.f32 %v3510_v14, %v1175_v12  ;;  %v2855_v1 = vpop.eup %2854  ;;  %v939_v59 = vsel %vm938_vm12, %v3659_v49, %v937_v50  ;;  %v951_v25 = vmul.f32 %v2851_v6, %v3679_v9  ;;  %2868 = vrsqrt.f32 %v3779_v35 }
 0x18e   : > { %v1218_v4 = vmul.f32 %v3510_v14, %v1177_v54  ;;  %v2857_v42 = vpop.eup %2856  ;;  %2870 = vrcp.f32 %v928_v63  ;;  %vm952_vm3 = vcmp.eq.f32.partialorder %v3679_v9, inf  ;;  %v3807_v29 = vadd.f32 1e-06, %v845_v28 }
 0x18f   : > { %v1179_v40 = vmul.f32 %v2847_v17, %v3301_v38  ;;  %v2859_v37 = vpop.eup %2858  ;;  %vm954_vm4 = vcmp.eq.f32.partialorder %v3679_v9, 0.0  ;;  %v955_v57 = vand.u32 2147483648, %v3679_v9  ;;  %2872 = vrsqrt.f32 %v3796_v61 }
 0x190   : > { %v3814_v62 = vadd.f32 %v3540_v11, %v1216_v47  ;;  %v2861_v6 = vpop.eup %2860  ;;  %v935_v50 = vsel %vm933_vm13, %v934_v0, %v932_v32  ;;  %v942_v5 = vsel %vm940_vm14, %v941_v18, %v939_v59  ;;  %v946_v38 = vsel %vm945_vm1, %v3675_v43, %v944_v34 }
 0x191   : > { %v3824_v17 = vadd.f32 %v3540_v11, %v1217_v3  ;;  %v3826_v19 = vpop.eup %2862  ;;  %v953_v12 = vsel %vm952_vm3, %v3679_v9, %v951_v25  ;;  %v958_v63 = vmul.f32 %v2855_v1, %v3714_v56  ;;  %v965_v28 = vmul.f32 %v2857_v42, %v3716_v15 }
 0x192   : > { %2638 = vmatmul.mubr.msk.f32.gmra.mrb[10].mxu1 %vm540_vm0, %v3814_v62  ;;  %v3834_v13 = vadd.f32 %v3540_v11, %v1218_v4  ;;  %v2865_v49 = vpop.eup %2864  ;;  %2874 = vrsqrt.f32 %v3807_v29  ;;  %v1219_v0 = vmul.f32 %v3510_v14, %v1179_v40  ;;  %v897_v18 = vsel %vm896_vm15, %v3595_v58, %v3723_v21 }
 0x193   : > { %2640 = vmatprep.mubr.msk.f32.mxu1 %vm540_vm0, %v3824_v17  ;;  %vm898_vm5 = vcmp.eq.f32.partialorder %v3595_v58, 0.0  ;;  %v2867_v32 = vpop.eup %2866  ;;  %2876 = vrcp.f32 %v935_v50  ;;  %vm959_vm6 = vcmp.eq.f32.partialorder %v3714_v56, inf  ;;  %vm961_vm7 = vcmp.eq.f32.partialorder %v3714_v56, 0.0 }
 0x194   : > { %v900_v54 = vsel %vm898_vm5, %v899_v48, %v897_v18  ;;  %vm966_vm8 = vcmp.eq.f32.partialorder %v3716_v15, inf  ;;  %v3851_v34 = vadd.f32 %v3540_v11, %v1219_v0  ;;  %v1181_v47 = vmul.f32 %v2853_v33, %v3304_v41 }
 0x195   : > { %2878 = vrcp.f32 %v900_v54  ;;  %v949_v21 = vsel %vm947_vm2, %v948_v10, %v946_v38  ;;  %v956_v3 = vsel %vm954_vm4, %v955_v57, %v953_v12  ;;  %v960_v1 = vsel %vm959_vm6, %v3714_v56, %v958_v63 }
 0x196   : > { %2880 = vrcp.f32 %v942_v5  ;;  %2641 = vmatmul.mubr.msk.f32.gmra.mrb[12].mxu1 %vm540_vm0, %v3834_v13  ;;  %v967_v58 = vsel %vm966_vm8, %v3716_v15, %v965_v28  ;;  %v972_v48 = vmul.f32 %v2865_v49, %v3750_v44  ;;  %v979_v59 = vmul.f32 %v2867_v32, %v3753_v16 }
 0x197   : > { %2643 = vmatprep.mubr.msk.f32.mxu1 %vm540_vm0, %v3851_v34  ;;  %v1220_v41 = vmul.f32 %v3510_v14, %v1181_v47  ;;  %v2869_v43 = vpop.eup %2868  ;;  %v962_v9 = vand.u32 2147483648, %v3714_v56  ;;  %vm968_vm9 = vcmp.eq.f32.partialorder %v3716_v15, 0.0  ;;  %v969_v10 = vand.u32 2147483648, %v3716_v15 }
 0x198   : > { %vm973_vm10 = vcmp.eq.f32.partialorder %v3750_v44, inf  ;;  %v2871_v33 = vpop.eup %2870  ;;  %2882 = vrcp.f32 %v949_v21  ;;  %vm975_vm11 = vcmp.eq.f32.partialorder %v3750_v44, 0.0  ;;  %v976_v25 = vand.u32 2147483648, %v3750_v44 }
 0x199   : > { %v3874_v4 = vadd.f32 %v3540_v11, %v1220_v41  ;;  %v2873_v42 = vpop.eup %2872  ;;  %2884 = vrcp.f32 %v956_v3  ;;  %v963_v40 = vsel %vm961_vm7, %v962_v9, %v960_v1  ;;  %v970_v57 = vsel %vm968_vm9, %v969_v10, %v967_v58 }
 0x19a   : > { %vm980_vm12 = vcmp.eq.f32.partialorder %v3753_v16, inf  ;;  %v974_v15 = vsel %vm973_vm10, %v3750_v44, %v972_v48  ;;  %v986_v5 = vmul.f32 %v2869_v43, %v3779_v35  ;;  %v1121_v38 = vmul.f32 %v2859_v37, %v3316_v8 }
 0x19b   : > { %v981_v50 = vsel %vm980_vm12, %v3753_v16, %v979_v59  ;;  %2644 = vmatmul.mubr.msk.f32.gmra.mrb[14].mxu1 %vm540_vm0, %v3874_v4  ;;  %vm982_vm13 = vcmp.eq.f32.partialorder %v3753_v16, 0.0  ;;  %v983_v12 = vand.u32 2147483648, %v3753_v16  ;;  %vm987_vm14 = vcmp.eq.f32.partialorder %v3779_v35, inf }
 0x19c   : > { %v1123_v56 = vmul.f32 %v2861_v6, %v3325_v55  ;;  %v2875_v63 = vpop.eup %2874  ;;  %2886 = vrcp.f32 %v963_v40  ;;  %vm989_vm15 = vcmp.eq.f32.partialorder %v3779_v35, 0.0  ;;  %v990_v28 = vand.u32 2147483648, %v3779_v35 }
 0x19d   : > { %v993_v49 = vmul.f32 %v2873_v42, %v3796_v61  ;;  %v2877_v0 = vpop.eup %2876  ;;  %2888 = vrcp.f32 %v970_v57  ;;  %v977_v8 = vsel %vm975_vm11, %v976_v25, %v974_v15  ;;  %v984_v37 = vsel %vm982_vm13, %v983_v12, %v981_v50 }
 0x19e   : > { %vm994_vm1 = vcmp.eq.f32.partialorder %v3796_v61, inf  ;;  %v988_v18 = vsel %vm987_vm14, %v3779_v35, %v986_v5  ;;  %v1190_v55 = vmul.f32 %v3510_v14, %v1121_v38  ;;  %v1125_v6 = vmul.f32 %v3826_v19, %v3328_v60 }
 0x19f   : > { %v2879_v16 = vpop.eup %2878  ;;  %v1127_v32 = vmul.f32 %v2871_v33, %v3337_v51  ;;  %vm996_vm2 = vcmp.eq.f32.partialorder %v3796_v61, 0.0  ;;  %v1000_v47 = vmul.f32 %v2875_v63, %v3807_v29  ;;  %v1191_v21 = vmul.f32 %v3510_v14, %v1123_v56 }
 0x1a0   : > { %v2881_v54 = vpop.eup %2880  ;;  %v1119_v44 = vmul.f32 %v2879_v16, %v3313_v7  ;;  %2890 = vrcp.f32 %v977_v8  ;;  %v995_v3 = vsel %vm994_vm1, %v3796_v61, %v993_v49  ;;  %v997_v1 = vand.u32 2147483648, %v3796_v61 }
 0x1a1   : > { %vm1001_vm3 = vcmp.eq.f32.partialorder %v3807_v29, inf  ;;  %2892 = vrcp.f32 %v984_v37  ;;  %v991_v51 = vsel %vm989_vm15, %v990_v28, %v988_v18  ;;  %v1129_v19 = vmul.f32 %v2877_v0, %v3340_v31  ;;  %v4453_v28 = vld [vmem:[#allocation34_spill] sm:$0xff] }
 0x1a2   : > { %v1189_v60 = vmul.f32 %v3510_v14, %v1119_v44  ;;  %v2883_v58 = vpop.eup %2882  ;;  %v1229_v7 = vadd.f32 %v3540_v11, %v1190_v55  ;;  %v1192_v48 = vmul.f32 %v3510_v14, %v1125_v6  ;;  %v1193_v59 = vmul.f32 %v3510_v14, %v1127_v32  ;;  %v4455_v6 = vld [vmem:[#allocation36_spill] sm:$0xff] }
 0x1a3   : > { %v1131_v41 = vmul.f32 %v2881_v54, %v3349_v45  ;;  %v2885_v43 = vpop.eup %2884  ;;  %v998_v9 = vsel %vm996_vm2, %v997_v1, %v995_v3  ;;  %v1002_v35 = vsel %vm1001_vm3, %v3807_v29, %v1000_v47  ;;  %v1230_v33 = vadd.f32 %v3540_v11, %v1191_v21  ;;  %v4456_v21 = vld [vmem:[#allocation37_spill] sm:$0xff] }
 0x1a4   : > { %v1228_v10 = vadd.f32 %v3540_v11, %v1189_v60  ;;  %v1004_v31 = vand.u32 2147483648, %v3807_v29  ;;  %2894 = vrcp.f32 %v991_v51  ;;  %vm1003_vm4 = vcmp.eq.f32.partialorder %v3807_v29, 0.0 }
 0x1a5   : > { %v1194_v45 = vmul.f32 %v3510_v14, %v1129_v19  ;;  %2896 = vrcp.f32 %v998_v9  ;;  %v1231_v42 = vadd.f32 %v3540_v11, %v1192_v48  ;;  %v1133_v40 = vmul.f32 %v2883_v58, %v3352_v23  ;;  %v4457_v19 = vld [vmem:[#allocation38_spill] sm:$0xff] }
 0x1a6   : > { %2598 = vmatprep.mubr.msk.f32.mxu0 %vm540_vm0, %v1228_v10  ;;  %2648 = vmatprep.mubr.msk.f32.mxu1 %vm540_vm0, %v1228_v10  ;;  %v2887_v25 = vpop.eup %2886  ;;  %v1005_v61 = vsel %vm1003_vm4, %v1004_v31, %v1002_v35  ;;  %v1232_v29 = vadd.f32 %v3540_v11, %v1193_v59  ;;  %v1195_v15 = vmul.f32 %v3510_v14, %v1131_v41  ;;  %v4458_v59 = vld [vmem:[#allocation39_spill] sm:$0xff] }
 0x1a7   : > { %2599 = vmatmul.mubr.msk.f32.vlgmr.msra.gmra.mrb[0].mxu0 %vm540_vm0, %v1229_v7  ;;  %2649 = vmatmul.mubr.msk.f32.vlgmr.msra.gmra.mrb[16].mxu1 %vm540_vm0, %v1229_v7  ;;  %v2889_v57 = vpop.eup %2888  ;;  %v1135_v50 = vmul.f32 %v2885_v43, %v3361_v39  ;;  %2898 = vrcp.f32 %v1005_v61  ;;  %v1233_v38 = vadd.f32 %v3540_v11, %v1194_v45  ;;  %v1196_v23 = vmul.f32 %v3510_v14, %v1133_v40  ;;  %v4062_v61 = vld [vmem:[%s4369_s7] ss:$0 sm:$0xff] }
 0x1a8   : > { %2601 = vmatprep.mubr.msk.f32.mxu0 %vm540_vm0, %v1230_v33  ;;  %2651 = vmatprep.mubr.msk.f32.mxu1 %vm540_vm0, %v1230_v33  ;;  %v1137_v12 = vmul.f32 %v2887_v25, %v3364_v2  ;;  %v1234_v63 = vadd.f32 %v3540_v11, %v1195_v15  ;;  %v1139_v49 = vmul.f32 %v2889_v57, %v4453_v28  ;;  %v4454_v2 = vld [vmem:[#allocation35_spill] sm:$0xff]  ;;  %v4057_v25 = vld [vmem:[%s4370_s8] ss:$0 sm:$0xff] }
 0x1a9   : > { %v1197_v39 = vmul.f32 %v3510_v14, %v1135_v50  ;;  %v1235_v0 = vadd.f32 %v3540_v11, %v1196_v23 }
 0x1aa   : > { %v2891_v5 = vpop.eup %2890  ;;  %v1198_v8 = vmul.f32 %v3510_v14, %v1137_v12  ;;  %v1199_v55 = vmul.f32 %v3510_v14, %v1139_v49 }
 0x1ab   : > { %2602 = vmatmul.mubr.msk.f32.gmra.mrb[2].mxu0 %vm540_vm0, %v1231_v42  ;;  %2652 = vmatmul.mubr.msk.f32.gmra.mrb[18].mxu1 %vm540_vm0, %v1231_v42  ;;  %v2893_v56 = vpop.eup %2892  ;;  %v1141_v37 = vmul.f32 %v2891_v5, %v4454_v2  ;;  %v1236_v18 = vadd.f32 %v3540_v11, %v1197_v39 }
 0x1ac   : > { %2604 = vmatprep.mubr.msk.f32.mxu0 %vm540_vm0, %v1232_v29  ;;  %2654 = vmatprep.mubr.msk.f32.mxu1 %vm540_vm0, %v1232_v29  ;;  %v1143_v32 = vmul.f32 %v2893_v56, %v4455_v6  ;;  %v1237_v47 = vadd.f32 %v3540_v11, %v1198_v8  ;;  %v1238_v51 = vadd.f32 %v3540_v11, %v1199_v55 }
 0x1ad   : > { %v1200_v44 = vmul.f32 %v3510_v14, %v1141_v37 }
 0x1ae   : > { %v2895_v16 = vpop.eup %2894  ;;  %v1201_v60 = vmul.f32 %v3510_v14, %v1143_v32 }
 0x1af   : > { %2605 = vmatmul.mubr.msk.f32.gmra.mrb[4].mxu0 %vm540_vm0, %v1233_v38  ;;  %2655 = vmatmul.mubr.msk.f32.gmra.mrb[20].mxu1 %vm540_vm0, %v1233_v38  ;;  %v2897_v54 = vpop.eup %2896  ;;  %v1145_v3 = vmul.f32 %v2895_v16, %v4456_v21  ;;  %v1239_v7 = vadd.f32 %v3540_v11, %v1200_v44 }
 0x1b0   : > { %2607 = vmatprep.mubr.msk.f32.mxu0 %vm540_vm0, %v1234_v63  ;;  %2657 = vmatprep.mubr.msk.f32.mxu1 %vm540_vm0, %v1234_v63  ;;  %v1147_v58 = vmul.f32 %v2897_v54, %v4457_v19  ;;  %v1240_v43 = vadd.f32 %v3540_v11, %v1201_v60 }
 0x1b1   : > { %v2899_v1 = vpop.eup %2898  ;;  %v1202_v48 = vmul.f32 %v3510_v14, %v1145_v3 }
 0x1b2   : > { %v1149_v41 = vmul.f32 %v2899_v1, %v4458_v59  ;;  %v1203_v9 = vmul.f32 %v3510_v14, %v1147_v58 }
 0x1b3   : > { %2608 = vmatmul.mubr.msk.f32.gmra.mrb[6].mxu0 %vm540_vm0, %v1235_v0  ;;  %2658 = vmatmul.mubr.msk.f32.gmra.mrb[22].mxu1 %vm540_vm0, %v1235_v0  ;;  %v1241_v35 = vadd.f32 %v3540_v11, %v1202_v48 }
 0x1b4   : > { %2610 = vmatprep.mubr.msk.f32.mxu0 %vm540_vm0, %v1236_v18  ;;  %2660 = vmatprep.mubr.msk.f32.mxu1 %vm540_vm0, %v1236_v18  ;;  %v1204_v10 = vmul.f32 %v3510_v14, %v1149_v41  ;;  %v1242_v33 = vadd.f32 %v3540_v11, %v1203_v9  ;;  %v4459_v14 = vld [vmem:[#allocation40_spill] sm:$0xff] }
 0x1b6   : > { %v1243_v31 = vadd.f32 %v3540_v11, %v1204_v10  ;;  %v1854_v11 = vld [vmem:[%s4371_s9] sm:$0xff] }
 0x1b7   : > { %2611 = vmatmul.mubr.msk.f32.gmra.mrb[8].mxu0 %vm540_vm0, %v1237_v47  ;;  %2661 = vmatmul.mubr.msk.f32.gmra.mrb[24].mxu1 %vm540_vm0, %v1237_v47 }
 0x1b8   : > { %2613 = vmatprep.mubr.msk.f32.mxu0 %vm540_vm0, %v1238_v51  ;;  %2663 = vmatprep.mubr.msk.f32.mxu1 %vm540_vm0, %v1238_v51 }
 0x1b9   : > { %2696 = vmatprep.subr.mxu0 %v1854_v11 }
 0x1ba   : > { %2697 = vmatpush3.msra.mxu0 %v1854_v11 }
 0x1bb   : > { %2614 = vmatmul.mubr.msk.f32.gmra.mrb[10].mxu0 %vm540_vm0, %v1239_v7  ;;  %2664 = vmatmul.mubr.msk.f32.gmra.mrb[26].mxu1 %vm540_vm0, %v1239_v7 }
 0x1bc   : > { %2616 = vmatprep.mubr.msk.f32.mxu0 %vm540_vm0, %v1240_v43  ;;  %2666 = vmatprep.mubr.msk.f32.mxu1 %vm540_vm0, %v1240_v43 }
 0x1bf   : > { %2617 = vmatmul.mubr.msk.f32.gmra.mrb[12].mxu0 %vm540_vm0, %v1241_v35  ;;  %2667 = vmatmul.mubr.msk.f32.gmra.mrb[28].mxu1 %vm540_vm0, %v1241_v35 }
 0x1c0   : > { %2619 = vmatprep.mubr.msk.f32.mxu0 %vm540_vm0, %v1242_v33  ;;  %2669 = vmatprep.mubr.msk.f32.mxu1 %vm540_vm0, %v1242_v33 }
 0x1c3   : > { %2620 = vmatmul.mubr.msk.f32.gmra.mrb[14].mxu0 %vm540_vm0, %v1243_v31  ;;  %2670 = vmatmul.mubr.msk.f32.gmra.mrb[30].mxu1 %vm540_vm0, %v1243_v31 }
 0x1c4   : > { %2672 = vmatprep.mubr.msk.f32.mxu1 %vm540_vm0, %v4459_v14 }
 0x1c7   : > { %2673 = vmatmul.mubr.msk.f32.gmra.mrb[32].mxu1 %vm540_vm0, %v3605_v24 }
 0x1c8   : > { %2675 = vmatprep.mubr.msk.f32.mxu1 %vm540_vm0, %v3609_v22 }
 0x1cb   : > { %2676 = vmatmul.mubr.msk.f32.gmra.mrb[34].mxu1 %vm540_vm0, %v3636_v20 }
 0x1cc   : > { %2678 = vmatprep.mubr.msk.f32.mxu1 %vm540_vm0, %v3652_v30 }
 0x1cf   : > { %2679 = vmatmul.mubr.msk.f32.gmra.mrb[36].mxu1 %vm540_vm0, %v3682_v46 }
 0x1d0   : > { %2681 = vmatprep.mubr.msk.f32.mxu1 %vm540_vm0, %v3687_v53 }
 0x1d3   : > { %2682 = vmatmul.mubr.msk.f32.gmra.mrb[38].mxu1 %vm540_vm0, %v3719_v27 }
 0x1d4   : > { %2684 = vmatprep.mubr.msk.f32.mxu1 %vm540_vm0, %v3735_v36 }
 0x1d7   : > { %2685 = vmatmul.mubr.msk.f32.gmra.mrb[40].mxu1 %vm540_vm0, %v3763_v52 }
 0x1d8   : > { %2687 = vmatprep.mubr.msk.f32.mxu1 %vm540_vm0, %v3771_v26 }
 0x1db   : > { %2688 = vmatmul.mubr.msk.f32.gmra.mrb[42].mxu1 %vm540_vm0, %v3814_v62 }
 0x1dc   : > { %2690 = vmatprep.mubr.msk.f32.mxu1 %vm540_vm0, %v3824_v17 }
 0x1df   : > { %2691 = vmatmul.mubr.msk.f32.gmra.mrb[44].mxu1 %vm540_vm0, %v3834_v13 }
 0x1e0   : > { %2693 = vmatprep.mubr.msk.f32.mxu1 %vm540_vm0, %v3851_v34 }
 0x1e3   : > { %2694 = vmatmul.mubr.msk.f32.gmra.mrb[46].mxu1 %vm540_vm0, %v3874_v4 }
 0x241   : > { %v4022_v24 = vpop.f32.mrb[0].mxu1 }
 0x242   : > { %v4024_v22 = vpop.f32.mrb[1].mxu1 }
 0x248   : > { %v4026_v20 = vpop.f32.mrb[2].mxu1 }
 0x249   : > { %v4028_v30 = vpop.f32.mrb[3].mxu1 }
 0x24f   : > { %v4030_v46 = vpop.f32.mrb[4].mxu1 }
 0x250   : > { %v4032_v53 = vpop.f32.mrb[5].mxu1 }
 0x254   : > { %v4034_v27 = vpop.f32.mrb[6].mxu1 }
 0x255   : > { %v4036_v36 = vpop.f32.mrb[7].mxu1 }
 0x25c   : > { %v4038_v52 = vpop.f32.mrb[8].mxu1 }
 0x25d   : > { %v4040_v26 = vpop.f32.mrb[9].mxu1 }
 0x265   : > { %v4042_v62 = vpop.f32.mrb[10].mxu1 }
 0x266   : > { %v4044_v17 = vpop.f32.mrb[11].mxu1 }
 0x269   : > { %v4046_v13 = vpop.f32.mrb[12].mxu1 }
 0x26a   : > { %v4048_v34 = vpop.f32.mrb[13].mxu1 }
 0x26e   : > { %v4050_v4 = vpop.f32.mrb[14].mxu1 }
 0x26f   : > { %v4052_v45 = vpop.f32.mrb[15].mxu1 }
 0x27a   : > { %v2600_v42 = vpop.f32.mrb[0].mxu0  ;;  %v2650_v40 = vpop.f32.mrb[16].mxu1 }
 0x27b   : > { %v1436_v57 = vadd.f32 %v2600_v42, %v4062_v61  ;;  %v1669_v29 = vadd.f32 %v2650_v40, %v4057_v25  ;;  %v1430_v15 = vpop.f32.mrb[1].mxu0  ;;  %v1663_v50 = vpop.f32.mrb[17].mxu1 }
 0x27c   : > { %v1431_v5 = vadd.f32 %v4062_v61, %v1430_v15  ;;  %v1664_v38 = vadd.f32 %v4057_v25, %v1663_v50 }
 0x27d   : > { %v1823_v23 = vmul.f32 %v1669_v29, %v1436_v57 }
 0x27e   : > { %v1822_v12 = vmul.f32 %v1664_v38, %v1431_v5  ;;  %v2603_v56 = vpop.f32.mrb[2].mxu0  ;;  %v2653_v63 = vpop.f32.mrb[18].mxu1 }
 0x27f   : > { %v1446_v39 = vadd.f32 %v2603_v56, %v4062_v61  ;;  %v1679_v28 = vadd.f32 %v2653_v63, %v4057_v25  ;;  %v1440_v49 = vpop.f32.mrb[3].mxu0  ;;  %v1673_v0 = vpop.f32.mrb[19].mxu1 }
 0x280   : > { %v1441_v8 = vadd.f32 %v4062_v61, %v1440_v49  ;;  %v1674_v2 = vadd.f32 %v4057_v25, %v1673_v0  ;;  %2698 = vmatprep.mubr.msk.f32.mxu0 %vm540_vm0, %v1822_v12 }
 0x281   : > { %v1825_v37 = vmul.f32 %v1679_v28, %v1446_v39  ;;  %2699 = vmatmul.mubr.msk.f32.vlgmr.msra.gmra.mrb[16].mxu0 %vm540_vm0, %v1823_v23 }
 0x282   : > { %v1824_v16 = vmul.f32 %v1674_v2, %v1441_v8  ;;  %v2606_v18 = vpop.f32.mrb[4].mxu0  ;;  %v2656_v55 = vpop.f32.mrb[20].mxu1 }
 0x283   : > { %v1456_v6 = vadd.f32 %v2606_v18, %v4062_v61  ;;  %v1689_v32 = vadd.f32 %v2656_v55, %v4057_v25  ;;  %v1450_v54 = vpop.f32.mrb[5].mxu0  ;;  %v1683_v47 = vpop.f32.mrb[21].mxu1 }
 0x284   : > { %v1451_v44 = vadd.f32 %v4062_v61, %v1450_v54  ;;  %v1684_v21 = vadd.f32 %v4057_v25, %v1683_v47  ;;  %2701 = vmatprep.mubr.msk.f32.mxu0 %vm540_vm0, %v1824_v16 }
 0x285   : > { %v1827_v3 = vmul.f32 %v1689_v32, %v1456_v6  ;;  %2702 = vmatmul.mubr.msk.f32.gmra.mrb[18].mxu0 %vm540_vm0, %v1825_v37 }
 0x286   : > { %v1826_v1 = vmul.f32 %v1684_v21, %v1451_v44  ;;  %v2609_v51 = vpop.f32.mrb[6].mxu0  ;;  %v2659_v60 = vpop.f32.mrb[22].mxu1 }
 0x287   : > { %v1466_v19 = vadd.f32 %v2609_v51, %v4062_v61  ;;  %v1699_v58 = vadd.f32 %v2659_v60, %v4057_v25  ;;  %v1460_v7 = vpop.f32.mrb[7].mxu0  ;;  %v1693_v48 = vpop.f32.mrb[23].mxu1 }
 0x288   : > { %v1461_v59 = vadd.f32 %v4062_v61, %v1460_v7  ;;  %v1694_v41 = vadd.f32 %v4057_v25, %v1693_v48  ;;  %2704 = vmatprep.mubr.msk.f32.mxu0 %vm540_vm0, %v1826_v1  ;;  %v1516_v48 = vadd.f32 %v4022_v24, %v4062_v61 }
 0x289   : > { %v1829_v43 = vmul.f32 %v1699_v58, %v1466_v19  ;;  %2705 = vmatmul.mubr.msk.f32.gmra.mrb[20].mxu0 %vm540_vm0, %v1827_v3 }
 0x28a   : > { %v1828_v9 = vmul.f32 %v1694_v41, %v1461_v59  ;;  %v2612_v35 = vpop.f32.mrb[8].mxu0  ;;  %v2662_v10 = vpop.f32.mrb[24].mxu1 }
 0x28b   : > { %v1476_v33 = vadd.f32 %v2612_v35, %v4062_v61  ;;  %v1709_v31 = vadd.f32 %v2662_v10, %v4057_v25  ;;  %v1470_v14 = vpop.f32.mrb[9].mxu0  ;;  %v1703_v11 = vpop.f32.mrb[25].mxu1 }
 0x28c   : > { %v1471_v42 = vadd.f32 %v4062_v61, %v1470_v14  ;;  %v1704_v40 = vadd.f32 %v4057_v25, %v1703_v11  ;;  %2707 = vmatprep.mubr.msk.f32.mxu0 %vm540_vm0, %v1828_v9  ;;  %v1521_v11 = vadd.f32 %v4062_v61, %v4028_v30 }
 0x28d   : > { %v1831_v57 = vmul.f32 %v1709_v31, %v1476_v33  ;;  %2708 = vmatmul.mubr.msk.f32.gmra.mrb[22].mxu0 %vm540_vm0, %v1829_v43  ;;  %v1511_v43 = vadd.f32 %v4062_v61, %v4024_v22  ;;  %v1526_v31 = vadd.f32 %v4026_v20, %v4062_v61 }
 0x28e   : > { %v1830_v29 = vmul.f32 %v1704_v40, %v1471_v42  ;;  %v2615_v15 = vpop.f32.mrb[10].mxu0  ;;  %v2665_v50 = vpop.f32.mrb[26].mxu1 }
 0x28f   : > { %v1486_v5 = vadd.f32 %v2615_v15, %v4062_v61  ;;  %v1719_v38 = vadd.f32 %v2665_v50, %v4057_v25  ;;  %v1480_v23 = vpop.f32.mrb[11].mxu0  ;;  %v1713_v12 = vpop.f32.mrb[27].mxu1  ;;  %v1531_v50 = vadd.f32 %v4062_v61, %v4032_v53 }
 0x290   : > { %v1481_v56 = vadd.f32 %v4062_v61, %v1480_v23  ;;  %v1714_v63 = vadd.f32 %v4057_v25, %v1713_v12  ;;  %2710 = vmatprep.mubr.msk.f32.mxu0 %vm540_vm0, %v1830_v29  ;;  %v1536_v29 = vadd.f32 %v4030_v46, %v4062_v61  ;;  %v1546_v12 = vadd.f32 %v4034_v27, %v4062_v61 }
 0x291   : > { %v1833_v39 = vmul.f32 %v1719_v38, %v1486_v5  ;;  %2711 = vmatmul.mubr.msk.f32.gmra.mrb[24].mxu0 %vm540_vm0, %v1831_v57 }
 0x292   : > { %v1832_v28 = vmul.f32 %v1714_v63, %v1481_v56  ;;  %v2618_v49 = vpop.f32.mrb[12].mxu0  ;;  %v2668_v0 = vpop.f32.mrb[28].mxu1  ;;  %v1541_v63 = vadd.f32 %v4062_v61, %v4036_v36 }
 0x293   : > { %v1496_v8 = vadd.f32 %v2618_v49, %v4062_v61  ;;  %v1729_v2 = vadd.f32 %v2668_v0, %v4057_v25  ;;  %v1490_v37 = vpop.f32.mrb[13].mxu0  ;;  %v1723_v16 = vpop.f32.mrb[29].mxu1  ;;  %v1556_v0 = vadd.f32 %v4038_v52, %v4062_v61 }
 0x294   : > { %v1491_v18 = vadd.f32 %v4062_v61, %v1490_v37  ;;  %v1724_v55 = vadd.f32 %v4057_v25, %v1723_v16  ;;  %2713 = vmatprep.mubr.msk.f32.mxu0 %vm540_vm0, %v1832_v28 }
 0x295   : > { %v1835_v6 = vmul.f32 %v1729_v2, %v1496_v8  ;;  %2714 = vmatmul.mubr.msk.f32.gmra.mrb[26].mxu0 %vm540_vm0, %v1833_v39  ;;  %v1551_v2 = vadd.f32 %v4062_v61, %v4040_v26 }
 0x296   : > { %v1834_v32 = vmul.f32 %v1724_v55, %v1491_v18  ;;  %v2621_v54 = vpop.f32.mrb[14].mxu0  ;;  %v2671_v47 = vpop.f32.mrb[30].mxu1  ;;  %v1566_v55 = vadd.f32 %v4042_v62, %v4062_v61 }
 0x297   : > { %v1506_v44 = vadd.f32 %v2621_v54, %v4062_v61  ;;  %v1739_v21 = vadd.f32 %v2671_v47, %v4057_v25  ;;  %v1500_v3 = vpop.f32.mrb[15].mxu0  ;;  %v1733_v1 = vpop.f32.mrb[31].mxu1 }
 0x298   : > { %v1501_v51 = vadd.f32 %v4062_v61, %v1500_v3  ;;  %v1734_v60 = vadd.f32 %v4057_v25, %v1733_v1  ;;  %2716 = vmatprep.mubr.msk.f32.mxu0 %vm540_vm0, %v1834_v32  ;;  %v1561_v32 = vadd.f32 %v4062_v61, %v4044_v17  ;;  %v1571_v1 = vadd.f32 %v4062_v61, %v4048_v34 }
 0x299   : > { %v1837_v19 = vmul.f32 %v1739_v21, %v1506_v44  ;;  %2717 = vmatmul.mubr.msk.f32.gmra.mrb[28].mxu0 %vm540_vm0, %v1835_v6  ;;  %v1576_v21 = vadd.f32 %v4046_v13, %v4062_v61 }
 0x29a   : > { %v1836_v58 = vmul.f32 %v1734_v60, %v1501_v51  ;;  %v2674_v7 = vpop.f32.mrb[32].mxu1 }
 0x29b   : > { %v1749_v59 = vadd.f32 %v2674_v7, %v4057_v25  ;;  %v1743_v41 = vpop.f32.mrb[33].mxu1 }
 0x29c   : > { %v1744_v9 = vadd.f32 %v4057_v25, %v1743_v41  ;;  %2719 = vmatprep.mubr.msk.f32.mxu0 %vm540_vm0, %v1836_v58  ;;  %v1586_v58 = vadd.f32 %v4050_v4, %v4062_v61  ;;  %v4179_v4 = vld [vmem:[%s4372_s10] ss:$0 sm:$0xff] }
 0x29d   : > { %v1839_v35 = vmul.f32 %v1749_v59, %v1516_v48  ;;  %2720 = vmatmul.mubr.msk.f32.gmra.mrb[30].mxu0 %vm540_vm0, %v1837_v19  ;;  %v1581_v48 = vadd.f32 %v4062_v61, %v4052_v45  ;;  %v4184_v45 = vld [vmem:[%s4373_s11] ss:$0 sm:$0xff] }
 0x29e   : > { %v1838_v10 = vmul.f32 %v1744_v9, %v1511_v43  ;;  %v2677_v33 = vpop.f32.mrb[34].mxu1 }
 0x29f   : > { %v1759_v24 = vadd.f32 %v2677_v33, %v4057_v25  ;;  %v1753_v14 = vpop.f32.mrb[35].mxu1 }
 0x2a0   : > { %v1754_v22 = vadd.f32 %v4057_v25, %v1753_v14  ;;  %2722 = vmatprep.mubr.msk.f32.mxu0 %vm540_vm0, %v1838_v10 }
 0x2a1   : > { %v1841_v42 = vmul.f32 %v1759_v24, %v1526_v31  ;;  %2723 = vmatmul.mubr.msk.f32.gmra.mrb[32].mxu0 %vm540_vm0, %v1839_v35  ;;  %v4460_v31 = vld [vmem:[#allocation19_spill] sm:$0xff] }
 0x2a2   : > { %v1840_v40 = vmul.f32 %v1754_v22, %v1521_v11  ;;  %v2680_v57 = vpop.f32.mrb[36].mxu1  ;;  %v4461_v22 = vld [vmem:[#allocation18_spill] sm:$0xff] }
 0x2a3   : > { %v1769_v20 = vadd.f32 %v2680_v57, %v4057_v25  ;;  %v1763_v15 = vpop.f32.mrb[37].mxu1 }
 0x2a4   : > { %v1764_v30 = vadd.f32 %v4057_v25, %v1763_v15  ;;  %2725 = vmatprep.mubr.msk.f32.mxu0 %vm540_vm0, %v1840_v40  ;;  %v4462_v15 = vld [vmem:[#allocation21_spill] sm:$0xff] }
 0x2a5   : > { %v1843_v5 = vmul.f32 %v1769_v20, %v1536_v29  ;;  %2726 = vmatmul.mubr.msk.f32.gmra.mrb[34].mxu0 %vm540_vm0, %v1841_v42 }
 0x2a6   : > { %v1842_v38 = vmul.f32 %v1764_v30, %v1531_v50  ;;  %v2683_v23 = vpop.f32.mrb[38].mxu1 }
 0x2a7   : > { %v1779_v46 = vadd.f32 %v2683_v23, %v4057_v25  ;;  %v1773_v56 = vpop.f32.mrb[39].mxu1 }
 0x2a8   : > { %v1774_v53 = vadd.f32 %v4057_v25, %v1773_v56  ;;  %2728 = vmatprep.mubr.msk.f32.mxu0 %vm540_vm0, %v1842_v38  ;;  %v4463_v38 = vld [vmem:[#allocation20_spill] sm:$0xff] }
 0x2a9   : > { %v1845_v39 = vmul.f32 %v1779_v46, %v1546_v12  ;;  %2729 = vmatmul.mubr.msk.f32.gmra.mrb[36].mxu0 %vm540_vm0, %v1843_v5 }
 0x2aa   : > { %v1844_v28 = vmul.f32 %v1774_v53, %v1541_v63  ;;  %v2686_v49 = vpop.f32.mrb[40].mxu1  ;;  %v4464_v53 = vld [vmem:[#allocation23_spill] sm:$0xff] }
 0x2ab   : > { %v1789_v27 = vadd.f32 %v2686_v49, %v4057_v25  ;;  %v1783_v8 = vpop.f32.mrb[41].mxu1 }
 0x2ac   : > { %v1784_v36 = vadd.f32 %v4057_v25, %v1783_v8  ;;  %2731 = vmatprep.mubr.msk.f32.mxu0 %vm540_vm0, %v1844_v28 }
 0x2ad   : > { %v1847_v37 = vmul.f32 %v1789_v27, %v1556_v0  ;;  %2732 = vmatmul.mubr.msk.f32.gmra.mrb[38].mxu0 %vm540_vm0, %v1845_v39  ;;  %v4465_v0 = vld [vmem:[#allocation22_spill] sm:$0xff] }
 0x2ae   : > { %v1846_v16 = vmul.f32 %v1784_v36, %v1551_v2  ;;  %v2689_v18 = vpop.f32.mrb[42].mxu1 }
 0x2af   : > { %v1799_v52 = vadd.f32 %v2689_v18, %v4057_v25  ;;  %v1793_v6 = vpop.f32.mrb[43].mxu1 }
 0x2b0   : > { %v1794_v26 = vadd.f32 %v4057_v25, %v1793_v6  ;;  %2734 = vmatprep.mubr.msk.f32.mxu0 %vm540_vm0, %v1846_v16  ;;  %v4466_v16 = vld [vmem:[#allocation25_spill] sm:$0xff]  ;;  %v4467_v6 = vld [vmem:[#allocation24_spill] sm:$0xff] }
 0x2b1   : > { %v1849_v54 = vmul.f32 %v1799_v52, %v1566_v55  ;;  %2735 = vmatmul.mubr.msk.f32.gmra.mrb[40].mxu0 %vm540_vm0, %v1847_v37 }
 0x2b2   : > { %v1848_v47 = vmul.f32 %v1794_v26, %v1561_v32  ;;  %v2692_v44 = vpop.f32.mrb[44].mxu1 }
 0x2b3   : > { %v1809_v62 = vadd.f32 %v2692_v44, %v4057_v25  ;;  %v1803_v3 = vpop.f32.mrb[45].mxu1 }
 0x2b4   : > { %v1804_v17 = vadd.f32 %v4057_v25, %v1803_v3  ;;  %2737 = vmatprep.mubr.msk.f32.mxu0 %vm540_vm0, %v1848_v47 }
 0x2b5   : > { %v1851_v51 = vmul.f32 %v1809_v62, %v1576_v21  ;;  %2738 = vmatmul.mubr.msk.f32.gmra.mrb[42].mxu0 %vm540_vm0, %v1849_v54  ;;  %v4468_v21 = vld [vmem:[#allocation27_spill] sm:$0xff] }
 0x2b6   : > { %v1850_v60 = vmul.f32 %v1804_v17, %v1571_v1  ;;  %v2695_v19 = vpop.f32.mrb[46].mxu1  ;;  %v4469_v17 = vld [vmem:[#allocation26_spill] sm:$0xff] }
 0x2b7   : > { %v1819_v13 = vadd.f32 %v2695_v19, %v4057_v25  ;;  %v1813_v7 = vpop.f32.mrb[47].mxu1 }
 0x2b8   : > { %v1814_v34 = vadd.f32 %v4057_v25, %v1813_v7  ;;  %2740 = vmatprep.mubr.msk.f32.mxu0 %vm540_vm0, %v1850_v60  ;;  %v4470_v7 = vld [vmem:[#allocation29_spill] sm:$0xff] }
 0x2b9   : > { %v1853_v59 = vmul.f32 %v1819_v13, %v1586_v58  ;;  %2741 = vmatmul.mubr.msk.f32.gmra.mrb[44].mxu0 %vm540_vm0, %v1851_v51 }
 0x2ba   : > { %v1852_v41 = vmul.f32 %v1814_v34, %v1581_v48 }
 0x2bc   : > { %2743 = vmatprep.mubr.msk.f32.mxu0 %vm540_vm0, %v1852_v41  ;;  %v4471_v41 = vld [vmem:[#allocation28_spill] sm:$0xff] }
 0x2bd   : > { %2744 = vmatmul.mubr.msk.f32.gmra.mrb[46].mxu0 %vm540_vm0, %v1853_v59 }
 0x354   : > { %v2700_v43 = vpop.f32.mrb[16].mxu0 }
 0x355   : > { %v2030_v25 = vadd.f32 %v2700_v43, %v4179_v4  ;;  %v2024_v61 = vpop.f32.mrb[17].mxu0 }
 0x356   : > { %v2025_v9 = vadd.f32 %v4179_v4, %v2024_v61 }
 0x357   : > { %v2191_v35 = vmul.f32 %v4184_v45, %v2030_v25 }
 0x358   : > { %v2190_v10 = vmul.f32 %v4184_v45, %v2025_v9  ;;  %v2703_v33 = vpop.f32.mrb[18].mxu0 }
 0x359   : > { %v2223_v24 = vadd.f32 %v2191_v35, %v4460_v31  ;;  %v2040_v14 = vadd.f32 %v2703_v33, %v4179_v4  ;;  %v2034_v11 = vpop.f32.mrb[19].mxu0 }
 0x35a   : > { %v2222_v42 = vadd.f32 %v2190_v10, %v4461_v22  ;;  %v2035_v40 = vadd.f32 %v4179_v4, %v2034_v11  ;;  %v4472_v10 = vld [vmem:[#allocation31_spill] sm:$0xff] }
 0x35b   : > { %2255 = vst.msk [vmem:[%s4194_s28 + $0x8] sm:$0xff] %vm540_vm0, %v2223_v24  ;;  %v2193_v57 = vmul.f32 %v4184_v45, %v2040_v14  ;;  %v4473_v14 = vld [vmem:[#allocation30_spill] sm:$0xff] }
 0x35c   : > { %2254 = vst.msk [vmem:[%s4194_s28] sm:$0xff] %vm540_vm0, %v2222_v42  ;;  %v2192_v29 = vmul.f32 %v4184_v45, %v2035_v40  ;;  %v2706_v20 = vpop.f32.mrb[20].mxu0 }
 0x35d   : > { %v2225_v50 = vadd.f32 %v2193_v57, %v4462_v15  ;;  %v2050_v30 = vadd.f32 %v2706_v20, %v4179_v4  ;;  %v2044_v5 = vpop.f32.mrb[21].mxu0 }
 0x35e   : > { %v2224_v23 = vadd.f32 %v2192_v29, %v4463_v38  ;;  %v2045_v12 = vadd.f32 %v4179_v4, %v2044_v5  ;;  %v4474_v29 = vld [vmem:[#allocation33_spill] sm:$0xff] }
 0x35f   : > { %2257 = vst.msk [vmem:[%s4194_s28 + $0x18] sm:$0xff] %vm540_vm0, %v2225_v50  ;;  %v2195_v46 = vmul.f32 %v4184_v45, %v2050_v30  ;;  %v4475_v30 = vld [vmem:[#allocation32_spill] sm:$0xff] }
 0x360   : > { %2256 = vst.msk [vmem:[%s4194_s28 + $0x10] sm:$0xff] %vm540_vm0, %v2224_v23  ;;  %v2194_v56 = vmul.f32 %v4184_v45, %v2045_v12  ;;  %v2709_v63 = vpop.f32.mrb[22].mxu0 }
 0x361   : > { %v2227_v39 = vadd.f32 %v2195_v46, %v4464_v53  ;;  %v2060_v28 = vadd.f32 %v2709_v63, %v4179_v4  ;;  %v2054_v49 = vpop.f32.mrb[23].mxu0 }
 0x362   : > { %v2226_v27 = vadd.f32 %v2194_v56, %v4465_v0  ;;  %v2055_v8 = vadd.f32 %v4179_v4, %v2054_v49  ;;  %v4476_v56 = vld [vmem:[#allocation4_spill] sm:$0xff] }
 0x363   : > { %2259 = vst.msk [vmem:[%s4194_s28 + $0x28] sm:$0xff] %vm540_vm0, %v2227_v39  ;;  %v2197_v2 = vmul.f32 %v4184_v45, %v2060_v28  ;;  %v4477_v28 = vld [vmem:[#allocation2_spill] sm:$0xff] }
 0x364   : > { %2258 = vst.msk [vmem:[%s4194_s28 + $0x20] sm:$0xff] %vm540_vm0, %v2226_v27  ;;  %v2196_v36 = vmul.f32 %v4184_v45, %v2055_v8  ;;  %v2712_v37 = vpop.f32.mrb[24].mxu0 }
 0x365   : > { %v2229_v18 = vadd.f32 %v2197_v2, %v4466_v16  ;;  %v2070_v55 = vadd.f32 %v2712_v37, %v4179_v4  ;;  %v2064_v52 = vpop.f32.mrb[25].mxu0 }
 0x366   : > { %v2228_v32 = vadd.f32 %v2196_v36, %v4467_v6  ;;  %v2065_v26 = vadd.f32 %v4179_v4, %v2064_v52  ;;  %v4478_v36 = vld [vmem:[#allocation5_spill] sm:$0xff] }
 0x367   : > { %2261 = vst.msk [vmem:[%s4194_s28 + $0x38] sm:$0xff] %vm540_vm0, %v2229_v18  ;;  %v2199_v54 = vmul.f32 %v4184_v45, %v2070_v55  ;;  %v4479_v55 = vld [vmem:[#allocation3_spill] sm:$0xff] }
 0x368   : > { %2260 = vst.msk [vmem:[%s4194_s28 + $0x30] sm:$0xff] %vm540_vm0, %v2228_v32  ;;  %v2198_v47 = vmul.f32 %v4184_v45, %v2065_v26  ;;  %v2715_v44 = vpop.f32.mrb[26].mxu0 }
 0x369   : > { %v2231_v62 = vadd.f32 %v2199_v54, %v4468_v21  ;;  %v2080_v3 = vadd.f32 %v2715_v44, %v4179_v4  ;;  %v2074_v1 = vpop.f32.mrb[27].mxu0 }
 0x36a   : > { %v2230_v51 = vadd.f32 %v2198_v47, %v4469_v17  ;;  %v2075_v60 = vadd.f32 %v4179_v4, %v2074_v1  ;;  %v4480_v47 = vld [vmem:[#allocation7_spill] sm:$0xff] }
 0x36b   : > { %2263 = vst.msk [vmem:[%s4194_s28 + $0x48] sm:$0xff] %vm540_vm0, %v2231_v62  ;;  %v2201_v19 = vmul.f32 %v4184_v45, %v2080_v3  ;;  %v4481_v3 = vld [vmem:[#allocation6_spill] sm:$0xff] }
 0x36c   : > { %2262 = vst.msk [vmem:[%s4194_s28 + $0x40] sm:$0xff] %vm540_vm0, %v2230_v51  ;;  %v2200_v58 = vmul.f32 %v4184_v45, %v2075_v60  ;;  %v2718_v13 = vpop.f32.mrb[28].mxu0 }
 0x36d   : > { %v2233_v48 = vadd.f32 %v2201_v19, %v4470_v7  ;;  %v2090_v34 = vadd.f32 %v2718_v13, %v4179_v4  ;;  %v2084_v59 = vpop.f32.mrb[29].mxu0 }
 0x36e   : > { %v2232_v43 = vadd.f32 %v2200_v58, %v4471_v41  ;;  %v2085_v25 = vadd.f32 %v4179_v4, %v2084_v59  ;;  %v4482_v58 = vld [vmem:[#allocation9_spill] sm:$0xff] }
 0x36f   : > { %2265 = vst.msk [vmem:[%s4194_s28 + $0x58] sm:$0xff] %vm540_vm0, %v2233_v48  ;;  %v2203_v61 = vmul.f32 %v4184_v45, %v2090_v34  ;;  %v4483_v34 = vld [vmem:[#allocation8_spill] sm:$0xff] }
 0x370   : > { %2264 = vst.msk [vmem:[%s4194_s28 + $0x50] sm:$0xff] %vm540_vm0, %v2232_v43  ;;  %v2202_v9 = vmul.f32 %v4184_v45, %v2085_v25  ;;  %v2721_v35 = vpop.f32.mrb[30].mxu0 }
 0x371   : > { %v2235_v33 = vadd.f32 %v2203_v61, %v4472_v10  ;;  %v2100_v31 = vadd.f32 %v2721_v35, %v4179_v4  ;;  %v2094_v24 = vpop.f32.mrb[31].mxu0 }
 0x372   : > { %v2234_v11 = vadd.f32 %v2202_v9, %v4473_v14  ;;  %v2095_v22 = vadd.f32 %v4179_v4, %v2094_v24  ;;  %v4484_v9 = vld [vmem:[#allocation11_spill] sm:$0xff] }
 0x373   : > { %2267 = vst.msk [vmem:[%s4194_s28 + $0x68] sm:$0xff] %vm540_vm0, %v2235_v33  ;;  %v2205_v42 = vmul.f32 %v4184_v45, %v2100_v31  ;;  %v4485_v31 = vld [vmem:[#allocation10_spill] sm:$0xff] }
 0x374   : > { %2266 = vst.msk [vmem:[%s4194_s28 + $0x60] sm:$0xff] %vm540_vm0, %v2234_v11  ;;  %v2204_v40 = vmul.f32 %v4184_v45, %v2095_v22  ;;  %v2724_v57 = vpop.f32.mrb[32].mxu0 }
 0x375   : > { %v2237_v20 = vadd.f32 %v2205_v42, %v4474_v29  ;;  %v2110_v15 = vadd.f32 %v2724_v57, %v4179_v4  ;;  %v2104_v50 = vpop.f32.mrb[33].mxu0 }
 0x376   : > { %v2236_v5 = vadd.f32 %v2204_v40, %v4475_v30  ;;  %v2105_v38 = vadd.f32 %v4179_v4, %v2104_v50  ;;  %v4486_v40 = vld [vmem:[#allocation13_spill] sm:$0xff] }
 0x377   : > { %2269 = vst.msk [vmem:[%s4194_s28 + $0x78] sm:$0xff] %vm540_vm0, %v2237_v20  ;;  %v2207_v23 = vmul.f32 %v4184_v45, %v2110_v15  ;;  %v4487_v15 = vld [vmem:[#allocation12_spill] sm:$0xff] }
 0x378   : > { %2268 = vst.msk [vmem:[%s4194_s28 + $0x70] sm:$0xff] %vm540_vm0, %v2236_v5  ;;  %v2206_v12 = vmul.f32 %v4184_v45, %v2105_v38  ;;  %v2727_v46 = vpop.f32.mrb[34].mxu0 }
 0x379   : > { %v2239_v63 = vadd.f32 %v2207_v23, %v4476_v56  ;;  %v2120_v53 = vadd.f32 %v2727_v46, %v4179_v4  ;;  %v2114_v39 = vpop.f32.mrb[35].mxu0 }
 0x37a   : > { %v2238_v49 = vadd.f32 %v2206_v12, %v4477_v28  ;;  %v2115_v0 = vadd.f32 %v4179_v4, %v2114_v39  ;;  %v4488_v12 = vld [vmem:[#allocation15_spill] sm:$0xff] }
 0x37b   : > { %2271 = vst.msk [vmem:[%s4194_s28 + $0x88] sm:$0xff] %vm540_vm0, %v2239_v63  ;;  %v2209_v27 = vmul.f32 %v4184_v45, %v2120_v53  ;;  %v4489_v53 = vld [vmem:[#allocation14_spill] sm:$0xff] }
 0x37c   : > { %2270 = vst.msk [vmem:[%s4194_s28 + $0x80] sm:$0xff] %vm540_vm0, %v2238_v49  ;;  %v2208_v8 = vmul.f32 %v4184_v45, %v2115_v0  ;;  %v2730_v2 = vpop.f32.mrb[36].mxu0 }
 0x37d   : > { %v2241_v37 = vadd.f32 %v2209_v27, %v4478_v36  ;;  %v2130_v16 = vadd.f32 %v2730_v2, %v4179_v4  ;;  %v2124_v18 = vpop.f32.mrb[37].mxu0  ;;  %v4490_v27 = vld [vmem:[#allocation17_spill] sm:$0xff]  ;;  %v4491_v2 = vld [vmem:[#allocation16_spill] sm:$0xff] }
 0x37e   : > { %v2240_v52 = vadd.f32 %v2208_v8, %v4479_v55  ;;  %v2125_v6 = vadd.f32 %v4179_v4, %v2124_v18 }
 0x37f   : > { %2273 = vst.msk [vmem:[%s4194_s28 + $0x98] sm:$0xff] %vm540_vm0, %v2241_v37  ;;  %v2211_v32 = vmul.f32 %v4184_v45, %v2130_v16 }
 0x380   : > { %2272 = vst.msk [vmem:[%s4194_s28 + $0x90] sm:$0xff] %vm540_vm0, %v2240_v52  ;;  %v2210_v26 = vmul.f32 %v4184_v45, %v2125_v6  ;;  %v2733_v54 = vpop.f32.mrb[38].mxu0 }
 0x381   : > { %v2243_v44 = vadd.f32 %v2211_v32, %v4480_v47  ;;  %v2140_v21 = vadd.f32 %v2733_v54, %v4179_v4  ;;  %v2134_v62 = vpop.f32.mrb[39].mxu0 }
 0x382   : > { %v2242_v1 = vadd.f32 %v2210_v26, %v4481_v3  ;;  %v2135_v17 = vadd.f32 %v4179_v4, %v2134_v62 }
 0x383   : > { %2275 = vst.msk [vmem:[%s4194_s28 + $0xa8] sm:$0xff] %vm540_vm0, %v2243_v44  ;;  %v2213_v51 = vmul.f32 %v4184_v45, %v2140_v21 }
 0x384   : > { %2274 = vst.msk [vmem:[%s4194_s28 + $0xa0] sm:$0xff] %vm540_vm0, %v2242_v1  ;;  %v2212_v60 = vmul.f32 %v4184_v45, %v2135_v17  ;;  %v2736_v19 = vpop.f32.mrb[40].mxu0 }
 0x385   : > { %v2245_v13 = vadd.f32 %v2213_v51, %v4482_v58  ;;  %v2150_v7 = vadd.f32 %v2736_v19, %v4179_v4  ;;  %v2144_v48 = vpop.f32.mrb[41].mxu0 }
 0x386   : > { %v2244_v59 = vadd.f32 %v2212_v60, %v4483_v34  ;;  %v2145_v41 = vadd.f32 %v4179_v4, %v2144_v48 }
 0x387   : > { %2277 = vst.msk [vmem:[%s4194_s28 + $0xb8] sm:$0xff] %vm540_vm0, %v2245_v13  ;;  %v2215_v43 = vmul.f32 %v4184_v45, %v2150_v7 }
 0x388   : > { %2276 = vst.msk [vmem:[%s4194_s28 + $0xb0] sm:$0xff] %vm540_vm0, %v2244_v59  ;;  %v2214_v25 = vmul.f32 %v4184_v45, %v2145_v41  ;;  %v2739_v61 = vpop.f32.mrb[42].mxu0 }
 0x389   : > { %v2247_v35 = vadd.f32 %v2215_v43, %v4484_v9  ;;  %v2160_v10 = vadd.f32 %v2739_v61, %v4179_v4  ;;  %v2154_v33 = vpop.f32.mrb[43].mxu0 }
 0x38a   : > { %v2246_v24 = vadd.f32 %v2214_v25, %v4485_v31  ;;  %v2155_v14 = vadd.f32 %v4179_v4, %v2154_v33 }
 0x38b   : > { %2279 = vst.msk [vmem:[%s4194_s28 + $0xc8] sm:$0xff] %vm540_vm0, %v2247_v35  ;;  %v2217_v11 = vmul.f32 %v4184_v45, %v2160_v10 }
 0x38c   : > { %2278 = vst.msk [vmem:[%s4194_s28 + $0xc0] sm:$0xff] %vm540_vm0, %v2246_v24  ;;  %v2216_v22 = vmul.f32 %v4184_v45, %v2155_v14  ;;  %v2742_v42 = vpop.f32.mrb[44].mxu0 }
 0x38d   : > { %v2249_v57 = vadd.f32 %v2217_v11, %v4486_v40  ;;  %v2170_v29 = vadd.f32 %v2742_v42, %v4179_v4  ;;  %v2164_v20 = vpop.f32.mrb[45].mxu0 }
 0x38e   : > { %v2248_v50 = vadd.f32 %v2216_v22, %v4487_v15  ;;  %v2165_v30 = vadd.f32 %v4179_v4, %v2164_v20 }
 0x38f   : > { %2281 = vst.msk [vmem:[%s4194_s28 + $0xd8] sm:$0xff] %vm540_vm0, %v2249_v57  ;;  %v2219_v5 = vmul.f32 %v4184_v45, %v2170_v29 }
 0x390   : > { %2280 = vst.msk [vmem:[%s4194_s28 + $0xd0] sm:$0xff] %vm540_vm0, %v2248_v50  ;;  %v2218_v38 = vmul.f32 %v4184_v45, %v2165_v30  ;;  %v2745_v23 = vpop.f32.mrb[46].mxu0 }
 0x391   : > { %v2251_v46 = vadd.f32 %v2219_v5, %v4488_v12  ;;  %v2180_v56 = vadd.f32 %v2745_v23, %v4179_v4  ;;  %v2174_v63 = vpop.f32.mrb[47].mxu0 }
 0x392   : > { %v2250_v39 = vadd.f32 %v2218_v38, %v4489_v53  ;;  %v2175_v28 = vadd.f32 %v4179_v4, %v2174_v63 }
 0x393   : > { %2283 = vst.msk [vmem:[%s4194_s28 + $0xe8] sm:$0xff] %vm540_vm0, %v2251_v46  ;;  %v2221_v49 = vmul.f32 %v4184_v45, %v2180_v56 }
 0x394   : > { %2282 = vst.msk [vmem:[%s4194_s28 + $0xe0] sm:$0xff] %vm540_vm0, %v2250_v39  ;;  %v2220_v0 = vmul.f32 %v4184_v45, %v2175_v28 }
 0x395   : > { %v2253_v8 = vadd.f32 %v2221_v49, %v4490_v27 }
 0x396   : > { %v2252_v36 = vadd.f32 %v2220_v0, %v4491_v2 }
 0x397   : > { %2285 = vst.msk [vmem:[%s4194_s28 + $0xf8] sm:$0xff] %vm540_vm0, %v2253_v8 }
 0x398   : > { %2284 = vst.msk [vmem:[%s4194_s28 + $0xf0] sm:$0xff] %vm540_vm0, %v2252_v36 }
 0x399 PF: > { %s22_s23 = sadd.s32 1, %s2922_s23   ;;  %s4492_s21 = smov %s2918_s22 }
 0x39a   : > { %p19_p5 = scmp.ge.s32.totalorder %s22_s23, 4   ;;  %s4493_s22 = smov %s4495_s24 }
 0x39c   :  { %21 = sbr.rel (!%p19_p5) target bundleno = 2 (0x2), region = 101 }

// kernel: nafblock_forward.4
= control target key start
LH: loop header
LB: loop body
LE: loop exit
PB: predicated region body
PF: predicated region fallthrough
CT: control target
= control target key end

     0   :  { %s4522_s30 = smov 0   ;;  %s10455_s0 = inlined_call_operand.vmem [shape: f32[2,18,18,8], index: 0, kind: input, shape index: {}]   ;;  %s10456_s1 = inlined_call_operand.vmem [shape: f32[2,18,18,8], index: 1, kind: input, shape index: {}]   ;;  %s10457_s2 = inlined_call_operand.vmem [shape: f32[9,8], index: 2, kind: input, shape index: {}]   ;;  %s10458_s3 = inlined_call_operand.vmem [shape: f32[9,8], index: 3, kind: input, shape index: {}]   ;;  %s10459_s4 = inlined_call_operand.vmem [shape: f32[1,8], index: 4, kind: input, shape index: {}]   ;;  %s10460_s5 = inlined_call_operand.vmem [shape: f32[1,8], index: 5, kind: input, shape index: {}]   ;;  %s10461_s6 = inlined_call_operand.vmem [shape: f32[8,8], index: 6, kind: input, shape index: {}]   ;;  %s10462_s7 = inlined_call_operand.vmem [shape: f32[8,8], index: 7, kind: input, shape index: {}]   ;;  %s10463_s8 = inlined_call_operand.vmem [shape: f32[1,8], index: 8, kind: input, shape index: {}]   ;;  %s10464_s9 = inlined_call_operand.vmem [shape: f32[2,1,8], index: 9, kind: output, shape index: {}]  }
   0x1 LB: > { %s4310_s10 = sadd.s32 4294967295, %s4468_s30   ;;  %p4314_p0 = scmp.ge.s32.totalorder %s4468_s30, 1  ;;  %s4468_s30 = sphi %s4522_s30, %s19_s30  }
   0x2   : > { %p297_p1 = scmp.lt.s32.totalorder %s4468_s30, 3 }
   0x4   : > { %p298_p2 = pnand %p4314_p0, %p297_p1 }
   0x6   : > { %301 = sbr.rel (%p298_p2) target bundleno = 1204 (0x4b4), region = 56 }
   0xd   : > { %p336_p3 = scmp.lt.s32.totalorder %s4310_s10, 1  ;;  %v4543_v0 = vld [vmem:[%s10457_s2] ss:$0 sm:$0xff]  ;;  %v4554_v3 = vld [vmem:[%s10457_s2 + $0x1] ss:$0 sm:$0xff]  ;;  %vm573_vm0 = vcmask 1046528  }
   0xe   : > { %vm819_vm1 = vcmask 1045504   ;;  %vm3923_vm2 = vcmask 64512   ;;  %vm4471_vm3 = vmmov 0   ;;  %vm4249_vm4 = vcmask 57344  }
   0xf   : > { %s12294_s10 = smov (!%p336_p3, %s4310_s10), 1 }
  0x10   : > { %s4355_s11 = smul.u32 432, %s12294_s10  ;;  %s348_s28 = scalar_lea.vmem %s10464_s9, %s12294_s10 }
  0x12   : > { %s4538_s14 = scalar_lea.vmem %s10455_s0, %s4355_s11  ;;  %s7415_s19 = scalar_lea.vmem %s10456_s1, %s4355_s11 }
  0x13   : > { %v4546_v1 = vld [vmem:[%s4538_s14] sm:$0xff]  ;;  %v4549_v2 = vld [vmem:[%s4538_s14 + $0x8] sm:$0xff]  ;;  %v4557_v4 = vld [vmem:[%s4538_s14 + $0x10] sm:$0x3] }
  0x14   : > { %10841 = vst [vmem:[#allocation2_spill] sm:$0xff] %v4546_v1  ;;  %10842 = vst [vmem:[#allocation3_spill] sm:$0xff] %v4549_v2  ;;  %v4560_v5 = vld [vmem:[%s4538_s14 + $0x18] sm:$0xff]  ;;  %v4563_v6 = vld [vmem:[%s4538_s14 + $0x20] sm:$0xff]  ;;  %v4570_v8 = vmul.f32 %v4543_v0, %v4546_v1  ;;  %v4580_v11 = vmul.f32 %v4543_v0, %v4549_v2  ;;  %v4588_v13 = vmul.f32 %v4554_v3, %v4546_v1 }
  0x15   : > { %10843 = vst [vmem:[#allocation4_spill] sm:$0xff] %v4557_v4  ;;  %10844 = vst [vmem:[#allocation5_spill] sm:$0xff] %v4560_v5  ;;  %v4566_v7 = vld [vmem:[%s4538_s14 + $0x28] sm:$0x3]  ;;  %v4573_v9 = vld [vmem:[%s4538_s14 + $0x30] sm:$0xff]  ;;  %v4584_v12 = vmul.f32 %v4543_v0, %v4560_v5  ;;  %v4592_v14 = vmul.f32 %v4554_v3, %v4549_v2  ;;  %v4602_v17 = vmul.f32 %v4543_v0, %v4563_v6 }
  0x16   : > { %10845 = vst [vmem:[#allocation6_spill] sm:$0xff] %v4563_v6  ;;  %10846 = vst [vmem:[#allocation7_spill] sm:$0xff] %v4566_v7  ;;  %v4576_v10 = vld [vmem:[%s4538_s14 + $0x38] sm:$0xff]  ;;  %v4595_v15 = vld [vmem:[%s4538_s14 + $0x40] sm:$0x3]  ;;  %v4606_v18 = vmul.f32 %v4543_v0, %v4573_v9  ;;  %v4610_v19 = vmul.f32 %v4554_v3, %v4557_v4  ;;  %v4614_v20 = vmul.f32 %v4554_v3, %v4560_v5 }
  0x17   : > { %10847 = vst [vmem:[#allocation8_spill] sm:$0xff] %v4573_v9  ;;  %10848 = vst [vmem:[#allocation9_spill] sm:$0xff] %v4576_v10  ;;  %v4598_v16 = vld [vmem:[%s4538_s14 + $0x48] sm:$0xff]  ;;  %v4617_v21 = vld [vmem:[%s4538_s14 + $0x50] sm:$0xff]  ;;  %v4627_v24 = vmul.f32 %v4543_v0, %v4576_v10  ;;  %v4635_v26 = vmul.f32 %v4554_v3, %v4563_v6  ;;  %v4639_v27 = vmul.f32 %v4554_v3, %v4566_v7 }
  0x18   : > { %10849 = vst [vmem:[#allocation10_spill] sm:$0xff] %v4595_v15  ;;  %10850 = vst [vmem:[#allocation11_spill] sm:$0xff] %v4598_v16  ;;  %v4620_v22 = vld [vmem:[%s4538_s14 + $0x58] sm:$0x3]  ;;  %v4623_v23 = vld [vmem:[%s4538_s14 + $0x60] sm:$0xff]  ;;  %v4631_v25 = vmul.f32 %v4543_v0, %v4598_v16  ;;  %v4649_v30 = vmul.f32 %v4543_v0, %v4617_v21  ;;  %v4657_v32 = vmul.f32 %v4554_v3, %v4573_v9 }
  0x19   : > { %10851 = vst [vmem:[#allocation12_spill] sm:$0xff] %v4617_v21  ;;  %10852 = vst [vmem:[#allocation13_spill] sm:$0xff] %v4620_v22  ;;  %v4642_v28 = vld [vmem:[%s4538_s14 + $0x68] sm:$0xff]  ;;  %v4645_v29 = vld [vmem:[%s4538_s14 + $0x78] sm:$0xff]  ;;  %v4653_v31 = vmul.f32 %v4543_v0, %v4623_v23  ;;  %v4661_v33 = vmul.f32 %v4554_v3, %v4576_v10  ;;  %v4682_v39 = vmul.f32 %v4554_v3, %v4595_v15 }
  0x1a   : > { %10853 = vst [vmem:[#allocation14_spill] sm:$0xff] %v4623_v23  ;;  %10854 = vst [vmem:[#allocation15_spill] sm:$0xff] %v4631_v25  ;;  %v4664_v34 = vld [vmem:[%s4538_s14 + $0x70] sm:$0x3]  ;;  %v4667_v35 = vld [vmem:[%s4538_s14 + $0x80] sm:$0xff]  ;;  %v4674_v37 = vmul.f32 %v4543_v0, %v4642_v28  ;;  %v4678_v38 = vmul.f32 %v4543_v0, %v4645_v29  ;;  %v4686_v40 = vmul.f32 %v4554_v3, %v4598_v16 }
  0x1b   : > { %10855 = vst [vmem:[#allocation16_spill] sm:$0xff] %v4642_v28  ;;  %10856 = vst [vmem:[#allocation17_spill] sm:$0xff] %v4645_v29  ;;  %v4670_v36 = vld [vmem:[%s4538_s14 + $0x90] sm:$0xff]  ;;  %v4689_v41 = vld [vmem:[%s4538_s14 + $0x88] sm:$0x3]  ;;  %v4699_v44 = vmul.f32 %v4543_v0, %v4667_v35  ;;  %v4707_v46 = vmul.f32 %v4554_v3, %v4617_v21  ;;  %v4711_v47 = vmul.f32 %v4554_v3, %v4620_v22  ;;  %v587_v25 = vrot.slane %v4682_v39, 1 }
  0x1c   : > { %10857 = vst [vmem:[#allocation18_spill] sm:$0xff] %v4649_v30  ;;  %10858 = vst [vmem:[#allocation19_spill] sm:$0xff] %v4653_v31  ;;  %v4692_v42 = vld [vmem:[%s4538_s14 + $0x98] sm:$0xff]  ;;  %v4695_v43 = vld [vmem:[%s4538_s14 + $0xa8] sm:$0xff]  ;;  %v4703_v45 = vmul.f32 %v4543_v0, %v4670_v36  ;;  %v4729_v52 = vmul.f32 %v4554_v3, %v4623_v23  ;;  %v4733_v53 = vmul.f32 %v4554_v3, %v4642_v28  ;;  %v577_v31 = vrot.slane %v4610_v19, 1 }
  0x1d   : > { %10859 = vst [vmem:[#allocation20_spill] sm:$0xff] %v4664_v34  ;;  %10860 = vst [vmem:[#allocation21_spill] sm:$0xff] %v4667_v35  ;;  %v4714_v48 = vld [vmem:[%s4538_s14 + $0xb0] sm:$0xff]  ;;  %v4717_v49 = vld [vmem:[%s4538_s14 + $0xc0] sm:$0xff]  ;;  %v4721_v50 = vmul.f32 %v4543_v0, %v4692_v42  ;;  %v4725_v51 = vmul.f32 %v4543_v0, %v4695_v43  ;;  %v4754_v59 = vmul.f32 %v4554_v3, %v4664_v34  ;;  %v585_v30 = vrot.slane %v4661_v33, 1 }
  0x1e   : > { %10861 = vst [vmem:[#allocation22_spill] sm:$0xff] %v4670_v36  ;;  %10862 = vst [vmem:[#allocation23_spill] sm:$0xff] %v4674_v37  ;;  %v4736_v54 = vld [vmem:[%s4538_s14 + $0xa0] sm:$0x3]  ;;  %v4739_v55 = vld [vmem:[%s4538_s14 + $0xc8] sm:$0xff]  ;;  %v4746_v57 = vmul.f32 %v4543_v0, %v4714_v48  ;;  %v4750_v58 = vmul.f32 %v4543_v0, %v4717_v49  ;;  %v4758_v60 = vmul.f32 %v4554_v3, %v4645_v29  ;;  %v575_v37 = vrot.slane %v4592_v14, 1 }
  0x1f   : > { %10863 = vst [vmem:[#allocation24_spill] sm:$0xff] %v4678_v38  ;;  %10864 = vst [vmem:[#allocation25_spill] sm:$0xff] %v4689_v41  ;;  %v4742_v56 = vld [vmem:[%s4538_s14 + $0xd8] sm:$0xff]  ;;  %v4764_v62 = vld [vmem:[%s4538_s14 + $0xe0] sm:$0xff]  ;;  %v4771_v28 = vmul.f32 %v4543_v0, %v4739_v55  ;;  %v4779_v23 = vmul.f32 %v4554_v3, %v4667_v35  ;;  %v4783_v29 = vmul.f32 %v4554_v3, %v4689_v41 }
  0x20   : > { %10865 = vst [vmem:[#allocation26_spill] sm:$0xff] %v4692_v42  ;;  %10866 = vst [vmem:[#allocation27_spill] sm:$0xff] %v4695_v43  ;;  %v4761_v61 = vld [vmem:[%s4538_s14 + $0xb8] sm:$0x3]  ;;  %v4767_v63 = vld [vmem:[%s4538_s14 + $0xf0] sm:$0xff]  ;;  %v4775_v34 = vmul.f32 %v4543_v0, %v4742_v56  ;;  %v4793_v16 = vmul.f32 %v4543_v0, %v4764_v62  ;;  %v4801_v35 = vmul.f32 %v4554_v3, %v4670_v36 }
  0x21   : > { %10867 = vst [vmem:[#allocation28_spill] sm:$0xff] %v4699_v44  ;;  %10868 = vst [vmem:[#allocation29_spill] sm:$0xff] %v4703_v45  ;;  %v4786_v22 = vld [vmem:[%s4538_s14 + $0xf8] sm:$0xff]  ;;  %v4789_v21 = vld [vmem:[%s4538_s14 + $0x108] sm:$0xff]  ;;  %v4797_v15 = vmul.f32 %v4543_v0, %v4767_v63  ;;  %v4805_v41 = vmul.f32 %v4554_v3, %v4692_v42  ;;  %v4826_v42 = vmul.f32 %v4554_v3, %v4736_v54  ;;  %v600_v33 = vrot.slane %v4779_v23, 1 }
  0x22   : > { %10869 = vst [vmem:[#allocation30_spill] sm:$0xff] %v4714_v48  ;;  %10870 = vst [vmem:[#allocation31_spill] sm:$0xff] %v4717_v49  ;;  %v4808_v10 = vld [vmem:[%s4538_s14 + $0xd0] sm:$0x3]  ;;  %v4814_v7 = vld [vmem:[%s4538_s14 + $0x120] sm:$0xff]  ;;  %v4818_v6 = vmul.f32 %v4543_v0, %v4786_v22  ;;  %v4822_v36 = vmul.f32 %v4543_v0, %v4789_v21  ;;  %v4830_v5 = vmul.f32 %v4554_v3, %v4695_v43 }
  0x23   : > { %10871 = vst [vmem:[#allocation32_spill] sm:$0xff] %v4721_v50  ;;  %10872 = vst [vmem:[#allocation33_spill] sm:$0xff] %v4725_v51  ;;  %v4811_v9 = vld [vmem:[%s4538_s14 + $0x110] sm:$0xff]  ;;  %v4833_v4 = vld [vmem:[%s4538_s14 + $0xe8] sm:$0x3]  ;;  %v4851_v43 = vmul.f32 %v4554_v3, %v4714_v48  ;;  %v4953_v38 = vmul.f32 %v4554_v3, %v4789_v21  ;;  %v605_v39 = vrot.slane %v4805_v41, 1  ;;  %v588_v41 = vsel %vm573_vm0, %v585_v30, %v587_v25 }
  0x24   : > { %10873 = vst [vmem:[#allocation34_spill] sm:$0xff] %v4736_v54  ;;  %10874 = vst [vmem:[#allocation35_spill] sm:$0xff] %v4739_v55  ;;  %v4836_v2 = vld [vmem:[%s4538_s14 + $0x128] sm:$0xff]  ;;  %v4839_v1 = vld [vmem:[%s4538_s14 + $0x138] sm:$0xff]  ;;  %v4847_v54 = vmul.f32 %v4543_v0, %v4814_v7 }
  0x25   : > { %10875 = vst [vmem:[#allocation36_spill] sm:$0xff] %v4742_v56  ;;  %10876 = vst [vmem:[#allocation37_spill] sm:$0xff] %v4746_v57  ;;  %v4872_v48 = vmul.f32 %v4543_v0, %v4839_v1  ;;  %v4889_v57 = vld [vmem:[%s4538_s14 + $0x168] sm:$0xff]  ;;  %v4908_v51 = vld [vmem:[%s4538_s14 + $0x130] sm:$0x3] }
  0x26   : > { %10877 = vst [vmem:[#allocation38_spill] sm:$0xff] %v4750_v58  ;;  %10878 = vst [vmem:[#allocation39_spill] sm:$0xff] %v4761_v61  ;;  %v4886_v58 = vld [vmem:[%s4538_s14 + $0x158] sm:$0xff]  ;;  %v4911_v50 = vld [vmem:[%s4538_s14 + $0x170] sm:$0xff] }
  0x27   : > { %10879 = vst [vmem:[#allocation40_spill] sm:$0xff] %v4764_v62  ;;  %10880 = vst [vmem:[#allocation41_spill] sm:$0xff] %v4767_v63  ;;  %v4930_v45 = vld [vmem:[%s4538_s14 + $0x148] sm:$0x3]  ;;  %v4934_v44 = vmul.f32 %v4543_v0, %v4911_v50 }
  0x28   : > { %10881 = vst [vmem:[#allocation42_spill] sm:$0xff] %v4771_v28  ;;  %10882 = vst [vmem:[#allocation43_spill] sm:$0xff] %v4775_v34  ;;  %v4864_v34 = vld [vmem:[%s4538_s14 + $0x150] sm:$0xff]  ;;  %v4883_v28 = vld [vmem:[%s4538_s14 + $0x118] sm:$0x3] }
  0x29   : > { %10883 = vst [vmem:[#allocation44_spill] sm:$0xff] %v4786_v22  ;;  %10884 = vst [vmem:[#allocation45_spill] sm:$0xff] %v4789_v21  ;;  %v4976_v21 = vmul.f32 %v4554_v3, %v4908_v51 }
  0x2a   : > { %10885 = vst [vmem:[#allocation46_spill] sm:$0xff] %v4793_v16  ;;  %10886 = vst [vmem:[#allocation47_spill] sm:$0xff] %v4797_v15  ;;  %v4858_v15 = vld [vmem:[%s4538_s14 + $0x100] sm:$0x3] }
  0x2b   : > { %10887 = vst [vmem:[#allocation48_spill] sm:$0xff] %v4808_v10  ;;  %10888 = vst [vmem:[#allocation49_spill] sm:$0xff] %v4811_v9  ;;  %v4861_v16 = vld [vmem:[%s4538_s14 + $0x140] sm:$0xff] }
  0x2c   : > { %10889 = vst [vmem:[#allocation50_spill] sm:$0xff] %v4814_v7  ;;  %10890 = vst [vmem:[#allocation51_spill] sm:$0xff] %v4818_v6  ;;  %v4855_v6 = vmul.f32 %v4554_v3, %v4761_v61  ;;  %v4876_v61 = vmul.f32 %v4554_v3, %v4717_v49  ;;  %v4901_v49 = vmul.f32 %v4554_v3, %v4808_v10 }
  0x2d   : > { %10891 = vst [vmem:[#allocation52_spill] sm:$0xff] %v4822_v36  ;;  %10892 = vst [vmem:[#allocation53_spill] sm:$0xff] %v4833_v4  ;;  %v4843_v36 = vmul.f32 %v4543_v0, %v4811_v9  ;;  %v4923_v10 = vmul.f32 %v4554_v3, %v4764_v62  ;;  %v4946_v62 = vmul.f32 %v4554_v3, %v4858_v15 }
  0x2e   : > { %10893 = vst [vmem:[#allocation54_spill] sm:$0xff] %v4836_v2  ;;  %10894 = vst [vmem:[#allocation55_spill] sm:$0xff] %v4839_v1 }
  0x2f   : > { %10895 = vst [vmem:[#allocation56_spill] sm:$0xff] %v4843_v36  ;;  %10896 = vst [vmem:[#allocation57_spill] sm:$0xff] %v4847_v54  ;;  %v4868_v36 = vmul.f32 %v4543_v0, %v4836_v2  ;;  %v4880_v54 = vmul.f32 %v4554_v3, %v4739_v55  ;;  %v4905_v55 = vmul.f32 %v4554_v3, %v4742_v56 }
  0x30   : > { %10897 = vst [vmem:[#allocation58_spill] sm:$0xff] %v4858_v15  ;;  %10898 = vst [vmem:[#allocation59_spill] sm:$0xff] %v4861_v16  ;;  %v4927_v56 = vmul.f32 %v4554_v3, %v4833_v4  ;;  %v4949_v4 = vld [vmem:[%s4538_s14 + $0x160] sm:$0x3]  ;;  %v4968_v15 = vld [vmem:[%s4538_s14 + $0x178] sm:$0x3] }
  0x31   : > { %10899 = vst [vmem:[#allocation60_spill] sm:$0xff] %v4864_v34  ;;  %10900 = vst [vmem:[#allocation61_spill] sm:$0xff] %v4868_v36  ;;  %v4893_v36 = vmul.f32 %v4543_v0, %v4861_v16  ;;  %v5003_v14 = vmul.f32 %v4554_v3, %v4949_v4  ;;  %v5015_v19 = vmul.f32 %v4554_v3, %v4968_v15  ;;  %v615_v23 = vrot.slane %v4880_v54, 1 }
  0x32   : > { %10901 = vst [vmem:[#allocation62_spill] sm:$0xff] %v4872_v48  ;;  %10902 = vst [vmem:[#allocation63_spill] sm:$0xff] %v4883_v28  ;;  %v4897_v48 = vmul.f32 %v4543_v0, %v4864_v34 }
  0x33   : > { %10903 = vst [vmem:[#allocation64_spill] sm:$0xff] %v4886_v58  ;;  %10904 = vst [vmem:[#allocation65_spill] sm:$0xff] %v4889_v57 }
  0x34   : > { %10905 = vst [vmem:[#allocation66_spill] sm:$0xff] %v4893_v36  ;;  %10906 = vst [vmem:[#allocation67_spill] sm:$0xff] %v4897_v48  ;;  %v4915_v36 = vmul.f32 %v4543_v0, %v4886_v58  ;;  %v4919_v48 = vmul.f32 %v4543_v0, %v4889_v57  ;;  %v4957_v0 = vmul.f32 %v4554_v3, %v4811_v9  ;;  %v574_v9 = vrot.slane %v4588_v13, 1 }
  0x35   : > { %10907 = vst [vmem:[#allocation68_spill] sm:$0xff] %v4908_v51  ;;  %10908 = vst [vmem:[#allocation69_spill] sm:$0xff] %v4911_v50  ;;  %v4995_v51 = vmul.f32 %v4554_v3, %v4864_v34  ;;  %v4999_v13 = vmul.f32 %v4554_v3, %v4886_v58  ;;  %v579_v34 = vrot.slane %v4614_v20, 1  ;;  %v580_v58 = vrot.slane %v4635_v26, 1 }
  0x36   : > { %10909 = vst [vmem:[#allocation70_spill] sm:$0xff] %v4915_v36  ;;  %10910 = vst [vmem:[#allocation71_spill] sm:$0xff] %v4919_v48  ;;  %v4938_v36 = vmul.f32 %v4554_v3, %v4767_v63  ;;  %v4942_v48 = vmul.f32 %v4554_v3, %v4786_v22  ;;  %v4961_v63 = vmul.f32 %v4554_v3, %v4883_v28  ;;  %v590_v20 = vrot.slane %v4707_v46, 1 }
  0x37   : > { %10911 = vst [vmem:[#allocation72_spill] sm:$0xff] %v4930_v45  ;;  %10912 = vst [vmem:[#allocation73_spill] sm:$0xff] %v4934_v44  ;;  %v4965_v22 = vmul.f32 %v4554_v3, %v4814_v7  ;;  %v4972_v44 = vmul.f32 %v4554_v3, %v4836_v2  ;;  %v4982_v28 = vmul.f32 %v4554_v3, %v4839_v1  ;;  %v592_v26 = vrot.slane %v4711_v47, 1 }
  0x38   : > { %10913 = vst [vmem:[#allocation74_spill] sm:$0xff] %v4949_v4  ;;  %10914 = vst [vmem:[#allocation75_spill] sm:$0xff] %v4968_v15  ;;  %v4986_v7 = vmul.f32 %v4554_v3, %v4861_v16  ;;  %v4990_v2 = vmul.f32 %v4554_v3, %v4930_v45  ;;  %v5007_v16 = vmul.f32 %v4554_v3, %v4889_v57  ;;  %v582_v4 = vrot.slane %v4639_v27, 1 }
  0x39   : > { %v5011_v45 = vmul.f32 %v4554_v3, %v4911_v50  ;;  %v5020_v1 = vsel %vm573_vm0, %v574_v9, %v575_v37  ;;  %v584_v57 = vrot.slane %v4657_v32, 1  ;;  %v5026_v50 = vsel %vm573_vm0, %v575_v37, %v577_v31 }
  0x3a   : > { %v589_v3 = vrot.slane %v4686_v40, 1  ;;  %v594_v9 = vrot.slane %v4729_v52, 1  ;;  %v595_v15 = vrot.slane %v4733_v53, 1  ;;  %v597_v27 = vrot.slane %v4754_v59, 1 }
  0x3b   : > { %v599_v32 = vrot.slane %v4758_v60, 1  ;;  %v602_v31 = vrot.slane %v4783_v29, 1  ;;  %v604_v37 = vrot.slane %v4801_v35, 1  ;;  %v607_v40 = vrot.slane %v4826_v42, 1 }
  0x3c   : > { %v609_v46 = vrot.slane %v4830_v5, 1  ;;  %v610_v47 = vrot.slane %v4851_v43, 1  ;;  %v581_v52 = vsel %vm573_vm0, %v579_v34, %v580_v58  ;;  %v612_v53 = vrot.slane %v4855_v6, 1 }
  0x3d   : > { %v614_v59 = vrot.slane %v4876_v61, 1  ;;  %v583_v29 = vsel %vm573_vm0, %v580_v58, %v582_v4  ;;  %v586_v35 = vsel %vm573_vm0, %v584_v57, %v585_v30  ;;  %v591_v42 = vsel %vm573_vm0, %v589_v3, %v590_v20 }
  0x3e   : > { %v593_v5 = vsel %vm573_vm0, %v590_v20, %v592_v26  ;;  %v596_v43 = vsel %vm573_vm0, %v594_v9, %v595_v15  ;;  %v598_v34 = vsel %vm573_vm0, %v595_v15, %v597_v27  ;;  %v601_v6 = vsel %vm573_vm0, %v599_v32, %v600_v33 }
  0x3f   : > { %v603_v60 = vsel %vm573_vm0, %v600_v33, %v602_v31  ;;  %v606_v54 = vsel %vm573_vm0, %v604_v37, %v605_v39  ;;  %v608_v4 = vsel %vm573_vm0, %v605_v39, %v607_v40  ;;  %v611_v57 = vsel %vm573_vm0, %v609_v46, %v610_v47 }
  0x40   : > { %v613_v25 = vsel %vm573_vm0, %v610_v47, %v612_v53  ;;  %v616_v30 = vsel %vm573_vm0, %v614_v59, %v615_v23  ;;  %v617_v58 = vrot.slane %v4901_v49, 1  ;;  %v619_v61 = vrot.slane %v4905_v55, 1 }
  0x41   : > { %v620_v15 = vrot.slane %v4923_v10, 1  ;;  %v622_v3 = vrot.slane %v4927_v56, 1  ;;  %v624_v20 = vrot.slane %v4938_v36, 1  ;;  %v625_v26 = vrot.slane %v4942_v48, 1 }
  0x42   : > { %v627_v9 = vrot.slane %v4946_v62, 1  ;;  %v629_v27 = vrot.slane %v4953_v38, 1  ;;  %v630_v32 = vrot.slane %v4957_v0, 1  ;;  %v632_v33 = vrot.slane %v4961_v63, 1 }
  0x43   : > { %v634_v49 = vrot.slane %v4965_v22, 1  ;;  %v635_v55 = vrot.slane %v4972_v44, 1  ;;  %v637_v10 = vrot.slane %v4976_v21, 1  ;;  %v639_v56 = vrot.slane %v4982_v28, 1 }
  0x44   : > { %v640_v36 = vrot.slane %v4986_v7, 1  ;;  %v642_v48 = vrot.slane %v4990_v2, 1  ;;  %v644_v62 = vrot.slane %v4995_v51, 1  ;;  %v645_v38 = vrot.slane %v4999_v13, 1 }
  0x45   : > { %v618_v0 = vsel %vm573_vm0, %v615_v23, %v617_v58  ;;  %v647_v63 = vrot.slane %v5003_v14, 1  ;;  %v649_v22 = vrot.slane %v5007_v16, 1  ;;  %v650_v44 = vrot.slane %v5011_v45, 1 }
  0x46   : > { %v621_v21 = vsel %vm573_vm0, %v619_v61, %v620_v15  ;;  %v623_v28 = vsel %vm573_vm0, %v620_v15, %v622_v3  ;;  %v626_v7 = vsel %vm573_vm0, %v624_v20, %v625_v26  ;;  %v652_v2 = vrot.slane %v5015_v19, 1  ;;  %v10917_v15 = vld [vmem:[#allocation18_spill] sm:$0xff] }
  0x47   : > { %v628_v51 = vsel %vm573_vm0, %v625_v26, %v627_v9  ;;  %v631_v13 = vsel %vm573_vm0, %v629_v27, %v630_v32  ;;  %v633_v31 = vsel %vm573_vm0, %v630_v32, %v632_v33  ;;  %v636_v14 = vsel %vm573_vm0, %v634_v49, %v635_v55 }
  0x48   : > { %v638_v16 = vsel %vm573_vm0, %v635_v55, %v637_v10  ;;  %v641_v45 = vsel %vm573_vm0, %v639_v56, %v640_v36  ;;  %v643_v37 = vsel %vm573_vm0, %v640_v36, %v642_v48  ;;  %v646_v39 = vsel %vm573_vm0, %v644_v62, %v645_v38  ;;  %v10947_v10 = vld [vmem:[#allocation52_spill] sm:$0xff]  ;;  %v10951_v62 = vld [vmem:[#allocation57_spill] sm:$0xff] }
  0x49   : > { %v648_v40 = vsel %vm573_vm0, %v645_v38, %v647_v63  ;;  %v651_v19 = vsel %vm573_vm0, %v649_v22, %v650_v44  ;;  %v5099_v46 = vadd.f32 %v5020_v1, %v4570_v8  ;;  %v5103_v47 = vadd.f32 %v5026_v50, %v4580_v11  ;;  %v10915_v1 = vld [vmem:[#allocation15_spill] sm:$0xff]  ;;  %v10949_v36 = vld [vmem:[#allocation56_spill] sm:$0xff]  ;;  %v10955_v22 = vld [vmem:[#allocation62_spill] sm:$0xff] }
  0x4a   : > { %v653_v53 = vsel %vm573_vm0, %v650_v44, %v652_v2  ;;  %v5107_v59 = vadd.f32 %v581_v52, %v4584_v12  ;;  %v5110_v23 = vadd.f32 %v583_v29, %v4602_v17  ;;  %v5113_v58 = vadd.f32 %v586_v35, %v4606_v18  ;;  %v10919_v50 = vld [vmem:[#allocation19_spill] sm:$0xff]  ;;  %v10923_v17 = vld [vmem:[#allocation24_spill] sm:$0xff] }
  0x4b   : > { %v5116_v61 = vadd.f32 %v588_v41, %v4627_v24  ;;  %v5119_v8 = vadd.f32 %v591_v42, %v10915_v1  ;;  %v5122_v11 = vadd.f32 %v593_v5, %v10917_v15  ;;  %v5125_v3 = vadd.f32 %v596_v43, %v10919_v50  ;;  %v10921_v12 = vld [vmem:[#allocation23_spill] sm:$0xff]  ;;  %v10925_v18 = vld [vmem:[#allocation28_spill] sm:$0xff]  ;;  %v10927_v24 = vld [vmem:[#allocation29_spill] sm:$0xff] }
  0x4c   : > { %v5128_v52 = vadd.f32 %v598_v34, %v10921_v12  ;;  %v5131_v29 = vadd.f32 %v601_v6, %v10923_v17  ;;  %v5134_v35 = vadd.f32 %v603_v60, %v10925_v18  ;;  %v5137_v41 = vadd.f32 %v606_v54, %v10927_v24  ;;  %v10929_v42 = vld [vmem:[#allocation32_spill] sm:$0xff]  ;;  %v10931_v5 = vld [vmem:[#allocation33_spill] sm:$0xff]  ;;  %v10935_v34 = vld [vmem:[#allocation38_spill] sm:$0xff] }
  0x4d   : > { %10916 = vst [vmem:[#allocation15_spill] sm:$0xff] %v5119_v8  ;;  %10918 = vst [vmem:[#allocation18_spill] sm:$0xff] %v5122_v11  ;;  %v5140_v20 = vadd.f32 %v608_v4, %v10929_v42  ;;  %v5143_v26 = vadd.f32 %v611_v57, %v10931_v5  ;;  %v10933_v43 = vld [vmem:[#allocation37_spill] sm:$0xff]  ;;  %v5149_v27 = vadd.f32 %v616_v30, %v10935_v34  ;;  %v10937_v6 = vld [vmem:[#allocation42_spill] sm:$0xff] }
  0x4e   : > { %10920 = vst [vmem:[#allocation19_spill] sm:$0xff] %v5125_v3  ;;  %10922 = vst [vmem:[#allocation23_spill] sm:$0xff] %v5128_v52  ;;  %v5146_v9 = vadd.f32 %v613_v25, %v10933_v43  ;;  %v5152_v32 = vadd.f32 %v618_v0, %v10937_v6  ;;  %v10939_v60 = vld [vmem:[#allocation43_spill] sm:$0xff]  ;;  %v10941_v54 = vld [vmem:[#allocation46_spill] sm:$0xff]  ;;  %v5172_v56 = vadd.f32 %v631_v13, %v10947_v10 }
  0x4f   : > { %10924 = vst [vmem:[#allocation24_spill] sm:$0xff] %v5131_v29  ;;  %10926 = vst [vmem:[#allocation28_spill] sm:$0xff] %v5134_v35  ;;  %v5155_v33 = vadd.f32 %v621_v21, %v10939_v60  ;;  %v5158_v49 = vadd.f32 %v623_v28, %v10941_v54  ;;  %v10943_v4 = vld [vmem:[#allocation47_spill] sm:$0xff]  ;;  %v5166_v57 = vld [vmem:[%s10457_s2 + $0x2] ss:$0 sm:$0xff]  ;;  %v5175_v48 = vadd.f32 %v633_v31, %v10949_v36 }
  0x50   : > { %10928 = vst [vmem:[#allocation29_spill] sm:$0xff] %v5137_v41  ;;  %10930 = vst [vmem:[#allocation32_spill] sm:$0xff] %v5140_v20  ;;  %v5161_v55 = vadd.f32 %v626_v7, %v10943_v4  ;;  %v10945_v25 = vld [vmem:[#allocation51_spill] sm:$0xff]  ;;  %v5178_v38 = vadd.f32 %v636_v14, %v10951_v62  ;;  %v10953_v0 = vld [vmem:[#allocation61_spill] sm:$0xff]  ;;  %v5184_v44 = vadd.f32 %v641_v45, %v10955_v22 }
  0x51   : > { %10932 = vst [vmem:[#allocation33_spill] sm:$0xff] %v5143_v26  ;;  %10934 = vst [vmem:[#allocation37_spill] sm:$0xff] %v5146_v9  ;;  %v5169_v30 = vadd.f32 %v628_v51, %v10945_v25  ;;  %v5181_v63 = vadd.f32 %v638_v16, %v10953_v0  ;;  %v10957_v21 = vld [vmem:[#allocation66_spill] sm:$0xff]  ;;  %v10959_v7 = vld [vmem:[#allocation67_spill] sm:$0xff] }
  0x52   : > { %10936 = vst [vmem:[#allocation38_spill] sm:$0xff] %v5149_v27  ;;  %10938 = vst [vmem:[#allocation42_spill] sm:$0xff] %v5152_v32  ;;  %v5187_v28 = vadd.f32 %v643_v37, %v10957_v21  ;;  %v5190_v2 = vadd.f32 %v646_v39, %v10959_v7  ;;  %v10961_v51 = vld [vmem:[#allocation70_spill] sm:$0xff]  ;;  %v10963_v31 = vld [vmem:[#allocation71_spill] sm:$0xff] }
  0x53   : > { %10940 = vst [vmem:[#allocation43_spill] sm:$0xff] %v5155_v33  ;;  %10942 = vst [vmem:[#allocation46_spill] sm:$0xff] %v5158_v49  ;;  %v5193_v13 = vadd.f32 %v648_v40, %v10961_v51  ;;  %v5196_v1 = vadd.f32 %v651_v19, %v10963_v31  ;;  %v10965_v14 = vld [vmem:[#allocation73_spill] sm:$0xff]  ;;  %v10967_v16 = vld [vmem:[#allocation2_spill] sm:$0xff] }
  0x54   : > { %10944 = vst [vmem:[#allocation47_spill] sm:$0xff] %v5161_v55  ;;  %10946 = vst [vmem:[#allocation51_spill] sm:$0xff] %v5169_v30  ;;  %v5199_v15 = vadd.f32 %v653_v53, %v10965_v14  ;;  %v723_v50 = vmul.f32 %v5166_v57, %v10967_v16  ;;  %v10968_v45 = vld [vmem:[#allocation3_spill] sm:$0xff]  ;;  %v10969_v37 = vld [vmem:[#allocation4_spill] sm:$0xff] }
  0x55   : > { %10948 = vst [vmem:[#allocation52_spill] sm:$0xff] %v5172_v56  ;;  %10950 = vst [vmem:[#allocation56_spill] sm:$0xff] %v5175_v48  ;;  %v724_v12 = vmul.f32 %v5166_v57, %v10968_v45  ;;  %v725_v17 = vmul.f32 %v5166_v57, %v10969_v37  ;;  %v10970_v39 = vld [vmem:[#allocation5_spill] sm:$0xff]  ;;  %v10971_v40 = vld [vmem:[#allocation6_spill] sm:$0xff] }
  0x56   : > { %10952 = vst [vmem:[#allocation57_spill] sm:$0xff] %v5178_v38  ;;  %10954 = vst [vmem:[#allocation61_spill] sm:$0xff] %v5181_v63  ;;  %v5209_v18 = vmul.f32 %v5166_v57, %v10970_v39  ;;  %v5213_v19 = vmul.f32 %v5166_v57, %v10971_v40  ;;  %v10972_v24 = vld [vmem:[#allocation7_spill] sm:$0xff]  ;;  %v10973_v42 = vld [vmem:[#allocation8_spill] sm:$0xff]  ;;  %v820_v33 = vrot.slane %v723_v50, 2 }
  0x57   : > { %10956 = vst [vmem:[#allocation62_spill] sm:$0xff] %v5184_v44  ;;  %10958 = vst [vmem:[#allocation66_spill] sm:$0xff] %v5187_v28  ;;  %v5217_v53 = vmul.f32 %v5166_v57, %v10972_v24  ;;  %v5221_v5 = vmul.f32 %v5166_v57, %v10973_v42  ;;  %v10974_v43 = vld [vmem:[#allocation9_spill] sm:$0xff]  ;;  %v10975_v6 = vld [vmem:[#allocation10_spill] sm:$0xff]  ;;  %v821_v32 = vrot.slane %v724_v12, 2 }
  0x58   : > { %10960 = vst [vmem:[#allocation67_spill] sm:$0xff] %v5190_v2  ;;  %10962 = vst [vmem:[#allocation70_spill] sm:$0xff] %v5193_v13  ;;  %v5225_v34 = vmul.f32 %v5166_v57, %v10974_v43  ;;  %v5229_v60 = vmul.f32 %v5166_v57, %v10975_v6  ;;  %v10976_v54 = vld [vmem:[#allocation11_spill] sm:$0xff]  ;;  %v10977_v25 = vld [vmem:[#allocation12_spill] sm:$0xff]  ;;  %v825_v52 = vrot.slane %v5209_v18, 2 }
  0x59   : > { %10964 = vst [vmem:[#allocation71_spill] sm:$0xff] %v5196_v1  ;;  %10966 = vst [vmem:[#allocation73_spill] sm:$0xff] %v5199_v15  ;;  %v5233_v4 = vmul.f32 %v5166_v57, %v10976_v54  ;;  %v5237_v10 = vmul.f32 %v5166_v57, %v10977_v25  ;;  %v10978_v36 = vld [vmem:[#allocation13_spill] sm:$0xff]  ;;  %v10979_v0 = vld [vmem:[#allocation14_spill] sm:$0xff]  ;;  %v5390_v3 = vsel %vm819_vm1, %v820_v33, %v821_v32 }
  0x5a   : > { %v5241_v62 = vmul.f32 %v5166_v57, %v10978_v36  ;;  %v5245_v22 = vmul.f32 %v5166_v57, %v10979_v0  ;;  %v10980_v21 = vld [vmem:[#allocation16_spill] sm:$0xff]  ;;  %v10982_v14 = vld [vmem:[#allocation17_spill] sm:$0xff]  ;;  %v10985_v24 = vld [vmem:[#allocation22_spill] sm:$0xff]  ;;  %v831_v11 = vrot.slane %v5225_v34, 2  ;;  %v833_v8 = vrot.slane %v5229_v60, 2 }
  0x5b   : > { %v5249_v7 = vmul.f32 %v5166_v57, %v10980_v21  ;;  %v10981_v51 = vld [vmem:[#allocation20_spill] sm:$0xff]  ;;  %v5257_v16 = vmul.f32 %v5166_v57, %v10982_v14  ;;  %v10983_v45 = vld [vmem:[#allocation21_spill] sm:$0xff]  ;;  %v5269_v21 = vmul.f32 %v5166_v57, %v10985_v24  ;;  %v10986_v0 = vld [vmem:[#allocation26_spill] sm:$0xff]  ;;  %v836_v18 = vrot.slane %v5237_v10, 2 }
  0x5c   : > { %v5253_v31 = vmul.f32 %v5166_v57, %v10981_v51  ;;  %v5261_v37 = vmul.f32 %v5166_v57, %v10983_v45  ;;  %v10984_v36 = vld [vmem:[#allocation25_spill] sm:$0xff]  ;;  %v5273_v51 = vmul.f32 %v5166_v57, %v10986_v0  ;;  %v10987_v25 = vld [vmem:[#allocation34_spill] sm:$0xff]  ;;  %v10988_v54 = vld [vmem:[#allocation27_spill] sm:$0xff]  ;;  %v840_v33 = vrot.slane %v5245_v22, 2 }
  0x5d   : > { %v5265_v6 = vmul.f32 %v5166_v57, %v10984_v36  ;;  %v5277_v14 = vmul.f32 %v5166_v57, %v10987_v25  ;;  %v5281_v45 = vmul.f32 %v5166_v57, %v10988_v54  ;;  %v10989_v43 = vld [vmem:[#allocation30_spill] sm:$0xff]  ;;  %v10990_v42 = vld [vmem:[#allocation39_spill] sm:$0xff]  ;;  %v10993_v15 = vld [vmem:[#allocation48_spill] sm:$0xff] }
  0x5e   : > { %v5285_v36 = vmul.f32 %v5166_v57, %v10989_v43  ;;  %v5289_v24 = vmul.f32 %v5166_v57, %v10990_v42  ;;  %v10991_v40 = vld [vmem:[#allocation31_spill] sm:$0xff]  ;;  %v5301_v54 = vmul.f32 %v5166_v57, %v10993_v15  ;;  %v10994_v1 = vld [vmem:[#allocation36_spill] sm:$0xff]  ;;  %v10996_v2 = vld [vmem:[#allocation53_spill] sm:$0xff]  ;;  %v846_v34 = vrot.slane %v5261_v37, 2 }
  0x5f   : > { %v5293_v0 = vmul.f32 %v5166_v57, %v10991_v40  ;;  %v10992_v39 = vld [vmem:[#allocation35_spill] sm:$0xff]  ;;  %v5305_v43 = vmul.f32 %v5166_v57, %v10994_v1  ;;  %v10995_v13 = vld [vmem:[#allocation40_spill] sm:$0xff]  ;;  %v5313_v40 = vmul.f32 %v5166_v57, %v10996_v2  ;;  %v10997_v28 = vld [vmem:[#allocation41_spill] sm:$0xff]  ;;  %v851_v60 = vrot.slane %v5273_v51, 2 }
  0x60   : > { %v5297_v25 = vmul.f32 %v5166_v57, %v10992_v39  ;;  %v5309_v42 = vmul.f32 %v5166_v57, %v10995_v13  ;;  %v5317_v39 = vmul.f32 %v5166_v57, %v10997_v28  ;;  %v10998_v44 = vld [vmem:[#allocation44_spill] sm:$0xff]  ;;  %v10999_v63 = vld [vmem:[#allocation58_spill] sm:$0xff]  ;;  %v11000_v38 = vld [vmem:[#allocation45_spill] sm:$0xff]  ;;  %v855_v10 = vrot.slane %v5281_v45, 2 }
  0x61   : > { %v5321_v15 = vmul.f32 %v5166_v57, %v10998_v44  ;;  %v5325_v1 = vmul.f32 %v5166_v57, %v10999_v63  ;;  %v5329_v13 = vmul.f32 %v5166_v57, %v11000_v38  ;;  %v11001_v48 = vld [vmem:[#allocation49_spill] sm:$0xff]  ;;  %v11002_v56 = vld [vmem:[#allocation63_spill] sm:$0xff]  ;;  %v11003_v30 = vld [vmem:[#allocation50_spill] sm:$0xff]  ;;  %v834_v51 = vsel %vm819_vm1, %v831_v11, %v833_v8 }
  0x62   : > { %v5333_v2 = vmul.f32 %v5166_v57, %v11001_v48  ;;  %v5337_v28 = vmul.f32 %v5166_v57, %v11002_v56  ;;  %v5341_v44 = vmul.f32 %v5166_v57, %v11003_v30  ;;  %v11004_v55 = vld [vmem:[#allocation54_spill] sm:$0xff]  ;;  %v11005_v49 = vld [vmem:[#allocation68_spill] sm:$0xff]  ;;  %v11006_v48 = vld [vmem:[#allocation55_spill] sm:$0xff]  ;;  %v863_v37 = vrot.slane %v5301_v54, 2 }
  0x63   : > { %v5345_v63 = vmul.f32 %v5166_v57, %v11004_v55  ;;  %v5349_v38 = vmul.f32 %v5166_v57, %v11005_v49  ;;  %v5353_v27 = vmul.f32 %v5166_v57, %v11006_v48  ;;  %v11007_v56 = vld [vmem:[#allocation59_spill] sm:$0xff]  ;;  %v11008_v30 = vld [vmem:[#allocation72_spill] sm:$0xff]  ;;  %v823_v55 = vrot.slane %v725_v17, 2  ;;  %v11011_v12 = vld [vmem:[#allocation74_spill] sm:$0xff] }
  0x64   : > { %v5357_v9 = vmul.f32 %v5166_v57, %v11007_v56  ;;  %v5361_v26 = vmul.f32 %v5166_v57, %v11008_v30  ;;  %v11009_v20 = vld [vmem:[#allocation60_spill] sm:$0xff]  ;;  %v5373_v48 = vmul.f32 %v5166_v57, %v11011_v12  ;;  %v11012_v35 = vld [vmem:[#allocation65_spill] sm:$0xff]  ;;  %v11014_v17 = vld [vmem:[#allocation75_spill] sm:$0xff]  ;;  %v828_v12 = vrot.slane %v5217_v53, 2 }
  0x65   : > { %v5365_v41 = vmul.f32 %v5166_v57, %v11009_v20  ;;  %v11010_v49 = vld [vmem:[#allocation64_spill] sm:$0xff]  ;;  %v5377_v56 = vmul.f32 %v5166_v57, %v11012_v35  ;;  %v11013_v29 = vld [vmem:[#allocation69_spill] sm:$0xff]  ;;  %v5385_v20 = vmul.f32 %v5166_v57, %v11014_v17  ;;  %v830_v35 = vrot.slane %v5221_v5, 2 }
  0x66   : > { %v5369_v50 = vmul.f32 %v5166_v57, %v11010_v49  ;;  %v5381_v30 = vmul.f32 %v5166_v57, %v11013_v29  ;;  %v826_v49 = vrot.slane %v5213_v19, 2  ;;  %v5396_v29 = vsel %vm819_vm1, %v821_v32, %v823_v55 }
  0x67   : > { %v835_v57 = vrot.slane %v5233_v4, 2  ;;  %v838_v19 = vrot.slane %v5241_v62, 2  ;;  %v841_v17 = vrot.slane %v5249_v7, 2  ;;  %v843_v53 = vrot.slane %v5253_v31, 2 }
  0x68   : > { %v845_v5 = vrot.slane %v5257_v16, 2  ;;  %v848_v32 = vrot.slane %v5265_v6, 2  ;;  %v850_v55 = vrot.slane %v5269_v21, 2  ;;  %v853_v4 = vrot.slane %v5277_v14, 2 }
  0x69   : > { %v856_v62 = vrot.slane %v5285_v36, 2  ;;  %v827_v22 = vsel %vm819_vm1, %v825_v52, %v826_v49  ;;  %v858_v7 = vrot.slane %v5289_v24, 2  ;;  %v860_v31 = vrot.slane %v5293_v0, 2 }
  0x6a   : > { %v861_v16 = vrot.slane %v5297_v25, 2  ;;  %v829_v6 = vsel %vm819_vm1, %v826_v49, %v828_v12  ;;  %v832_v21 = vsel %vm819_vm1, %v830_v35, %v831_v11  ;;  %v837_v14 = vsel %vm819_vm1, %v835_v57, %v836_v18 }
  0x6b   : > { %v839_v45 = vsel %vm819_vm1, %v836_v18, %v838_v19  ;;  %v842_v36 = vsel %vm819_vm1, %v840_v33, %v841_v17  ;;  %v844_v52 = vsel %vm819_vm1, %v841_v17, %v843_v53  ;;  %v847_v24 = vsel %vm819_vm1, %v845_v5, %v846_v34 }
  0x6c   : > { %v849_v0 = vsel %vm819_vm1, %v846_v34, %v848_v32  ;;  %v852_v25 = vsel %vm819_vm1, %v850_v55, %v851_v60  ;;  %v854_v49 = vsel %vm819_vm1, %v851_v60, %v853_v4  ;;  %v857_v35 = vsel %vm819_vm1, %v855_v10, %v856_v62 }
  0x6d   : > { %v859_v8 = vsel %vm819_vm1, %v856_v62, %v858_v7  ;;  %v862_v11 = vsel %vm819_vm1, %v860_v31, %v861_v16  ;;  %v865_v12 = vrot.slane %v5305_v43, 2  ;;  %v866_v17 = vrot.slane %v5309_v42, 2 }
  0x6e   : > { %v868_v57 = vrot.slane %v5313_v40, 2  ;;  %v870_v18 = vrot.slane %v5317_v39, 2  ;;  %v871_v19 = vrot.slane %v5321_v15, 2  ;;  %v873_v33 = vrot.slane %v5325_v1, 2 }
  0x6f   : > { %v875_v53 = vrot.slane %v5329_v13, 2  ;;  %v876_v5 = vrot.slane %v5333_v2, 2  ;;  %v878_v34 = vrot.slane %v5337_v28, 2  ;;  %v880_v54 = vrot.slane %v5341_v44, 2 }
  0x70   : > { %v881_v43 = vrot.slane %v5345_v63, 2  ;;  %v883_v42 = vrot.slane %v5349_v38, 2  ;;  %v885_v40 = vrot.slane %v5353_v27, 2  ;;  %v886_v39 = vrot.slane %v5357_v9, 2 }
  0x71   : > { %v888_v15 = vrot.slane %v5361_v26, 2  ;;  %v890_v1 = vrot.slane %v5365_v41, 2  ;;  %v891_v13 = vrot.slane %v5369_v50, 2  ;;  %v864_v2 = vsel %vm819_vm1, %v861_v16, %v863_v37 }
  0x72   : > { %v893_v28 = vrot.slane %v5373_v48, 2  ;;  %v895_v44 = vrot.slane %v5377_v56, 2  ;;  %v896_v63 = vrot.slane %v5381_v30, 2  ;;  %v867_v38 = vsel %vm819_vm1, %v865_v12, %v866_v17 }
  0x73   : > { %v869_v27 = vsel %vm819_vm1, %v866_v17, %v868_v57  ;;  %v872_v9 = vsel %vm819_vm1, %v870_v18, %v871_v19  ;;  %v898_v26 = vrot.slane %v5385_v20, 2  ;;  %v874_v41 = vsel %vm819_vm1, %v871_v19, %v873_v33  ;;  %v11016_v17 = vld [vmem:[#allocation18_spill] sm:$0xff] }
  0x74   : > { %v877_v50 = vsel %vm819_vm1, %v875_v53, %v876_v5  ;;  %v879_v32 = vsel %vm819_vm1, %v876_v5, %v878_v34  ;;  %v882_v48 = vsel %vm819_vm1, %v880_v54, %v881_v43  ;;  %v884_v56 = vsel %vm819_vm1, %v881_v43, %v883_v42 }
  0x75   : > { %v887_v30 = vsel %vm819_vm1, %v885_v40, %v886_v39  ;;  %v889_v55 = vsel %vm819_vm1, %v886_v39, %v888_v15  ;;  %v892_v60 = vsel %vm819_vm1, %v890_v1, %v891_v13  ;;  %v894_v4 = vsel %vm819_vm1, %v891_v13, %v893_v28  ;;  %v11034_v39 = vld [vmem:[#allocation56_spill] sm:$0xff]  ;;  %v11036_v1 = vld [vmem:[#allocation57_spill] sm:$0xff] }
  0x76   : > { %v897_v20 = vsel %vm819_vm1, %v895_v44, %v896_v63  ;;  %v5469_v10 = vadd.f32 %v5390_v3, %v5099_v46  ;;  %v5473_v62 = vadd.f32 %v5396_v29, %v5103_v47  ;;  %v899_v7 = vsel %vm819_vm1, %v896_v63, %v898_v26  ;;  %v11015_v46 = vld [vmem:[#allocation15_spill] sm:$0xff]  ;;  %v11040_v44 = vld [vmem:[#allocation62_spill] sm:$0xff] }
  0x77   : > { %v5477_v31 = vadd.f32 %v827_v22, %v5107_v59  ;;  %v5480_v16 = vadd.f32 %v829_v6, %v5110_v23  ;;  %v5483_v37 = vadd.f32 %v832_v21, %v5113_v58  ;;  %v5486_v12 = vadd.f32 %v834_v51, %v5116_v61  ;;  %v11017_v29 = vld [vmem:[#allocation19_spill] sm:$0xff]  ;;  %v11019_v23 = vld [vmem:[#allocation24_spill] sm:$0xff]  ;;  %v11021_v61 = vld [vmem:[#allocation29_spill] sm:$0xff] }
  0x78   : > { %v5489_v3 = vadd.f32 %v837_v14, %v11015_v46  ;;  %v5492_v47 = vadd.f32 %v839_v45, %v11016_v17  ;;  %v5495_v57 = vadd.f32 %v842_v36, %v11017_v29  ;;  %v11018_v59 = vld [vmem:[#allocation23_spill] sm:$0xff]  ;;  %v5501_v6 = vadd.f32 %v847_v24, %v11019_v23  ;;  %v11020_v58 = vld [vmem:[#allocation28_spill] sm:$0xff]  ;;  %v11023_v45 = vld [vmem:[#allocation33_spill] sm:$0xff] }
  0x79   : > { %v5498_v22 = vadd.f32 %v844_v52, %v11018_v59  ;;  %v5504_v21 = vadd.f32 %v849_v0, %v11020_v58  ;;  %v5507_v51 = vadd.f32 %v852_v25, %v11021_v61  ;;  %v11022_v14 = vld [vmem:[#allocation32_spill] sm:$0xff]  ;;  %v5513_v19 = vadd.f32 %v857_v35, %v11023_v45  ;;  %v11024_v36 = vld [vmem:[#allocation37_spill] sm:$0xff]  ;;  %v11025_v52 = vld [vmem:[#allocation38_spill] sm:$0xff] }
  0x7a   : > { %v5510_v18 = vadd.f32 %v854_v49, %v11022_v14  ;;  %v5516_v33 = vadd.f32 %v859_v8, %v11024_v36  ;;  %v5519_v53 = vadd.f32 %v862_v11, %v11025_v52  ;;  %v11026_v24 = vld [vmem:[#allocation42_spill] sm:$0xff]  ;;  %v11027_v0 = vld [vmem:[#allocation43_spill] sm:$0xff]  ;;  %v11032_v11 = vld [vmem:[#allocation52_spill] sm:$0xff]  ;;  %v5543_v15 = vadd.f32 %v879_v32, %v11034_v39 }
  0x7b   : > { %v5522_v5 = vadd.f32 %v864_v2, %v11026_v24  ;;  %v5525_v34 = vadd.f32 %v867_v38, %v11027_v0  ;;  %v11028_v25 = vld [vmem:[#allocation46_spill] sm:$0xff]  ;;  %v11029_v49 = vld [vmem:[#allocation47_spill] sm:$0xff]  ;;  %v5540_v40 = vadd.f32 %v877_v50, %v11032_v11  ;;  %v5546_v13 = vadd.f32 %v882_v48, %v11036_v1  ;;  %v11038_v2 = vld [vmem:[#allocation61_spill] sm:$0xff] }
  0x7c   : > { %v5528_v54 = vadd.f32 %v869_v27, %v11028_v25  ;;  %v5531_v43 = vadd.f32 %v872_v9, %v11029_v49  ;;  %v4320_v35 = vld [vmem:[%s10457_s2 + $0x3] ss:$0 sm:$0xff]  ;;  %v11030_v8 = vld [vmem:[#allocation51_spill] sm:$0xff]  ;;  %11035 = vst [vmem:[#allocation4_spill] sm:$0xff] %v5543_v15  ;;  %v5549_v28 = vadd.f32 %v884_v56, %v11038_v2  ;;  %v5552_v63 = vadd.f32 %v887_v30, %v11040_v44  ;;  %v11050_v48 = vld [vmem:[#allocation73_spill] sm:$0xff] }
  0x7d   : > { %v5537_v42 = vadd.f32 %v874_v41, %v11030_v8  ;;  %11033 = vst [vmem:[#allocation3_spill] sm:$0xff] %v5540_v40  ;;  %11037 = vst [vmem:[#allocation15_spill] sm:$0xff] %v5546_v13  ;;  %v11042_v38 = vld [vmem:[#allocation66_spill] sm:$0xff]  ;;  %v11044_v9 = vld [vmem:[#allocation67_spill] sm:$0xff]  ;;  %v5567_v17 = vadd.f32 %v899_v7, %v11050_v48 }
  0x7e   : > { %11039 = vst [vmem:[#allocation18_spill] sm:$0xff] %v5549_v28  ;;  %11041 = vst [vmem:[#allocation19_spill] sm:$0xff] %v5552_v63  ;;  %v5555_v27 = vadd.f32 %v889_v55, %v11042_v38  ;;  %v5558_v26 = vadd.f32 %v892_v60, %v11044_v9  ;;  %v11046_v41 = vld [vmem:[#allocation70_spill] sm:$0xff]  ;;  %v11048_v32 = vld [vmem:[#allocation71_spill] sm:$0xff] }
  0x7f   : > { %11031 = vst [vmem:[#allocation2_spill] sm:$0xff] %v5537_v42  ;;  %v5561_v50 = vadd.f32 %v894_v4, %v11046_v41  ;;  %v5564_v46 = vadd.f32 %v897_v20, %v11048_v32  ;;  %11051 = vst [vmem:[#allocation32_spill] sm:$0xff] %v5567_v17  ;;  %v11052_v56 = vld [vmem:[#allocation5_spill] sm:$0xff]  ;;  %v11053_v59 = vld [vmem:[#allocation6_spill] sm:$0xff] }
  0x80   : > { %11043 = vst [vmem:[#allocation23_spill] sm:$0xff] %v5555_v27  ;;  %11045 = vst [vmem:[#allocation24_spill] sm:$0xff] %v5558_v26  ;;  %v969_v29 = vmul.f32 %v4320_v35, %v11052_v56  ;;  %v970_v30 = vmul.f32 %v4320_v35, %v11053_v59  ;;  %v11054_v23 = vld [vmem:[#allocation8_spill] sm:$0xff]  ;;  %v11055_v58 = vld [vmem:[#allocation9_spill] sm:$0xff] }
  0x81   : > { %11047 = vst [vmem:[#allocation28_spill] sm:$0xff] %v5561_v50  ;;  %11049 = vst [vmem:[#allocation29_spill] sm:$0xff] %v5564_v46  ;;  %v971_v55 = vmul.f32 %v4320_v35, %v11054_v23  ;;  %v972_v60 = vmul.f32 %v4320_v35, %v11055_v58  ;;  %v11056_v61 = vld [vmem:[#allocation11_spill] sm:$0xff]  ;;  %v11057_v4 = vld [vmem:[#allocation12_spill] sm:$0xff] }
  0x82   : > { %v973_v14 = vmul.f32 %v4320_v35, %v11056_v61  ;;  %v974_v45 = vmul.f32 %v4320_v35, %v11057_v4  ;;  %v11058_v36 = vld [vmem:[#allocation14_spill] sm:$0xff]  ;;  %v11059_v52 = vld [vmem:[#allocation16_spill] sm:$0xff]  ;;  %v11060_v7 = vld [vmem:[#allocation17_spill] sm:$0xff] }
  0x83   : > { %v975_v20 = vmul.f32 %v4320_v35, %v11058_v36  ;;  %v976_v24 = vmul.f32 %v4320_v35, %v11059_v52  ;;  %v977_v0 = vmul.f32 %v4320_v35, %v11060_v7  ;;  %v11061_v25 = vld [vmem:[#allocation21_spill] sm:$0xff]  ;;  %v11062_v8 = vld [vmem:[#allocation22_spill] sm:$0xff]  ;;  %v11064_v2 = vld [vmem:[#allocation27_spill] sm:$0xff] }
  0x84   : > { %v978_v49 = vmul.f32 %v4320_v35, %v11061_v25  ;;  %v979_v11 = vmul.f32 %v4320_v35, %v11062_v8  ;;  %v11063_v39 = vld [vmem:[#allocation26_spill] sm:$0xff]  ;;  %v981_v44 = vmul.f32 %v4320_v35, %v11064_v2  ;;  %v11066_v41 = vld [vmem:[#allocation31_spill] sm:$0xff]  ;;  %v11068_v61 = vld [vmem:[#allocation36_spill] sm:$0xff] }
  0x85   : > { %v980_v1 = vmul.f32 %v4320_v35, %v11063_v39  ;;  %v11065_v38 = vld [vmem:[#allocation30_spill] sm:$0xff]  ;;  %v983_v32 = vmul.f32 %v4320_v35, %v11066_v41  ;;  %v11067_v48 = vld [vmem:[#allocation35_spill] sm:$0xff]  ;;  %v985_v36 = vmul.f32 %v4320_v35, %v11068_v61  ;;  %v11071_v7 = vld [vmem:[#allocation40_spill] sm:$0xff] }
  0x86   : > { %v982_v9 = vmul.f32 %v4320_v35, %v11065_v38  ;;  %v984_v4 = vmul.f32 %v4320_v35, %v11067_v48  ;;  %v5587_v58 = vld [vmem:[%s4538_s14 + $0x180] sm:$0xff]  ;;  %v5590_v52 = vld [vmem:[%s4538_s14 + $0x188] sm:$0xff]  ;;  %v986_v25 = vmul.f32 %v4320_v35, %v11071_v7  ;;  %v11072_v23 = vld [vmem:[#allocation41_spill] sm:$0xff] }
  0x87   : > { %11069 = vst [vmem:[#allocation33_spill] sm:$0xff] %v5587_v58  ;;  %11070 = vst [vmem:[#allocation37_spill] sm:$0xff] %v5590_v52  ;;  %v987_v8 = vmul.f32 %v4320_v35, %v11072_v23  ;;  %v11073_v59 = vld [vmem:[#allocation44_spill] sm:$0xff]  ;;  %v11074_v56 = vld [vmem:[#allocation45_spill] sm:$0xff] }
  0x88   : > { %v988_v39 = vmul.f32 %v4320_v35, %v11073_v59  ;;  %v989_v2 = vmul.f32 %v4320_v35, %v11074_v56  ;;  %v11075_v17 = vld [vmem:[#allocation49_spill] sm:$0xff]  ;;  %v11076_v46 = vld [vmem:[#allocation50_spill] sm:$0xff]  ;;  %v11078_v26 = vld [vmem:[#allocation55_spill] sm:$0xff]  ;;  %v999_v56 = vmul.f32 %v4320_v35, %v5587_v58 }
  0x89   : > { %v990_v38 = vmul.f32 %v4320_v35, %v11075_v17  ;;  %v991_v41 = vmul.f32 %v4320_v35, %v11076_v46  ;;  %v11077_v50 = vld [vmem:[#allocation54_spill] sm:$0xff]  ;;  %v993_v61 = vmul.f32 %v4320_v35, %v11078_v26  ;;  %v11079_v27 = vld [vmem:[#allocation59_spill] sm:$0xff]  ;;  %v11080_v28 = vld [vmem:[#allocation60_spill] sm:$0xff]  ;;  %v1000_v17 = vmul.f32 %v4320_v35, %v5590_v52 }
  0x8a   : > { %v992_v48 = vmul.f32 %v4320_v35, %v11077_v50  ;;  %v994_v63 = vmul.f32 %v4320_v35, %v11079_v27  ;;  %v995_v13 = vmul.f32 %v4320_v35, %v11080_v28  ;;  %v11081_v15 = vld [vmem:[#allocation64_spill] sm:$0xff]  ;;  %v11082_v40 = vld [vmem:[#allocation65_spill] sm:$0xff]  ;;  %v5608_v46 = vadd.f32 %v969_v29, %v5469_v10  ;;  %v11101_v29 = vld [vmem:[#allocation3_spill] sm:$0xff] }
  0x8b   : > { %v996_v7 = vmul.f32 %v4320_v35, %v11081_v15  ;;  %v997_v23 = vmul.f32 %v4320_v35, %v11082_v40  ;;  %v11083_v42 = vld [vmem:[#allocation69_spill] sm:$0xff]  ;;  %v5611_v50 = vadd.f32 %v970_v30, %v5473_v62  ;;  %v5614_v27 = vadd.f32 %v971_v55, %v5477_v31  ;;  %v11103_v30 = vld [vmem:[#allocation4_spill] sm:$0xff]  ;;  %v11105_v55 = vld [vmem:[#allocation15_spill] sm:$0xff] }
  0x8c   : > { %v998_v59 = vmul.f32 %v4320_v35, %v11083_v42  ;;  %v5617_v28 = vadd.f32 %v972_v60, %v5480_v16  ;;  %v5620_v40 = vadd.f32 %v973_v14, %v5483_v37  ;;  %v5623_v42 = vadd.f32 %v974_v45, %v5486_v12  ;;  %v11107_v60 = vld [vmem:[#allocation18_spill] sm:$0xff]  ;;  %v11109_v14 = vld [vmem:[#allocation19_spill] sm:$0xff] }
  0x8d   : > { %v5626_v35 = vadd.f32 %v975_v20, %v5489_v3  ;;  %v5629_v10 = vadd.f32 %v976_v24, %v5492_v47  ;;  %v5632_v62 = vadd.f32 %v977_v0, %v5495_v57  ;;  %v5635_v31 = vadd.f32 %v978_v49, %v5498_v22  ;;  %v11111_v45 = vld [vmem:[#allocation23_spill] sm:$0xff]  ;;  %v11113_v20 = vld [vmem:[#allocation24_spill] sm:$0xff]  ;;  %v11117_v49 = vld [vmem:[#allocation29_spill] sm:$0xff] }
  0x8e   : > { %v5638_v16 = vadd.f32 %v979_v11, %v5501_v6  ;;  %v5641_v37 = vadd.f32 %v980_v1, %v5504_v21  ;;  %v5644_v12 = vadd.f32 %v981_v44, %v5507_v51  ;;  %v5647_v3 = vadd.f32 %v982_v9, %v5510_v18  ;;  %v11115_v0 = vld [vmem:[#allocation28_spill] sm:$0xff]  ;;  %v11127_v9 = vld [vmem:[#allocation11_spill] sm:$0xff] }
  0x8f   : > { %11084 = vst [vmem:[#allocation38_spill] sm:$0xff] %v5626_v35  ;;  %11085 = vst [vmem:[#allocation42_spill] sm:$0xff] %v5629_v10  ;;  %v5650_v47 = vadd.f32 %v983_v32, %v5513_v19  ;;  %v5653_v57 = vadd.f32 %v984_v4, %v5516_v33  ;;  %v5656_v22 = vadd.f32 %v985_v36, %v5519_v53  ;;  %v5673_v19 = vld [vmem:[%s10457_s2 + $0x4] ss:$0 sm:$0xff]  ;;  %v11128_v32 = vld [vmem:[#allocation12_spill] sm:$0xff] }
  0x90   : > { %11086 = vst [vmem:[#allocation43_spill] sm:$0xff] %v5632_v62  ;;  %11087 = vst [vmem:[#allocation46_spill] sm:$0xff] %v5635_v31  ;;  %v5659_v6 = vadd.f32 %v986_v25, %v5522_v5  ;;  %v5662_v21 = vadd.f32 %v987_v8, %v5525_v34  ;;  %v5665_v51 = vadd.f32 %v988_v39, %v5528_v54  ;;  %v11099_v33 = vld [vmem:[#allocation2_spill] sm:$0xff] }
  0x91   : > { %11088 = vst [vmem:[#allocation47_spill] sm:$0xff] %v5638_v16  ;;  %11089 = vst [vmem:[#allocation51_spill] sm:$0xff] %v5641_v37  ;;  %v5668_v18 = vadd.f32 %v989_v2, %v5531_v43  ;;  %v5676_v53 = vadd.f32 %v990_v38, %v11099_v33  ;;  %v5679_v5 = vadd.f32 %v991_v41, %v11101_v29  ;;  %v11126_v38 = vld [vmem:[#allocation10_spill] sm:$0xff]  ;;  %v11129_v33 = vld [vmem:[#allocation13_spill] sm:$0xff] }
  0x92   : > { %11090 = vst [vmem:[#allocation52_spill] sm:$0xff] %v5644_v12  ;;  %11091 = vst [vmem:[#allocation56_spill] sm:$0xff] %v5647_v3  ;;  %v5682_v34 = vadd.f32 %v992_v48, %v11103_v30  ;;  %v5685_v54 = vadd.f32 %v993_v61, %v11105_v55  ;;  %v5688_v43 = vadd.f32 %v994_v63, %v11107_v60  ;;  %v11119_v61 = vld [vmem:[#allocation32_spill] sm:$0xff]  ;;  %v11121_v63 = vld [vmem:[#allocation5_spill] sm:$0xff] }
  0x93   : > { %11092 = vst [vmem:[#allocation57_spill] sm:$0xff] %v5650_v47  ;;  %11093 = vst [vmem:[#allocation61_spill] sm:$0xff] %v5653_v57  ;;  %v5691_v4 = vadd.f32 %v995_v13, %v11109_v14  ;;  %v5694_v36 = vadd.f32 %v996_v7, %v11111_v45  ;;  %v5697_v24 = vadd.f32 %v997_v23, %v11113_v20  ;;  %v11122_v13 = vld [vmem:[#allocation6_spill] sm:$0xff]  ;;  %v11123_v7 = vld [vmem:[#allocation7_spill] sm:$0xff] }
  0x94   : > { %11094 = vst [vmem:[#allocation62_spill] sm:$0xff] %v5656_v22  ;;  %11095 = vst [vmem:[#allocation66_spill] sm:$0xff] %v5659_v6  ;;  %v5700_v25 = vadd.f32 %v998_v59, %v11115_v0  ;;  %v5703_v8 = vadd.f32 %v999_v56, %v11117_v49  ;;  %v5706_v11 = vadd.f32 %v1000_v17, %v11119_v61  ;;  %v11124_v23 = vld [vmem:[#allocation8_spill] sm:$0xff]  ;;  %v11125_v59 = vld [vmem:[#allocation9_spill] sm:$0xff] }
  0x95   : > { %11096 = vst [vmem:[#allocation67_spill] sm:$0xff] %v5662_v21  ;;  %11097 = vst [vmem:[#allocation70_spill] sm:$0xff] %v5665_v51  ;;  %v1038_v39 = vmul.f32 %v5673_v19, %v11121_v63  ;;  %v1039_v1 = vmul.f32 %v5673_v19, %v11122_v13  ;;  %v1040_v2 = vmul.f32 %v5673_v19, %v11123_v7  ;;  %v11130_v30 = vld [vmem:[#allocation14_spill] sm:$0xff]  ;;  %v11131_v60 = vld [vmem:[#allocation16_spill] sm:$0xff] }
  0x96   : > { %11098 = vst [vmem:[#allocation71_spill] sm:$0xff] %v5668_v18  ;;  %11100 = vst [vmem:[#allocation73_spill] sm:$0xff] %v5676_v53  ;;  %v5716_v44 = vmul.f32 %v5673_v19, %v11124_v23  ;;  %v5720_v56 = vmul.f32 %v5673_v19, %v11125_v59  ;;  %v5724_v17 = vmul.f32 %v5673_v19, %v11126_v38  ;;  %v11132_v45 = vld [vmem:[#allocation20_spill] sm:$0xff]  ;;  %v11133_v0 = vld [vmem:[#allocation17_spill] sm:$0xff] }
  0x97   : > { %11102 = vst [vmem:[#allocation55_spill] sm:$0xff] %v5679_v5  ;;  %11104 = vst [vmem:[#allocation64_spill] sm:$0xff] %v5682_v34  ;;  %v5728_v41 = vmul.f32 %v5673_v19, %v11127_v9  ;;  %v5732_v48 = vmul.f32 %v5673_v19, %v11128_v32  ;;  %v5736_v29 = vmul.f32 %v5673_v19, %v11129_v33  ;;  %v11134_v61 = vld [vmem:[#allocation21_spill] sm:$0xff]  ;;  %v11136_v23 = vld [vmem:[#allocation22_spill] sm:$0xff]  ;;  %v1135_v47 = vrot.slane %v1039_v1, 1 }
  0x98   : > { %11106 = vst [vmem:[#allocation2_spill] sm:$0xff] %v5685_v54  ;;  %11108 = vst [vmem:[#allocation3_spill] sm:$0xff] %v5688_v43  ;;  %v5740_v55 = vmul.f32 %v5673_v19, %v11130_v30  ;;  %v5744_v14 = vmul.f32 %v5673_v19, %v11131_v60  ;;  %v5748_v20 = vmul.f32 %v5673_v19, %v11132_v45  ;;  %v11135_v13 = vld [vmem:[#allocation25_spill] sm:$0xff]  ;;  %v11137_v38 = vld [vmem:[#allocation26_spill] sm:$0xff] }
  0x99   : > { %11110 = vst [vmem:[#allocation4_spill] sm:$0xff] %v5691_v4  ;;  %11112 = vst [vmem:[#allocation15_spill] sm:$0xff] %v5694_v36  ;;  %v5752_v49 = vmul.f32 %v5673_v19, %v11133_v0  ;;  %v5756_v63 = vmul.f32 %v5673_v19, %v11134_v61  ;;  %v5760_v7 = vmul.f32 %v5673_v19, %v11135_v13  ;;  %v11138_v32 = vld [vmem:[#allocation34_spill] sm:$0xff]  ;;  %v11139_v30 = vld [vmem:[#allocation27_spill] sm:$0xff]  ;;  %v1145_v10 = vrot.slane %v5732_v48, 1 }
  0x9a   : > { %11114 = vst [vmem:[#allocation18_spill] sm:$0xff] %v5697_v24  ;;  %11116 = vst [vmem:[#allocation19_spill] sm:$0xff] %v5700_v25  ;;  %v5764_v59 = vmul.f32 %v5673_v19, %v11136_v23  ;;  %v5768_v9 = vmul.f32 %v5673_v19, %v11137_v38  ;;  %v5772_v33 = vmul.f32 %v5673_v19, %v11138_v32  ;;  %v11140_v45 = vld [vmem:[#allocation30_spill] sm:$0xff]  ;;  %v11141_v61 = vld [vmem:[#allocation39_spill] sm:$0xff]  ;;  %v1147_v35 = vrot.slane %v5736_v29, 1 }
  0x9b   : > { %11118 = vst [vmem:[#allocation23_spill] sm:$0xff] %v5703_v8  ;;  %11120 = vst [vmem:[#allocation24_spill] sm:$0xff] %v5706_v11  ;;  %v5776_v60 = vmul.f32 %v5673_v19, %v11139_v30  ;;  %v5780_v0 = vmul.f32 %v5673_v19, %v11140_v45  ;;  %v5784_v13 = vmul.f32 %v5673_v19, %v11141_v61  ;;  %v11142_v23 = vld [vmem:[#allocation31_spill] sm:$0xff]  ;;  %v11144_v8 = vld [vmem:[#allocation48_spill] sm:$0xff] }
  0x9c   : > { %v5788_v38 = vmul.f32 %v5673_v19, %v11142_v23  ;;  %v11143_v11 = vld [vmem:[#allocation35_spill] sm:$0xff]  ;;  %v5796_v30 = vmul.f32 %v5673_v19, %v11144_v8  ;;  %v11145_v25 = vld [vmem:[#allocation36_spill] sm:$0xff]  ;;  %v11147_v36 = vld [vmem:[#allocation53_spill] sm:$0xff]  ;;  %v1160_v48 = vrot.slane %v5768_v9, 1 }
  0x9d   : > { %v5792_v32 = vmul.f32 %v5673_v19, %v11143_v11  ;;  %v5800_v45 = vmul.f32 %v5673_v19, %v11145_v25  ;;  %v11146_v24 = vld [vmem:[#allocation40_spill] sm:$0xff]  ;;  %v5808_v23 = vmul.f32 %v5673_v19, %v11147_v36  ;;  %v11148_v4 = vld [vmem:[#allocation41_spill] sm:$0xff]  ;;  %v11150_v54 = vld [vmem:[#allocation58_spill] sm:$0xff]  ;;  %v1164_v29 = vrot.slane %v5776_v60, 1 }
  0x9e   : > { %v5804_v61 = vmul.f32 %v5673_v19, %v11146_v24  ;;  %v5812_v11 = vmul.f32 %v5673_v19, %v11148_v4  ;;  %v11149_v43 = vld [vmem:[#allocation44_spill] sm:$0xff]  ;;  %v5820_v25 = vmul.f32 %v5673_v19, %v11150_v54  ;;  %v11151_v34 = vld [vmem:[#allocation45_spill] sm:$0xff]  ;;  %v11153_v53 = vld [vmem:[#allocation63_spill] sm:$0xff] }
  0x9f   : > { %v5816_v8 = vmul.f32 %v5673_v19, %v11149_v43  ;;  %v5824_v24 = vmul.f32 %v5673_v19, %v11151_v34  ;;  %v11152_v5 = vld [vmem:[#allocation49_spill] sm:$0xff]  ;;  %v5832_v4 = vmul.f32 %v5673_v19, %v11153_v53  ;;  %v11154_v18 = vld [vmem:[#allocation50_spill] sm:$0xff]  ;;  %v11156_v21 = vld [vmem:[#allocation68_spill] sm:$0xff] }
  0xa0   : > { %v5828_v36 = vmul.f32 %v5673_v19, %v11152_v5  ;;  %v5836_v43 = vmul.f32 %v5673_v19, %v11154_v18  ;;  %v11155_v51 = vld [vmem:[#allocation54_spill] sm:$0xff]  ;;  %v5844_v34 = vmul.f32 %v5673_v19, %v11156_v21  ;;  %v5848_v5 = vmul.f32 %v5673_v19, %v11078_v26  ;;  %v5851_v6 = vld [vmem:[%s4538_s14 + $0x190] sm:$0x3]  ;;  %v11158_v53 = vld [vmem:[#allocation59_spill] sm:$0xff] }
  0xa1   : > { %v5840_v54 = vmul.f32 %v5673_v19, %v11155_v51  ;;  %11157 = vst [vmem:[#allocation28_spill] sm:$0xff] %v5851_v6  ;;  %v5855_v22 = vmul.f32 %v5673_v19, %v11158_v53  ;;  %v11159_v18 = vld [vmem:[#allocation72_spill] sm:$0xff]  ;;  %v1134_v51 = vrot.slane %v1038_v39, 1  ;;  %v5867_v26 = vmul.f32 %v5673_v19, %v11081_v15  ;;  %v11161_v12 = vld [vmem:[#allocation74_spill] sm:$0xff]  ;;  %v11162_v16 = vld [vmem:[#allocation65_spill] sm:$0xff] }
  0xa2   : > { %v5859_v57 = vmul.f32 %v5673_v19, %v11159_v18  ;;  %v11160_v3 = vld [vmem:[#allocation60_spill] sm:$0xff]  ;;  %v5871_v37 = vmul.f32 %v5673_v19, %v11161_v12  ;;  %v1137_v53 = vrot.slane %v1040_v2, 1  ;;  %v5875_v31 = vmul.f32 %v5673_v19, %v11162_v16  ;;  %v11163_v18 = vld [vmem:[#allocation69_spill] sm:$0xff]  ;;  %v11164_v1 = vld [vmem:[#allocation75_spill] sm:$0xff] }
  0xa3   : > { %v5863_v21 = vmul.f32 %v5673_v19, %v11160_v3  ;;  %v5879_v39 = vmul.f32 %v5673_v19, %v11163_v18  ;;  %v5883_v3 = vmul.f32 %v5673_v19, %v11164_v1  ;;  %v5887_v15 = vmul.f32 %v5673_v19, %v5587_v58 }
  0xa4   : > { %v5891_v12 = vmul.f32 %v5673_v19, %v5590_v52  ;;  %v5895_v16 = vmul.f32 %v5673_v19, %v5851_v6  ;;  %v1139_v2 = vrot.slane %v5716_v44, 1  ;;  %v1140_v18 = vrot.slane %v5720_v56, 1 }
  0xa5   : > { %v5900_v62 = vsel %vm573_vm0, %v1134_v51, %v1135_v47  ;;  %v1142_v1 = vrot.slane %v5724_v17, 1  ;;  %v1144_v58 = vrot.slane %v5728_v41, 1  ;;  %v5906_v52 = vsel %vm573_vm0, %v1135_v47, %v1137_v53 }
  0xa6   : > { %v1149_v19 = vrot.slane %v5740_v55, 1  ;;  %v1150_v44 = vrot.slane %v5744_v14, 1  ;;  %v1152_v56 = vrot.slane %v5748_v20, 1  ;;  %v1154_v51 = vrot.slane %v5752_v49, 1 }
  0xa7   : > { %v1155_v6 = vrot.slane %v5756_v63, 1  ;;  %v1157_v17 = vrot.slane %v5760_v7, 1  ;;  %v1159_v41 = vrot.slane %v5764_v59, 1  ;;  %v1162_v47 = vrot.slane %v5772_v33, 1 }
  0xa8   : > { %v1165_v55 = vrot.slane %v5780_v0, 1  ;;  %v1167_v14 = vrot.slane %v5784_v13, 1  ;;  %v1169_v20 = vrot.slane %v5788_v38, 1  ;;  %v1170_v49 = vrot.slane %v5792_v32, 1 }
  0xa9   : > { %v1141_v63 = vsel %vm573_vm0, %v1139_v2, %v1140_v18  ;;  %v1172_v7 = vrot.slane %v5796_v30, 1  ;;  %v1174_v59 = vrot.slane %v5800_v45, 1  ;;  %v1175_v9 = vrot.slane %v5804_v61, 1 }
  0xaa   : > { %v1143_v33 = vsel %vm573_vm0, %v1140_v18, %v1142_v1  ;;  %v1146_v60 = vsel %vm573_vm0, %v1144_v58, %v1145_v10  ;;  %v1148_v0 = vsel %vm573_vm0, %v1145_v10, %v1147_v35  ;;  %v1151_v13 = vsel %vm573_vm0, %v1149_v19, %v1150_v44 }
  0xab   : > { %v1153_v38 = vsel %vm573_vm0, %v1150_v44, %v1152_v56  ;;  %v1156_v32 = vsel %vm573_vm0, %v1154_v51, %v1155_v6  ;;  %v1158_v53 = vsel %vm573_vm0, %v1155_v6, %v1157_v17  ;;  %v1161_v30 = vsel %vm573_vm0, %v1159_v41, %v1160_v48 }
  0xac   : > { %v1163_v45 = vsel %vm573_vm0, %v1160_v48, %v1162_v47  ;;  %v1166_v61 = vsel %vm573_vm0, %v1164_v29, %v1165_v55  ;;  %v1168_v2 = vsel %vm573_vm0, %v1165_v55, %v1167_v14  ;;  %v1171_v58 = vsel %vm573_vm0, %v1169_v20, %v1170_v49 }
  0xad   : > { %v1173_v35 = vsel %vm573_vm0, %v1170_v49, %v1172_v7  ;;  %v1176_v10 = vsel %vm573_vm0, %v1174_v59, %v1175_v9  ;;  %v1177_v18 = vrot.slane %v5808_v23, 1  ;;  %v1179_v1 = vrot.slane %v5812_v11, 1 }
  0xae   : > { %v1180_v6 = vrot.slane %v5816_v8, 1  ;;  %v1182_v19 = vrot.slane %v5820_v25, 1  ;;  %v1184_v44 = vrot.slane %v5824_v24, 1  ;;  %v1185_v56 = vrot.slane %v5828_v36, 1 }
  0xaf   : > { %v1187_v51 = vrot.slane %v5832_v4, 1  ;;  %v1189_v17 = vrot.slane %v5836_v43, 1  ;;  %v1190_v41 = vrot.slane %v5840_v54, 1  ;;  %v1192_v48 = vrot.slane %v5844_v34, 1 }
  0xb0   : > { %v1194_v23 = vrot.slane %v5848_v5, 1  ;;  %v1195_v11 = vrot.slane %v5855_v22, 1  ;;  %v1197_v8 = vrot.slane %v5859_v57, 1  ;;  %v1199_v25 = vrot.slane %v5863_v21, 1 }
  0xb1   : > { %v1200_v24 = vrot.slane %v5867_v26, 1  ;;  %v1202_v36 = vrot.slane %v5871_v37, 1  ;;  %v1204_v4 = vrot.slane %v5875_v31, 1  ;;  %v1205_v43 = vrot.slane %v5879_v39, 1 }
  0xb2   : > { %v1178_v54 = vsel %vm573_vm0, %v1175_v9, %v1177_v18  ;;  %v1207_v34 = vrot.slane %v5883_v3, 1  ;;  %v1209_v5 = vrot.slane %v5887_v15, 1  ;;  %v1210_v22 = vrot.slane %v5891_v12, 1 }
  0xb3   : > { %v1181_v57 = vsel %vm573_vm0, %v1179_v1, %v1180_v6  ;;  %v1183_v21 = vsel %vm573_vm0, %v1180_v6, %v1182_v19  ;;  %v1186_v26 = vsel %vm573_vm0, %v1184_v44, %v1185_v56  ;;  %v1212_v37 = vrot.slane %v5895_v16, 1  ;;  %v11167_v6 = vld [vmem:[#allocation42_spill] sm:$0xff] }
  0xb4   : > { %v1188_v31 = vsel %vm573_vm0, %v1185_v56, %v1187_v51  ;;  %v1191_v39 = vsel %vm573_vm0, %v1189_v17, %v1190_v41  ;;  %v1193_v47 = vsel %vm573_vm0, %v1190_v41, %v1192_v48  ;;  %v1196_v3 = vsel %vm573_vm0, %v1194_v23, %v1195_v11 }
  0xb5   : > { %v1198_v15 = vsel %vm573_vm0, %v1195_v11, %v1197_v8  ;;  %v1201_v12 = vsel %vm573_vm0, %v1199_v25, %v1200_v24  ;;  %v1203_v29 = vsel %vm573_vm0, %v1200_v24, %v1202_v36  ;;  %v1206_v55 = vsel %vm573_vm0, %v1204_v4, %v1205_v43  ;;  %v11197_v8 = vld [vmem:[#allocation55_spill] sm:$0xff]  ;;  %v11199_v24 = vld [vmem:[#allocation64_spill] sm:$0xff]  ;;  %v11201_v4 = vld [vmem:[#allocation2_spill] sm:$0xff] }
  0xb6   : > { %v1208_v14 = vsel %vm573_vm0, %v1205_v43, %v1207_v34  ;;  %v1211_v16 = vsel %vm573_vm0, %v1209_v5, %v1210_v22  ;;  %v5979_v20 = vadd.f32 %v5900_v62, %v5608_v46  ;;  %v5983_v49 = vadd.f32 %v5906_v52, %v5611_v50  ;;  %v11165_v46 = vld [vmem:[#allocation38_spill] sm:$0xff]  ;;  %v11169_v52 = vld [vmem:[#allocation43_spill] sm:$0xff]  ;;  %v11205_v5 = vld [vmem:[#allocation4_spill] sm:$0xff] }
  0xb7   : > { %v1213_v7 = vsel %vm573_vm0, %v1210_v22, %v1212_v37  ;;  %v5987_v59 = vadd.f32 %v1141_v63, %v5614_v27  ;;  %v5990_v9 = vadd.f32 %v1143_v33, %v5617_v28  ;;  %v5993_v18 = vadd.f32 %v1146_v60, %v5620_v40  ;;  %v11171_v27 = vld [vmem:[#allocation46_spill] sm:$0xff]  ;;  %v11173_v28 = vld [vmem:[#allocation47_spill] sm:$0xff] }
  0xb8   : > { %v5996_v1 = vadd.f32 %v1148_v0, %v5623_v42  ;;  %v5999_v62 = vadd.f32 %v1151_v13, %v11165_v46  ;;  %v6002_v50 = vadd.f32 %v1153_v38, %v11167_v6  ;;  %v6005_v19 = vadd.f32 %v1156_v32, %v11169_v52  ;;  %v11175_v40 = vld [vmem:[#allocation51_spill] sm:$0xff]  ;;  %v11177_v42 = vld [vmem:[#allocation52_spill] sm:$0xff]  ;;  %v11181_v38 = vld [vmem:[#allocation57_spill] sm:$0xff] }
  0xb9   : > { %v6008_v63 = vadd.f32 %v1158_v53, %v11171_v27  ;;  %v6011_v33 = vadd.f32 %v1161_v30, %v11173_v28  ;;  %v6014_v60 = vadd.f32 %v1163_v45, %v11175_v40  ;;  %v6017_v0 = vadd.f32 %v1166_v61, %v11177_v42  ;;  %v11179_v13 = vld [vmem:[#allocation56_spill] sm:$0xff]  ;;  %v11183_v32 = vld [vmem:[#allocation61_spill] sm:$0xff]  ;;  %v11185_v53 = vld [vmem:[#allocation62_spill] sm:$0xff] }
  0xba   : > { %11166 = vst [vmem:[#allocation29_spill] sm:$0xff] %v5999_v62  ;;  %11168 = vst [vmem:[#allocation32_spill] sm:$0xff] %v6002_v50  ;;  %v6020_v44 = vadd.f32 %v1168_v2, %v11179_v13  ;;  %v6023_v56 = vadd.f32 %v1171_v58, %v11181_v38  ;;  %v6026_v51 = vadd.f32 %v1173_v35, %v11183_v32  ;;  %v11187_v30 = vld [vmem:[#allocation66_spill] sm:$0xff]  ;;  %v11189_v45 = vld [vmem:[#allocation67_spill] sm:$0xff] }
  0xbb   : > { %11170 = vst [vmem:[#allocation5_spill] sm:$0xff] %v6005_v19  ;;  %11172 = vst [vmem:[#allocation6_spill] sm:$0xff] %v6008_v63  ;;  %v6029_v17 = vadd.f32 %v1176_v10, %v11185_v53  ;;  %v6032_v41 = vadd.f32 %v1178_v54, %v11187_v30  ;;  %v6035_v48 = vadd.f32 %v1181_v57, %v11189_v45  ;;  %v11191_v61 = vld [vmem:[#allocation70_spill] sm:$0xff]  ;;  %v11193_v2 = vld [vmem:[#allocation71_spill] sm:$0xff] }
  0xbc   : > { %11174 = vst [vmem:[#allocation7_spill] sm:$0xff] %v6011_v33  ;;  %11176 = vst [vmem:[#allocation8_spill] sm:$0xff] %v6014_v60  ;;  %v6038_v23 = vadd.f32 %v1183_v21, %v11191_v61  ;;  %v6041_v58 = vadd.f32 %v1186_v26, %v11193_v2  ;;  %v6046_v35 = vld [vmem:[%s10457_s2 + $0x5] ss:$0 sm:$0xff]  ;;  %v11195_v10 = vld [vmem:[#allocation73_spill] sm:$0xff]  ;;  %v6052_v25 = vadd.f32 %v1191_v39, %v11197_v8 }
  0xbd   : > { %11178 = vst [vmem:[#allocation9_spill] sm:$0xff] %v6017_v0  ;;  %11180 = vst [vmem:[#allocation10_spill] sm:$0xff] %v6020_v44  ;;  %v6049_v11 = vadd.f32 %v1188_v31, %v11195_v10  ;;  %v6055_v36 = vadd.f32 %v1193_v47, %v11199_v24  ;;  %v6058_v43 = vadd.f32 %v1196_v3, %v11201_v4  ;;  %v11203_v54 = vld [vmem:[#allocation3_spill] sm:$0xff]  ;;  %v11209_v26 = vld [vmem:[#allocation18_spill] sm:$0xff] }
  0xbe   : > { %11182 = vst [vmem:[#allocation11_spill] sm:$0xff] %v6023_v56  ;;  %11184 = vst [vmem:[#allocation12_spill] sm:$0xff] %v6026_v51  ;;  %v6061_v34 = vadd.f32 %v1198_v15, %v11203_v54  ;;  %v6064_v22 = vadd.f32 %v1201_v12, %v11205_v5  ;;  %v11207_v57 = vld [vmem:[#allocation15_spill] sm:$0xff]  ;;  %v6070_v37 = vadd.f32 %v1206_v55, %v11209_v26  ;;  %v11215_v46 = vld [vmem:[#allocation24_spill] sm:$0xff] }
  0xbf   : > { %11186 = vst [vmem:[#allocation13_spill] sm:$0xff] %v6029_v17  ;;  %11188 = vst [vmem:[#allocation14_spill] sm:$0xff] %v6032_v41  ;;  %v6067_v21 = vadd.f32 %v1203_v29, %v11207_v57  ;;  %v11211_v31 = vld [vmem:[#allocation19_spill] sm:$0xff]  ;;  %v6079_v15 = vadd.f32 %v1213_v7, %v11215_v46  ;;  %v4366_v12 = vld [vmem:[%s4538_s14 + $0x18] sm:$0xff] }
  0xc0   : > { %11190 = vst [vmem:[#allocation16_spill] sm:$0xff] %v6035_v48  ;;  %11192 = vst [vmem:[#allocation20_spill] sm:$0xff] %v6038_v23  ;;  %v6073_v39 = vadd.f32 %v1208_v14, %v11211_v31  ;;  %v11213_v47 = vld [vmem:[#allocation23_spill] sm:$0xff]  ;;  %v6083_v6 = vmul.f32 %v4366_v12, %v6046_v35  ;;  %v4367_v29 = vld [vmem:[%s4538_s14 + $0x20] sm:$0xff] }
  0xc1   : > { %11194 = vst [vmem:[#allocation17_spill] sm:$0xff] %v6041_v58  ;;  %11196 = vst [vmem:[#allocation21_spill] sm:$0xff] %v6049_v11  ;;  %v6076_v3 = vadd.f32 %v1211_v16, %v11213_v47  ;;  %v6087_v55 = vmul.f32 %v4367_v29, %v6046_v35  ;;  %v4368_v52 = vld [vmem:[%s4538_s14 + $0x28] sm:$0x3]  ;;  %v6094_v16 = vld [vmem:[%s4538_s14 + $0x30] sm:$0xff] }
  0xc2   : > { %11198 = vst [vmem:[#allocation25_spill] sm:$0xff] %v6052_v25  ;;  %11200 = vst [vmem:[#allocation22_spill] sm:$0xff] %v6055_v36  ;;  %v6091_v14 = vmul.f32 %v4368_v52, %v6046_v35  ;;  %v6098_v7 = vmul.f32 %v6094_v16, %v6046_v35  ;;  %v6101_v27 = vld [vmem:[%s4538_s14 + $0x38] sm:$0xff]  ;;  %v6108_v40 = vld [vmem:[%s4538_s14 + $0x40] sm:$0x3]  ;;  %v1379_v58 = vrot.slane %v6083_v6, 2 }
  0xc3   : > { %11202 = vst [vmem:[#allocation26_spill] sm:$0xff] %v6058_v43  ;;  %11204 = vst [vmem:[#allocation34_spill] sm:$0xff] %v6061_v34  ;;  %v6105_v28 = vmul.f32 %v6101_v27, %v6046_v35  ;;  %v6112_v42 = vmul.f32 %v6108_v40, %v6046_v35  ;;  %v6115_v13 = vld [vmem:[%s4538_s14 + $0x48] sm:$0xff]  ;;  %v6122_v32 = vld [vmem:[%s4538_s14 + $0x50] sm:$0xff]  ;;  %v1380_v23 = vrot.slane %v6087_v55, 2 }
  0xc4   : > { %11206 = vst [vmem:[#allocation27_spill] sm:$0xff] %v6064_v22  ;;  %11208 = vst [vmem:[#allocation30_spill] sm:$0xff] %v6067_v21  ;;  %v6119_v38 = vmul.f32 %v6115_v13, %v6046_v35  ;;  %v6126_v53 = vmul.f32 %v6122_v32, %v6046_v35  ;;  %v6129_v30 = vld [vmem:[%s4538_s14 + $0x58] sm:$0x3]  ;;  %v6136_v61 = vld [vmem:[%s4538_s14 + $0x60] sm:$0xff]  ;;  %v1382_v6 = vrot.slane %v6091_v14, 2 }
  0xc5   : > { %11210 = vst [vmem:[#allocation39_spill] sm:$0xff] %v6070_v37  ;;  %11212 = vst [vmem:[#allocation31_spill] sm:$0xff] %v6073_v39  ;;  %v6133_v45 = vmul.f32 %v6129_v30, %v6046_v35  ;;  %v6140_v2 = vmul.f32 %v6136_v61, %v6046_v35  ;;  %v6143_v10 = vld [vmem:[%s4538_s14 + $0x68] sm:$0xff]  ;;  %v6150_v24 = vld [vmem:[%s4538_s14 + $0x70] sm:$0x3]  ;;  %v1385_v63 = vrot.slane %v6105_v28, 2  ;;  %v6405_v19 = vsel %vm819_vm1, %v1379_v58, %v1380_v23 }
  0xc6   : > { %11214 = vst [vmem:[#allocation35_spill] sm:$0xff] %v6076_v3  ;;  %11216 = vst [vmem:[#allocation48_spill] sm:$0xff] %v6079_v15  ;;  %v6147_v8 = vmul.f32 %v6143_v10, %v6046_v35  ;;  %v6154_v4 = vmul.f32 %v6150_v24, %v6046_v35  ;;  %v6157_v54 = vld [vmem:[%s4538_s14 + $0x78] sm:$0xff]  ;;  %v6164_v57 = vld [vmem:[%s4538_s14 + $0x80] sm:$0xff]  ;;  %v1390_v50 = vrot.slane %v6126_v53, 2 }
  0xc7   : > { %11217 = vst [vmem:[#allocation36_spill] sm:$0xff] %v6094_v16  ;;  %11218 = vst [vmem:[#allocation40_spill] sm:$0xff] %v6101_v27  ;;  %v6161_v5 = vmul.f32 %v6157_v54, %v6046_v35  ;;  %v6168_v26 = vmul.f32 %v6164_v57, %v6046_v35  ;;  %v6171_v31 = vld [vmem:[%s4538_s14 + $0x88] sm:$0x3]  ;;  %v6178_v46 = vld [vmem:[%s4538_s14 + $0x90] sm:$0xff]  ;;  %v1392_v62 = vrot.slane %v6133_v45, 2 }
  0xc8   : > { %11219 = vst [vmem:[#allocation53_spill] sm:$0xff] %v6108_v40  ;;  %11220 = vst [vmem:[#allocation41_spill] sm:$0xff] %v6115_v13  ;;  %v6175_v47 = vmul.f32 %v6171_v31, %v6046_v35  ;;  %v6182_v12 = vmul.f32 %v6178_v46, %v6046_v35  ;;  %v6185_v29 = vld [vmem:[%s4538_s14 + $0x98] sm:$0xff]  ;;  %v6248_v13 = vld [vmem:[%s4538_s14 + $0xe0] sm:$0xff]  ;;  %v1397_v28 = vrot.slane %v6154_v4, 2 }
  0xc9   : > { %11221 = vst [vmem:[#allocation44_spill] sm:$0xff] %v6122_v32  ;;  %11222 = vst [vmem:[#allocation58_spill] sm:$0xff] %v6129_v30  ;;  %v6189_v52 = vmul.f32 %v6185_v29, %v6046_v35  ;;  %v6199_v30 = vld [vmem:[%s4538_s14 + $0xa8] sm:$0xff]  ;;  %v6241_v32 = vld [vmem:[%s4538_s14 + $0xd8] sm:$0xff]  ;;  %v1399_v58 = vrot.slane %v6161_v5, 2 }
  0xca   : > { %11223 = vst [vmem:[#allocation45_spill] sm:$0xff] %v6136_v61  ;;  %11224 = vst [vmem:[#allocation49_spill] sm:$0xff] %v6143_v10  ;;  %v6203_v40 = vmul.f32 %v6199_v30, %v6046_v35  ;;  %v6227_v10 = vld [vmem:[%s4538_s14 + $0xc8] sm:$0xff]  ;;  %v6234_v61 = vld [vmem:[%s4538_s14 + $0xd0] sm:$0x3] }
  0xcb   : > { %11225 = vst [vmem:[#allocation63_spill] sm:$0xff] %v6150_v24  ;;  %11226 = vst [vmem:[#allocation50_spill] sm:$0xff] %v6157_v54  ;;  %v6192_v24 = vld [vmem:[%s4538_s14 + $0xa0] sm:$0x3]  ;;  %v6255_v27 = vld [vmem:[%s4538_s14 + $0xe8] sm:$0x3] }
  0xcc   : > { %11227 = vst [vmem:[#allocation54_spill] sm:$0xff] %v6164_v57  ;;  %11228 = vst [vmem:[#allocation68_spill] sm:$0xff] %v6171_v31  ;;  %v6196_v31 = vmul.f32 %v6192_v24, %v6046_v35  ;;  %v6213_v57 = vld [vmem:[%s4538_s14 + $0xb8] sm:$0x3]  ;;  %v6220_v54 = vld [vmem:[%s4538_s14 + $0xc0] sm:$0xff]  ;;  %v1405_v53 = vrot.slane %v6189_v52, 2 }
  0xcd   : > { %11229 = vst [vmem:[#allocation59_spill] sm:$0xff] %v6178_v46  ;;  %11230 = vst [vmem:[#allocation72_spill] sm:$0xff] %v6185_v29  ;;  %v6206_v46 = vld [vmem:[%s4538_s14 + $0xb0] sm:$0xff]  ;;  %v6269_v15 = vld [vmem:[%s4538_s14 + $0xf8] sm:$0xff]  ;;  %v1409_v45 = vrot.slane %v6203_v40, 2 }
  0xce   : > { %11231 = vst [vmem:[#allocation60_spill] sm:$0xff] %v6192_v24  ;;  %11232 = vst [vmem:[#allocation74_spill] sm:$0xff] %v6199_v30  ;;  %v6210_v29 = vmul.f32 %v6206_v46, %v6046_v35  ;;  %v6217_v24 = vmul.f32 %v6213_v57, %v6046_v35  ;;  %v6224_v30 = vmul.f32 %v6220_v54, %v6046_v35  ;;  %v6262_v16 = vld [vmem:[%s4538_s14 + $0xf0] sm:$0xff]  ;;  %v6276_v3 = vld [vmem:[%s4538_s14 + $0x100] sm:$0x3] }
  0xcf   : > { %11233 = vst [vmem:[#allocation65_spill] sm:$0xff] %v6206_v46  ;;  %11234 = vst [vmem:[#allocation69_spill] sm:$0xff] %v6213_v57  ;;  %v6231_v46 = vmul.f32 %v6227_v10, %v6046_v35  ;;  %v6238_v57 = vmul.f32 %v6234_v61, %v6046_v35  ;;  %v6283_v39 = vld [vmem:[%s4538_s14 + $0x108] sm:$0xff]  ;;  %v6290_v37 = vld [vmem:[%s4538_s14 + $0x110] sm:$0xff] }
  0xd0   : > { %11235 = vst [vmem:[#allocation75_spill] sm:$0xff] %v6220_v54  ;;  %11236 = vst [vmem:[#allocation38_spill] sm:$0xff] %v6227_v10  ;;  %v6245_v54 = vmul.f32 %v6241_v32, %v6046_v35  ;;  %v6252_v10 = vmul.f32 %v6248_v13, %v6046_v35  ;;  %v6297_v21 = vld [vmem:[%s4538_s14 + $0x118] sm:$0x3]  ;;  %v6304_v22 = vld [vmem:[%s4538_s14 + $0x120] sm:$0xff]  ;;  %v1414_v4 = vrot.slane %v6224_v30, 2 }
  0xd1   : > { %11237 = vst [vmem:[#allocation42_spill] sm:$0xff] %v6234_v61  ;;  %11238 = vst [vmem:[#allocation43_spill] sm:$0xff] %v6241_v32  ;;  %v6259_v61 = vmul.f32 %v6255_v27, %v6046_v35  ;;  %v6266_v32 = vmul.f32 %v6262_v16, %v6046_v35  ;;  %v6311_v34 = vld [vmem:[%s4538_s14 + $0x128] sm:$0xff]  ;;  %v6318_v43 = vld [vmem:[%s4538_s14 + $0x130] sm:$0x3]  ;;  %v1415_v5 = vrot.slane %v6231_v46, 2 }
  0xd2   : > { %11239 = vst [vmem:[#allocation46_spill] sm:$0xff] %v6248_v13  ;;  %11240 = vst [vmem:[#allocation47_spill] sm:$0xff] %v6255_v27  ;;  %v6273_v13 = vmul.f32 %v6269_v15, %v6046_v35  ;;  %v6280_v27 = vmul.f32 %v6276_v3, %v6046_v35  ;;  %v6325_v36 = vld [vmem:[%s4538_s14 + $0x138] sm:$0xff]  ;;  %v6332_v25 = vld [vmem:[%s4538_s14 + $0x140] sm:$0xff]  ;;  %v1420_v52 = vrot.slane %v6252_v10, 2 }
  0xd3   : > { %11241 = vst [vmem:[#allocation51_spill] sm:$0xff] %v6262_v16  ;;  %11242 = vst [vmem:[#allocation52_spill] sm:$0xff] %v6269_v15  ;;  %v6287_v16 = vmul.f32 %v6283_v39, %v6046_v35  ;;  %v6294_v15 = vmul.f32 %v6290_v37, %v6046_v35  ;;  %v6339_v11 = vld [vmem:[%s4538_s14 + $0x148] sm:$0x3]  ;;  %v6355_v41 = vld [vmem:[%s4538_s14 + $0x158] sm:$0xff] }
  0xd4   : > { %11243 = vst [vmem:[#allocation56_spill] sm:$0xff] %v6276_v3  ;;  %11244 = vst [vmem:[#allocation57_spill] sm:$0xff] %v6283_v39  ;;  %v6301_v3 = vmul.f32 %v6297_v21, %v6046_v35  ;;  %v6308_v39 = vmul.f32 %v6304_v22, %v6046_v35  ;;  %v6362_v17 = vld [vmem:[%s4538_s14 + $0x160] sm:$0x3]  ;;  %v6370_v55 = vld [vmem:[%s4538_s14 + $0x168] sm:$0xff] }
  0xd5   : > { %11245 = vst [vmem:[#allocation61_spill] sm:$0xff] %v6290_v37  ;;  %11246 = vst [vmem:[#allocation62_spill] sm:$0xff] %v6297_v21  ;;  %v6315_v37 = vmul.f32 %v6311_v34, %v6046_v35  ;;  %v6322_v21 = vmul.f32 %v6318_v43, %v6046_v35  ;;  %v6377_v51 = vld [vmem:[%s4538_s14 + $0x170] sm:$0xff]  ;;  %v6384_v56 = vld [vmem:[%s4538_s14 + $0x178] sm:$0x3] }
  0xd6   : > { %11247 = vst [vmem:[#allocation66_spill] sm:$0xff] %v6304_v22  ;;  %11248 = vst [vmem:[#allocation67_spill] sm:$0xff] %v6311_v34  ;;  %v6329_v22 = vmul.f32 %v6325_v36, %v6046_v35  ;;  %v6336_v34 = vmul.f32 %v6332_v25, %v6046_v35  ;;  %v11259_v44 = vld [vmem:[#allocation33_spill] sm:$0xff]  ;;  %v11261_v60 = vld [vmem:[#allocation28_spill] sm:$0xff] }
  0xd7   : > { %11249 = vst [vmem:[#allocation70_spill] sm:$0xff] %v6318_v43  ;;  %11250 = vst [vmem:[#allocation71_spill] sm:$0xff] %v6325_v36  ;;  %v6343_v43 = vmul.f32 %v6339_v11, %v6046_v35  ;;  %v6348_v36 = vld [vmem:[%s4538_s14 + $0x150] sm:$0xff]  ;;  %v6392_v14 = vmul.f32 %v6046_v35, %v11259_v44  ;;  %v11260_v0 = vld [vmem:[#allocation37_spill] sm:$0xff]  ;;  %v6400_v33 = vmul.f32 %v6046_v35, %v11261_v60  ;;  %v1389_v44 = vrot.slane %v6119_v38, 2 }
  0xd8   : > { %11251 = vst [vmem:[#allocation73_spill] sm:$0xff] %v6332_v25  ;;  %11252 = vst [vmem:[#allocation55_spill] sm:$0xff] %v6339_v11  ;;  %v6352_v48 = vmul.f32 %v6348_v36, %v6046_v35  ;;  %v6359_v25 = vmul.f32 %v6355_v41, %v6046_v35  ;;  %v6366_v11 = vmul.f32 %v6362_v17, %v6046_v35  ;;  %v1400_v60 = vrot.slane %v6168_v26, 2 }
  0xd9   : > { %11253 = vst [vmem:[#allocation64_spill] sm:$0xff] %v6348_v36  ;;  %11254 = vst [vmem:[#allocation2_spill] sm:$0xff] %v6355_v41  ;;  %v6374_v36 = vmul.f32 %v6370_v55, %v6046_v35  ;;  %v6381_v41 = vmul.f32 %v6377_v51, %v6046_v35  ;;  %v1404_v38 = vrot.slane %v6182_v12, 2  ;;  %v1419_v12 = vrot.slane %v6245_v54, 2 }
  0xda   : > { %11255 = vst [vmem:[#allocation3_spill] sm:$0xff] %v6362_v17  ;;  %11256 = vst [vmem:[#allocation4_spill] sm:$0xff] %v6370_v55  ;;  %v6388_v17 = vmul.f32 %v6384_v56, %v6046_v35  ;;  %v6396_v55 = vmul.f32 %v6046_v35, %v11260_v0  ;;  %v6411_v0 = vsel %vm819_vm1, %v1380_v23, %v1382_v6  ;;  %v1394_v35 = vrot.slane %v6140_v2, 2 }
  0xdb   : > { %11257 = vst [vmem:[#allocation15_spill] sm:$0xff] %v6377_v51  ;;  %11258 = vst [vmem:[#allocation18_spill] sm:$0xff] %v6384_v56  ;;  %v1384_v51 = vrot.slane %v6098_v7, 2  ;;  %v1387_v56 = vrot.slane %v6112_v42, 2  ;;  %v1395_v7 = vrot.slane %v6147_v8, 2  ;;  %v1402_v42 = vrot.slane %v6175_v47, 2 }
  0xdc   : > { %v1407_v23 = vrot.slane %v6196_v31, 2  ;;  %v1410_v2 = vrot.slane %v6210_v29, 2  ;;  %v1412_v8 = vrot.slane %v6217_v24, 2  ;;  %v1417_v47 = vrot.slane %v6238_v57, 2 }
  0xdd   : > { %v1386_v26 = vsel %vm819_vm1, %v1384_v51, %v1385_v63  ;;  %v1388_v31 = vsel %vm819_vm1, %v1385_v63, %v1387_v56  ;;  %v1391_v40 = vsel %vm819_vm1, %v1389_v44, %v1390_v50  ;;  %v1393_v29 = vsel %vm819_vm1, %v1390_v50, %v1392_v62 }
  0xde   : > { %v1396_v24 = vsel %vm819_vm1, %v1394_v35, %v1395_v7  ;;  %v1398_v30 = vsel %vm819_vm1, %v1395_v7, %v1397_v28  ;;  %v1401_v46 = vsel %vm819_vm1, %v1399_v58, %v1400_v60  ;;  %v1403_v51 = vsel %vm819_vm1, %v1400_v60, %v1402_v42 }
  0xdf   : > { %v1406_v57 = vsel %vm819_vm1, %v1404_v38, %v1405_v53  ;;  %v1408_v54 = vsel %vm819_vm1, %v1405_v53, %v1407_v23  ;;  %v1411_v10 = vsel %vm819_vm1, %v1409_v45, %v1410_v2  ;;  %v1413_v63 = vsel %vm819_vm1, %v1410_v2, %v1412_v8 }
  0xe0   : > { %v1416_v44 = vsel %vm819_vm1, %v1414_v4, %v1415_v5  ;;  %v1418_v62 = vsel %vm819_vm1, %v1415_v5, %v1417_v47  ;;  %v1421_v50 = vsel %vm819_vm1, %v1419_v12, %v1420_v52  ;;  %v1422_v56 = vrot.slane %v6259_v61, 2 }
  0xe1   : > { %v1424_v6 = vrot.slane %v6266_v32, 2  ;;  %v1425_v60 = vrot.slane %v6273_v13, 2  ;;  %v1427_v35 = vrot.slane %v6280_v27, 2  ;;  %v1429_v7 = vrot.slane %v6287_v16, 2 }
  0xe2   : > { %v1430_v28 = vrot.slane %v6294_v15, 2  ;;  %v1432_v58 = vrot.slane %v6301_v3, 2  ;;  %v1434_v42 = vrot.slane %v6308_v39, 2  ;;  %v1435_v38 = vrot.slane %v6315_v37, 2 }
  0xe3   : > { %v1437_v53 = vrot.slane %v6322_v21, 2  ;;  %v1439_v61 = vrot.slane %v6329_v22, 2  ;;  %v1440_v32 = vrot.slane %v6336_v34, 2  ;;  %v1442_v13 = vrot.slane %v6343_v43, 2 }
  0xe4   : > { %v1444_v27 = vrot.slane %v6352_v48, 2  ;;  %v1445_v16 = vrot.slane %v6359_v25, 2  ;;  %v1447_v15 = vrot.slane %v6366_v11, 2  ;;  %v1449_v3 = vrot.slane %v6374_v36, 2 }
  0xe5   : > { %v1450_v39 = vrot.slane %v6381_v41, 2  ;;  %v1423_v37 = vsel %vm819_vm1, %v1420_v52, %v1422_v56  ;;  %v1452_v21 = vrot.slane %v6388_v17, 2  ;;  %v1454_v22 = vrot.slane %v6392_v14, 2 }
  0xe6   : > { %v1455_v34 = vrot.slane %v6396_v55, 2  ;;  %v1426_v43 = vsel %vm819_vm1, %v1424_v6, %v1425_v60  ;;  %v1428_v48 = vsel %vm819_vm1, %v1425_v60, %v1427_v35  ;;  %v1431_v25 = vsel %vm819_vm1, %v1429_v7, %v1430_v28  ;;  %v11263_v60 = vld [vmem:[#allocation32_spill] sm:$0xff] }
  0xe7   : > { %v1457_v11 = vrot.slane %v6400_v33, 2  ;;  %v1433_v36 = vsel %vm819_vm1, %v1430_v28, %v1432_v58  ;;  %v1436_v41 = vsel %vm819_vm1, %v1434_v42, %v1435_v38  ;;  %v1438_v23 = vsel %vm819_vm1, %v1435_v38, %v1437_v53 }
  0xe8   : > { %v1441_v17 = vsel %vm819_vm1, %v1439_v61, %v1440_v32  ;;  %v1443_v14 = vsel %vm819_vm1, %v1440_v32, %v1442_v13  ;;  %v1446_v55 = vsel %vm819_vm1, %v1444_v27, %v1445_v16  ;;  %v1448_v45 = vsel %vm819_vm1, %v1445_v16, %v1447_v15  ;;  %v11281_v16 = vld [vmem:[#allocation22_spill] sm:$0xff] }
  0xe9   : > { %v1451_v2 = vsel %vm819_vm1, %v1449_v3, %v1450_v39  ;;  %v1453_v8 = vsel %vm819_vm1, %v1450_v39, %v1452_v21  ;;  %v1456_v33 = vsel %vm819_vm1, %v1454_v22, %v1455_v34  ;;  %v6484_v4 = vadd.f32 %v6405_v19, %v5979_v20  ;;  %v11262_v20 = vld [vmem:[#allocation29_spill] sm:$0xff]  ;;  %v11283_v3 = vld [vmem:[#allocation26_spill] sm:$0xff]  ;;  %v11287_v22 = vld [vmem:[#allocation27_spill] sm:$0xff] }
  0xea   : > { %v6488_v5 = vadd.f32 %v6411_v0, %v5983_v49  ;;  %v1458_v47 = vsel %vm819_vm1, %v1455_v34, %v1457_v11  ;;  %v6492_v12 = vadd.f32 %v1386_v26, %v5987_v59  ;;  %v6495_v52 = vadd.f32 %v1388_v31, %v5990_v9  ;;  %v11264_v0 = vld [vmem:[#allocation5_spill] sm:$0xff]  ;;  %v11265_v59 = vld [vmem:[#allocation6_spill] sm:$0xff]  ;;  %v11266_v9 = vld [vmem:[#allocation7_spill] sm:$0xff] }
  0xeb   : > { %v6498_v56 = vadd.f32 %v1391_v40, %v5993_v18  ;;  %v6501_v6 = vadd.f32 %v1393_v29, %v5996_v1  ;;  %v6504_v19 = vadd.f32 %v1396_v24, %v11262_v20  ;;  %v6507_v49 = vadd.f32 %v1398_v30, %v11263_v60  ;;  %v11267_v18 = vld [vmem:[#allocation8_spill] sm:$0xff]  ;;  %v11268_v1 = vld [vmem:[#allocation9_spill] sm:$0xff]  ;;  %v11269_v24 = vld [vmem:[#allocation10_spill] sm:$0xff] }
  0xec   : > { %v6510_v35 = vadd.f32 %v1401_v46, %v11264_v0  ;;  %v6513_v26 = vadd.f32 %v1403_v51, %v11265_v59  ;;  %v6516_v31 = vadd.f32 %v1406_v57, %v11266_v9  ;;  %v6519_v40 = vadd.f32 %v1408_v54, %v11267_v18  ;;  %v11270_v30 = vld [vmem:[#allocation11_spill] sm:$0xff]  ;;  %v11271_v46 = vld [vmem:[#allocation12_spill] sm:$0xff]  ;;  %v11272_v51 = vld [vmem:[#allocation13_spill] sm:$0xff] }
  0xed   : > { %v6522_v29 = vadd.f32 %v1411_v10, %v11268_v1  ;;  %v6525_v7 = vadd.f32 %v1413_v63, %v11269_v24  ;;  %v6528_v28 = vadd.f32 %v1416_v44, %v11270_v30  ;;  %v6531_v58 = vadd.f32 %v1418_v62, %v11271_v46  ;;  %v11273_v57 = vld [vmem:[#allocation14_spill] sm:$0xff]  ;;  %v11274_v54 = vld [vmem:[#allocation16_spill] sm:$0xff]  ;;  %v11276_v63 = vld [vmem:[#allocation17_spill] sm:$0xff] }
  0xee   : > { %v6534_v42 = vadd.f32 %v1421_v50, %v11272_v51  ;;  %v6537_v38 = vadd.f32 %v1423_v37, %v11273_v57  ;;  %v6540_v53 = vadd.f32 %v1426_v43, %v11274_v54  ;;  %v11275_v10 = vld [vmem:[#allocation20_spill] sm:$0xff]  ;;  %v6546_v32 = vadd.f32 %v1431_v25, %v11276_v63  ;;  %v4323_v44 = vld [vmem:[%s10457_s2 + $0x6] ss:$0 sm:$0xff]  ;;  %v11277_v62 = vld [vmem:[#allocation21_spill] sm:$0xff] }
  0xef   : > { %v6543_v61 = vadd.f32 %v1428_v48, %v11275_v10  ;;  %v6552_v13 = vadd.f32 %v1433_v36, %v11277_v62  ;;  %v11279_v50 = vld [vmem:[#allocation25_spill] sm:$0xff]  ;;  %v6558_v15 = vadd.f32 %v1438_v23, %v11281_v16  ;;  %v6561_v39 = vadd.f32 %v1441_v17, %v11283_v3  ;;  %v11285_v37 = vld [vmem:[#allocation34_spill] sm:$0xff]  ;;  %v11291_v25 = vld [vmem:[#allocation39_spill] sm:$0xff] }
  0xf0   : > { %v6555_v27 = vadd.f32 %v1436_v41, %v11279_v50  ;;  %v6564_v21 = vadd.f32 %v1443_v14, %v11285_v37  ;;  %v6567_v34 = vadd.f32 %v1446_v55, %v11287_v22  ;;  %v11289_v43 = vld [vmem:[#allocation30_spill] sm:$0xff]  ;;  %v6573_v11 = vadd.f32 %v1451_v2, %v11291_v25  ;;  %v11293_v36 = vld [vmem:[#allocation31_spill] sm:$0xff]  ;;  %v11297_v17 = vld [vmem:[#allocation48_spill] sm:$0xff] }
  0xf1   : > { %11278 = vst [vmem:[#allocation19_spill] sm:$0xff] %v6552_v13  ;;  %11282 = vst [vmem:[#allocation24_spill] sm:$0xff] %v6558_v15  ;;  %v6570_v48 = vadd.f32 %v1448_v45, %v11289_v43  ;;  %v6576_v41 = vadd.f32 %v1453_v8, %v11293_v36  ;;  %v11295_v23 = vld [vmem:[#allocation35_spill] sm:$0xff]  ;;  %v6582_v60 = vadd.f32 %v1458_v47, %v11297_v17  ;;  %v11299_v14 = vld [vmem:[#allocation36_spill] sm:$0xff] }
  0xf2   : > { %11280 = vst [vmem:[#allocation23_spill] sm:$0xff] %v6555_v27  ;;  %11284 = vst [vmem:[#allocation29_spill] sm:$0xff] %v6561_v39  ;;  %v6579_v20 = vadd.f32 %v1456_v33, %v11295_v23  ;;  %v1528_v0 = vmul.f32 %v11299_v14, %v4323_v44  ;;  %v11300_v59 = vld [vmem:[#allocation40_spill] sm:$0xff]  ;;  %v11301_v9 = vld [vmem:[#allocation41_spill] sm:$0xff] }
  0xf3   : > { %11286 = vst [vmem:[#allocation32_spill] sm:$0xff] %v6564_v21  ;;  %11288 = vst [vmem:[#allocation5_spill] sm:$0xff] %v6567_v34  ;;  %v1529_v55 = vmul.f32 %v11300_v59, %v4323_v44  ;;  %v1530_v45 = vmul.f32 %v11301_v9, %v4323_v44  ;;  %v11302_v18 = vld [vmem:[#allocation44_spill] sm:$0xff]  ;;  %v11303_v1 = vld [vmem:[#allocation45_spill] sm:$0xff] }
  0xf4   : > { %11290 = vst [vmem:[#allocation6_spill] sm:$0xff] %v6570_v48  ;;  %11292 = vst [vmem:[#allocation7_spill] sm:$0xff] %v6573_v11  ;;  %v1531_v2 = vmul.f32 %v11302_v18, %v4323_v44  ;;  %v1532_v24 = vmul.f32 %v11303_v1, %v4323_v44  ;;  %v11304_v8 = vld [vmem:[#allocation49_spill] sm:$0xff]  ;;  %v11305_v46 = vld [vmem:[#allocation50_spill] sm:$0xff] }
  0xf5   : > { %11294 = vst [vmem:[#allocation8_spill] sm:$0xff] %v6576_v41  ;;  %11296 = vst [vmem:[#allocation9_spill] sm:$0xff] %v6579_v20  ;;  %v1533_v30 = vmul.f32 %v11304_v8, %v4323_v44  ;;  %v1534_v33 = vmul.f32 %v11305_v46, %v4323_v44  ;;  %v11306_v51 = vld [vmem:[#allocation54_spill] sm:$0xff]  ;;  %v11307_v47 = vld [vmem:[#allocation59_spill] sm:$0xff] }
  0xf6   : > { %11298 = vst [vmem:[#allocation10_spill] sm:$0xff] %v6582_v60  ;;  %v1535_v57 = vmul.f32 %v11306_v51, %v4323_v44  ;;  %v1536_v54 = vmul.f32 %v11307_v47, %v4323_v44  ;;  %v11308_v10 = vld [vmem:[#allocation72_spill] sm:$0xff]  ;;  %v11309_v62 = vld [vmem:[#allocation74_spill] sm:$0xff]  ;;  %v11310_v16 = vld [vmem:[#allocation65_spill] sm:$0xff] }
  0xf7   : > { %v1537_v63 = vmul.f32 %v11308_v10, %v4323_v44  ;;  %v1538_v50 = vmul.f32 %v11309_v62, %v4323_v44  ;;  %v1539_v3 = vmul.f32 %v11310_v16, %v4323_v44  ;;  %v11311_v37 = vld [vmem:[#allocation75_spill] sm:$0xff]  ;;  %v11312_v43 = vld [vmem:[#allocation38_spill] sm:$0xff]  ;;  %v6602_v18 = vld [vmem:[%s4538_s14 + $0x198] sm:$0xff] }
  0xf8   : > { %v1540_v22 = vmul.f32 %v11311_v37, %v4323_v44  ;;  %v1541_v25 = vmul.f32 %v11312_v43, %v4323_v44  ;;  %v11313_v36 = vld [vmem:[#allocation43_spill] sm:$0xff]  ;;  %v11314_v17 = vld [vmem:[#allocation46_spill] sm:$0xff]  ;;  %11316 = vst [vmem:[#allocation11_spill] sm:$0xff] %v6602_v18  ;;  %v11318_v47 = vld [vmem:[#allocation52_spill] sm:$0xff] }
  0xf9   : > { %v1542_v23 = vmul.f32 %v11313_v36, %v4323_v44  ;;  %v1543_v8 = vmul.f32 %v11314_v17, %v4323_v44  ;;  %v11315_v1 = vld [vmem:[#allocation51_spill] sm:$0xff]  ;;  %v6605_v51 = vld [vmem:[%s4538_s14 + $0x1a0] sm:$0xff]  ;;  %v1545_v10 = vmul.f32 %v11318_v47, %v4323_v44  ;;  %v11319_v9 = vld [vmem:[#allocation57_spill] sm:$0xff] }
  0xfa   : > { %v1544_v46 = vmul.f32 %v11315_v1, %v4323_v44  ;;  %11317 = vst [vmem:[#allocation12_spill] sm:$0xff] %v6605_v51  ;;  %v1546_v62 = vmul.f32 %v11319_v9, %v4323_v44  ;;  %v11320_v59 = vld [vmem:[#allocation61_spill] sm:$0xff]  ;;  %v11321_v14 = vld [vmem:[#allocation66_spill] sm:$0xff]  ;;  %v11322_v60 = vld [vmem:[#allocation67_spill] sm:$0xff] }
  0xfb   : > { %v1547_v16 = vmul.f32 %v11320_v59, %v4323_v44  ;;  %v1548_v37 = vmul.f32 %v11321_v14, %v4323_v44  ;;  %v1549_v43 = vmul.f32 %v11322_v60, %v4323_v44  ;;  %v11323_v20 = vld [vmem:[#allocation71_spill] sm:$0xff]  ;;  %v11324_v41 = vld [vmem:[#allocation73_spill] sm:$0xff]  ;;  %v11325_v11 = vld [vmem:[#allocation64_spill] sm:$0xff]  ;;  %v1558_v14 = vmul.f32 %v4323_v44, %v6602_v18 }
  0xfc   : > { %v1550_v36 = vmul.f32 %v11323_v20, %v4323_v44  ;;  %v1551_v17 = vmul.f32 %v11324_v41, %v4323_v44  ;;  %v1552_v1 = vmul.f32 %v11325_v11, %v4323_v44  ;;  %v11326_v48 = vld [vmem:[#allocation2_spill] sm:$0xff]  ;;  %v11327_v21 = vld [vmem:[#allocation4_spill] sm:$0xff]  ;;  %v11328_v15 = vld [vmem:[#allocation15_spill] sm:$0xff]  ;;  %v1559_v60 = vmul.f32 %v4323_v44, %v6605_v51 }
  0xfd   : > { %v1553_v34 = vmul.f32 %v11326_v48, %v4323_v44  ;;  %v1554_v39 = vmul.f32 %v11327_v21, %v4323_v44  ;;  %v1555_v47 = vmul.f32 %v11328_v15, %v4323_v44  ;;  %v11329_v27 = vld [vmem:[#allocation33_spill] sm:$0xff]  ;;  %v6623_v20 = vadd.f32 %v1528_v0, %v6484_v4  ;;  %v11348_v0 = vld [vmem:[#allocation23_spill] sm:$0xff] }
  0xfe   : > { %v1556_v9 = vmul.f32 %v4323_v44, %v11329_v27  ;;  %v11330_v13 = vld [vmem:[#allocation37_spill] sm:$0xff]  ;;  %v6626_v41 = vadd.f32 %v1529_v55, %v6488_v5  ;;  %v6629_v48 = vadd.f32 %v1530_v45, %v6492_v12  ;;  %v6632_v21 = vadd.f32 %v1531_v2, %v6495_v52  ;;  %v11350_v55 = vld [vmem:[#allocation24_spill] sm:$0xff] }
  0xff   : > { %v1557_v59 = vmul.f32 %v4323_v44, %v11330_v13  ;;  %v6635_v27 = vadd.f32 %v1532_v24, %v6498_v56  ;;  %v6638_v13 = vadd.f32 %v1533_v30, %v6501_v6  ;;  %v6641_v44 = vadd.f32 %v1534_v33, %v6504_v19  ;;  %v11352_v45 = vld [vmem:[#allocation29_spill] sm:$0xff]  ;;  %v11354_v2 = vld [vmem:[#allocation32_spill] sm:$0xff]  ;;  %v11358_v30 = vld [vmem:[#allocation6_spill] sm:$0xff] }
 0x100   : > { %v6644_v4 = vadd.f32 %v1535_v57, %v6507_v49  ;;  %v6647_v5 = vadd.f32 %v1536_v54, %v6510_v35  ;;  %v6650_v12 = vadd.f32 %v1537_v63, %v6513_v26  ;;  %v6653_v52 = vadd.f32 %v1538_v50, %v6516_v31  ;;  %v11356_v24 = vld [vmem:[#allocation5_spill] sm:$0xff]  ;;  %v11360_v33 = vld [vmem:[#allocation7_spill] sm:$0xff]  ;;  %v11362_v54 = vld [vmem:[#allocation8_spill] sm:$0xff] }
 0x101   : > { %11331 = vst [vmem:[#allocation13_spill] sm:$0xff] %v6641_v44  ;;  %v6656_v56 = vadd.f32 %v1539_v3, %v6519_v40  ;;  %v6659_v6 = vadd.f32 %v1540_v22, %v6522_v29  ;;  %v6662_v19 = vadd.f32 %v1541_v25, %v6525_v7  ;;  %v6665_v49 = vadd.f32 %v1542_v23, %v6528_v28  ;;  %v6688_v28 = vld [vmem:[%s10457_s2 + $0x7] ss:$0 sm:$0xff]  ;;  %v11364_v63 = vld [vmem:[#allocation9_spill] sm:$0xff] }
 0x102   : > { %11332 = vst [vmem:[#allocation14_spill] sm:$0xff] %v6644_v4  ;;  %11333 = vst [vmem:[#allocation16_spill] sm:$0xff] %v6647_v5  ;;  %v6668_v35 = vadd.f32 %v1543_v8, %v6531_v58  ;;  %v6671_v26 = vadd.f32 %v1544_v46, %v6534_v42  ;;  %v6674_v31 = vadd.f32 %v1545_v10, %v6537_v38  ;;  %v11346_v58 = vld [vmem:[#allocation19_spill] sm:$0xff]  ;;  %v11374_v25 = vld [vmem:[#allocation45_spill] sm:$0xff] }
 0x103   : > { %11334 = vst [vmem:[#allocation20_spill] sm:$0xff] %v6650_v12  ;;  %11335 = vst [vmem:[#allocation17_spill] sm:$0xff] %v6653_v52  ;;  %v6677_v40 = vadd.f32 %v1546_v62, %v6540_v53  ;;  %v6680_v29 = vadd.f32 %v1547_v16, %v6543_v61  ;;  %v6683_v7 = vadd.f32 %v1548_v37, %v6546_v32  ;;  %v11375_v23 = vld [vmem:[#allocation49_spill] sm:$0xff] }
 0x104   : > { %11336 = vst [vmem:[#allocation21_spill] sm:$0xff] %v6656_v56  ;;  %11337 = vst [vmem:[#allocation25_spill] sm:$0xff] %v6659_v6  ;;  %v6691_v42 = vadd.f32 %v1549_v43, %v11346_v58  ;;  %v6694_v38 = vadd.f32 %v1550_v36, %v11348_v0  ;;  %v6697_v53 = vadd.f32 %v1551_v17, %v11350_v55  ;;  %v11376_v58 = vld [vmem:[#allocation63_spill] sm:$0xff]  ;;  %v11377_v55 = vld [vmem:[#allocation50_spill] sm:$0xff] }
 0x105   : > { %11338 = vst [vmem:[#allocation22_spill] sm:$0xff] %v6662_v19  ;;  %11339 = vst [vmem:[#allocation26_spill] sm:$0xff] %v6665_v49  ;;  %v6700_v61 = vadd.f32 %v1552_v1, %v11352_v45  ;;  %v6703_v32 = vadd.f32 %v1553_v34, %v11354_v2  ;;  %v6706_v8 = vadd.f32 %v1554_v39, %v11356_v24  ;;  %v11366_v1 = vld [vmem:[#allocation10_spill] sm:$0xff]  ;;  %v11368_v34 = vld [vmem:[#allocation36_spill] sm:$0xff] }
 0x106   : > { %11340 = vst [vmem:[#allocation34_spill] sm:$0xff] %v6668_v35  ;;  %11341 = vst [vmem:[#allocation27_spill] sm:$0xff] %v6671_v26  ;;  %v6709_v46 = vadd.f32 %v1555_v47, %v11358_v30  ;;  %v6712_v57 = vadd.f32 %v1556_v9, %v11360_v33  ;;  %v6715_v10 = vadd.f32 %v1557_v59, %v11362_v54  ;;  %v11369_v39 = vld [vmem:[#allocation40_spill] sm:$0xff]  ;;  %v11370_v47 = vld [vmem:[#allocation53_spill] sm:$0xff] }
 0x107   : > { %11342 = vst [vmem:[#allocation30_spill] sm:$0xff] %v6674_v31  ;;  %11343 = vst [vmem:[#allocation39_spill] sm:$0xff] %v6677_v40  ;;  %v6718_v62 = vadd.f32 %v1558_v14, %v11364_v63  ;;  %v6721_v50 = vadd.f32 %v1559_v60, %v11366_v1  ;;  %v1597_v16 = vmul.f32 %v11368_v34, %v6688_v28  ;;  %v11371_v9 = vld [vmem:[#allocation41_spill] sm:$0xff]  ;;  %v11372_v59 = vld [vmem:[#allocation44_spill] sm:$0xff] }
 0x108   : > { %11344 = vst [vmem:[#allocation31_spill] sm:$0xff] %v6680_v29  ;;  %11345 = vst [vmem:[#allocation35_spill] sm:$0xff] %v6683_v7  ;;  %v1598_v3 = vmul.f32 %v11369_v39, %v6688_v28  ;;  %v1599_v37 = vmul.f32 %v11370_v47, %v6688_v28  ;;  %v6731_v22 = vmul.f32 %v11371_v9, %v6688_v28  ;;  %v11373_v60 = vld [vmem:[#allocation58_spill] sm:$0xff]  ;;  %v11379_v30 = vld [vmem:[#allocation68_spill] sm:$0xff] }
 0x109   : > { %11347 = vst [vmem:[#allocation48_spill] sm:$0xff] %v6691_v42  ;;  %11349 = vst [vmem:[#allocation19_spill] sm:$0xff] %v6694_v38  ;;  %v6735_v14 = vmul.f32 %v11372_v59, %v6688_v28  ;;  %v6739_v43 = vmul.f32 %v11373_v60, %v6688_v28  ;;  %v6743_v36 = vmul.f32 %v11374_v25, %v6688_v28  ;;  %v11378_v2 = vld [vmem:[#allocation54_spill] sm:$0xff]  ;;  %v11380_v54 = vld [vmem:[#allocation59_spill] sm:$0xff] }
 0x10a   : > { %11351 = vst [vmem:[#allocation23_spill] sm:$0xff] %v6697_v53  ;;  %11353 = vst [vmem:[#allocation24_spill] sm:$0xff] %v6700_v61  ;;  %v6747_v17 = vmul.f32 %v11375_v23, %v6688_v28  ;;  %v6751_v0 = vmul.f32 %v11376_v58, %v6688_v28  ;;  %v6755_v45 = vmul.f32 %v11377_v55, %v6688_v28  ;;  %v11381_v1 = vld [vmem:[#allocation72_spill] sm:$0xff]  ;;  %v11383_v25 = vld [vmem:[#allocation74_spill] sm:$0xff]  ;;  %v1694_v49 = vrot.slane %v1598_v3, 1 }
 0x10b   : > { %11355 = vst [vmem:[#allocation29_spill] sm:$0xff] %v6703_v32  ;;  %11357 = vst [vmem:[#allocation32_spill] sm:$0xff] %v6706_v8  ;;  %v6759_v24 = vmul.f32 %v11378_v2, %v6688_v28  ;;  %v6763_v33 = vmul.f32 %v11379_v30, %v6688_v28  ;;  %v6767_v63 = vmul.f32 %v11380_v54, %v6688_v28  ;;  %v11382_v23 = vld [vmem:[#allocation60_spill] sm:$0xff]  ;;  %v11384_v60 = vld [vmem:[#allocation65_spill] sm:$0xff] }
 0x10c   : > { %11359 = vst [vmem:[#allocation5_spill] sm:$0xff] %v6709_v46  ;;  %11361 = vst [vmem:[#allocation6_spill] sm:$0xff] %v6712_v57  ;;  %v6771_v58 = vmul.f32 %v11381_v1, %v6688_v28  ;;  %v6775_v55 = vmul.f32 %v11382_v23, %v6688_v28  ;;  %v6779_v2 = vmul.f32 %v11383_v25, %v6688_v28  ;;  %v11385_v59 = vld [vmem:[#allocation69_spill] sm:$0xff]  ;;  %v11386_v9 = vld [vmem:[#allocation75_spill] sm:$0xff]  ;;  %v1704_v4 = vrot.slane %v6747_v17, 1 }
 0x10d   : > { %11363 = vst [vmem:[#allocation7_spill] sm:$0xff] %v6715_v10  ;;  %11365 = vst [vmem:[#allocation8_spill] sm:$0xff] %v6718_v62  ;;  %v6783_v30 = vmul.f32 %v11384_v60, %v6688_v28  ;;  %v6787_v54 = vmul.f32 %v11385_v59, %v6688_v28  ;;  %v6791_v1 = vmul.f32 %v11386_v9, %v6688_v28  ;;  %v11387_v47 = vld [vmem:[#allocation38_spill] sm:$0xff]  ;;  %v11389_v34 = vld [vmem:[#allocation43_spill] sm:$0xff]  ;;  %v1706_v44 = vrot.slane %v6751_v0, 1 }
 0x10e   : > { %11367 = vst [vmem:[#allocation9_spill] sm:$0xff] %v6721_v50  ;;  %v6795_v23 = vmul.f32 %v11387_v47, %v6688_v28  ;;  %v11388_v39 = vld [vmem:[#allocation42_spill] sm:$0xff]  ;;  %v6803_v60 = vmul.f32 %v11389_v34, %v6688_v28  ;;  %v11391_v9 = vld [vmem:[#allocation47_spill] sm:$0xff]  ;;  %v11394_v34 = vld [vmem:[#allocation56_spill] sm:$0xff] }
 0x10f   : > { %v6799_v25 = vmul.f32 %v11388_v39, %v6688_v28  ;;  %v11390_v50 = vld [vmem:[#allocation46_spill] sm:$0xff]  ;;  %v6811_v62 = vmul.f32 %v11391_v9, %v6688_v28  ;;  %v11392_v47 = vld [vmem:[#allocation51_spill] sm:$0xff]  ;;  %v11393_v39 = vld [vmem:[#allocation52_spill] sm:$0xff]  ;;  %v6823_v46 = vmul.f32 %v11394_v34, %v6688_v28  ;;  %v1719_v17 = vrot.slane %v6783_v30, 1 }
 0x110   : > { %v6807_v59 = vmul.f32 %v11390_v50, %v6688_v28  ;;  %v6815_v10 = vmul.f32 %v11392_v47, %v6688_v28  ;;  %v6819_v57 = vmul.f32 %v11393_v39, %v6688_v28  ;;  %v11395_v8 = vld [vmem:[#allocation57_spill] sm:$0xff]  ;;  %v11397_v61 = vld [vmem:[#allocation62_spill] sm:$0xff]  ;;  %v11399_v38 = vld [vmem:[#allocation67_spill] sm:$0xff]  ;;  %v1724_v0 = vrot.slane %v6795_v23, 1 }
 0x111   : > { %v6827_v50 = vmul.f32 %v11395_v8, %v6688_v28  ;;  %v11396_v32 = vld [vmem:[#allocation61_spill] sm:$0xff]  ;;  %v6835_v47 = vmul.f32 %v11397_v61, %v6688_v28  ;;  %v11398_v53 = vld [vmem:[#allocation66_spill] sm:$0xff]  ;;  %v6843_v34 = vmul.f32 %v11399_v38, %v6688_v28  ;;  %v11401_v7 = vld [vmem:[#allocation71_spill] sm:$0xff]  ;;  %v6863_v38 = vmul.f32 %v11325_v11, %v6688_v28 }
 0x112   : > { %v6831_v9 = vmul.f32 %v11396_v32, %v6688_v28  ;;  %v6839_v39 = vmul.f32 %v11398_v53, %v6688_v28  ;;  %v11400_v42 = vld [vmem:[#allocation70_spill] sm:$0xff]  ;;  %v6851_v32 = vmul.f32 %v11401_v7, %v6688_v28  ;;  %v11402_v29 = vld [vmem:[#allocation73_spill] sm:$0xff]  ;;  %v11403_v40 = vld [vmem:[#allocation55_spill] sm:$0xff]  ;;  %v6882_v11 = vmul.f32 %v11328_v15, %v6688_v28 }
 0x113   : > { %v6847_v8 = vmul.f32 %v11400_v42, %v6688_v28  ;;  %v6855_v61 = vmul.f32 %v11402_v29, %v6688_v28  ;;  %v6859_v53 = vmul.f32 %v11403_v40, %v6688_v28  ;;  %v6866_v31 = vld [vmem:[%s4538_s14 + $0x1a8] sm:$0x3]  ;;  %v11405_v42 = vld [vmem:[#allocation2_spill] sm:$0xff]  ;;  %v1693_v29 = vrot.slane %v1597_v16, 1  ;;  %v11407_v19 = vld [vmem:[#allocation4_spill] sm:$0xff] }
 0x114   : > { %11404 = vst [vmem:[#allocation10_spill] sm:$0xff] %v6866_v31  ;;  %v6870_v26 = vmul.f32 %v11405_v42, %v6688_v28  ;;  %v11406_v7 = vld [vmem:[#allocation3_spill] sm:$0xff]  ;;  %v6878_v40 = vmul.f32 %v11407_v19, %v6688_v28  ;;  %v11408_v6 = vld [vmem:[#allocation18_spill] sm:$0xff]  ;;  %v1696_v42 = vrot.slane %v1599_v37, 1  ;;  %v11409_v52 = vld [vmem:[#allocation33_spill] sm:$0xff]  ;;  %v6902_v15 = vmul.f32 %v6688_v28, %v6602_v18 }
 0x115   : > { %v6874_v35 = vmul.f32 %v11406_v7, %v6688_v28  ;;  %v6886_v56 = vmul.f32 %v11408_v6, %v6688_v28  ;;  %v6890_v12 = vmul.f32 %v6688_v28, %v11409_v52  ;;  %v11410_v7 = vld [vmem:[#allocation37_spill] sm:$0xff]  ;;  %v11411_v3 = vld [vmem:[#allocation28_spill] sm:$0xff]  ;;  %v6906_v6 = vmul.f32 %v6688_v28, %v6605_v51 }
 0x116   : > { %v6894_v16 = vmul.f32 %v6688_v28, %v11410_v7  ;;  %v6898_v19 = vmul.f32 %v6688_v28, %v11411_v3  ;;  %v6910_v52 = vmul.f32 %v6688_v28, %v6866_v31  ;;  %v1698_v37 = vrot.slane %v6731_v22, 1 }
 0x117   : > { %v1699_v7 = vrot.slane %v6735_v14, 1  ;;  %v6915_v5 = vsel %vm573_vm0, %v1693_v29, %v1694_v49  ;;  %v1701_v3 = vrot.slane %v6739_v43, 1  ;;  %v1703_v18 = vrot.slane %v6743_v36, 1 }
 0x118   : > { %v6921_v51 = vsel %vm573_vm0, %v1694_v49, %v1696_v42  ;;  %v1708_v28 = vrot.slane %v6755_v45, 1  ;;  %v1709_v22 = vrot.slane %v6759_v24, 1  ;;  %v1711_v14 = vrot.slane %v6763_v33, 1 }
 0x119   : > { %v1713_v29 = vrot.slane %v6767_v63, 1  ;;  %v1714_v31 = vrot.slane %v6771_v58, 1  ;;  %v1716_v43 = vrot.slane %v6775_v55, 1  ;;  %v1718_v36 = vrot.slane %v6779_v2, 1 }
 0x11a   : > { %v1721_v49 = vrot.slane %v6787_v54, 1  ;;  %v1723_v42 = vrot.slane %v6791_v1, 1  ;;  %v1726_v45 = vrot.slane %v6799_v25, 1  ;;  %v1728_v24 = vrot.slane %v6803_v60, 1 }
 0x11b   : > { %v1729_v33 = vrot.slane %v6807_v59, 1  ;;  %v1700_v58 = vsel %vm573_vm0, %v1698_v37, %v1699_v7  ;;  %v1731_v55 = vrot.slane %v6811_v62, 1  ;;  %v1733_v2 = vrot.slane %v6815_v10, 1 }
 0x11c   : > { %v1734_v30 = vrot.slane %v6819_v57, 1  ;;  %v1702_v54 = vsel %vm573_vm0, %v1699_v7, %v1701_v3  ;;  %v1705_v63 = vsel %vm573_vm0, %v1703_v18, %v1704_v4  ;;  %v1707_v23 = vsel %vm573_vm0, %v1704_v4, %v1706_v44 }
 0x11d   : > { %v1710_v25 = vsel %vm573_vm0, %v1708_v28, %v1709_v22  ;;  %v1712_v60 = vsel %vm573_vm0, %v1709_v22, %v1711_v14  ;;  %v1715_v59 = vsel %vm573_vm0, %v1713_v29, %v1714_v31  ;;  %v1717_v1 = vsel %vm573_vm0, %v1714_v31, %v1716_v43 }
 0x11e   : > { %v1720_v62 = vsel %vm573_vm0, %v1718_v36, %v1719_v17  ;;  %v1722_v10 = vsel %vm573_vm0, %v1719_v17, %v1721_v49  ;;  %v1725_v57 = vsel %vm573_vm0, %v1723_v42, %v1724_v0  ;;  %v1727_v37 = vsel %vm573_vm0, %v1724_v0, %v1726_v45 }
 0x11f   : > { %v1730_v18 = vsel %vm573_vm0, %v1728_v24, %v1729_v33  ;;  %v1732_v44 = vsel %vm573_vm0, %v1729_v33, %v1731_v55  ;;  %v1735_v4 = vsel %vm573_vm0, %v1733_v2, %v1734_v30  ;;  %v1736_v7 = vrot.slane %v6823_v46, 1 }
 0x120   : > { %v1738_v3 = vrot.slane %v6827_v50, 1  ;;  %v1739_v31 = vrot.slane %v6831_v9, 1  ;;  %v1741_v28 = vrot.slane %v6835_v47, 1  ;;  %v1743_v22 = vrot.slane %v6839_v39, 1 }
 0x121   : > { %v1744_v14 = vrot.slane %v6843_v34, 1  ;;  %v1746_v29 = vrot.slane %v6847_v8, 1  ;;  %v1748_v43 = vrot.slane %v6851_v32, 1  ;;  %v1749_v36 = vrot.slane %v6855_v61, 1 }
 0x122   : > { %v1751_v17 = vrot.slane %v6859_v53, 1  ;;  %v1753_v46 = vrot.slane %v6863_v38, 1  ;;  %v1754_v50 = vrot.slane %v6870_v26, 1  ;;  %v1756_v9 = vrot.slane %v6874_v35, 1 }
 0x123   : > { %v1758_v47 = vrot.slane %v6878_v40, 1  ;;  %v1759_v39 = vrot.slane %v6882_v11, 1  ;;  %v1761_v34 = vrot.slane %v6886_v56, 1  ;;  %v1763_v8 = vrot.slane %v6890_v12, 1 }
 0x124   : > { %v1764_v32 = vrot.slane %v6894_v16, 1  ;;  %v1737_v61 = vsel %vm573_vm0, %v1734_v30, %v1736_v7  ;;  %v1766_v53 = vrot.slane %v6898_v19, 1  ;;  %v1768_v38 = vrot.slane %v6902_v15, 1 }
 0x125   : > { %v1769_v26 = vrot.slane %v6906_v6, 1  ;;  %v1740_v35 = vsel %vm573_vm0, %v1738_v3, %v1739_v31  ;;  %v1742_v40 = vsel %vm573_vm0, %v1739_v31, %v1741_v28  ;;  %v1745_v11 = vsel %vm573_vm0, %v1743_v22, %v1744_v14  ;;  %v11414_v31 = vld [vmem:[#allocation14_spill] sm:$0xff] }
 0x126   : > { %v1771_v56 = vrot.slane %v6910_v52, 1  ;;  %v1747_v12 = vsel %vm573_vm0, %v1744_v14, %v1746_v29  ;;  %v1750_v16 = vsel %vm573_vm0, %v1748_v43, %v1749_v36  ;;  %v1752_v49 = vsel %vm573_vm0, %v1749_v36, %v1751_v17 }
 0x127   : > { %v1755_v19 = vsel %vm573_vm0, %v1753_v46, %v1754_v50  ;;  %v1757_v15 = vsel %vm573_vm0, %v1754_v50, %v1756_v9  ;;  %v1760_v6 = vsel %vm573_vm0, %v1758_v47, %v1759_v39  ;;  %v1762_v42 = vsel %vm573_vm0, %v1759_v39, %v1761_v34  ;;  %v11444_v9 = vld [vmem:[#allocation19_spill] sm:$0xff] }
 0x128   : > { %v1765_v0 = vsel %vm573_vm0, %v1763_v8, %v1764_v32  ;;  %v1767_v45 = vsel %vm573_vm0, %v1764_v32, %v1766_v53  ;;  %v1770_v52 = vsel %vm573_vm0, %v1768_v38, %v1769_v26  ;;  %v6994_v24 = vadd.f32 %v6915_v5, %v6623_v20  ;;  %v11412_v20 = vld [vmem:[#allocation13_spill] sm:$0xff]  ;;  %v11446_v39 = vld [vmem:[#allocation23_spill] sm:$0xff]  ;;  %v11448_v8 = vld [vmem:[#allocation24_spill] sm:$0xff] }
 0x129   : > { %v6998_v33 = vadd.f32 %v6921_v51, %v6626_v41  ;;  %v1772_v55 = vsel %vm573_vm0, %v1769_v26, %v1771_v56  ;;  %v7002_v2 = vadd.f32 %v1700_v58, %v6629_v48  ;;  %v7005_v30 = vadd.f32 %v1702_v54, %v6632_v21  ;;  %v11416_v51 = vld [vmem:[#allocation16_spill] sm:$0xff]  ;;  %v11420_v21 = vld [vmem:[#allocation17_spill] sm:$0xff] }
 0x12a   : > { %v7008_v7 = vadd.f32 %v1705_v63, %v6635_v27  ;;  %v7011_v3 = vadd.f32 %v1707_v23, %v6638_v13  ;;  %v7014_v5 = vadd.f32 %v1710_v25, %v11412_v20  ;;  %v7017_v41 = vadd.f32 %v1712_v60, %v11414_v31  ;;  %v11418_v48 = vld [vmem:[#allocation20_spill] sm:$0xff]  ;;  %v11422_v27 = vld [vmem:[#allocation21_spill] sm:$0xff]  ;;  %v11426_v25 = vld [vmem:[#allocation22_spill] sm:$0xff] }
 0x12b   : > { %v7020_v28 = vadd.f32 %v1715_v59, %v11416_v51  ;;  %v7023_v58 = vadd.f32 %v1717_v1, %v11418_v48  ;;  %v7026_v54 = vadd.f32 %v1720_v62, %v11420_v21  ;;  %v7029_v63 = vadd.f32 %v1722_v10, %v11422_v27  ;;  %v11424_v13 = vld [vmem:[#allocation25_spill] sm:$0xff]  ;;  %v11428_v60 = vld [vmem:[#allocation26_spill] sm:$0xff]  ;;  %v11432_v1 = vld [vmem:[#allocation27_spill] sm:$0xff] }
 0x12c   : > { %11413 = vst [vmem:[#allocation33_spill] sm:$0xff] %v7014_v5  ;;  %11415 = vst [vmem:[#allocation37_spill] sm:$0xff] %v7017_v41  ;;  %v7032_v23 = vadd.f32 %v1725_v57, %v11424_v13  ;;  %v7035_v22 = vadd.f32 %v1727_v37, %v11426_v25  ;;  %v7038_v14 = vadd.f32 %v1730_v18, %v11428_v60  ;;  %v11430_v59 = vld [vmem:[#allocation34_spill] sm:$0xff]  ;;  %v11436_v10 = vld [vmem:[#allocation39_spill] sm:$0xff] }
 0x12d   : > { %11417 = vst [vmem:[#allocation28_spill] sm:$0xff] %v7020_v28  ;;  %11419 = vst [vmem:[#allocation13_spill] sm:$0xff] %v7023_v58  ;;  %v7041_v29 = vadd.f32 %v1732_v44, %v11430_v59  ;;  %v7044_v43 = vadd.f32 %v1735_v4, %v11432_v1  ;;  %v11434_v62 = vld [vmem:[#allocation30_spill] sm:$0xff]  ;;  %v7050_v17 = vadd.f32 %v1740_v35, %v11436_v10  ;;  %v11438_v57 = vld [vmem:[#allocation31_spill] sm:$0xff] }
 0x12e   : > { %11421 = vst [vmem:[#allocation14_spill] sm:$0xff] %v7026_v54  ;;  %11423 = vst [vmem:[#allocation16_spill] sm:$0xff] %v7029_v63  ;;  %v7047_v36 = vadd.f32 %v1737_v61, %v11434_v62  ;;  %v7053_v46 = vadd.f32 %v1742_v40, %v11438_v57  ;;  %v11440_v37 = vld [vmem:[#allocation35_spill] sm:$0xff]  ;;  %v11442_v44 = vld [vmem:[#allocation48_spill] sm:$0xff]  ;;  %v7067_v47 = vadd.f32 %v1750_v16, %v11444_v9 }
 0x12f   : > { %11425 = vst [vmem:[#allocation20_spill] sm:$0xff] %v7032_v23  ;;  %11427 = vst [vmem:[#allocation17_spill] sm:$0xff] %v7035_v22  ;;  %v7056_v50 = vadd.f32 %v1745_v11, %v11440_v37  ;;  %v7061_v18 = vld [vmem:[%s10457_s2 + $0x8] ss:$0 sm:$0xff]  ;;  %v7064_v4 = vadd.f32 %v1747_v12, %v11442_v44  ;;  %v7070_v34 = vadd.f32 %v1752_v49, %v11446_v39  ;;  %v11450_v61 = vld [vmem:[#allocation29_spill] sm:$0xff] }
 0x130   : > { %11429 = vst [vmem:[#allocation21_spill] sm:$0xff] %v7038_v14  ;;  %11431 = vst [vmem:[#allocation25_spill] sm:$0xff] %v7041_v29  ;;  %v7073_v32 = vadd.f32 %v1755_v19, %v11448_v8  ;;  %v7076_v53 = vadd.f32 %v1757_v15, %v11450_v61  ;;  %v11452_v38 = vld [vmem:[#allocation32_spill] sm:$0xff]  ;;  %v11454_v35 = vld [vmem:[#allocation5_spill] sm:$0xff] }
 0x131   : > { %11433 = vst [vmem:[#allocation22_spill] sm:$0xff] %v7044_v43  ;;  %11435 = vst [vmem:[#allocation26_spill] sm:$0xff] %v7047_v36  ;;  %v7079_v26 = vadd.f32 %v1760_v6, %v11452_v38  ;;  %v7082_v40 = vadd.f32 %v1762_v42, %v11454_v35  ;;  %v11456_v11 = vld [vmem:[#allocation6_spill] sm:$0xff]  ;;  %v11458_v12 = vld [vmem:[#allocation7_spill] sm:$0xff] }
 0x132   : > { %11437 = vst [vmem:[#allocation34_spill] sm:$0xff] %v7050_v17  ;;  %11439 = vst [vmem:[#allocation27_spill] sm:$0xff] %v7053_v46  ;;  %v7085_v56 = vadd.f32 %v1765_v0, %v11456_v11  ;;  %v7088_v16 = vadd.f32 %v1767_v45, %v11458_v12  ;;  %v11460_v49 = vld [vmem:[#allocation8_spill] sm:$0xff]  ;;  %v11462_v19 = vld [vmem:[#allocation9_spill] sm:$0xff] }
 0x133   : > { %11441 = vst [vmem:[#allocation30_spill] sm:$0xff] %v7056_v50  ;;  %11443 = vst [vmem:[#allocation39_spill] sm:$0xff] %v7064_v4  ;;  %v7091_v20 = vadd.f32 %v1770_v52, %v11460_v49  ;;  %v7094_v31 = vadd.f32 %v1772_v55, %v11462_v19  ;;  %v11464_v15 = vld [vmem:[#allocation36_spill] sm:$0xff]  ;;  %v11466_v42 = vld [vmem:[#allocation53_spill] sm:$0xff] }
 0x134   : > { %11445 = vst [vmem:[#allocation31_spill] sm:$0xff] %v7067_v47  ;;  %11447 = vst [vmem:[#allocation35_spill] sm:$0xff] %v7070_v34  ;;  %v1842_v51 = vmul.f32 %v11464_v15, %v7061_v18  ;;  %v11465_v6 = vld [vmem:[#allocation40_spill] sm:$0xff]  ;;  %v1844_v21 = vmul.f32 %v11466_v42, %v7061_v18  ;;  %v11467_v0 = vld [vmem:[#allocation41_spill] sm:$0xff] }
 0x135   : > { %11449 = vst [vmem:[#allocation48_spill] sm:$0xff] %v7073_v32  ;;  %11451 = vst [vmem:[#allocation19_spill] sm:$0xff] %v7076_v53  ;;  %v1843_v48 = vmul.f32 %v11465_v6, %v7061_v18  ;;  %v7104_v27 = vmul.f32 %v11467_v0, %v7061_v18  ;;  %v11468_v45 = vld [vmem:[#allocation44_spill] sm:$0xff]  ;;  %v11469_v55 = vld [vmem:[#allocation58_spill] sm:$0xff] }
 0x136   : > { %11453 = vst [vmem:[#allocation23_spill] sm:$0xff] %v7079_v26  ;;  %11455 = vst [vmem:[#allocation24_spill] sm:$0xff] %v7082_v40  ;;  %v7108_v52 = vmul.f32 %v11468_v45, %v7061_v18  ;;  %v7112_v13 = vmul.f32 %v11469_v55, %v7061_v18  ;;  %v11470_v25 = vld [vmem:[#allocation45_spill] sm:$0xff]  ;;  %v11472_v62 = vld [vmem:[#allocation63_spill] sm:$0xff]  ;;  %v1938_v17 = vrot.slane %v1842_v51, 2 }
 0x137   : > { %11457 = vst [vmem:[#allocation29_spill] sm:$0xff] %v7085_v56  ;;  %11459 = vst [vmem:[#allocation32_spill] sm:$0xff] %v7088_v16  ;;  %v7116_v60 = vmul.f32 %v11470_v25, %v7061_v18  ;;  %v11471_v59 = vld [vmem:[#allocation49_spill] sm:$0xff]  ;;  %v7124_v10 = vmul.f32 %v11472_v62, %v7061_v18  ;;  %v11473_v57 = vld [vmem:[#allocation50_spill] sm:$0xff]  ;;  %v1939_v36 = vrot.slane %v1843_v48, 2  ;;  %v1943_v58 = vrot.slane %v7104_v27, 2 }
 0x138   : > { %11461 = vst [vmem:[#allocation5_spill] sm:$0xff] %v7091_v20  ;;  %11463 = vst [vmem:[#allocation6_spill] sm:$0xff] %v7094_v31  ;;  %v7120_v1 = vmul.f32 %v11471_v59, %v7061_v18  ;;  %v7128_v37 = vmul.f32 %v11473_v57, %v7061_v18  ;;  %v11474_v44 = vld [vmem:[#allocation54_spill] sm:$0xff]  ;;  %v11475_v39 = vld [vmem:[#allocation68_spill] sm:$0xff] }
 0x139   : > { %v7132_v9 = vmul.f32 %v11474_v44, %v7061_v18  ;;  %v7136_v8 = vmul.f32 %v11475_v39, %v7061_v18  ;;  %v11476_v61 = vld [vmem:[#allocation59_spill] sm:$0xff]  ;;  %v11477_v35 = vld [vmem:[#allocation72_spill] sm:$0xff]  ;;  %v11479_v19 = vld [vmem:[#allocation74_spill] sm:$0xff]  ;;  %v7285_v28 = vsel %vm819_vm1, %v1938_v17, %v1939_v36  ;;  %v1951_v5 = vrot.slane %v7124_v10, 2 }
 0x13a   : > { %v7140_v38 = vmul.f32 %v11476_v61, %v7061_v18  ;;  %v7144_v11 = vmul.f32 %v11477_v35, %v7061_v18  ;;  %v11478_v12 = vld [vmem:[#allocation60_spill] sm:$0xff]  ;;  %v7152_v15 = vmul.f32 %v11479_v19, %v7061_v18  ;;  %v11480_v6 = vld [vmem:[#allocation65_spill] sm:$0xff]  ;;  %v11482_v55 = vld [vmem:[#allocation75_spill] sm:$0xff]  ;;  %v1949_v41 = vrot.slane %v7120_v1, 2 }
 0x13b   : > { %v7148_v49 = vmul.f32 %v11478_v12, %v7061_v18  ;;  %v7156_v42 = vmul.f32 %v11480_v6, %v7061_v18  ;;  %v11481_v0 = vld [vmem:[#allocation69_spill] sm:$0xff]  ;;  %v7164_v25 = vmul.f32 %v11482_v55, %v7061_v18  ;;  %v11483_v59 = vld [vmem:[#allocation38_spill] sm:$0xff]  ;;  %v11485_v39 = vld [vmem:[#allocation43_spill] sm:$0xff]  ;;  %v1954_v27 = vrot.slane %v7132_v9, 2 }
 0x13c   : > { %v7160_v45 = vmul.f32 %v11481_v0, %v7061_v18  ;;  %v7168_v62 = vmul.f32 %v11483_v59, %v7061_v18  ;;  %v11484_v57 = vld [vmem:[#allocation42_spill] sm:$0xff]  ;;  %v7176_v61 = vmul.f32 %v11485_v39, %v7061_v18  ;;  %v11487_v19 = vld [vmem:[#allocation47_spill] sm:$0xff]  ;;  %v11489_v59 = vld [vmem:[#allocation52_spill] sm:$0xff]  ;;  %v1958_v17 = vrot.slane %v7140_v38, 2 }
 0x13d   : > { %v7172_v44 = vmul.f32 %v11484_v57, %v7061_v18  ;;  %v11486_v35 = vld [vmem:[#allocation46_spill] sm:$0xff]  ;;  %v7184_v6 = vmul.f32 %v11487_v19, %v7061_v18  ;;  %v11488_v0 = vld [vmem:[#allocation51_spill] sm:$0xff]  ;;  %v7192_v57 = vmul.f32 %v11489_v59, %v7061_v18  ;;  %v11490_v31 = vld [vmem:[#allocation56_spill] sm:$0xff]  ;;  %v1964_v1 = vrot.slane %v7156_v42, 2 }
 0x13e   : > { %v7180_v12 = vmul.f32 %v11486_v35, %v7061_v18  ;;  %v7188_v55 = vmul.f32 %v11488_v0, %v7061_v18  ;;  %v7196_v39 = vmul.f32 %v11490_v31, %v7061_v18  ;;  %v11491_v20 = vld [vmem:[#allocation57_spill] sm:$0xff]  ;;  %v11493_v56 = vld [vmem:[#allocation62_spill] sm:$0xff]  ;;  %v11495_v31 = vld [vmem:[#allocation67_spill] sm:$0xff]  ;;  %v1968_v10 = vrot.slane %v7164_v25, 2 }
 0x13f   : > { %v7200_v35 = vmul.f32 %v11491_v20, %v7061_v18  ;;  %v11492_v16 = vld [vmem:[#allocation61_spill] sm:$0xff]  ;;  %v7208_v0 = vmul.f32 %v11493_v56, %v7061_v18  ;;  %v11494_v40 = vld [vmem:[#allocation66_spill] sm:$0xff]  ;;  %v7216_v26 = vmul.f32 %v11495_v31, %v7061_v18  ;;  %v11500_v31 = vld [vmem:[#allocation64_spill] sm:$0xff]  ;;  %v1971_v9 = vrot.slane %v7172_v44, 2 }
 0x140   : > { %v7204_v19 = vmul.f32 %v11492_v16, %v7061_v18  ;;  %v7212_v59 = vmul.f32 %v11494_v40, %v7061_v18  ;;  %v11496_v20 = vld [vmem:[#allocation70_spill] sm:$0xff]  ;;  %v11497_v16 = vld [vmem:[#allocation71_spill] sm:$0xff]  ;;  %v11498_v56 = vld [vmem:[#allocation73_spill] sm:$0xff]  ;;  %v7236_v4 = vmul.f32 %v11500_v31, %v7061_v18  ;;  %v1974_v38 = vrot.slane %v7180_v12, 2 }
 0x141   : > { %v7220_v53 = vmul.f32 %v11496_v20, %v7061_v18  ;;  %v7224_v32 = vmul.f32 %v11497_v16, %v7061_v18  ;;  %v7228_v34 = vmul.f32 %v11498_v56, %v7061_v18  ;;  %v11499_v40 = vld [vmem:[#allocation55_spill] sm:$0xff]  ;;  %v11501_v20 = vld [vmem:[#allocation2_spill] sm:$0xff]  ;;  %v11503_v56 = vld [vmem:[#allocation4_spill] sm:$0xff]  ;;  %v1979_v42 = vrot.slane %v7192_v57, 2 }
 0x142   : > { %v7232_v47 = vmul.f32 %v11499_v40, %v7061_v18  ;;  %v7240_v50 = vmul.f32 %v11501_v20, %v7061_v18  ;;  %v11502_v16 = vld [vmem:[#allocation3_spill] sm:$0xff]  ;;  %v7248_v43 = vmul.f32 %v11503_v56, %v7061_v18  ;;  %v11505_v31 = vld [vmem:[#allocation18_spill] sm:$0xff]  ;;  %v1941_v20 = vrot.slane %v1844_v21, 2  ;;  %v4413_v48 = vld [vmem:[%s4538_s14 + $0x190] sm:$0x3] }
 0x143   : > { %v7244_v46 = vmul.f32 %v11502_v16, %v7061_v18  ;;  %v11504_v40 = vld [vmem:[#allocation15_spill] sm:$0xff]  ;;  %v7256_v14 = vmul.f32 %v11505_v31, %v7061_v18  ;;  %v4411_v22 = vld [vmem:[%s4538_s14 + $0x180] sm:$0xff]  ;;  %v7268_v56 = vmul.f32 %v4413_v48, %v7061_v18  ;;  %v11507_v54 = vld [vmem:[#allocation12_spill] sm:$0xff]  ;;  %v1946_v48 = vrot.slane %v7112_v13, 2 }
 0x144   : > { %v7252_v29 = vmul.f32 %v11504_v40, %v7061_v18  ;;  %v7260_v23 = vmul.f32 %v4411_v22, %v7061_v18  ;;  %v4412_v16 = vld [vmem:[%s4538_s14 + $0x188] sm:$0xff]  ;;  %v7276_v31 = vmul.f32 %v7061_v18, %v11507_v54  ;;  %v11508_v21 = vld [vmem:[#allocation10_spill] sm:$0xff]  ;;  %v7291_v54 = vsel %vm819_vm1, %v1939_v36, %v1941_v20 }
 0x145   : > { %v7264_v51 = vmul.f32 %v4412_v16, %v7061_v18  ;;  %v11506_v63 = vld [vmem:[#allocation11_spill] sm:$0xff]  ;;  %v7280_v22 = vmul.f32 %v7061_v18, %v11508_v21  ;;  %v1944_v16 = vrot.slane %v7108_v52, 2  ;;  %v1956_v52 = vrot.slane %v7136_v8, 2 }
 0x146   : > { %v7272_v40 = vmul.f32 %v7061_v18, %v11506_v63  ;;  %v1948_v63 = vrot.slane %v7116_v60, 2  ;;  %v1953_v18 = vrot.slane %v7128_v37, 2  ;;  %v1959_v21 = vrot.slane %v7144_v11, 2 }
 0x147   : > { %v1961_v13 = vrot.slane %v7148_v49, 2  ;;  %v1963_v60 = vrot.slane %v7152_v15, 2  ;;  %v1966_v36 = vrot.slane %v7160_v45, 2  ;;  %v1969_v37 = vrot.slane %v7168_v62, 2 }
 0x148   : > { %v1973_v8 = vrot.slane %v7176_v61, 2  ;;  %v1945_v11 = vsel %vm819_vm1, %v1943_v58, %v1944_v16  ;;  %v1976_v49 = vrot.slane %v7184_v6, 2  ;;  %v1978_v15 = vrot.slane %v7188_v55, 2 }
 0x149   : > { %v1947_v45 = vsel %vm819_vm1, %v1944_v16, %v1946_v48  ;;  %v1950_v25 = vsel %vm819_vm1, %v1948_v63, %v1949_v41  ;;  %v1952_v62 = vsel %vm819_vm1, %v1949_v41, %v1951_v5  ;;  %v1955_v44 = vsel %vm819_vm1, %v1953_v18, %v1954_v27 }
 0x14a   : > { %v1957_v61 = vsel %vm819_vm1, %v1954_v27, %v1956_v52  ;;  %v1960_v12 = vsel %vm819_vm1, %v1958_v17, %v1959_v21  ;;  %v1962_v58 = vsel %vm819_vm1, %v1959_v21, %v1961_v13  ;;  %v1965_v6 = vsel %vm819_vm1, %v1963_v60, %v1964_v1 }
 0x14b   : > { %v1967_v55 = vsel %vm819_vm1, %v1964_v1, %v1966_v36  ;;  %v1970_v57 = vsel %vm819_vm1, %v1968_v10, %v1969_v37  ;;  %v1972_v20 = vsel %vm819_vm1, %v1969_v37, %v1971_v9  ;;  %v1975_v16 = vsel %vm819_vm1, %v1973_v8, %v1974_v38 }
 0x14c   : > { %v1977_v5 = vsel %vm819_vm1, %v1974_v38, %v1976_v49  ;;  %v1980_v41 = vsel %vm819_vm1, %v1978_v15, %v1979_v42  ;;  %v1981_v48 = vrot.slane %v7196_v39, 2  ;;  %v1983_v63 = vrot.slane %v7200_v35, 2 }
 0x14d   : > { %v1984_v18 = vrot.slane %v7204_v19, 2  ;;  %v1986_v27 = vrot.slane %v7208_v0, 2  ;;  %v1988_v52 = vrot.slane %v7212_v59, 2  ;;  %v1989_v17 = vrot.slane %v7216_v26, 2 }
 0x14e   : > { %v1991_v21 = vrot.slane %v7220_v53, 2  ;;  %v1993_v13 = vrot.slane %v7224_v32, 2  ;;  %v1994_v60 = vrot.slane %v7228_v34, 2  ;;  %v1996_v1 = vrot.slane %v7232_v47, 2 }
 0x14f   : > { %v1998_v39 = vrot.slane %v7236_v4, 2  ;;  %v1999_v35 = vrot.slane %v7240_v50, 2  ;;  %v2001_v19 = vrot.slane %v7244_v46, 2  ;;  %v2003_v0 = vrot.slane %v7248_v43, 2 }
 0x150   : > { %v2004_v59 = vrot.slane %v7252_v29, 2  ;;  %v2006_v26 = vrot.slane %v7256_v14, 2  ;;  %v2008_v53 = vrot.slane %v7260_v23, 2  ;;  %v2009_v32 = vrot.slane %v7264_v51, 2 }
 0x151   : > { %v1982_v34 = vsel %vm819_vm1, %v1979_v42, %v1981_v48  ;;  %v2011_v47 = vrot.slane %v7268_v56, 2  ;;  %v2013_v4 = vrot.slane %v7272_v40, 2  ;;  %v2014_v50 = vrot.slane %v7276_v31, 2 }
 0x152   : > { %v1985_v46 = vsel %vm819_vm1, %v1983_v63, %v1984_v18  ;;  %v1987_v43 = vsel %vm819_vm1, %v1984_v18, %v1986_v27  ;;  %v1990_v29 = vsel %vm819_vm1, %v1988_v52, %v1989_v17  ;;  %v2016_v14 = vrot.slane %v7280_v22, 2  ;;  %v11509_v18 = vld [vmem:[#allocation33_spill] sm:$0xff] }
 0x153   : > { %v1992_v23 = vsel %vm819_vm1, %v1989_v17, %v1991_v21  ;;  %v1995_v51 = vsel %vm819_vm1, %v1993_v13, %v1994_v60  ;;  %v1997_v36 = vsel %vm819_vm1, %v1994_v60, %v1996_v1  ;;  %v2000_v56 = vsel %vm819_vm1, %v1998_v39, %v1999_v35  ;;  %v11510_v52 = vld [vmem:[#allocation37_spill] sm:$0xff]  ;;  %v11511_v21 = vld [vmem:[#allocation28_spill] sm:$0xff]  ;;  %v11513_v60 = vld [vmem:[#allocation14_spill] sm:$0xff] }
 0x154   : > { %v2002_v40 = vsel %vm819_vm1, %v1999_v35, %v2001_v19  ;;  %v2005_v31 = vsel %vm819_vm1, %v2003_v0, %v2004_v59  ;;  %v2007_v10 = vsel %vm819_vm1, %v2004_v59, %v2006_v26  ;;  %v2010_v37 = vsel %vm819_vm1, %v2008_v53, %v2009_v32  ;;  %v11515_v39 = vld [vmem:[#allocation20_spill] sm:$0xff]  ;;  %v11520_v35 = vld [vmem:[#allocation26_spill] sm:$0xff]  ;;  %v11522_v0 = vld [vmem:[#allocation27_spill] sm:$0xff] }
 0x155   : > { %v2012_v9 = vsel %vm819_vm1, %v2009_v32, %v2011_v47  ;;  %v2015_v22 = vsel %vm819_vm1, %v2013_v4, %v2014_v50  ;;  %v2050_v8 = vadd.f32 %v7285_v28, %v6994_v24  ;;  %v2051_v38 = vadd.f32 %v7291_v54, %v6998_v33  ;;  %v11512_v24 = vld [vmem:[#allocation13_spill] sm:$0xff]  ;;  %v11514_v54 = vld [vmem:[#allocation16_spill] sm:$0xff]  ;;  %v11521_v19 = vld [vmem:[#allocation34_spill] sm:$0xff] }
 0x156   : > { %v2017_v49 = vsel %vm819_vm1, %v2014_v50, %v2016_v14  ;;  %v2052_v15 = vadd.f32 %v1945_v11, %v7002_v2  ;;  %v2053_v42 = vadd.f32 %v1947_v45, %v7005_v30  ;;  %v2054_v48 = vadd.f32 %v1950_v25, %v7008_v7  ;;  %v11516_v11 = vld [vmem:[#allocation17_spill] sm:$0xff]  ;;  %v11523_v59 = vld [vmem:[#allocation30_spill] sm:$0xff]  ;;  %v11525_v26 = vld [vmem:[#allocation31_spill] sm:$0xff] }
 0x157   : > { %v2055_v63 = vadd.f32 %v1952_v62, %v7011_v3  ;;  %v2056_v27 = vadd.f32 %v1955_v44, %v11509_v18  ;;  %v2057_v17 = vadd.f32 %v1957_v61, %v11510_v52  ;;  %v2058_v13 = vadd.f32 %v1960_v12, %v11511_v21  ;;  %v11517_v45 = vld [vmem:[#allocation21_spill] sm:$0xff]  ;;  %v11519_v62 = vld [vmem:[#allocation22_spill] sm:$0xff]  ;;  %v11529_v4 = vld [vmem:[#allocation23_spill] sm:$0xff] }
 0x158   : > { %v2059_v28 = vadd.f32 %v1962_v58, %v11512_v24  ;;  %v2060_v33 = vadd.f32 %v1965_v6, %v11513_v60  ;;  %v2061_v1 = vadd.f32 %v1967_v55, %v11514_v54  ;;  %v2062_v2 = vadd.f32 %v1970_v57, %v11515_v39  ;;  %v11518_v25 = vld [vmem:[#allocation25_spill] sm:$0xff]  ;;  %v4326_v55 = vld [vmem:[%s10459_s4] ss:$0 sm:$0xff]  ;;  %v11524_v57 = vld [vmem:[#allocation39_spill] sm:$0xff] }
 0x159   : > { %v2063_v30 = vadd.f32 %v1972_v20, %v11516_v11  ;;  %v2064_v7 = vadd.f32 %v1975_v16, %v11517_v45  ;;  %v2065_v3 = vadd.f32 %v1977_v5, %v11518_v25  ;;  %v2066_v44 = vadd.f32 %v1980_v41, %v11519_v62  ;;  %v11526_v5 = vld [vmem:[#allocation35_spill] sm:$0xff]  ;;  %v11527_v41 = vld [vmem:[#allocation48_spill] sm:$0xff]  ;;  %v11533_v21 = vld [vmem:[#allocation5_spill] sm:$0xff] }
 0x15a   : > { %v2067_v61 = vadd.f32 %v1982_v34, %v11520_v35  ;;  %v2068_v12 = vadd.f32 %v1985_v46, %v11521_v19  ;;  %v2069_v58 = vadd.f32 %v1987_v43, %v11522_v0  ;;  %v2070_v6 = vadd.f32 %v1990_v29, %v11523_v59  ;;  %v11528_v34 = vld [vmem:[#allocation19_spill] sm:$0xff]  ;;  %v11530_v46 = vld [vmem:[#allocation24_spill] sm:$0xff]  ;;  %v11531_v29 = vld [vmem:[#allocation29_spill] sm:$0xff] }
 0x15b   : > { %v2071_v20 = vadd.f32 %v1992_v23, %v11524_v57  ;;  %v2072_v16 = vadd.f32 %v1995_v51, %v11525_v26  ;;  %v2073_v53 = vadd.f32 %v1997_v36, %v11526_v5  ;;  %v2074_v32 = vadd.f32 %v2000_v56, %v11527_v41  ;;  %v11532_v18 = vld [vmem:[#allocation32_spill] sm:$0xff]  ;;  %v11534_v23 = vld [vmem:[#allocation6_spill] sm:$0xff]  ;;  %v7466_v45 = vld [vmem:[%s7415_s19 + $0x8] sm:$0xff] }
 0x15c   : > { %v2075_v47 = vadd.f32 %v2002_v40, %v11528_v34  ;;  %v2076_v50 = vadd.f32 %v2005_v31, %v11529_v4  ;;  %v2077_v43 = vadd.f32 %v2007_v10, %v11530_v46  ;;  %v2078_v14 = vadd.f32 %v2010_v37, %v11531_v29  ;;  %11561 = vst [vmem:[#allocation47_spill] sm:$0xff] %v7466_v45  ;;  %v7472_v25 = vld [vmem:[%s7415_s19 + $0x20] sm:$0xff]  ;;  %v7486_v19 = vld [vmem:[%s7415_s19 + $0x38] sm:$0xff]  ;;  %v7492_v0 = vld [vmem:[%s7415_s19 + $0x50] sm:$0xff] }
 0x15d   : > { %v2079_v52 = vadd.f32 %v2012_v9, %v11532_v18  ;;  %v2080_v24 = vadd.f32 %v2015_v22, %v11533_v21  ;;  %v2081_v60 = vadd.f32 %v2017_v49, %v11534_v23  ;;  %v7400_v54 = vadd.f32 %v4326_v55, %v2050_v8  ;;  %11563 = vst [vmem:[#allocation52_spill] sm:$0xff] %v7472_v25  ;;  %v7507_v26 = vld [vmem:[%s7415_s19 + $0x78] sm:$0xff]  ;;  %v7545_v46 = vld [vmem:[%s7415_s19 + $0xc0] sm:$0xff]  ;;  %v7573_v23 = vld [vmem:[%s7415_s19 + $0xf0] sm:$0xff] }
 0x15e   : > { %v7402_v51 = vadd.f32 %v4326_v55, %v2051_v38  ;;  %v7404_v36 = vadd.f32 %v4326_v55, %v2052_v15  ;;  %v7406_v56 = vadd.f32 %v4326_v55, %v2053_v42  ;;  %v7408_v40 = vadd.f32 %v4326_v55, %v2054_v48  ;;  %11569 = vst [vmem:[#allocation67_spill] sm:$0xff] %v7486_v19  ;;  %v7520_v41 = vld [vmem:[%s7415_s19 + $0x98] sm:$0xff] }
 0x15f   : > { %11535 = vst [vmem:[#allocation7_spill] sm:$0xff] %v7400_v54  ;;  %v7417_v31 = vadd.f32 %v4326_v55, %v2055_v63  ;;  %v7419_v10 = vadd.f32 %v4326_v55, %v2056_v27  ;;  %v7421_v37 = vadd.f32 %v4326_v55, %v2057_v17  ;;  %v7423_v9 = vadd.f32 %v4326_v55, %v2058_v13  ;;  %v7567_v21 = vld [vmem:[%s7415_s19 + $0xd8] sm:$0xff] }
 0x160   : > { %11536 = vst [vmem:[#allocation8_spill] sm:$0xff] %v7402_v51  ;;  %11537 = vst [vmem:[#allocation9_spill] sm:$0xff] %v7404_v36  ;;  %v7425_v22 = vadd.f32 %v4326_v55, %v2059_v28  ;;  %v7427_v8 = vadd.f32 %v4326_v55, %v2060_v33  ;;  %v7429_v38 = vadd.f32 %v4326_v55, %v2061_v1  ;;  %v7450_v33 = vld [vmem:[%s7415_s19] sm:$0xff]  ;;  %v7684_v36 = vld [vmem:[%s7415_s19 + $0x170] sm:$0xff] }
 0x161   : > { %11538 = vst [vmem:[#allocation36_spill] sm:$0xff] %v7406_v56  ;;  %11539 = vst [vmem:[#allocation40_spill] sm:$0xff] %v7408_v40  ;;  %v7431_v49 = vadd.f32 %v4326_v55, %v2062_v2  ;;  %v7433_v15 = vadd.f32 %v4326_v55, %v2063_v30  ;;  %v7435_v42 = vadd.f32 %v4326_v55, %v2064_v7  ;;  %v7455_v1 = vld [vmem:[%s10458_s3] ss:$0 sm:$0xff]  ;;  %v7469_v7 = vld [vmem:[%s7415_s19 + $0x18] sm:$0xff] }
 0x162   : > { %11540 = vst [vmem:[#allocation53_spill] sm:$0xff] %v7417_v31  ;;  %11541 = vst [vmem:[#allocation41_spill] sm:$0xff] %v7419_v10  ;;  %v7437_v48 = vadd.f32 %v4326_v55, %v2065_v3  ;;  %v7439_v63 = vadd.f32 %v4326_v55, %v2066_v44  ;;  %v7441_v27 = vadd.f32 %v4326_v55, %v2067_v61  ;;  %v7475_v3 = vld [vmem:[%s7415_s19 + $0x30] sm:$0xff]  ;;  %v7678_v40 = vld [vmem:[%s7415_s19 + $0x158] sm:$0xff] }
 0x163   : > { %11542 = vst [vmem:[#allocation44_spill] sm:$0xff] %v7421_v37  ;;  %11543 = vst [vmem:[#allocation58_spill] sm:$0xff] %v7423_v9  ;;  %v7443_v17 = vadd.f32 %v4326_v55, %v2068_v12  ;;  %v7445_v13 = vadd.f32 %v4326_v55, %v2069_v58  ;;  %v7447_v28 = vadd.f32 %v4326_v55, %v2070_v6  ;;  %v7489_v12 = vld [vmem:[%s7415_s19 + $0x48] sm:$0xff]  ;;  %v7495_v58 = vld [vmem:[%s7415_s19 + $0x60] sm:$0xff] }
 0x164   : > { %11544 = vst [vmem:[#allocation45_spill] sm:$0xff] %v7425_v22  ;;  %11545 = vst [vmem:[#allocation49_spill] sm:$0xff] %v7427_v8  ;;  %v7457_v39 = vadd.f32 %v4326_v55, %v2071_v20  ;;  %v7459_v2 = vadd.f32 %v4326_v55, %v2072_v16  ;;  %v7461_v11 = vadd.f32 %v4326_v55, %v2073_v53  ;;  %v7504_v20 = vld [vmem:[%s7415_s19 + $0x68] sm:$0xff]  ;;  %v7510_v16 = vld [vmem:[%s7415_s19 + $0x80] sm:$0xff] }
 0x165   : > { %11546 = vst [vmem:[#allocation63_spill] sm:$0xff] %v7429_v38  ;;  %11547 = vst [vmem:[#allocation50_spill] sm:$0xff] %v7431_v49  ;;  %v7463_v30 = vadd.f32 %v4326_v55, %v2074_v32  ;;  %v7477_v62 = vadd.f32 %v4326_v55, %v2075_v47  ;;  %v7479_v44 = vadd.f32 %v4326_v55, %v2076_v50  ;;  %v7517_v53 = vld [vmem:[%s7415_s19 + $0x90] sm:$0xff]  ;;  %v7523_v32 = vld [vmem:[%s7415_s19 + $0xa8] sm:$0xff] }
 0x166   : > { %11548 = vst [vmem:[#allocation54_spill] sm:$0xff] %v7433_v15  ;;  %11549 = vst [vmem:[#allocation68_spill] sm:$0xff] %v7435_v42  ;;  %v7481_v35 = vadd.f32 %v4326_v55, %v2077_v43  ;;  %v7483_v61 = vadd.f32 %v4326_v55, %v2078_v14  ;;  %v7497_v59 = vadd.f32 %v4326_v55, %v2079_v52  ;;  %v7542_v50 = vld [vmem:[%s7415_s19 + $0xb0] sm:$0xff]  ;;  %v7548_v43 = vld [vmem:[%s7415_s19 + $0xc8] sm:$0xff] }
 0x167   : > { %11550 = vst [vmem:[#allocation59_spill] sm:$0xff] %v7437_v48  ;;  %11551 = vst [vmem:[#allocation72_spill] sm:$0xff] %v7439_v63  ;;  %v7499_v6 = vadd.f32 %v4326_v55, %v2080_v24  ;;  %v7501_v57 = vadd.f32 %v4326_v55, %v2081_v60  ;;  %v7514_v5 = vmul.f32 %v7455_v1, %v7450_v33  ;;  %v7570_v24 = vld [vmem:[%s7415_s19 + $0xe0] sm:$0xff]  ;;  %v7653_v38 = vld [vmem:[%s7415_s19 + $0x138] sm:$0xff] }
 0x168   : > { %11552 = vst [vmem:[#allocation60_spill] sm:$0xff] %v7441_v27  ;;  %11553 = vst [vmem:[#allocation74_spill] sm:$0xff] %v7443_v17  ;;  %v7527_v55 = vmul.f32 %v7455_v1, %v7466_v45  ;;  %v7531_v34 = vmul.f32 %v7455_v1, %v7469_v7  ;;  %v7535_v47 = vmul.f32 %v7455_v1, %v7472_v25  ;;  %v7626_v17 = vld [vmem:[%s7415_s19 + $0x120] sm:$0xff]  ;;  %v7629_v27 = vld [vmem:[%s7415_s19 + $0x128] sm:$0xff] }
 0x169   : > { %11554 = vst [vmem:[#allocation65_spill] sm:$0xff] %v7445_v13  ;;  %11555 = vst [vmem:[#allocation69_spill] sm:$0xff] %v7447_v28  ;;  %v7539_v4 = vmul.f32 %v7455_v1, %v7475_v3  ;;  %v7552_v29 = vmul.f32 %v7455_v1, %v7486_v19  ;;  %v7556_v14 = vmul.f32 %v7455_v1, %v7489_v12  ;;  %v7620_v28 = vld [vmem:[%s7415_s19 + $0x28] sm:$0x3]  ;;  %v7623_v13 = vld [vmem:[%s7415_s19 + $0x40] sm:$0x3] }
 0x16a   : > { %11556 = vst [vmem:[#allocation75_spill] sm:$0xff] %v7450_v33  ;;  %11557 = vst [vmem:[#allocation38_spill] sm:$0xff] %v7457_v39  ;;  %v7560_v18 = vmul.f32 %v7455_v1, %v7492_v0  ;;  %v7564_v52 = vmul.f32 %v7455_v1, %v7495_v58  ;;  %v7577_v60 = vmul.f32 %v7455_v1, %v7504_v20  ;;  %v7650_v49 = vld [vmem:[%s10458_s3 + $0x1] ss:$0 sm:$0xff]  ;;  %v7659_v22 = vld [vmem:[%s7415_s19 + $0x150] sm:$0xff] }
 0x16b   : > { %11558 = vst [vmem:[#allocation42_spill] sm:$0xff] %v7459_v2  ;;  %11559 = vst [vmem:[#allocation43_spill] sm:$0xff] %v7461_v11  ;;  %v7609_v11 = vmul.f32 %v7455_v1, %v7523_v32  ;;  %v7613_v2 = vmul.f32 %v7455_v1, %v7542_v50  ;;  %v7617_v39 = vmul.f32 %v7455_v1, %v7545_v46  ;;  %v7656_v8 = vld [vmem:[%s7415_s19 + $0x140] sm:$0xff]  ;;  %v7681_v56 = vld [vmem:[%s7415_s19 + $0x168] sm:$0xff] }
 0x16c   : > { %11560 = vst [vmem:[#allocation46_spill] sm:$0xff] %v7463_v30  ;;  %11562 = vst [vmem:[#allocation51_spill] sm:$0xff] %v7469_v7  ;;  %v7605_v30 = vmul.f32 %v7455_v1, %v7520_v41  ;;  %v7633_v63 = vmul.f32 %v7455_v1, %v7548_v43  ;;  %v7637_v48 = vmul.f32 %v7455_v1, %v7567_v21 }
 0x16d   : > { %11564 = vst [vmem:[#allocation56_spill] sm:$0xff] %v7475_v3  ;;  %11565 = vst [vmem:[#allocation57_spill] sm:$0xff] %v7477_v62  ;;  %v7601_v62 = vld [vmem:[%s7415_s19 + $0x110] sm:$0xff]  ;;  %v7641_v42 = vmul.f32 %v7455_v1, %v7570_v24  ;;  %v7645_v15 = vmul.f32 %v7455_v1, %v7573_v23  ;;  %v7675_v31 = vmul.f32 %v7455_v1, %v7626_v17 }
 0x16e   : > { %11566 = vst [vmem:[#allocation61_spill] sm:$0xff] %v7479_v44  ;;  %11567 = vst [vmem:[#allocation62_spill] sm:$0xff] %v7481_v35  ;;  %v7595_v35 = vld [vmem:[%s7415_s19 + $0xf8] sm:$0xff]  ;;  %v7598_v44 = vld [vmem:[%s7415_s19 + $0x108] sm:$0xff]  ;;  %v7671_v10 = vmul.f32 %v7455_v1, %v7601_v62  ;;  %v7688_v51 = vmul.f32 %v7455_v1, %v7629_v27  ;;  %v7692_v54 = vmul.f32 %v7455_v1, %v7653_v38 }
 0x16f   : > { %11568 = vst [vmem:[#allocation66_spill] sm:$0xff] %v7483_v61  ;;  %11570 = vst [vmem:[#allocation70_spill] sm:$0xff] %v7489_v12  ;;  %v7592_v61 = vld [vmem:[%s7415_s19 + $0x10] sm:$0x3]  ;;  %v7663_v9 = vmul.f32 %v7455_v1, %v7595_v35  ;;  %v7667_v37 = vmul.f32 %v7455_v1, %v7598_v44 }
 0x170   : > { %11571 = vst [vmem:[#allocation71_spill] sm:$0xff] %v7492_v0  ;;  %11572 = vst [vmem:[#allocation73_spill] sm:$0xff] %v7495_v58 }
 0x171   : > { %11573 = vst [vmem:[#allocation55_spill] sm:$0xff] %v7497_v59  ;;  %11574 = vst [vmem:[#allocation64_spill] sm:$0xff] %v7499_v6  ;;  %v7585_v6 = vmul.f32 %v7455_v1, %v7510_v16  ;;  %v7589_v59 = vmul.f32 %v7455_v1, %v7517_v53 }
 0x172   : > { %11575 = vst [vmem:[#allocation2_spill] sm:$0xff] %v7501_v57  ;;  %11576 = vst [vmem:[#allocation3_spill] sm:$0xff] %v7504_v20  ;;  %v7581_v57 = vmul.f32 %v7455_v1, %v7507_v26 }
 0x173   : > { %11577 = vst [vmem:[#allocation4_spill] sm:$0xff] %v7507_v26  ;;  %11578 = vst [vmem:[#allocation15_spill] sm:$0xff] %v7510_v16 }
 0x174   : > { %11579 = vst [vmem:[#allocation18_spill] sm:$0xff] %v7517_v53  ;;  %11580 = vst [vmem:[#allocation11_spill] sm:$0xff] %v7520_v41 }
 0x175   : > { %11581 = vst [vmem:[#allocation12_spill] sm:$0xff] %v7523_v32  ;;  %11582 = vst [vmem:[#allocation10_spill] sm:$0xff] %v7542_v50 }
 0x176   : > { %11583 = vst [vmem:[#allocation33_spill] sm:$0xff] %v7545_v46  ;;  %11584 = vst [vmem:[#allocation37_spill] sm:$0xff] %v7548_v43 }
 0x177   : > { %11585 = vst [vmem:[#allocation28_spill] sm:$0xff] %v7556_v14  ;;  %11586 = vst [vmem:[#allocation13_spill] sm:$0xff] %v7560_v18 }
 0x178   : > { %11587 = vst [vmem:[#allocation14_spill] sm:$0xff] %v7564_v52  ;;  %11588 = vst [vmem:[#allocation16_spill] sm:$0xff] %v7567_v21 }
 0x179   : > { %11589 = vst [vmem:[#allocation20_spill] sm:$0xff] %v7570_v24  ;;  %11590 = vst [vmem:[#allocation17_spill] sm:$0xff] %v7573_v23 }
 0x17a   : > { %11591 = vst [vmem:[#allocation21_spill] sm:$0xff] %v7577_v60  ;;  %11592 = vst [vmem:[#allocation25_spill] sm:$0xff] %v7581_v57  ;;  %v7903_v57 = vmul.f32 %v7650_v49, %v7629_v27 }
 0x17b   : > { %11593 = vst [vmem:[#allocation22_spill] sm:$0xff] %v7585_v6  ;;  %11594 = vst [vmem:[#allocation26_spill] sm:$0xff] %v7589_v59  ;;  %v7884_v6 = vmul.f32 %v7650_v49, %v7598_v44 }
 0x17c   : > { %11595 = vst [vmem:[#allocation34_spill] sm:$0xff] %v7592_v61  ;;  %11596 = vst [vmem:[#allocation27_spill] sm:$0xff] %v7595_v35 }
 0x17d   : > { %11597 = vst [vmem:[#allocation30_spill] sm:$0xff] %v7598_v44  ;;  %11598 = vst [vmem:[#allocation39_spill] sm:$0xff] %v7601_v62 }
 0x17e   : > { %11599 = vst [vmem:[#allocation31_spill] sm:$0xff] %v7605_v30  ;;  %11600 = vst [vmem:[#allocation35_spill] sm:$0xff] %v7609_v11  ;;  %v7827_v11 = vmul.f32 %v7650_v49, %v7523_v32  ;;  %v7846_v30 = vmul.f32 %v7650_v49, %v7548_v43  ;;  %v7869_v43 = vmul.f32 %v7650_v49, %v7573_v23 }
 0x17f   : > { %11601 = vst [vmem:[#allocation48_spill] sm:$0xff] %v7613_v2  ;;  %11602 = vst [vmem:[#allocation19_spill] sm:$0xff] %v7617_v39  ;;  %v7804_v39 = vld [vmem:[%s7415_s19 + $0x100] sm:$0x3]  ;;  %v7823_v2 = vld [vmem:[%s7415_s19 + $0x118] sm:$0x3] }
 0x180   : > { %11603 = vst [vmem:[#allocation23_spill] sm:$0xff] %v7620_v28  ;;  %11604 = vst [vmem:[#allocation24_spill] sm:$0xff] %v7623_v13  ;;  %v7892_v23 = vmul.f32 %v7650_v49, %v7823_v2 }
 0x181   : > { %11605 = vst [vmem:[#allocation29_spill] sm:$0xff] %v7626_v17  ;;  %11606 = vst [vmem:[#allocation32_spill] sm:$0xff] %v7629_v27 }
 0x182   : > { %11607 = vst [vmem:[#allocation5_spill] sm:$0xff] %v7633_v63  ;;  %11608 = vst [vmem:[#allocation6_spill] sm:$0xff] %v7637_v48  ;;  %v7767_v48 = vmul.f32 %v7650_v49, %v7489_v12  ;;  %v7786_v63 = vmul.f32 %v7650_v49, %v7504_v20 }
 0x183   : > { %11609 = vst [vmem:[#allocation76_spill] sm:$0xff] %v7641_v42  ;;  %11610 = vst [vmem:[#allocation77_spill] sm:$0xff] %v7645_v15  ;;  %v7726_v15 = vmul.f32 %v7650_v49, %v7466_v45  ;;  %v7748_v45 = vmul.f32 %v7650_v49, %v7620_v28  ;;  %v7763_v42 = vld [vmem:[%s7415_s19 + $0xb8] sm:$0x3]  ;;  %v7771_v28 = vmul.f32 %v7650_v49, %v7492_v0 }
 0x184   : > { %11611 = vst [vmem:[#allocation78_spill] sm:$0xff] %v7653_v38  ;;  %11612 = vst [vmem:[#allocation79_spill] sm:$0xff] %v7656_v8  ;;  %v7794_v0 = vmul.f32 %v7650_v49, %v7507_v26  ;;  %v7816_v26 = vmul.f32 %v7650_v49, %v7520_v41  ;;  %v7839_v41 = vmul.f32 %v7650_v49, %v7545_v46  ;;  %v7861_v46 = vld [vmem:[%s7415_s19 + $0x148] sm:$0x3] }
 0x185   : > { %11613 = vst [vmem:[#allocation80_spill] sm:$0xff] %v7659_v22  ;;  %11614 = vst [vmem:[#allocation81_spill] sm:$0xff] %v7663_v9  ;;  %v7707_v9 = vmul.f32 %v7455_v1, %v7678_v40  ;;  %v2346_v60 = vrot.slane %v7726_v15, 1  ;;  %v7921_v27 = vmul.f32 %v7650_v49, %v7861_v46 }
 0x186   : > { %11615 = vst [vmem:[#allocation82_spill] sm:$0xff] %v7667_v37  ;;  %11616 = vst [vmem:[#allocation83_spill] sm:$0xff] %v7671_v10  ;;  %v7696_v10 = vmul.f32 %v7455_v1, %v7656_v8  ;;  %v7703_v37 = vld [vmem:[%s7415_s19 + $0x58] sm:$0x3] }
 0x187   : > { %11617 = vst [vmem:[#allocation84_spill] sm:$0xff] %v7675_v31  ;;  %11618 = vst [vmem:[#allocation85_spill] sm:$0xff] %v7678_v40  ;;  %v7700_v31 = vmul.f32 %v7455_v1, %v7659_v22 }
 0x188   : > { %11619 = vst [vmem:[#allocation86_spill] sm:$0xff] %v7681_v56  ;;  %11620 = vst [vmem:[#allocation87_spill] sm:$0xff] %v7684_v36 }
 0x189   : > { %11621 = vst [vmem:[#allocation88_spill] sm:$0xff] %v7688_v51  ;;  %11622 = vst [vmem:[#allocation89_spill] sm:$0xff] %v7692_v54  ;;  %v7711_v51 = vmul.f32 %v7455_v1, %v7681_v56  ;;  %v7715_v54 = vmul.f32 %v7455_v1, %v7684_v36  ;;  %v7738_v1 = vmul.f32 %v7650_v49, %v7472_v25 }
 0x18a   : > { %11623 = vst [vmem:[#allocation90_spill] sm:$0xff] %v7696_v10  ;;  %11624 = vst [vmem:[#allocation91_spill] sm:$0xff] %v7700_v31  ;;  %v7719_v10 = vmul.f32 %v7650_v49, %v7450_v33  ;;  %v7722_v31 = vld [vmem:[%s7415_s19 + $0x70] sm:$0x3]  ;;  %v7741_v33 = vld [vmem:[%s7415_s19 + $0x88] sm:$0x3]  ;;  %v7760_v25 = vmul.f32 %v7650_v49, %v7623_v13 }
 0x18b   : > { %11625 = vst [vmem:[#allocation92_spill] sm:$0xff] %v7703_v37  ;;  %11626 = vst [vmem:[#allocation93_spill] sm:$0xff] %v7707_v9  ;;  %v7730_v9 = vmul.f32 %v7650_v49, %v7592_v61  ;;  %v7752_v61 = vmul.f32 %v7650_v49, %v7475_v3  ;;  %v7775_v3 = vmul.f32 %v7650_v49, %v7703_v37  ;;  %v7782_v13 = vld [vmem:[%s7415_s19 + $0xd0] sm:$0x3] }
 0x18c   : > { %11627 = vst [vmem:[#allocation94_spill] sm:$0xff] %v7711_v51  ;;  %11628 = vst [vmem:[#allocation95_spill] sm:$0xff] %v7715_v54  ;;  %v7734_v51 = vmul.f32 %v7650_v49, %v7469_v7  ;;  %v7744_v54 = vld [vmem:[%s7415_s19 + $0xa0] sm:$0x3]  ;;  %v7756_v7 = vmul.f32 %v7650_v49, %v7486_v19  ;;  %v7779_v19 = vmul.f32 %v7650_v49, %v7495_v58  ;;  %v7801_v58 = vld [vmem:[%s7415_s19 + $0xe8] sm:$0x3] }
 0x18d   : > { %11629 = vst [vmem:[#allocation96_spill] sm:$0xff] %v7722_v31  ;;  %11630 = vst [vmem:[#allocation97_spill] sm:$0xff] %v7741_v33  ;;  %v7790_v12 = vmul.f32 %v7650_v49, %v7722_v31  ;;  %v7798_v37 = vmul.f32 %v7650_v49, %v7510_v16  ;;  %v7808_v20 = vmul.f32 %v7650_v49, %v7741_v33  ;;  %v2348_v52 = vrot.slane %v7730_v9, 1 }
 0x18e   : > { %11631 = vst [vmem:[#allocation98_spill] sm:$0xff] %v7744_v54  ;;  %11632 = vst [vmem:[#allocation99_spill] sm:$0xff] %v7763_v42  ;;  %v7812_v31 = vmul.f32 %v7650_v49, %v7517_v53  ;;  %v7820_v16 = vmul.f32 %v7650_v49, %v7744_v54  ;;  %v7831_v33 = vmul.f32 %v7650_v49, %v7542_v50  ;;  %v7842_v54 = vld [vmem:[%s7415_s19 + $0x130] sm:$0x3]  ;;  %v2356_v18 = vrot.slane %v7756_v7, 1 }
 0x18f   : > { %11633 = vst [vmem:[#allocation100_spill] sm:$0xff] %v7782_v13  ;;  %11634 = vst [vmem:[#allocation101_spill] sm:$0xff] %v7801_v58  ;;  %v7835_v53 = vmul.f32 %v7650_v49, %v7763_v42  ;;  %v7850_v32 = vmul.f32 %v7650_v49, %v7782_v13  ;;  %v7854_v50 = vmul.f32 %v7650_v49, %v7567_v21  ;;  %v2358_v14 = vrot.slane %v7760_v25, 1 }
 0x190   : > { %11635 = vst [vmem:[#allocation102_spill] sm:$0xff] %v7804_v39  ;;  %11636 = vst [vmem:[#allocation103_spill] sm:$0xff] %v7823_v2  ;;  %v7858_v42 = vmul.f32 %v7650_v49, %v7570_v24  ;;  %v7865_v59 = vmul.f32 %v7650_v49, %v7801_v58  ;;  %v7873_v13 = vmul.f32 %v7650_v49, %v7595_v35  ;;  %v7880_v24 = vld [vmem:[%s7415_s19 + $0x160] sm:$0x3]  ;;  %v2371_v7 = vrot.slane %v7798_v37, 1 }
 0x191   : > { %11637 = vst [vmem:[#allocation104_spill] sm:$0xff] %v7842_v54  ;;  %11638 = vst [vmem:[#allocation105_spill] sm:$0xff] %v7861_v46  ;;  %v7877_v21 = vmul.f32 %v7650_v49, %v7804_v39  ;;  %v7888_v58 = vmul.f32 %v7650_v49, %v7601_v62  ;;  %v7896_v35 = vmul.f32 %v7650_v49, %v7626_v17  ;;  %v7899_v39 = vld [vmem:[%s7415_s19 + $0x178] sm:$0x3]  ;;  %v2345_v62 = vrot.slane %v7719_v10, 1 }
 0x192   : > { %11639 = vst [vmem:[#allocation106_spill] sm:$0xff] %v7880_v24  ;;  %11640 = vst [vmem:[#allocation107_spill] sm:$0xff] %v7899_v39  ;;  %v7907_v44 = vmul.f32 %v7650_v49, %v7842_v54  ;;  %v7913_v2 = vmul.f32 %v7650_v49, %v7653_v38  ;;  %v7917_v17 = vmul.f32 %v7650_v49, %v7656_v8  ;;  %v2375_v25 = vrot.slane %v7812_v31, 1 }
 0x193   : > { %v7926_v54 = vmul.f32 %v7650_v49, %v7659_v22  ;;  %v7930_v10 = vmul.f32 %v7650_v49, %v7678_v40  ;;  %v7934_v15 = vmul.f32 %v7650_v49, %v7880_v24  ;;  %v7938_v8 = vmul.f32 %v7650_v49, %v7681_v56 }
 0x194   : > { %v7942_v46 = vmul.f32 %v7650_v49, %v7684_v36  ;;  %v7946_v9 = vmul.f32 %v7650_v49, %v7899_v39  ;;  %v2350_v22 = vrot.slane %v7734_v51, 1  ;;  %v2351_v40 = vrot.slane %v7738_v1, 1 }
 0x195   : > { %v7951_v38 = vsel %vm573_vm0, %v2345_v62, %v2346_v60  ;;  %v2353_v24 = vrot.slane %v7748_v45, 1  ;;  %v2355_v56 = vrot.slane %v7752_v61, 1  ;;  %v7957_v36 = vsel %vm573_vm0, %v2346_v60, %v2348_v52 }
 0x196   : > { %v2360_v49 = vrot.slane %v7767_v48, 1  ;;  %v2361_v51 = vrot.slane %v7771_v28, 1  ;;  %v2363_v1 = vrot.slane %v7775_v3, 1  ;;  %v2365_v62 = vrot.slane %v7779_v19, 1 }
 0x197   : > { %v2366_v39 = vrot.slane %v7786_v63, 1  ;;  %v2368_v45 = vrot.slane %v7790_v12, 1  ;;  %v2370_v61 = vrot.slane %v7794_v0, 1  ;;  %v2373_v52 = vrot.slane %v7808_v20, 1 }
 0x198   : > { %v2376_v48 = vrot.slane %v7816_v26, 1  ;;  %v2378_v28 = vrot.slane %v7820_v16, 1  ;;  %v2380_v3 = vrot.slane %v7827_v11, 1  ;;  %v2381_v19 = vrot.slane %v7831_v33, 1 }
 0x199   : > { %v2352_v63 = vsel %vm573_vm0, %v2350_v22, %v2351_v40  ;;  %v2383_v12 = vrot.slane %v7835_v53, 1  ;;  %v2385_v0 = vrot.slane %v7839_v41, 1  ;;  %v2386_v37 = vrot.slane %v7846_v30, 1 }
 0x19a   : > { %v2354_v20 = vsel %vm573_vm0, %v2351_v40, %v2353_v24  ;;  %v2357_v31 = vsel %vm573_vm0, %v2355_v56, %v2356_v18  ;;  %v2359_v26 = vsel %vm573_vm0, %v2356_v18, %v2358_v14  ;;  %v2362_v16 = vsel %vm573_vm0, %v2360_v49, %v2361_v51 }
 0x19b   : > { %v2364_v11 = vsel %vm573_vm0, %v2361_v51, %v2363_v1  ;;  %v2367_v33 = vsel %vm573_vm0, %v2365_v62, %v2366_v39  ;;  %v2369_v22 = vsel %vm573_vm0, %v2366_v39, %v2368_v45  ;;  %v2372_v53 = vsel %vm573_vm0, %v2370_v61, %v2371_v7 }
 0x19c   : > { %v2374_v41 = vsel %vm573_vm0, %v2371_v7, %v2373_v52  ;;  %v2377_v30 = vsel %vm573_vm0, %v2375_v25, %v2376_v48  ;;  %v2379_v40 = vsel %vm573_vm0, %v2376_v48, %v2378_v28  ;;  %v2382_v56 = vsel %vm573_vm0, %v2380_v3, %v2381_v19 }
 0x19d   : > { %v2384_v14 = vsel %vm573_vm0, %v2381_v19, %v2383_v12  ;;  %v2387_v18 = vsel %vm573_vm0, %v2385_v0, %v2386_v37  ;;  %v2388_v24 = vrot.slane %v7850_v32, 1  ;;  %v2390_v60 = vrot.slane %v7854_v50, 1 }
 0x19e   : > { %v2391_v39 = vrot.slane %v7858_v42, 1  ;;  %v2393_v49 = vrot.slane %v7865_v59, 1  ;;  %v2395_v51 = vrot.slane %v7869_v43, 1  ;;  %v2396_v1 = vrot.slane %v7873_v13, 1 }
 0x19f   : > { %v2398_v62 = vrot.slane %v7877_v21, 1  ;;  %v2400_v45 = vrot.slane %v7884_v6, 1  ;;  %v2401_v61 = vrot.slane %v7888_v58, 1  ;;  %v2403_v7 = vrot.slane %v7892_v23, 1 }
 0x1a0   : > { %v2405_v32 = vrot.slane %v7896_v35, 1  ;;  %v2406_v50 = vrot.slane %v7903_v57, 1  ;;  %v2408_v42 = vrot.slane %v7907_v44, 1  ;;  %v2410_v59 = vrot.slane %v7913_v2, 1 }
 0x1a1   : > { %v2411_v43 = vrot.slane %v7917_v17, 1  ;;  %v2413_v13 = vrot.slane %v7921_v27, 1  ;;  %v2415_v21 = vrot.slane %v7926_v54, 1  ;;  %v2416_v6 = vrot.slane %v7930_v10, 1 }
 0x1a2   : > { %v2389_v58 = vsel %vm573_vm0, %v2386_v37, %v2388_v24  ;;  %v2418_v23 = vrot.slane %v7934_v15, 1  ;;  %v2420_v35 = vrot.slane %v7938_v8, 1  ;;  %v2421_v57 = vrot.slane %v7942_v46, 1 }
 0x1a3   : > { %v2392_v44 = vsel %vm573_vm0, %v2390_v60, %v2391_v39  ;;  %v2394_v2 = vsel %vm573_vm0, %v2391_v39, %v2393_v49  ;;  %v2397_v17 = vsel %vm573_vm0, %v2395_v51, %v2396_v1  ;;  %v2423_v27 = vrot.slane %v7946_v9, 1  ;;  %v11643_v39 = vld [vmem:[#allocation13_spill] sm:$0xff] }
 0x1a4   : > { %v2399_v54 = vsel %vm573_vm0, %v2396_v1, %v2398_v62  ;;  %v2402_v10 = vsel %vm573_vm0, %v2400_v45, %v2401_v61  ;;  %v2404_v52 = vsel %vm573_vm0, %v2401_v61, %v2403_v7  ;;  %v2407_v15 = vsel %vm573_vm0, %v2405_v32, %v2406_v50 }
 0x1a5   : > { %v2409_v8 = vsel %vm573_vm0, %v2406_v50, %v2408_v42  ;;  %v2412_v46 = vsel %vm573_vm0, %v2410_v59, %v2411_v43  ;;  %v2414_v25 = vsel %vm573_vm0, %v2411_v43, %v2413_v13  ;;  %v2417_v48 = vsel %vm573_vm0, %v2415_v21, %v2416_v6  ;;  %v11675_v43 = vld [vmem:[#allocation83_spill] sm:$0xff]  ;;  %v11677_v21 = vld [vmem:[#allocation84_spill] sm:$0xff] }
 0x1a6   : > { %v2419_v28 = vsel %vm573_vm0, %v2416_v6, %v2418_v23  ;;  %v2422_v9 = vsel %vm573_vm0, %v2420_v35, %v2421_v57  ;;  %v8030_v3 = vadd.f32 %v7951_v38, %v7514_v5  ;;  %v8034_v19 = vadd.f32 %v7957_v36, %v7527_v55  ;;  %v11641_v38 = vld [vmem:[#allocation28_spill] sm:$0xff]  ;;  %v11645_v55 = vld [vmem:[#allocation14_spill] sm:$0xff]  ;;  %v11681_v35 = vld [vmem:[#allocation89_spill] sm:$0xff] }
 0x1a7   : > { %v2424_v12 = vsel %vm573_vm0, %v2421_v57, %v2423_v27  ;;  %v8038_v0 = vadd.f32 %v2352_v63, %v7531_v34  ;;  %v8041_v37 = vadd.f32 %v2354_v20, %v7535_v47  ;;  %v8044_v24 = vadd.f32 %v2357_v31, %v7539_v4  ;;  %v11647_v34 = vld [vmem:[#allocation21_spill] sm:$0xff]  ;;  %v11651_v4 = vld [vmem:[#allocation22_spill] sm:$0xff] }
 0x1a8   : > { %v8047_v60 = vadd.f32 %v2359_v26, %v7552_v29  ;;  %v8050_v5 = vadd.f32 %v2362_v16, %v11641_v38  ;;  %v8053_v36 = vadd.f32 %v2364_v11, %v11643_v39  ;;  %v8056_v49 = vadd.f32 %v2367_v33, %v11645_v55  ;;  %v11649_v47 = vld [vmem:[#allocation25_spill] sm:$0xff]  ;;  %v11653_v29 = vld [vmem:[#allocation26_spill] sm:$0xff]  ;;  %v11655_v16 = vld [vmem:[#allocation31_spill] sm:$0xff] }
 0x1a9   : > { %v8059_v63 = vadd.f32 %v2369_v22, %v11647_v34  ;;  %v8062_v20 = vadd.f32 %v2372_v53, %v11649_v47  ;;  %v8065_v31 = vadd.f32 %v2374_v41, %v11651_v4  ;;  %v8068_v26 = vadd.f32 %v2377_v30, %v11653_v29  ;;  %v11657_v11 = vld [vmem:[#allocation35_spill] sm:$0xff]  ;;  %v11659_v33 = vld [vmem:[#allocation48_spill] sm:$0xff]  ;;  %v11663_v53 = vld [vmem:[#allocation5_spill] sm:$0xff] }
 0x1aa   : > { %11642 = vst [vmem:[#allocation28_spill] sm:$0xff] %v8050_v5  ;;  %11644 = vst [vmem:[#allocation13_spill] sm:$0xff] %v8053_v36  ;;  %v8071_v51 = vadd.f32 %v2379_v40, %v11655_v16  ;;  %v8074_v1 = vadd.f32 %v2382_v56, %v11657_v11  ;;  %v8077_v62 = vadd.f32 %v2384_v14, %v11659_v33  ;;  %v11661_v22 = vld [vmem:[#allocation19_spill] sm:$0xff]  ;;  %v11665_v41 = vld [vmem:[#allocation6_spill] sm:$0xff] }
 0x1ab   : > { %11646 = vst [vmem:[#allocation14_spill] sm:$0xff] %v8056_v49  ;;  %11648 = vst [vmem:[#allocation21_spill] sm:$0xff] %v8059_v63  ;;  %v8080_v45 = vadd.f32 %v2387_v18, %v11661_v22  ;;  %v8083_v61 = vadd.f32 %v2389_v58, %v11663_v53  ;;  %v8086_v7 = vadd.f32 %v2392_v44, %v11665_v41  ;;  %v11667_v30 = vld [vmem:[#allocation76_spill] sm:$0xff]  ;;  %v11669_v40 = vld [vmem:[#allocation77_spill] sm:$0xff] }
 0x1ac   : > { %11650 = vst [vmem:[#allocation25_spill] sm:$0xff] %v8062_v20  ;;  %11652 = vst [vmem:[#allocation22_spill] sm:$0xff] %v8065_v31  ;;  %v8089_v32 = vadd.f32 %v2394_v2, %v11667_v30  ;;  %v8092_v50 = vadd.f32 %v2397_v17, %v11669_v40  ;;  %v4329_v56 = vld [vmem:[%s10458_s3 + $0x2] ss:$0 sm:$0xff]  ;;  %v11671_v14 = vld [vmem:[#allocation81_spill] sm:$0xff]  ;;  %v8104_v13 = vadd.f32 %v2404_v52, %v11675_v43 }
 0x1ad   : > { %11654 = vst [vmem:[#allocation26_spill] sm:$0xff] %v8068_v26  ;;  %11656 = vst [vmem:[#allocation31_spill] sm:$0xff] %v8071_v51  ;;  %v8098_v42 = vadd.f32 %v2399_v54, %v11671_v14  ;;  %v11673_v18 = vld [vmem:[#allocation82_spill] sm:$0xff]  ;;  %v8107_v6 = vadd.f32 %v2407_v15, %v11677_v21  ;;  %v11679_v58 = vld [vmem:[#allocation88_spill] sm:$0xff]  ;;  %v8113_v57 = vadd.f32 %v2412_v46, %v11681_v35 }
 0x1ae   : > { %11658 = vst [vmem:[#allocation35_spill] sm:$0xff] %v8074_v1  ;;  %11660 = vst [vmem:[#allocation48_spill] sm:$0xff] %v8077_v62  ;;  %v8101_v59 = vadd.f32 %v2402_v10, %v11673_v18  ;;  %v8110_v23 = vadd.f32 %v2409_v8, %v11679_v58  ;;  %v11683_v44 = vld [vmem:[#allocation90_spill] sm:$0xff]  ;;  %v11685_v17 = vld [vmem:[#allocation91_spill] sm:$0xff] }
 0x1af   : > { %11662 = vst [vmem:[#allocation19_spill] sm:$0xff] %v8080_v45  ;;  %11664 = vst [vmem:[#allocation5_spill] sm:$0xff] %v8083_v61  ;;  %v8116_v2 = vadd.f32 %v2414_v25, %v11683_v44  ;;  %v8119_v27 = vadd.f32 %v2417_v48, %v11685_v17  ;;  %v11687_v54 = vld [vmem:[#allocation93_spill] sm:$0xff]  ;;  %v11689_v52 = vld [vmem:[#allocation94_spill] sm:$0xff] }
 0x1b0   : > { %11666 = vst [vmem:[#allocation6_spill] sm:$0xff] %v8086_v7  ;;  %11668 = vst [vmem:[#allocation76_spill] sm:$0xff] %v8089_v32  ;;  %v8122_v10 = vadd.f32 %v2419_v28, %v11687_v54  ;;  %v8125_v38 = vadd.f32 %v2422_v9, %v11689_v52  ;;  %v11691_v15 = vld [vmem:[#allocation95_spill] sm:$0xff]  ;;  %v11695_v47 = vld [vmem:[#allocation34_spill] sm:$0xff] }
 0x1b1   : > { %11670 = vst [vmem:[#allocation77_spill] sm:$0xff] %v8092_v50  ;;  %11672 = vst [vmem:[#allocation81_spill] sm:$0xff] %v8098_v42  ;;  %v8128_v39 = vadd.f32 %v2424_v12, %v11691_v15  ;;  %v11693_v8 = vld [vmem:[#allocation75_spill] sm:$0xff]  ;;  %v2496_v4 = vmul.f32 %v4329_v56, %v11695_v47  ;;  %v11697_v48 = vld [vmem:[#allocation52_spill] sm:$0xff] }
 0x1b2   : > { %11674 = vst [vmem:[#allocation82_spill] sm:$0xff] %v8101_v59  ;;  %11676 = vst [vmem:[#allocation83_spill] sm:$0xff] %v8104_v13  ;;  %v2494_v55 = vmul.f32 %v4329_v56, %v11693_v8  ;;  %v11694_v34 = vld [vmem:[#allocation47_spill] sm:$0xff]  ;;  %v8137_v16 = vmul.f32 %v4329_v56, %v11697_v48  ;;  %v11699_v9 = vld [vmem:[#allocation56_spill] sm:$0xff] }
 0x1b3   : > { %11678 = vst [vmem:[#allocation84_spill] sm:$0xff] %v8107_v6  ;;  %11680 = vst [vmem:[#allocation88_spill] sm:$0xff] %v8110_v23  ;;  %v2495_v46 = vmul.f32 %v4329_v56, %v11694_v34  ;;  %v11696_v25 = vld [vmem:[#allocation51_spill] sm:$0xff]  ;;  %v8143_v33 = vmul.f32 %v4329_v56, %v11699_v9  ;;  %v11701_v53 = vld [vmem:[#allocation24_spill] sm:$0xff]  ;;  %v2593_v26 = vrot.slane %v2496_v4, 2 }
 0x1b4   : > { %11682 = vst [vmem:[#allocation89_spill] sm:$0xff] %v8113_v57  ;;  %11684 = vst [vmem:[#allocation90_spill] sm:$0xff] %v8116_v2  ;;  %v8134_v29 = vmul.f32 %v4329_v56, %v11696_v25  ;;  %v11698_v28 = vld [vmem:[#allocation23_spill] sm:$0xff]  ;;  %v8149_v41 = vmul.f32 %v4329_v56, %v11701_v53  ;;  %v11702_v30 = vld [vmem:[#allocation70_spill] sm:$0xff] }
 0x1b5   : > { %11686 = vst [vmem:[#allocation91_spill] sm:$0xff] %v8119_v27  ;;  %11688 = vst [vmem:[#allocation93_spill] sm:$0xff] %v8122_v10  ;;  %v8140_v11 = vmul.f32 %v4329_v56, %v11698_v28  ;;  %v11700_v12 = vld [vmem:[#allocation67_spill] sm:$0xff]  ;;  %v8152_v40 = vmul.f32 %v4329_v56, %v11702_v30  ;;  %v11704_v43 = vld [vmem:[#allocation92_spill] sm:$0xff]  ;;  %v2591_v45 = vrot.slane %v2495_v46, 2 }
 0x1b6   : > { %11690 = vst [vmem:[#allocation94_spill] sm:$0xff] %v8125_v38  ;;  %11692 = vst [vmem:[#allocation95_spill] sm:$0xff] %v8128_v39  ;;  %v8146_v22 = vmul.f32 %v4329_v56, %v11700_v12  ;;  %v11703_v14 = vld [vmem:[#allocation71_spill] sm:$0xff]  ;;  %v8158_v21 = vmul.f32 %v4329_v56, %v11704_v43  ;;  %v11705_v58 = vld [vmem:[#allocation73_spill] sm:$0xff]  ;;  %v2595_v4 = vrot.slane %v8134_v29, 2 }
 0x1b7   : > { %v8155_v18 = vmul.f32 %v4329_v56, %v11703_v14  ;;  %v8161_v35 = vmul.f32 %v4329_v56, %v11705_v58  ;;  %v11706_v44 = vld [vmem:[#allocation3_spill] sm:$0xff]  ;;  %v11707_v54 = vld [vmem:[#allocation96_spill] sm:$0xff]  ;;  %v11710_v53 = vld [vmem:[#allocation97_spill] sm:$0xff]  ;;  %v8277_v5 = vsel %vm819_vm1, %v2591_v45, %v2593_v26 }
 0x1b8   : > { %v8164_v17 = vmul.f32 %v4329_v56, %v11706_v44  ;;  %v8167_v52 = vmul.f32 %v4329_v56, %v11707_v54  ;;  %v11708_v15 = vld [vmem:[#allocation4_spill] sm:$0xff]  ;;  %v11709_v34 = vld [vmem:[#allocation15_spill] sm:$0xff]  ;;  %v8176_v28 = vmul.f32 %v4329_v56, %v11710_v53  ;;  %v11711_v43 = vld [vmem:[#allocation18_spill] sm:$0xff] }
 0x1b9   : > { %v8170_v8 = vmul.f32 %v4329_v56, %v11708_v15  ;;  %v8173_v47 = vmul.f32 %v4329_v56, %v11709_v34  ;;  %v8179_v14 = vmul.f32 %v4329_v56, %v11711_v43  ;;  %v11712_v58 = vld [vmem:[#allocation11_spill] sm:$0xff]  ;;  %v11713_v44 = vld [vmem:[#allocation98_spill] sm:$0xff]  ;;  %v11714_v54 = vld [vmem:[#allocation12_spill] sm:$0xff]  ;;  %v2606_v29 = vrot.slane %v8155_v18, 2 }
 0x1ba   : > { %v8182_v30 = vmul.f32 %v4329_v56, %v11712_v58  ;;  %v8185_v12 = vmul.f32 %v4329_v56, %v11713_v44  ;;  %v8188_v9 = vmul.f32 %v4329_v56, %v11714_v54  ;;  %v11715_v15 = vld [vmem:[#allocation10_spill] sm:$0xff]  ;;  %v11716_v34 = vld [vmem:[#allocation99_spill] sm:$0xff]  ;;  %v11717_v53 = vld [vmem:[#allocation33_spill] sm:$0xff]  ;;  %v2618_v26 = vrot.slane %v8176_v28, 2 }
 0x1bb   : > { %v8191_v48 = vmul.f32 %v4329_v56, %v11715_v15  ;;  %v8194_v25 = vmul.f32 %v4329_v56, %v11716_v34  ;;  %v8197_v39 = vmul.f32 %v4329_v56, %v11717_v53  ;;  %v11718_v43 = vld [vmem:[#allocation37_spill] sm:$0xff]  ;;  %v11719_v58 = vld [vmem:[#allocation100_spill] sm:$0xff]  ;;  %v11724_v53 = vld [vmem:[#allocation27_spill] sm:$0xff] }
 0x1bc   : > { %v8200_v38 = vmul.f32 %v4329_v56, %v11718_v43  ;;  %v8203_v10 = vmul.f32 %v4329_v56, %v11719_v58  ;;  %v11720_v44 = vld [vmem:[#allocation16_spill] sm:$0xff]  ;;  %v11722_v15 = vld [vmem:[#allocation101_spill] sm:$0xff]  ;;  %v8218_v6 = vmul.f32 %v4329_v56, %v11724_v53  ;;  %v11725_v43 = vld [vmem:[#allocation102_spill] sm:$0xff]  ;;  %v2625_v18 = vrot.slane %v8188_v9, 2 }
 0x1bd   : > { %v8206_v27 = vmul.f32 %v4329_v56, %v11720_v44  ;;  %v11721_v54 = vld [vmem:[#allocation20_spill] sm:$0xff]  ;;  %v8212_v57 = vmul.f32 %v4329_v56, %v11722_v15  ;;  %v11723_v34 = vld [vmem:[#allocation17_spill] sm:$0xff]  ;;  %v8221_v13 = vmul.f32 %v4329_v56, %v11725_v43  ;;  %v11726_v58 = vld [vmem:[#allocation30_spill] sm:$0xff]  ;;  %v2590_v43 = vrot.slane %v2494_v55, 2 }
 0x1be   : > { %v8209_v2 = vmul.f32 %v4329_v56, %v11721_v54  ;;  %v8215_v23 = vmul.f32 %v4329_v56, %v11723_v34  ;;  %v8224_v59 = vmul.f32 %v4329_v56, %v11726_v58  ;;  %v11727_v44 = vld [vmem:[#allocation39_spill] sm:$0xff]  ;;  %v11729_v15 = vld [vmem:[#allocation29_spill] sm:$0xff]  ;;  %v11730_v34 = vld [vmem:[#allocation32_spill] sm:$0xff] }
 0x1bf   : > { %v8227_v42 = vmul.f32 %v4329_v56, %v11727_v44  ;;  %v11728_v54 = vld [vmem:[#allocation103_spill] sm:$0xff]  ;;  %v8233_v32 = vmul.f32 %v4329_v56, %v11729_v15  ;;  %v8236_v7 = vmul.f32 %v4329_v56, %v11730_v34  ;;  %v11731_v53 = vld [vmem:[#allocation104_spill] sm:$0xff]  ;;  %v11732_v62 = vld [vmem:[#allocation78_spill] sm:$0xff] }
 0x1c0   : > { %v8230_v50 = vmul.f32 %v4329_v56, %v11728_v54  ;;  %v8239_v61 = vmul.f32 %v4329_v56, %v11731_v53  ;;  %v8242_v58 = vmul.f32 %v4329_v56, %v11732_v62  ;;  %v11733_v1 = vld [vmem:[#allocation79_spill] sm:$0xff]  ;;  %v11734_v51 = vld [vmem:[#allocation105_spill] sm:$0xff]  ;;  %v11735_v15 = vld [vmem:[#allocation80_spill] sm:$0xff] }
 0x1c1   : > { %v8245_v44 = vmul.f32 %v4329_v56, %v11733_v1  ;;  %v8248_v54 = vmul.f32 %v4329_v56, %v11734_v51  ;;  %v8251_v31 = vmul.f32 %v4329_v56, %v11735_v15  ;;  %v11736_v34 = vld [vmem:[#allocation85_spill] sm:$0xff]  ;;  %v11737_v53 = vld [vmem:[#allocation106_spill] sm:$0xff]  ;;  %v11739_v62 = vld [vmem:[#allocation87_spill] sm:$0xff]  ;;  %v2596_v51 = vrot.slane %v8137_v16, 2 }
 0x1c2   : > { %v8254_v20 = vmul.f32 %v4329_v56, %v11736_v34  ;;  %v8257_v63 = vmul.f32 %v4329_v56, %v11737_v53  ;;  %v11738_v55 = vld [vmem:[#allocation86_spill] sm:$0xff]  ;;  %v8263_v49 = vmul.f32 %v4329_v56, %v11739_v62  ;;  %v11740_v1 = vld [vmem:[#allocation107_spill] sm:$0xff]  ;;  %v8271_v15 = vsel %vm819_vm1, %v2590_v43, %v2591_v45 }
 0x1c3   : > { %v8260_v46 = vmul.f32 %v4329_v56, %v11738_v55  ;;  %v8266_v36 = vmul.f32 %v4329_v56, %v11740_v1  ;;  %v2598_v34 = vrot.slane %v8140_v11, 2  ;;  %v2600_v53 = vrot.slane %v8143_v33, 2 }
 0x1c4   : > { %v2601_v55 = vrot.slane %v8146_v22, 2  ;;  %v2603_v62 = vrot.slane %v8149_v41, 2  ;;  %v2605_v56 = vrot.slane %v8152_v40, 2  ;;  %v2608_v16 = vrot.slane %v8158_v21, 2 }
 0x1c5   : > { %v2610_v43 = vrot.slane %v8161_v35, 2  ;;  %v2611_v1 = vrot.slane %v8164_v17, 2  ;;  %v2613_v11 = vrot.slane %v8167_v52, 2  ;;  %v2615_v33 = vrot.slane %v8170_v8, 2 }
 0x1c6   : > { %v2616_v22 = vrot.slane %v8173_v47, 2  ;;  %v2620_v45 = vrot.slane %v8179_v14, 2  ;;  %v2621_v41 = vrot.slane %v8182_v30, 2  ;;  %v2623_v40 = vrot.slane %v8185_v12, 2 }
 0x1c7   : > { %v2626_v21 = vrot.slane %v8191_v48, 2  ;;  %v2597_v35 = vsel %vm819_vm1, %v2595_v4, %v2596_v51  ;;  %v2628_v17 = vrot.slane %v8194_v25, 2  ;;  %v2630_v52 = vrot.slane %v8197_v39, 2 }
 0x1c8   : > { %v2631_v8 = vrot.slane %v8200_v38, 2  ;;  %v2599_v28 = vsel %vm819_vm1, %v2596_v51, %v2598_v34  ;;  %v2602_v14 = vsel %vm819_vm1, %v2600_v53, %v2601_v55  ;;  %v2604_v30 = vsel %vm819_vm1, %v2601_v55, %v2603_v62 }
 0x1c9   : > { %v2607_v12 = vsel %vm819_vm1, %v2605_v56, %v2606_v29  ;;  %v2609_v9 = vsel %vm819_vm1, %v2606_v29, %v2608_v16  ;;  %v2612_v48 = vsel %vm819_vm1, %v2610_v43, %v2611_v1  ;;  %v2614_v47 = vsel %vm819_vm1, %v2611_v1, %v2613_v11 }
 0x1ca   : > { %v2617_v25 = vsel %vm819_vm1, %v2615_v33, %v2616_v22  ;;  %v2619_v39 = vsel %vm819_vm1, %v2616_v22, %v2618_v26  ;;  %v2622_v38 = vsel %vm819_vm1, %v2620_v45, %v2621_v41  ;;  %v2624_v51 = vsel %vm819_vm1, %v2621_v41, %v2623_v40 }
 0x1cb   : > { %v2627_v53 = vsel %vm819_vm1, %v2625_v18, %v2626_v21  ;;  %v2629_v62 = vsel %vm819_vm1, %v2626_v21, %v2628_v17  ;;  %v2632_v34 = vsel %vm819_vm1, %v2630_v52, %v2631_v8  ;;  %v2633_v55 = vrot.slane %v8203_v10, 2 }
 0x1cc   : > { %v2635_v4 = vrot.slane %v8206_v27, 2  ;;  %v2636_v1 = vrot.slane %v8209_v2, 2  ;;  %v2638_v56 = vrot.slane %v8212_v57, 2  ;;  %v2640_v29 = vrot.slane %v8215_v23, 2 }
 0x1cd   : > { %v2641_v16 = vrot.slane %v8218_v6, 2  ;;  %v2643_v43 = vrot.slane %v8221_v13, 2  ;;  %v2645_v11 = vrot.slane %v8224_v59, 2  ;;  %v2646_v33 = vrot.slane %v8227_v42, 2 }
 0x1ce   : > { %v2648_v22 = vrot.slane %v8230_v50, 2  ;;  %v2650_v10 = vrot.slane %v8233_v32, 2  ;;  %v2651_v27 = vrot.slane %v8236_v7, 2  ;;  %v2653_v2 = vrot.slane %v8239_v61, 2 }
 0x1cf   : > { %v2655_v57 = vrot.slane %v8242_v58, 2  ;;  %v2656_v23 = vrot.slane %v8245_v44, 2  ;;  %v2658_v6 = vrot.slane %v8248_v54, 2  ;;  %v2660_v13 = vrot.slane %v8251_v31, 2 }
 0x1d0   : > { %v2661_v59 = vrot.slane %v8254_v20, 2  ;;  %v2634_v42 = vsel %vm819_vm1, %v2631_v8, %v2633_v55  ;;  %v2663_v50 = vrot.slane %v8257_v63, 2  ;;  %v2665_v32 = vrot.slane %v8260_v46, 2 }
 0x1d1   : > { %v2666_v7 = vrot.slane %v8263_v49, 2  ;;  %v2637_v61 = vsel %vm819_vm1, %v2635_v4, %v2636_v1  ;;  %v2639_v58 = vsel %vm819_vm1, %v2636_v1, %v2638_v56  ;;  %v2642_v44 = vsel %vm819_vm1, %v2640_v29, %v2641_v16  ;;  %v11742_v1 = vld [vmem:[#allocation13_spill] sm:$0xff] }
 0x1d2   : > { %v2668_v54 = vrot.slane %v8266_v36, 2  ;;  %v2644_v31 = vsel %vm819_vm1, %v2641_v16, %v2643_v43  ;;  %v2647_v20 = vsel %vm819_vm1, %v2645_v11, %v2646_v33  ;;  %v2649_v26 = vsel %vm819_vm1, %v2646_v33, %v2648_v22 }
 0x1d3   : > { %v2652_v63 = vsel %vm819_vm1, %v2650_v10, %v2651_v27  ;;  %v2654_v46 = vsel %vm819_vm1, %v2651_v27, %v2653_v2  ;;  %v2657_v49 = vsel %vm819_vm1, %v2655_v57, %v2656_v23  ;;  %v2659_v45 = vsel %vm819_vm1, %v2656_v23, %v2658_v6  ;;  %v11760_v23 = vld [vmem:[#allocation83_spill] sm:$0xff] }
 0x1d4   : > { %v2662_v41 = vsel %vm819_vm1, %v2660_v13, %v2661_v59  ;;  %v2664_v40 = vsel %vm819_vm1, %v2661_v59, %v2663_v50  ;;  %v2667_v36 = vsel %vm819_vm1, %v2665_v32, %v2666_v7  ;;  %v8350_v18 = vadd.f32 %v8271_v15, %v8030_v3  ;;  %v11741_v3 = vld [vmem:[#allocation28_spill] sm:$0xff]  ;;  %v11766_v32 = vld [vmem:[#allocation89_spill] sm:$0xff] }
 0x1d5   : > { %v8354_v21 = vadd.f32 %v8277_v5, %v8034_v19  ;;  %v2669_v17 = vsel %vm819_vm1, %v2666_v7, %v2668_v54  ;;  %v8358_v52 = vadd.f32 %v2597_v35, %v8038_v0  ;;  %v8361_v8 = vadd.f32 %v2599_v28, %v8041_v37  ;;  %v11743_v5 = vld [vmem:[#allocation14_spill] sm:$0xff]  ;;  %v11744_v0 = vld [vmem:[#allocation21_spill] sm:$0xff]  ;;  %v11762_v13 = vld [vmem:[#allocation84_spill] sm:$0xff] }
 0x1d6   : > { %v8364_v55 = vadd.f32 %v2602_v14, %v8044_v24  ;;  %v8367_v4 = vadd.f32 %v2604_v30, %v8047_v60  ;;  %v8370_v15 = vadd.f32 %v2607_v12, %v11741_v3  ;;  %v8373_v19 = vadd.f32 %v2609_v9, %v11742_v1  ;;  %v11745_v37 = vld [vmem:[#allocation25_spill] sm:$0xff]  ;;  %v11746_v24 = vld [vmem:[#allocation22_spill] sm:$0xff]  ;;  %v11748_v12 = vld [vmem:[#allocation31_spill] sm:$0xff] }
 0x1d7   : > { %v8376_v56 = vadd.f32 %v2612_v48, %v11743_v5  ;;  %v8379_v35 = vadd.f32 %v2614_v47, %v11744_v0  ;;  %v8382_v28 = vadd.f32 %v2617_v25, %v11745_v37  ;;  %v8385_v14 = vadd.f32 %v2619_v39, %v11746_v24  ;;  %v11747_v60 = vld [vmem:[#allocation26_spill] sm:$0xff]  ;;  %v11749_v9 = vld [vmem:[#allocation35_spill] sm:$0xff]  ;;  %v11750_v48 = vld [vmem:[#allocation48_spill] sm:$0xff] }
 0x1d8   : > { %v8388_v30 = vadd.f32 %v2622_v38, %v11747_v60  ;;  %v8391_v29 = vadd.f32 %v2624_v51, %v11748_v12  ;;  %v8394_v16 = vadd.f32 %v2627_v53, %v11749_v9  ;;  %v8397_v43 = vadd.f32 %v2629_v62, %v11750_v48  ;;  %v11751_v47 = vld [vmem:[#allocation19_spill] sm:$0xff]  ;;  %v11752_v25 = vld [vmem:[#allocation5_spill] sm:$0xff]  ;;  %v11753_v39 = vld [vmem:[#allocation6_spill] sm:$0xff] }
 0x1d9   : > { %v8400_v11 = vadd.f32 %v2632_v34, %v11751_v47  ;;  %v8403_v33 = vadd.f32 %v2634_v42, %v11752_v25  ;;  %v8406_v22 = vadd.f32 %v2637_v61, %v11753_v39  ;;  %v11754_v38 = vld [vmem:[#allocation76_spill] sm:$0xff]  ;;  %v11755_v51 = vld [vmem:[#allocation77_spill] sm:$0xff]  ;;  %v4330_v53 = vld [vmem:[%s10458_s3 + $0x3] ss:$0 sm:$0xff]  ;;  %v8424_v6 = vadd.f32 %v2649_v26, %v11760_v23 }
 0x1da   : > { %v8409_v10 = vadd.f32 %v2639_v58, %v11754_v38  ;;  %v8412_v27 = vadd.f32 %v2642_v44, %v11755_v51  ;;  %v11756_v62 = vld [vmem:[#allocation81_spill] sm:$0xff]  ;;  %v11758_v34 = vld [vmem:[#allocation82_spill] sm:$0xff]  ;;  %v8427_v59 = vadd.f32 %v2652_v63, %v11762_v13  ;;  %v11764_v42 = vld [vmem:[#allocation88_spill] sm:$0xff]  ;;  %v8433_v7 = vadd.f32 %v2657_v49, %v11766_v32 }
 0x1db   : > { %v8418_v2 = vadd.f32 %v2644_v31, %v11756_v62  ;;  %v8421_v57 = vadd.f32 %v2647_v20, %v11758_v34  ;;  %11761 = vst [vmem:[#allocation34_spill] sm:$0xff] %v8424_v6  ;;  %v8430_v50 = vadd.f32 %v2654_v46, %v11764_v42  ;;  %v11768_v61 = vld [vmem:[#allocation90_spill] sm:$0xff]  ;;  %v11770_v44 = vld [vmem:[#allocation91_spill] sm:$0xff]  ;;  %v11772_v31 = vld [vmem:[#allocation93_spill] sm:$0xff] }
 0x1dc   : > { %11763 = vst [vmem:[#allocation28_spill] sm:$0xff] %v8427_v59  ;;  %11767 = vst [vmem:[#allocation14_spill] sm:$0xff] %v8433_v7  ;;  %v8436_v58 = vadd.f32 %v2659_v45, %v11768_v61  ;;  %v8439_v54 = vadd.f32 %v2662_v41, %v11770_v44  ;;  %v8442_v20 = vadd.f32 %v2664_v40, %v11772_v31  ;;  %v11774_v26 = vld [vmem:[#allocation94_spill] sm:$0xff]  ;;  %v11776_v63 = vld [vmem:[#allocation95_spill] sm:$0xff] }
 0x1dd   : > { %11757 = vst [vmem:[#allocation75_spill] sm:$0xff] %v8418_v2  ;;  %11759 = vst [vmem:[#allocation47_spill] sm:$0xff] %v8421_v57  ;;  %v8445_v3 = vadd.f32 %v2667_v36, %v11774_v26  ;;  %v8448_v1 = vadd.f32 %v2669_v17, %v11776_v63  ;;  %v11778_v46 = vld [vmem:[#allocation51_spill] sm:$0xff]  ;;  %v11779_v0 = vld [vmem:[#allocation52_spill] sm:$0xff] }
 0x1de   : > { %11765 = vst [vmem:[#allocation13_spill] sm:$0xff] %v8430_v50  ;;  %11769 = vst [vmem:[#allocation21_spill] sm:$0xff] %v8436_v58  ;;  %v2739_v5 = vmul.f32 %v4330_v53, %v11778_v46  ;;  %v2740_v49 = vmul.f32 %v4330_v53, %v11779_v0  ;;  %v11780_v37 = vld [vmem:[#allocation56_spill] sm:$0xff]  ;;  %v11781_v24 = vld [vmem:[#allocation67_spill] sm:$0xff] }
 0x1df   : > { %11771 = vst [vmem:[#allocation25_spill] sm:$0xff] %v8439_v54  ;;  %11773 = vst [vmem:[#allocation22_spill] sm:$0xff] %v8442_v20  ;;  %v2741_v45 = vmul.f32 %v4330_v53, %v11780_v37  ;;  %v2742_v41 = vmul.f32 %v4330_v53, %v11781_v24  ;;  %v11782_v60 = vld [vmem:[#allocation70_spill] sm:$0xff]  ;;  %v11783_v40 = vld [vmem:[#allocation71_spill] sm:$0xff] }
 0x1e0   : > { %11775 = vst [vmem:[#allocation26_spill] sm:$0xff] %v8445_v3  ;;  %11777 = vst [vmem:[#allocation31_spill] sm:$0xff] %v8448_v1  ;;  %v2743_v12 = vmul.f32 %v4330_v53, %v11782_v60  ;;  %v2744_v9 = vmul.f32 %v4330_v53, %v11783_v40  ;;  %v11784_v48 = vld [vmem:[#allocation73_spill] sm:$0xff]  ;;  %v11785_v47 = vld [vmem:[#allocation3_spill] sm:$0xff] }
 0x1e1   : > { %v2745_v36 = vmul.f32 %v4330_v53, %v11784_v48  ;;  %v2746_v25 = vmul.f32 %v4330_v53, %v11785_v47  ;;  %v11786_v17 = vld [vmem:[#allocation4_spill] sm:$0xff]  ;;  %v11787_v38 = vld [vmem:[#allocation15_spill] sm:$0xff]  ;;  %v11788_v62 = vld [vmem:[#allocation18_spill] sm:$0xff] }
 0x1e2   : > { %v2747_v39 = vmul.f32 %v4330_v53, %v11786_v17  ;;  %v2748_v51 = vmul.f32 %v4330_v53, %v11787_v38  ;;  %v2749_v34 = vmul.f32 %v4330_v53, %v11788_v62  ;;  %v11789_v23 = vld [vmem:[#allocation11_spill] sm:$0xff]  ;;  %v11790_v42 = vld [vmem:[#allocation12_spill] sm:$0xff]  ;;  %v11791_v61 = vld [vmem:[#allocation10_spill] sm:$0xff] }
 0x1e3   : > { %v2750_v13 = vmul.f32 %v4330_v53, %v11789_v23  ;;  %v2751_v32 = vmul.f32 %v4330_v53, %v11790_v42  ;;  %v2752_v44 = vmul.f32 %v4330_v53, %v11791_v61  ;;  %v11792_v31 = vld [vmem:[#allocation33_spill] sm:$0xff]  ;;  %v11794_v60 = vld [vmem:[#allocation16_spill] sm:$0xff]  ;;  %v8468_v24 = vld [vmem:[%s7415_s19 + $0x180] sm:$0xff] }
 0x1e4   : > { %v2753_v26 = vmul.f32 %v4330_v53, %v11792_v31  ;;  %v11793_v63 = vld [vmem:[#allocation37_spill] sm:$0xff]  ;;  %v2755_v48 = vmul.f32 %v4330_v53, %v11794_v60  ;;  %11795 = vst [vmem:[#allocation35_spill] sm:$0xff] %v8468_v24  ;;  %v8471_v47 = vld [vmem:[%s7415_s19 + $0x188] sm:$0xff]  ;;  %v11797_v17 = vld [vmem:[#allocation20_spill] sm:$0xff] }
 0x1e5   : > { %v2754_v40 = vmul.f32 %v4330_v53, %v11793_v63  ;;  %11796 = vst [vmem:[#allocation48_spill] sm:$0xff] %v8471_v47  ;;  %v2756_v38 = vmul.f32 %v4330_v53, %v11797_v17  ;;  %v11798_v37 = vld [vmem:[#allocation17_spill] sm:$0xff]  ;;  %v11799_v0 = vld [vmem:[#allocation27_spill] sm:$0xff]  ;;  %v11800_v46 = vld [vmem:[#allocation30_spill] sm:$0xff] }
 0x1e6   : > { %v2757_v62 = vmul.f32 %v4330_v53, %v11798_v37  ;;  %v2758_v23 = vmul.f32 %v4330_v53, %v11799_v0  ;;  %v2759_v42 = vmul.f32 %v4330_v53, %v11800_v46  ;;  %v11801_v1 = vld [vmem:[#allocation39_spill] sm:$0xff]  ;;  %v11802_v3 = vld [vmem:[#allocation29_spill] sm:$0xff]  ;;  %v11803_v20 = vld [vmem:[#allocation32_spill] sm:$0xff]  ;;  %v2769_v46 = vmul.f32 %v4330_v53, %v8468_v24 }
 0x1e7   : > { %v2760_v61 = vmul.f32 %v4330_v53, %v11801_v1  ;;  %v2761_v31 = vmul.f32 %v4330_v53, %v11802_v3  ;;  %v2762_v63 = vmul.f32 %v4330_v53, %v11803_v20  ;;  %v11804_v54 = vld [vmem:[#allocation78_spill] sm:$0xff]  ;;  %v11805_v58 = vld [vmem:[#allocation79_spill] sm:$0xff]  ;;  %v11806_v50 = vld [vmem:[#allocation80_spill] sm:$0xff]  ;;  %v2770_v1 = vmul.f32 %v4330_v53, %v8471_v47 }
 0x1e8   : > { %v2763_v60 = vmul.f32 %v4330_v53, %v11804_v54  ;;  %v2764_v7 = vmul.f32 %v4330_v53, %v11805_v58  ;;  %v2765_v59 = vmul.f32 %v4330_v53, %v11806_v50  ;;  %v11807_v6 = vld [vmem:[#allocation85_spill] sm:$0xff]  ;;  %v11808_v57 = vld [vmem:[#allocation86_spill] sm:$0xff]  ;;  %v11809_v2 = vld [vmem:[#allocation87_spill] sm:$0xff]  ;;  %v8489_v3 = vadd.f32 %v2739_v5, %v8350_v18 }
 0x1e9   : > { %v2766_v17 = vmul.f32 %v4330_v53, %v11807_v6  ;;  %v2767_v37 = vmul.f32 %v4330_v53, %v11808_v57  ;;  %v2768_v0 = vmul.f32 %v4330_v53, %v11809_v2  ;;  %v8492_v20 = vadd.f32 %v2740_v49, %v8354_v21  ;;  %v11827_v5 = vld [vmem:[#allocation47_spill] sm:$0xff]  ;;  %v11829_v49 = vld [vmem:[#allocation34_spill] sm:$0xff] }
 0x1ea   : > { %v8495_v58 = vadd.f32 %v2741_v45, %v8358_v52  ;;  %v8498_v50 = vadd.f32 %v2742_v41, %v8361_v8  ;;  %v8501_v57 = vadd.f32 %v2743_v12, %v8364_v55  ;;  %v8504_v2 = vadd.f32 %v2744_v9, %v8367_v4  ;;  %v11831_v45 = vld [vmem:[#allocation28_spill] sm:$0xff]  ;;  %v11833_v41 = vld [vmem:[#allocation13_spill] sm:$0xff]  ;;  %v11835_v12 = vld [vmem:[#allocation14_spill] sm:$0xff] }
 0x1eb   : > { %v8507_v53 = vadd.f32 %v2745_v36, %v8370_v15  ;;  %v8510_v18 = vadd.f32 %v2746_v25, %v8373_v19  ;;  %v8513_v21 = vadd.f32 %v2747_v39, %v8376_v56  ;;  %v8516_v52 = vadd.f32 %v2748_v51, %v8379_v35  ;;  %v11837_v9 = vld [vmem:[#allocation21_spill] sm:$0xff]  ;;  %v11841_v39 = vld [vmem:[#allocation22_spill] sm:$0xff] }
 0x1ec   : > { %v8519_v8 = vadd.f32 %v2749_v34, %v8382_v28  ;;  %v8522_v55 = vadd.f32 %v2750_v13, %v8385_v14  ;;  %v8525_v4 = vadd.f32 %v2751_v32, %v8388_v30  ;;  %v8528_v15 = vadd.f32 %v2752_v44, %v8391_v29  ;;  %v11839_v36 = vld [vmem:[#allocation25_spill] sm:$0xff]  ;;  %v11843_v51 = vld [vmem:[#allocation26_spill] sm:$0xff] }
 0x1ed   : > { %11810 = vst [vmem:[#allocation19_spill] sm:$0xff] %v8507_v53  ;;  %11811 = vst [vmem:[#allocation5_spill] sm:$0xff] %v8510_v18  ;;  %v8531_v19 = vadd.f32 %v2753_v26, %v8394_v16  ;;  %v8534_v56 = vadd.f32 %v2754_v40, %v8397_v43  ;;  %v8537_v35 = vadd.f32 %v2755_v48, %v8400_v11  ;;  %v8554_v16 = vld [vmem:[%s10458_s3 + $0x4] ss:$0 sm:$0xff]  ;;  %v11825_v43 = vld [vmem:[#allocation75_spill] sm:$0xff] }
 0x1ee   : > { %11812 = vst [vmem:[#allocation6_spill] sm:$0xff] %v8513_v21  ;;  %11813 = vst [vmem:[#allocation76_spill] sm:$0xff] %v8516_v52  ;;  %v8540_v28 = vadd.f32 %v2756_v38, %v8403_v33  ;;  %v8543_v14 = vadd.f32 %v2757_v62, %v8406_v22  ;;  %v8546_v30 = vadd.f32 %v2758_v23, %v8409_v10  ;;  %v11853_v44 = vld [vmem:[#allocation70_spill] sm:$0xff]  ;;  %v11854_v26 = vld [vmem:[#allocation71_spill] sm:$0xff] }
 0x1ef   : > { %11814 = vst [vmem:[#allocation77_spill] sm:$0xff] %v8519_v8  ;;  %11815 = vst [vmem:[#allocation81_spill] sm:$0xff] %v8522_v55  ;;  %v8549_v29 = vadd.f32 %v2759_v42, %v8412_v27  ;;  %v8557_v11 = vadd.f32 %v2760_v61, %v11825_v43  ;;  %v8560_v33 = vadd.f32 %v2761_v31, %v11827_v5  ;;  %v11852_v61 = vld [vmem:[#allocation24_spill] sm:$0xff]  ;;  %v11888_v8 = vld [vmem:[#allocation86_spill] sm:$0xff] }
 0x1f0   : > { %11816 = vst [vmem:[#allocation82_spill] sm:$0xff] %v8525_v4  ;;  %11817 = vst [vmem:[#allocation83_spill] sm:$0xff] %v8528_v15  ;;  %v8563_v22 = vadd.f32 %v2762_v63, %v11829_v49  ;;  %v8566_v10 = vadd.f32 %v2763_v60, %v11831_v45  ;;  %v8569_v27 = vadd.f32 %v2764_v7, %v11833_v41  ;;  %v11845_v60 = vld [vmem:[#allocation31_spill] sm:$0xff]  ;;  %v11855_v43 = vld [vmem:[#allocation92_spill] sm:$0xff] }
 0x1f1   : > { %11818 = vst [vmem:[#allocation84_spill] sm:$0xff] %v8531_v19  ;;  %11819 = vst [vmem:[#allocation88_spill] sm:$0xff] %v8534_v56  ;;  %v8572_v40 = vadd.f32 %v2765_v59, %v11835_v12  ;;  %v8575_v48 = vadd.f32 %v2766_v17, %v11837_v9  ;;  %v8578_v25 = vadd.f32 %v2767_v37, %v11839_v36  ;;  %v11847_v7 = vld [vmem:[#allocation51_spill] sm:$0xff]  ;;  %v11848_v59 = vld [vmem:[#allocation52_spill] sm:$0xff] }
 0x1f2   : > { %11820 = vst [vmem:[#allocation89_spill] sm:$0xff] %v8537_v35  ;;  %11821 = vst [vmem:[#allocation90_spill] sm:$0xff] %v8540_v28  ;;  %v8581_v38 = vadd.f32 %v2768_v0, %v11841_v39  ;;  %v8584_v62 = vadd.f32 %v2769_v46, %v11843_v51  ;;  %v8587_v34 = vadd.f32 %v2770_v1, %v11845_v60  ;;  %v11849_v17 = vld [vmem:[#allocation23_spill] sm:$0xff]  ;;  %v11850_v37 = vld [vmem:[#allocation56_spill] sm:$0xff] }
 0x1f3   : > { %11822 = vst [vmem:[#allocation91_spill] sm:$0xff] %v8543_v14  ;;  %11823 = vst [vmem:[#allocation93_spill] sm:$0xff] %v8546_v30  ;;  %v2808_v23 = vmul.f32 %v8554_v16, %v11847_v7  ;;  %v2809_v13 = vmul.f32 %v8554_v16, %v11848_v59  ;;  %v2810_v42 = vmul.f32 %v8554_v16, %v11849_v17  ;;  %v11851_v0 = vld [vmem:[#allocation67_spill] sm:$0xff]  ;;  %v11856_v49 = vld [vmem:[#allocation73_spill] sm:$0xff] }
 0x1f4   : > { %11824 = vst [vmem:[#allocation94_spill] sm:$0xff] %v8549_v29  ;;  %11826 = vst [vmem:[#allocation95_spill] sm:$0xff] %v8557_v11  ;;  %v8597_v32 = vmul.f32 %v8554_v16, %v11850_v37  ;;  %v8601_v46 = vmul.f32 %v8554_v16, %v11851_v0  ;;  %v8605_v1 = vmul.f32 %v8554_v16, %v11852_v61  ;;  %v11857_v41 = vld [vmem:[#allocation3_spill] sm:$0xff]  ;;  %v11858_v9 = vld [vmem:[#allocation96_spill] sm:$0xff] }
 0x1f5   : > { %11828 = vst [vmem:[#allocation78_spill] sm:$0xff] %v8560_v33  ;;  %11830 = vst [vmem:[#allocation85_spill] sm:$0xff] %v8563_v22  ;;  %v8609_v31 = vmul.f32 %v8554_v16, %v11853_v44  ;;  %v8613_v63 = vmul.f32 %v8554_v16, %v11854_v26  ;;  %v8617_v5 = vmul.f32 %v8554_v16, %v11855_v43  ;;  %v11859_v39 = vld [vmem:[#allocation4_spill] sm:$0xff]  ;;  %v11860_v60 = vld [vmem:[#allocation15_spill] sm:$0xff]  ;;  %v2905_v19 = vrot.slane %v2809_v13, 1 }
 0x1f6   : > { %11832 = vst [vmem:[#allocation75_spill] sm:$0xff] %v8566_v10  ;;  %11834 = vst [vmem:[#allocation47_spill] sm:$0xff] %v8569_v27  ;;  %v8621_v45 = vmul.f32 %v8554_v16, %v11856_v49  ;;  %v8625_v12 = vmul.f32 %v8554_v16, %v11857_v41  ;;  %v8629_v36 = vmul.f32 %v8554_v16, %v11858_v9  ;;  %v11861_v59 = vld [vmem:[#allocation97_spill] sm:$0xff]  ;;  %v11862_v37 = vld [vmem:[#allocation18_spill] sm:$0xff] }
 0x1f7   : > { %11836 = vst [vmem:[#allocation34_spill] sm:$0xff] %v8572_v40  ;;  %11838 = vst [vmem:[#allocation28_spill] sm:$0xff] %v8575_v48  ;;  %v8633_v51 = vmul.f32 %v8554_v16, %v11859_v39  ;;  %v8637_v7 = vmul.f32 %v8554_v16, %v11860_v60  ;;  %v8641_v17 = vmul.f32 %v8554_v16, %v11861_v59  ;;  %v11863_v61 = vld [vmem:[#allocation11_spill] sm:$0xff]  ;;  %v11864_v26 = vld [vmem:[#allocation98_spill] sm:$0xff]  ;;  %v2915_v18 = vrot.slane %v8613_v63, 1 }
 0x1f8   : > { %11840 = vst [vmem:[#allocation13_spill] sm:$0xff] %v8578_v25  ;;  %11842 = vst [vmem:[#allocation14_spill] sm:$0xff] %v8581_v38  ;;  %v8645_v0 = vmul.f32 %v8554_v16, %v11862_v37  ;;  %v8649_v44 = vmul.f32 %v8554_v16, %v11863_v61  ;;  %v8653_v43 = vmul.f32 %v8554_v16, %v11864_v26  ;;  %v11865_v49 = vld [vmem:[#allocation12_spill] sm:$0xff]  ;;  %v11866_v9 = vld [vmem:[#allocation10_spill] sm:$0xff]  ;;  %v2917_v53 = vrot.slane %v8617_v5, 1 }
 0x1f9   : > { %11844 = vst [vmem:[#allocation21_spill] sm:$0xff] %v8584_v62  ;;  %11846 = vst [vmem:[#allocation25_spill] sm:$0xff] %v8587_v34  ;;  %v8657_v41 = vmul.f32 %v8554_v16, %v11865_v49  ;;  %v8661_v39 = vmul.f32 %v8554_v16, %v11866_v9  ;;  %v11867_v60 = vld [vmem:[#allocation99_spill] sm:$0xff]  ;;  %v11868_v37 = vld [vmem:[#allocation33_spill] sm:$0xff]  ;;  %v8756_v52 = vmul.f32 %v8554_v16, %v11888_v8 }
 0x1fa   : > { %v8665_v59 = vmul.f32 %v8554_v16, %v11867_v60  ;;  %v8669_v61 = vmul.f32 %v8554_v16, %v11868_v37  ;;  %v11869_v34 = vld [vmem:[#allocation37_spill] sm:$0xff]  ;;  %v11870_v62 = vld [vmem:[#allocation100_spill] sm:$0xff]  ;;  %v11875_v27 = vld [vmem:[#allocation27_spill] sm:$0xff]  ;;  %v2930_v63 = vrot.slane %v8649_v44, 1 }
 0x1fb   : > { %v8673_v26 = vmul.f32 %v8554_v16, %v11869_v34  ;;  %v8677_v49 = vmul.f32 %v8554_v16, %v11870_v62  ;;  %v11871_v38 = vld [vmem:[#allocation16_spill] sm:$0xff]  ;;  %v11873_v48 = vld [vmem:[#allocation101_spill] sm:$0xff]  ;;  %v8697_v62 = vmul.f32 %v8554_v16, %v11875_v27  ;;  %v11876_v10 = vld [vmem:[#allocation102_spill] sm:$0xff]  ;;  %v2934_v5 = vrot.slane %v8657_v41, 1 }
 0x1fc   : > { %v8681_v9 = vmul.f32 %v8554_v16, %v11871_v38  ;;  %v11872_v25 = vld [vmem:[#allocation20_spill] sm:$0xff]  ;;  %v8689_v37 = vmul.f32 %v8554_v16, %v11873_v48  ;;  %v11874_v40 = vld [vmem:[#allocation17_spill] sm:$0xff]  ;;  %v8701_v38 = vmul.f32 %v8554_v16, %v11876_v10  ;;  %v11877_v22 = vld [vmem:[#allocation30_spill] sm:$0xff] }
 0x1fd   : > { %v8685_v60 = vmul.f32 %v8554_v16, %v11872_v25  ;;  %v8693_v34 = vmul.f32 %v8554_v16, %v11874_v40  ;;  %v8705_v25 = vmul.f32 %v8554_v16, %v11877_v22  ;;  %v11878_v33 = vld [vmem:[#allocation39_spill] sm:$0xff]  ;;  %v11880_v29 = vld [vmem:[#allocation29_spill] sm:$0xff]  ;;  %v11881_v30 = vld [vmem:[#allocation32_spill] sm:$0xff] }
 0x1fe   : > { %v8709_v48 = vmul.f32 %v8554_v16, %v11878_v33  ;;  %v11879_v11 = vld [vmem:[#allocation103_spill] sm:$0xff]  ;;  %v8717_v27 = vmul.f32 %v8554_v16, %v11880_v29  ;;  %v8721_v10 = vmul.f32 %v8554_v16, %v11881_v30  ;;  %v11882_v14 = vld [vmem:[#allocation104_spill] sm:$0xff]  ;;  %v8729_v33 = vmul.f32 %v8554_v16, %v11804_v54  ;;  %v11885_v29 = vld [vmem:[#allocation105_spill] sm:$0xff] }
 0x1ff   : > { %v8713_v40 = vmul.f32 %v8554_v16, %v11879_v11  ;;  %v8725_v22 = vmul.f32 %v8554_v16, %v11882_v14  ;;  %v8732_v28 = vld [vmem:[%s7415_s19 + $0x190] sm:$0x3]  ;;  %v11884_v11 = vld [vmem:[#allocation79_spill] sm:$0xff]  ;;  %v8740_v56 = vmul.f32 %v8554_v16, %v11885_v29  ;;  %v2904_v30 = vrot.slane %v2808_v23, 1  ;;  %v11887_v4 = vld [vmem:[#allocation106_spill] sm:$0xff] }
 0x200   : > { %11883 = vst [vmem:[#allocation22_spill] sm:$0xff] %v8732_v28  ;;  %v8736_v35 = vmul.f32 %v8554_v16, %v11884_v11  ;;  %v11886_v15 = vld [vmem:[#allocation80_spill] sm:$0xff]  ;;  %v8748_v54 = vmul.f32 %v8554_v16, %v11807_v6  ;;  %v8752_v55 = vmul.f32 %v8554_v16, %v11887_v4  ;;  %v2907_v11 = vrot.slane %v2810_v42, 1  ;;  %v11889_v29 = vld [vmem:[#allocation87_spill] sm:$0xff] }
 0x201   : > { %v8744_v14 = vmul.f32 %v8554_v16, %v11886_v15  ;;  %v8760_v23 = vmul.f32 %v8554_v16, %v11889_v29  ;;  %v11890_v13 = vld [vmem:[#allocation107_spill] sm:$0xff]  ;;  %v8768_v6 = vmul.f32 %v8554_v16, %v8468_v24  ;;  %v8772_v4 = vmul.f32 %v8554_v16, %v8471_v47 }
 0x202   : > { %v8764_v15 = vmul.f32 %v8554_v16, %v11890_v13  ;;  %v8776_v8 = vmul.f32 %v8554_v16, %v8732_v28  ;;  %v2909_v42 = vrot.slane %v8597_v32, 1  ;;  %v2910_v29 = vrot.slane %v8601_v46, 1 }
 0x203   : > { %v8781_v21 = vsel %vm573_vm0, %v2904_v30, %v2905_v19  ;;  %v2912_v13 = vrot.slane %v8605_v1, 1  ;;  %v2914_v24 = vrot.slane %v8609_v31, 1  ;;  %v8787_v47 = vsel %vm573_vm0, %v2905_v19, %v2907_v11 }
 0x204   : > { %v2919_v16 = vrot.slane %v8621_v45, 1  ;;  %v2920_v32 = vrot.slane %v8625_v12, 1  ;;  %v2922_v46 = vrot.slane %v8629_v36, 1  ;;  %v2924_v30 = vrot.slane %v8633_v51, 1 }
 0x205   : > { %v2925_v28 = vrot.slane %v8637_v7, 1  ;;  %v2927_v1 = vrot.slane %v8641_v17, 1  ;;  %v2929_v31 = vrot.slane %v8645_v0, 1  ;;  %v2932_v19 = vrot.slane %v8653_v43, 1 }
 0x206   : > { %v2935_v45 = vrot.slane %v8661_v39, 1  ;;  %v2937_v12 = vrot.slane %v8665_v59, 1  ;;  %v2939_v36 = vrot.slane %v8669_v61, 1  ;;  %v2940_v51 = vrot.slane %v8673_v26, 1 }
 0x207   : > { %v2911_v7 = vsel %vm573_vm0, %v2909_v42, %v2910_v29  ;;  %v2942_v17 = vrot.slane %v8677_v49, 1  ;;  %v2944_v0 = vrot.slane %v8681_v9, 1  ;;  %v2945_v44 = vrot.slane %v8685_v60, 1 }
 0x208   : > { %v2913_v43 = vsel %vm573_vm0, %v2910_v29, %v2912_v13  ;;  %v2916_v41 = vsel %vm573_vm0, %v2914_v24, %v2915_v18  ;;  %v2918_v39 = vsel %vm573_vm0, %v2915_v18, %v2917_v53  ;;  %v2921_v59 = vsel %vm573_vm0, %v2919_v16, %v2920_v32 }
 0x209   : > { %v2923_v61 = vsel %vm573_vm0, %v2920_v32, %v2922_v46  ;;  %v2926_v26 = vsel %vm573_vm0, %v2924_v30, %v2925_v28  ;;  %v2928_v11 = vsel %vm573_vm0, %v2925_v28, %v2927_v1  ;;  %v2931_v49 = vsel %vm573_vm0, %v2929_v31, %v2930_v63 }
 0x20a   : > { %v2933_v9 = vsel %vm573_vm0, %v2930_v63, %v2932_v19  ;;  %v2936_v60 = vsel %vm573_vm0, %v2934_v5, %v2935_v45  ;;  %v2938_v42 = vsel %vm573_vm0, %v2935_v45, %v2937_v12  ;;  %v2941_v24 = vsel %vm573_vm0, %v2939_v36, %v2940_v51 }
 0x20b   : > { %v2943_v53 = vsel %vm573_vm0, %v2940_v51, %v2942_v17  ;;  %v2946_v18 = vsel %vm573_vm0, %v2944_v0, %v2945_v44  ;;  %v2947_v29 = vrot.slane %v8689_v37, 1  ;;  %v2949_v13 = vrot.slane %v8693_v34, 1 }
 0x20c   : > { %v2950_v28 = vrot.slane %v8697_v62, 1  ;;  %v2952_v16 = vrot.slane %v8701_v38, 1  ;;  %v2954_v32 = vrot.slane %v8705_v25, 1  ;;  %v2955_v46 = vrot.slane %v8709_v48, 1 }
 0x20d   : > { %v2957_v30 = vrot.slane %v8713_v40, 1  ;;  %v2959_v1 = vrot.slane %v8717_v27, 1  ;;  %v2960_v31 = vrot.slane %v8721_v10, 1  ;;  %v2962_v63 = vrot.slane %v8725_v22, 1 }
 0x20e   : > { %v2964_v37 = vrot.slane %v8729_v33, 1  ;;  %v2965_v34 = vrot.slane %v8736_v35, 1  ;;  %v2967_v62 = vrot.slane %v8740_v56, 1  ;;  %v2969_v38 = vrot.slane %v8744_v14, 1 }
 0x20f   : > { %v2970_v25 = vrot.slane %v8748_v54, 1  ;;  %v2972_v48 = vrot.slane %v8752_v55, 1  ;;  %v2974_v40 = vrot.slane %v8756_v52, 1  ;;  %v2975_v27 = vrot.slane %v8760_v23, 1 }
 0x210   : > { %v2948_v10 = vsel %vm573_vm0, %v2945_v44, %v2947_v29  ;;  %v2977_v22 = vrot.slane %v8764_v15, 1  ;;  %v2979_v33 = vrot.slane %v8768_v6, 1  ;;  %v2980_v35 = vrot.slane %v8772_v4, 1 }
 0x211   : > { %v2951_v56 = vsel %vm573_vm0, %v2949_v13, %v2950_v28  ;;  %v2953_v14 = vsel %vm573_vm0, %v2950_v28, %v2952_v16  ;;  %v2956_v54 = vsel %vm573_vm0, %v2954_v32, %v2955_v46  ;;  %v2982_v55 = vrot.slane %v8776_v8, 1  ;;  %v11893_v28 = vld [vmem:[#allocation5_spill] sm:$0xff] }
 0x212   : > { %v2958_v52 = vsel %vm573_vm0, %v2955_v46, %v2957_v30  ;;  %v2961_v23 = vsel %vm573_vm0, %v2959_v1, %v2960_v31  ;;  %v2963_v19 = vsel %vm573_vm0, %v2960_v31, %v2962_v63  ;;  %v2966_v15 = vsel %vm573_vm0, %v2964_v37, %v2965_v34 }
 0x213   : > { %v2968_v6 = vsel %vm573_vm0, %v2965_v34, %v2967_v62  ;;  %v2971_v4 = vsel %vm573_vm0, %v2969_v38, %v2970_v25  ;;  %v2973_v5 = vsel %vm573_vm0, %v2970_v25, %v2972_v48  ;;  %v2976_v45 = vsel %vm573_vm0, %v2974_v40, %v2975_v27  ;;  %v11923_v62 = vld [vmem:[#allocation78_spill] sm:$0xff]  ;;  %v11925_v25 = vld [vmem:[#allocation85_spill] sm:$0xff]  ;;  %v11927_v40 = vld [vmem:[#allocation75_spill] sm:$0xff] }
 0x214   : > { %v2978_v12 = vsel %vm573_vm0, %v2975_v27, %v2977_v22  ;;  %v2981_v8 = vsel %vm573_vm0, %v2979_v33, %v2980_v35  ;;  %v8860_v36 = vadd.f32 %v8781_v21, %v8489_v3  ;;  %v8864_v51 = vadd.f32 %v8787_v47, %v8492_v20  ;;  %v11891_v3 = vld [vmem:[#allocation19_spill] sm:$0xff]  ;;  %v11895_v47 = vld [vmem:[#allocation6_spill] sm:$0xff] }
 0x215   : > { %v2983_v17 = vsel %vm573_vm0, %v2980_v35, %v2982_v55  ;;  %v8868_v0 = vadd.f32 %v2911_v7, %v8495_v58  ;;  %v8871_v44 = vadd.f32 %v2913_v43, %v8498_v50  ;;  %v8874_v29 = vadd.f32 %v2916_v41, %v8501_v57  ;;  %v11897_v58 = vld [vmem:[#allocation76_spill] sm:$0xff]  ;;  %v11899_v50 = vld [vmem:[#allocation77_spill] sm:$0xff]  ;;  %v11931_v33 = vld [vmem:[#allocation34_spill] sm:$0xff] }
 0x216   : > { %v8877_v13 = vadd.f32 %v2918_v39, %v8504_v2  ;;  %v8880_v21 = vadd.f32 %v2921_v59, %v11891_v3  ;;  %v8883_v20 = vadd.f32 %v2923_v61, %v11893_v28  ;;  %v8886_v16 = vadd.f32 %v2926_v26, %v11895_v47  ;;  %v11901_v57 = vld [vmem:[#allocation81_spill] sm:$0xff]  ;;  %v11903_v2 = vld [vmem:[#allocation82_spill] sm:$0xff]  ;;  %v11905_v59 = vld [vmem:[#allocation83_spill] sm:$0xff] }
 0x217   : > { %v8889_v7 = vadd.f32 %v2928_v11, %v11897_v58  ;;  %v8892_v43 = vadd.f32 %v2931_v49, %v11899_v50  ;;  %v8895_v41 = vadd.f32 %v2933_v9, %v11901_v57  ;;  %v8898_v39 = vadd.f32 %v2936_v60, %v11903_v2  ;;  %v11907_v61 = vld [vmem:[#allocation84_spill] sm:$0xff]  ;;  %v11911_v11 = vld [vmem:[#allocation89_spill] sm:$0xff]  ;;  %v11913_v49 = vld [vmem:[#allocation90_spill] sm:$0xff] }
 0x218   : > { %11892 = vst [vmem:[#allocation26_spill] sm:$0xff] %v8880_v21  ;;  %11894 = vst [vmem:[#allocation31_spill] sm:$0xff] %v8883_v20  ;;  %v8901_v32 = vadd.f32 %v2938_v42, %v11905_v59  ;;  %v8904_v46 = vadd.f32 %v2941_v24, %v11907_v61  ;;  %v11909_v26 = vld [vmem:[#allocation88_spill] sm:$0xff]  ;;  %v8910_v1 = vadd.f32 %v2946_v18, %v11911_v11  ;;  %v11915_v9 = vld [vmem:[#allocation91_spill] sm:$0xff] }
 0x219   : > { %11896 = vst [vmem:[#allocation51_spill] sm:$0xff] %v8886_v16  ;;  %11898 = vst [vmem:[#allocation52_spill] sm:$0xff] %v8889_v7  ;;  %v8907_v30 = vadd.f32 %v2943_v53, %v11909_v26  ;;  %v8913_v31 = vadd.f32 %v2948_v10, %v11913_v49  ;;  %v8916_v63 = vadd.f32 %v2951_v56, %v11915_v9  ;;  %v11917_v60 = vld [vmem:[#allocation93_spill] sm:$0xff]  ;;  %v11919_v42 = vld [vmem:[#allocation94_spill] sm:$0xff] }
 0x21a   : > { %11900 = vst [vmem:[#allocation23_spill] sm:$0xff] %v8892_v43  ;;  %11902 = vst [vmem:[#allocation56_spill] sm:$0xff] %v8895_v41  ;;  %v8919_v37 = vadd.f32 %v2953_v14, %v11917_v60  ;;  %v8922_v24 = vadd.f32 %v2956_v54, %v11919_v42  ;;  %v8927_v53 = vld [vmem:[%s10458_s3 + $0x5] ss:$0 sm:$0xff]  ;;  %v11921_v18 = vld [vmem:[#allocation95_spill] sm:$0xff]  ;;  %v8933_v38 = vadd.f32 %v2961_v23, %v11923_v62 }
 0x21b   : > { %11904 = vst [vmem:[#allocation67_spill] sm:$0xff] %v8898_v39  ;;  %11906 = vst [vmem:[#allocation24_spill] sm:$0xff] %v8901_v32  ;;  %v8930_v34 = vadd.f32 %v2958_v52, %v11921_v18  ;;  %v8936_v48 = vadd.f32 %v2963_v19, %v11925_v25  ;;  %v8939_v27 = vadd.f32 %v2966_v15, %v11927_v40  ;;  %v11929_v10 = vld [vmem:[#allocation47_spill] sm:$0xff]  ;;  %v11933_v56 = vld [vmem:[#allocation28_spill] sm:$0xff] }
 0x21c   : > { %11908 = vst [vmem:[#allocation70_spill] sm:$0xff] %v8904_v46  ;;  %11910 = vst [vmem:[#allocation71_spill] sm:$0xff] %v8907_v30  ;;  %v8942_v22 = vadd.f32 %v2968_v6, %v11929_v10  ;;  %v8945_v35 = vadd.f32 %v2971_v4, %v11931_v33  ;;  %v8948_v14 = vadd.f32 %v2973_v5, %v11933_v56  ;;  %v11935_v54 = vld [vmem:[#allocation13_spill] sm:$0xff]  ;;  %v11937_v52 = vld [vmem:[#allocation14_spill] sm:$0xff] }
 0x21d   : > { %11912 = vst [vmem:[#allocation92_spill] sm:$0xff] %v8910_v1  ;;  %11914 = vst [vmem:[#allocation73_spill] sm:$0xff] %v8913_v31  ;;  %v8951_v55 = vadd.f32 %v2976_v45, %v11935_v54  ;;  %v8954_v23 = vadd.f32 %v2978_v12, %v11937_v52  ;;  %v11939_v19 = vld [vmem:[#allocation21_spill] sm:$0xff]  ;;  %v4415_v5 = vld [vmem:[%s7415_s19 + $0x20] sm:$0xff] }
 0x21e   : > { %11916 = vst [vmem:[#allocation3_spill] sm:$0xff] %v8916_v63  ;;  %11918 = vst [vmem:[#allocation96_spill] sm:$0xff] %v8919_v37  ;;  %v8957_v15 = vadd.f32 %v2981_v8, %v11939_v19  ;;  %v11941_v3 = vld [vmem:[#allocation25_spill] sm:$0xff]  ;;  %v8968_v45 = vmul.f32 %v4415_v5, %v8927_v53  ;;  %v4416_v47 = vld [vmem:[%s7415_s19 + $0x28] sm:$0x3] }
 0x21f   : > { %11920 = vst [vmem:[#allocation4_spill] sm:$0xff] %v8922_v24  ;;  %11922 = vst [vmem:[#allocation15_spill] sm:$0xff] %v8930_v34  ;;  %v8960_v6 = vadd.f32 %v2983_v17, %v11941_v3  ;;  %v4414_v4 = vld [vmem:[%s7415_s19 + $0x18] sm:$0xff]  ;;  %v8972_v12 = vmul.f32 %v4416_v47, %v8927_v53  ;;  %v8975_v8 = vld [vmem:[%s7415_s19 + $0x30] sm:$0xff] }
 0x220   : > { %11924 = vst [vmem:[#allocation97_spill] sm:$0xff] %v8933_v38  ;;  %11926 = vst [vmem:[#allocation18_spill] sm:$0xff] %v8936_v48  ;;  %v8964_v28 = vmul.f32 %v4414_v4, %v8927_v53  ;;  %v8979_v17 = vmul.f32 %v8975_v8, %v8927_v53  ;;  %v8982_v58 = vld [vmem:[%s7415_s19 + $0x38] sm:$0xff]  ;;  %v8989_v57 = vld [vmem:[%s7415_s19 + $0x40] sm:$0x3]  ;;  %v3150_v37 = vrot.slane %v8968_v45, 2 }
 0x221   : > { %11928 = vst [vmem:[#allocation11_spill] sm:$0xff] %v8939_v27  ;;  %11930 = vst [vmem:[#allocation98_spill] sm:$0xff] %v8942_v22  ;;  %v8986_v50 = vmul.f32 %v8982_v58, %v8927_v53  ;;  %v8993_v2 = vmul.f32 %v8989_v57, %v8927_v53  ;;  %v8996_v59 = vld [vmem:[%s7415_s19 + $0x48] sm:$0xff]  ;;  %v9003_v26 = vld [vmem:[%s7415_s19 + $0x50] sm:$0xff] }
 0x222   : > { %11932 = vst [vmem:[#allocation12_spill] sm:$0xff] %v8945_v35  ;;  %11934 = vst [vmem:[#allocation10_spill] sm:$0xff] %v8948_v14  ;;  %v9000_v61 = vmul.f32 %v8996_v59, %v8927_v53  ;;  %v9007_v11 = vmul.f32 %v9003_v26, %v8927_v53  ;;  %v9010_v49 = vld [vmem:[%s7415_s19 + $0x58] sm:$0x3]  ;;  %v9017_v60 = vld [vmem:[%s7415_s19 + $0x60] sm:$0xff]  ;;  %v3149_v24 = vrot.slane %v8964_v28, 2 }
 0x223   : > { %11936 = vst [vmem:[#allocation99_spill] sm:$0xff] %v8951_v55  ;;  %11938 = vst [vmem:[#allocation33_spill] sm:$0xff] %v8954_v23  ;;  %v9014_v9 = vmul.f32 %v9010_v49, %v8927_v53  ;;  %v9021_v42 = vmul.f32 %v9017_v60, %v8927_v53  ;;  %v9024_v18 = vld [vmem:[%s7415_s19 + $0x68] sm:$0xff]  ;;  %v9031_v25 = vld [vmem:[%s7415_s19 + $0x70] sm:$0x3]  ;;  %v3152_v28 = vrot.slane %v8972_v12, 2 }
 0x224   : > { %11940 = vst [vmem:[#allocation37_spill] sm:$0xff] %v8957_v15  ;;  %11942 = vst [vmem:[#allocation100_spill] sm:$0xff] %v8960_v6  ;;  %v9028_v62 = vmul.f32 %v9024_v18, %v8927_v53  ;;  %v9035_v40 = vmul.f32 %v9031_v25, %v8927_v53  ;;  %v9038_v10 = vld [vmem:[%s7415_s19 + $0x78] sm:$0xff]  ;;  %v9045_v56 = vld [vmem:[%s7415_s19 + $0x80] sm:$0xff]  ;;  %v3155_v7 = vrot.slane %v8986_v50, 2  ;;  %v9286_v16 = vsel %vm819_vm1, %v3149_v24, %v3150_v37 }
 0x225   : > { %11943 = vst [vmem:[#allocation16_spill] sm:$0xff] %v8975_v8  ;;  %11944 = vst [vmem:[#allocation20_spill] sm:$0xff] %v8982_v58  ;;  %v9042_v33 = vmul.f32 %v9038_v10, %v8927_v53  ;;  %v9049_v54 = vmul.f32 %v9045_v56, %v8927_v53  ;;  %v9052_v52 = vld [vmem:[%s7415_s19 + $0x88] sm:$0x3]  ;;  %v9059_v3 = vld [vmem:[%s7415_s19 + $0x90] sm:$0xff]  ;;  %v3160_v20 = vrot.slane %v9007_v11, 2 }
 0x226   : > { %11945 = vst [vmem:[#allocation101_spill] sm:$0xff] %v8989_v57  ;;  %11946 = vst [vmem:[#allocation17_spill] sm:$0xff] %v8996_v59  ;;  %v9056_v19 = vmul.f32 %v9052_v52, %v8927_v53  ;;  %v9063_v4 = vmul.f32 %v9059_v3, %v8927_v53  ;;  %v9066_v5 = vld [vmem:[%s7415_s19 + $0x98] sm:$0xff]  ;;  %v9129_v59 = vld [vmem:[%s7415_s19 + $0xe0] sm:$0xff]  ;;  %v3162_v21 = vrot.slane %v9014_v9, 2  ;;  %v3167_v50 = vrot.slane %v9035_v40, 2 }
 0x227   : > { %11947 = vst [vmem:[#allocation27_spill] sm:$0xff] %v9003_v26  ;;  %11948 = vst [vmem:[#allocation102_spill] sm:$0xff] %v9010_v49  ;;  %v9070_v47 = vmul.f32 %v9066_v5, %v8927_v53  ;;  %v9080_v49 = vld [vmem:[%s7415_s19 + $0xa8] sm:$0xff]  ;;  %v9122_v26 = vld [vmem:[%s7415_s19 + $0xd8] sm:$0xff]  ;;  %v3169_v24 = vrot.slane %v9042_v33, 2 }
 0x228   : > { %11949 = vst [vmem:[#allocation30_spill] sm:$0xff] %v9017_v60  ;;  %11950 = vst [vmem:[#allocation39_spill] sm:$0xff] %v9024_v18  ;;  %v9084_v57 = vmul.f32 %v9080_v49, %v8927_v53  ;;  %v9108_v18 = vld [vmem:[%s7415_s19 + $0xc8] sm:$0xff]  ;;  %v9115_v60 = vld [vmem:[%s7415_s19 + $0xd0] sm:$0x3] }
 0x229   : > { %11951 = vst [vmem:[#allocation103_spill] sm:$0xff] %v9031_v25  ;;  %11952 = vst [vmem:[#allocation29_spill] sm:$0xff] %v9038_v10  ;;  %v9073_v25 = vld [vmem:[%s7415_s19 + $0xa0] sm:$0x3]  ;;  %v9136_v58 = vld [vmem:[%s7415_s19 + $0xe8] sm:$0x3] }
 0x22a   : > { %11953 = vst [vmem:[#allocation32_spill] sm:$0xff] %v9045_v56  ;;  %11954 = vst [vmem:[#allocation104_spill] sm:$0xff] %v9052_v52  ;;  %v9077_v52 = vmul.f32 %v9073_v25, %v8927_v53  ;;  %v9094_v56 = vld [vmem:[%s7415_s19 + $0xb8] sm:$0x3]  ;;  %v9101_v10 = vld [vmem:[%s7415_s19 + $0xc0] sm:$0xff]  ;;  %v3175_v11 = vrot.slane %v9070_v47, 2 }
 0x22b   : > { %11955 = vst [vmem:[#allocation79_spill] sm:$0xff] %v9059_v3  ;;  %11956 = vst [vmem:[#allocation105_spill] sm:$0xff] %v9066_v5  ;;  %v9087_v3 = vld [vmem:[%s7415_s19 + $0xb0] sm:$0xff]  ;;  %v9150_v6 = vld [vmem:[%s7415_s19 + $0xf8] sm:$0xff]  ;;  %v3179_v9 = vrot.slane %v9084_v57, 2 }
 0x22c   : > { %11957 = vst [vmem:[#allocation80_spill] sm:$0xff] %v9073_v25  ;;  %11958 = vst [vmem:[#allocation106_spill] sm:$0xff] %v9080_v49  ;;  %v9091_v5 = vmul.f32 %v9087_v3, %v8927_v53  ;;  %v9098_v25 = vmul.f32 %v9094_v56, %v8927_v53  ;;  %v9105_v49 = vmul.f32 %v9101_v10, %v8927_v53  ;;  %v9143_v8 = vld [vmem:[%s7415_s19 + $0xf0] sm:$0xff]  ;;  %v9157_v15 = vld [vmem:[%s7415_s19 + $0x100] sm:$0x3] }
 0x22d   : > { %11959 = vst [vmem:[#allocation86_spill] sm:$0xff] %v9087_v3  ;;  %11960 = vst [vmem:[#allocation87_spill] sm:$0xff] %v9094_v56  ;;  %v9112_v3 = vmul.f32 %v9108_v18, %v8927_v53  ;;  %v9119_v56 = vmul.f32 %v9115_v60, %v8927_v53  ;;  %v9164_v23 = vld [vmem:[%s7415_s19 + $0x108] sm:$0xff]  ;;  %v9171_v55 = vld [vmem:[%s7415_s19 + $0x110] sm:$0xff] }
 0x22e   : > { %11961 = vst [vmem:[#allocation107_spill] sm:$0xff] %v9101_v10  ;;  %11962 = vst [vmem:[#allocation19_spill] sm:$0xff] %v9108_v18  ;;  %v9126_v10 = vmul.f32 %v9122_v26, %v8927_v53  ;;  %v9133_v18 = vmul.f32 %v9129_v59, %v8927_v53  ;;  %v9178_v14 = vld [vmem:[%s7415_s19 + $0x118] sm:$0x3]  ;;  %v9185_v35 = vld [vmem:[%s7415_s19 + $0x120] sm:$0xff]  ;;  %v3184_v40 = vrot.slane %v9105_v49, 2 }
 0x22f   : > { %11963 = vst [vmem:[#allocation5_spill] sm:$0xff] %v9115_v60  ;;  %11964 = vst [vmem:[#allocation6_spill] sm:$0xff] %v9122_v26  ;;  %v9140_v60 = vmul.f32 %v9136_v58, %v8927_v53  ;;  %v9147_v26 = vmul.f32 %v9143_v8, %v8927_v53  ;;  %v9192_v22 = vld [vmem:[%s7415_s19 + $0x128] sm:$0xff]  ;;  %v9199_v27 = vld [vmem:[%s7415_s19 + $0x130] sm:$0x3]  ;;  %v3185_v33 = vrot.slane %v9112_v3, 2 }
 0x230   : > { %11965 = vst [vmem:[#allocation76_spill] sm:$0xff] %v9129_v59  ;;  %11966 = vst [vmem:[#allocation77_spill] sm:$0xff] %v9136_v58  ;;  %v9154_v59 = vmul.f32 %v9150_v6, %v8927_v53  ;;  %v9161_v58 = vmul.f32 %v9157_v15, %v8927_v53  ;;  %v9206_v48 = vld [vmem:[%s7415_s19 + $0x138] sm:$0xff]  ;;  %v9213_v38 = vld [vmem:[%s7415_s19 + $0x140] sm:$0xff]  ;;  %v3190_v47 = vrot.slane %v9133_v18, 2 }
 0x231   : > { %11967 = vst [vmem:[#allocation81_spill] sm:$0xff] %v9143_v8  ;;  %11968 = vst [vmem:[#allocation82_spill] sm:$0xff] %v9150_v6  ;;  %v9168_v8 = vmul.f32 %v9164_v23, %v8927_v53  ;;  %v9175_v6 = vmul.f32 %v9171_v55, %v8927_v53  ;;  %v9220_v34 = vld [vmem:[%s7415_s19 + $0x148] sm:$0x3]  ;;  %v9236_v31 = vld [vmem:[%s7415_s19 + $0x158] sm:$0xff] }
 0x232   : > { %11969 = vst [vmem:[#allocation83_spill] sm:$0xff] %v9157_v15  ;;  %11970 = vst [vmem:[#allocation84_spill] sm:$0xff] %v9164_v23  ;;  %v9182_v15 = vmul.f32 %v9178_v14, %v8927_v53  ;;  %v9189_v23 = vmul.f32 %v9185_v35, %v8927_v53  ;;  %v9243_v1 = vld [vmem:[%s7415_s19 + $0x160] sm:$0x3]  ;;  %v9251_v45 = vld [vmem:[%s7415_s19 + $0x168] sm:$0xff] }
 0x233   : > { %11971 = vst [vmem:[#allocation88_spill] sm:$0xff] %v9171_v55  ;;  %11972 = vst [vmem:[#allocation89_spill] sm:$0xff] %v9178_v14  ;;  %v9196_v55 = vmul.f32 %v9192_v22, %v8927_v53  ;;  %v9203_v14 = vmul.f32 %v9199_v27, %v8927_v53  ;;  %v9258_v30 = vld [vmem:[%s7415_s19 + $0x170] sm:$0xff]  ;;  %v9265_v46 = vld [vmem:[%s7415_s19 + $0x178] sm:$0x3] }
 0x234   : > { %11973 = vst [vmem:[#allocation90_spill] sm:$0xff] %v9185_v35  ;;  %11974 = vst [vmem:[#allocation91_spill] sm:$0xff] %v9192_v22  ;;  %v9210_v35 = vmul.f32 %v9206_v48, %v8927_v53  ;;  %v9217_v22 = vmul.f32 %v9213_v38, %v8927_v53  ;;  %v11985_v32 = vld [vmem:[#allocation35_spill] sm:$0xff]  ;;  %v11986_v39 = vld [vmem:[#allocation48_spill] sm:$0xff] }
 0x235   : > { %11975 = vst [vmem:[#allocation93_spill] sm:$0xff] %v9199_v27  ;;  %11976 = vst [vmem:[#allocation94_spill] sm:$0xff] %v9206_v48  ;;  %v9224_v27 = vmul.f32 %v9220_v34, %v8927_v53  ;;  %v9229_v48 = vld [vmem:[%s7415_s19 + $0x150] sm:$0xff]  ;;  %v9273_v12 = vmul.f32 %v8927_v53, %v11985_v32  ;;  %v11987_v41 = vld [vmem:[#allocation22_spill] sm:$0xff]  ;;  %v3159_v32 = vrot.slane %v9000_v61, 2  ;;  %v3174_v61 = vrot.slane %v9063_v4, 2 }
 0x236   : > { %11977 = vst [vmem:[#allocation95_spill] sm:$0xff] %v9213_v38  ;;  %11978 = vst [vmem:[#allocation78_spill] sm:$0xff] %v9220_v34  ;;  %v9233_v63 = vmul.f32 %v9229_v48, %v8927_v53  ;;  %v9240_v38 = vmul.f32 %v9236_v31, %v8927_v53  ;;  %v9247_v34 = vmul.f32 %v9243_v1, %v8927_v53  ;;  %v3189_v4 = vrot.slane %v9126_v10, 2 }
 0x237   : > { %11979 = vst [vmem:[#allocation85_spill] sm:$0xff] %v9229_v48  ;;  %11980 = vst [vmem:[#allocation75_spill] sm:$0xff] %v9236_v31  ;;  %v9255_v48 = vmul.f32 %v9251_v45, %v8927_v53  ;;  %v9262_v31 = vmul.f32 %v9258_v30, %v8927_v53  ;;  %v9281_v43 = vmul.f32 %v8927_v53, %v11987_v41  ;;  %v3170_v41 = vrot.slane %v9049_v54, 2 }
 0x238   : > { %11981 = vst [vmem:[#allocation47_spill] sm:$0xff] %v9243_v1  ;;  %11982 = vst [vmem:[#allocation34_spill] sm:$0xff] %v9251_v45  ;;  %v9269_v1 = vmul.f32 %v9265_v46, %v8927_v53  ;;  %v9277_v45 = vmul.f32 %v8927_v53, %v11986_v39  ;;  %v9292_v39 = vsel %vm819_vm1, %v3150_v37, %v3152_v28  ;;  %v3164_v53 = vrot.slane %v9021_v42, 2 }
 0x239   : > { %11983 = vst [vmem:[#allocation28_spill] sm:$0xff] %v9258_v30  ;;  %11984 = vst [vmem:[#allocation13_spill] sm:$0xff] %v9265_v46  ;;  %v3154_v30 = vrot.slane %v8979_v17, 2  ;;  %v3157_v46 = vrot.slane %v8993_v2, 2  ;;  %v3165_v17 = vrot.slane %v9028_v62, 2  ;;  %v3172_v2 = vrot.slane %v9056_v19, 2 }
 0x23a   : > { %v3177_v37 = vrot.slane %v9077_v52, 2  ;;  %v3180_v42 = vrot.slane %v9091_v5, 2  ;;  %v3182_v62 = vrot.slane %v9098_v25, 2  ;;  %v3187_v19 = vrot.slane %v9119_v56, 2 }
 0x23b   : > { %v3156_v54 = vsel %vm819_vm1, %v3154_v30, %v3155_v7  ;;  %v3158_v52 = vsel %vm819_vm1, %v3155_v7, %v3157_v46  ;;  %v3161_v57 = vsel %vm819_vm1, %v3159_v32, %v3160_v20  ;;  %v3163_v5 = vsel %vm819_vm1, %v3160_v20, %v3162_v21 }
 0x23c   : > { %v3166_v25 = vsel %vm819_vm1, %v3164_v53, %v3165_v17  ;;  %v3168_v49 = vsel %vm819_vm1, %v3165_v17, %v3167_v50  ;;  %v3171_v3 = vsel %vm819_vm1, %v3169_v24, %v3170_v41  ;;  %v3173_v30 = vsel %vm819_vm1, %v3170_v41, %v3172_v2 }
 0x23d   : > { %v3176_v56 = vsel %vm819_vm1, %v3174_v61, %v3175_v11  ;;  %v3178_v10 = vsel %vm819_vm1, %v3175_v11, %v3177_v37  ;;  %v3181_v18 = vsel %vm819_vm1, %v3179_v9, %v3180_v42  ;;  %v3183_v7 = vsel %vm819_vm1, %v3180_v42, %v3182_v62 }
 0x23e   : > { %v3186_v32 = vsel %vm819_vm1, %v3184_v40, %v3185_v33  ;;  %v3188_v21 = vsel %vm819_vm1, %v3185_v33, %v3187_v19  ;;  %v3191_v20 = vsel %vm819_vm1, %v3189_v4, %v3190_v47  ;;  %v3192_v46 = vrot.slane %v9140_v60, 2 }
 0x23f   : > { %v3194_v28 = vrot.slane %v9147_v26, 2  ;;  %v3195_v41 = vrot.slane %v9154_v59, 2  ;;  %v3197_v53 = vrot.slane %v9161_v58, 2  ;;  %v3199_v17 = vrot.slane %v9168_v8, 2 }
 0x240   : > { %v3200_v50 = vrot.slane %v9175_v6, 2  ;;  %v3202_v24 = vrot.slane %v9182_v15, 2  ;;  %v3204_v2 = vrot.slane %v9189_v23, 2  ;;  %v3205_v61 = vrot.slane %v9196_v55, 2 }
 0x241   : > { %v3207_v11 = vrot.slane %v9203_v14, 2  ;;  %v3209_v60 = vrot.slane %v9210_v35, 2  ;;  %v3210_v26 = vrot.slane %v9217_v22, 2  ;;  %v3212_v59 = vrot.slane %v9224_v27, 2 }
 0x242   : > { %v3214_v58 = vrot.slane %v9233_v63, 2  ;;  %v3215_v8 = vrot.slane %v9240_v38, 2  ;;  %v3217_v6 = vrot.slane %v9247_v34, 2  ;;  %v3219_v15 = vrot.slane %v9255_v48, 2 }
 0x243   : > { %v3220_v23 = vrot.slane %v9262_v31, 2  ;;  %v3193_v55 = vsel %vm819_vm1, %v3190_v47, %v3192_v46  ;;  %v3222_v14 = vrot.slane %v9269_v1, 2  ;;  %v3224_v35 = vrot.slane %v9273_v12, 2 }
 0x244   : > { %v3225_v22 = vrot.slane %v9277_v45, 2  ;;  %v3196_v27 = vsel %vm819_vm1, %v3194_v28, %v3195_v41  ;;  %v3198_v63 = vsel %vm819_vm1, %v3195_v41, %v3197_v53  ;;  %v3201_v38 = vsel %vm819_vm1, %v3199_v17, %v3200_v50  ;;  %v11989_v41 = vld [vmem:[#allocation31_spill] sm:$0xff] }
 0x245   : > { %v3227_v34 = vrot.slane %v9281_v43, 2  ;;  %v3203_v48 = vsel %vm819_vm1, %v3200_v50, %v3202_v24  ;;  %v3206_v31 = vsel %vm819_vm1, %v3204_v2, %v3205_v61  ;;  %v3208_v37 = vsel %vm819_vm1, %v3205_v61, %v3207_v11 }
 0x246   : > { %v3211_v1 = vsel %vm819_vm1, %v3209_v60, %v3210_v26  ;;  %v3213_v12 = vsel %vm819_vm1, %v3210_v26, %v3212_v59  ;;  %v3216_v45 = vsel %vm819_vm1, %v3214_v58, %v3215_v8  ;;  %v3218_v9 = vsel %vm819_vm1, %v3215_v8, %v3217_v6  ;;  %v12007_v8 = vld [vmem:[#allocation18_spill] sm:$0xff] }
 0x247   : > { %v3221_v42 = vsel %vm819_vm1, %v3219_v15, %v3220_v23  ;;  %v3223_v62 = vsel %vm819_vm1, %v3220_v23, %v3222_v14  ;;  %v3226_v43 = vsel %vm819_vm1, %v3224_v35, %v3225_v22  ;;  %v9365_v40 = vadd.f32 %v9286_v16, %v8860_v36  ;;  %v11988_v36 = vld [vmem:[#allocation26_spill] sm:$0xff]  ;;  %v12009_v15 = vld [vmem:[#allocation11_spill] sm:$0xff]  ;;  %v12013_v35 = vld [vmem:[#allocation12_spill] sm:$0xff] }
 0x248   : > { %v9369_v33 = vadd.f32 %v9292_v39, %v8864_v51  ;;  %v3228_v19 = vsel %vm819_vm1, %v3225_v22, %v3227_v34  ;;  %v9373_v4 = vadd.f32 %v3156_v54, %v8868_v0  ;;  %v9376_v47 = vadd.f32 %v3158_v52, %v8871_v44  ;;  %v11990_v39 = vld [vmem:[#allocation51_spill] sm:$0xff]  ;;  %v11991_v0 = vld [vmem:[#allocation52_spill] sm:$0xff] }
 0x249   : > { %v9379_v46 = vadd.f32 %v3161_v57, %v8874_v29  ;;  %v9382_v28 = vadd.f32 %v3163_v5, %v8877_v13  ;;  %v9385_v16 = vadd.f32 %v3166_v25, %v11988_v36  ;;  %v9388_v51 = vadd.f32 %v3168_v49, %v11989_v41  ;;  %v11992_v44 = vld [vmem:[#allocation23_spill] sm:$0xff]  ;;  %v11993_v29 = vld [vmem:[#allocation56_spill] sm:$0xff]  ;;  %v11996_v49 = vld [vmem:[#allocation70_spill] sm:$0xff] }
 0x24a   : > { %v9391_v53 = vadd.f32 %v3171_v3, %v11990_v39  ;;  %v9394_v54 = vadd.f32 %v3173_v30, %v11991_v0  ;;  %v9397_v52 = vadd.f32 %v3176_v56, %v11992_v44  ;;  %v9400_v57 = vadd.f32 %v3178_v10, %v11993_v29  ;;  %v11994_v13 = vld [vmem:[#allocation67_spill] sm:$0xff]  ;;  %v11995_v25 = vld [vmem:[#allocation24_spill] sm:$0xff]  ;;  %v11999_v56 = vld [vmem:[#allocation73_spill] sm:$0xff] }
 0x24b   : > { %v9403_v5 = vadd.f32 %v3181_v18, %v11994_v13  ;;  %v9406_v17 = vadd.f32 %v3183_v7, %v11995_v25  ;;  %v9409_v50 = vadd.f32 %v3186_v32, %v11996_v49  ;;  %v11997_v3 = vld [vmem:[#allocation71_spill] sm:$0xff]  ;;  %v11998_v30 = vld [vmem:[#allocation92_spill] sm:$0xff]  ;;  %v9418_v61 = vadd.f32 %v3193_v55, %v11999_v56  ;;  %v4333_v32 = vld [vmem:[%s10458_s3 + $0x6] ss:$0 sm:$0xff] }
 0x24c   : > { %v9412_v24 = vadd.f32 %v3188_v21, %v11997_v3  ;;  %v9415_v2 = vadd.f32 %v3191_v20, %v11998_v30  ;;  %v12000_v10 = vld [vmem:[#allocation3_spill] sm:$0xff]  ;;  %v12001_v18 = vld [vmem:[#allocation96_spill] sm:$0xff]  ;;  %v12005_v20 = vld [vmem:[#allocation97_spill] sm:$0xff]  ;;  %v9439_v6 = vadd.f32 %v3208_v37, %v12007_v8  ;;  %v9442_v23 = vadd.f32 %v3211_v1, %v12009_v15 }
 0x24d   : > { %v9421_v11 = vadd.f32 %v3196_v27, %v12000_v10  ;;  %v9424_v60 = vadd.f32 %v3198_v63, %v12001_v18  ;;  %v12002_v7 = vld [vmem:[#allocation4_spill] sm:$0xff]  ;;  %v12003_v21 = vld [vmem:[#allocation15_spill] sm:$0xff]  ;;  %v9436_v58 = vadd.f32 %v3206_v31, %v12005_v20  ;;  %v12011_v55 = vld [vmem:[#allocation98_spill] sm:$0xff]  ;;  %v9448_v22 = vadd.f32 %v3216_v45, %v12013_v35 }
 0x24e   : > { %v9427_v26 = vadd.f32 %v3201_v38, %v12002_v7  ;;  %v9433_v59 = vadd.f32 %v3203_v48, %v12003_v21  ;;  %12008 = vst [vmem:[#allocation25_spill] sm:$0xff] %v9439_v6  ;;  %12010 = vst [vmem:[#allocation26_spill] sm:$0xff] %v9442_v23  ;;  %v9445_v14 = vadd.f32 %v3213_v12, %v12011_v55  ;;  %v12015_v27 = vld [vmem:[#allocation10_spill] sm:$0xff]  ;;  %v12017_v38 = vld [vmem:[#allocation99_spill] sm:$0xff] }
 0x24f   : > { %12006 = vst [vmem:[#allocation21_spill] sm:$0xff] %v9436_v58  ;;  %12014 = vst [vmem:[#allocation51_spill] sm:$0xff] %v9448_v22  ;;  %v9451_v63 = vadd.f32 %v3218_v9, %v12015_v27  ;;  %v9454_v34 = vadd.f32 %v3221_v42, %v12017_v38  ;;  %v12019_v48 = vld [vmem:[#allocation33_spill] sm:$0xff]  ;;  %v12023_v1 = vld [vmem:[#allocation100_spill] sm:$0xff] }
 0x250   : > { %12004 = vst [vmem:[#allocation14_spill] sm:$0xff] %v9433_v59  ;;  %12012 = vst [vmem:[#allocation31_spill] sm:$0xff] %v9445_v14  ;;  %v9457_v31 = vadd.f32 %v3223_v62, %v12019_v48  ;;  %v12021_v37 = vld [vmem:[#allocation37_spill] sm:$0xff]  ;;  %v9463_v41 = vadd.f32 %v3228_v19, %v12023_v1  ;;  %v12025_v12 = vld [vmem:[#allocation16_spill] sm:$0xff] }
 0x251   : > { %12016 = vst [vmem:[#allocation52_spill] sm:$0xff] %v9451_v63  ;;  %12018 = vst [vmem:[#allocation23_spill] sm:$0xff] %v9454_v34  ;;  %v9460_v36 = vadd.f32 %v3226_v43, %v12021_v37  ;;  %v3298_v39 = vmul.f32 %v12025_v12, %v4333_v32  ;;  %v12026_v0 = vld [vmem:[#allocation20_spill] sm:$0xff]  ;;  %v12027_v44 = vld [vmem:[#allocation17_spill] sm:$0xff] }
 0x252   : > { %12020 = vst [vmem:[#allocation56_spill] sm:$0xff] %v9457_v31  ;;  %12024 = vst [vmem:[#allocation24_spill] sm:$0xff] %v9463_v41  ;;  %v3299_v45 = vmul.f32 %v12026_v0, %v4333_v32  ;;  %v3300_v9 = vmul.f32 %v12027_v44, %v4333_v32  ;;  %v12028_v29 = vld [vmem:[#allocation27_spill] sm:$0xff]  ;;  %v12029_v13 = vld [vmem:[#allocation30_spill] sm:$0xff] }
 0x253   : > { %12022 = vst [vmem:[#allocation67_spill] sm:$0xff] %v9460_v36  ;;  %v3301_v42 = vmul.f32 %v12028_v29, %v4333_v32  ;;  %v3302_v25 = vmul.f32 %v12029_v13, %v4333_v32  ;;  %v12030_v62 = vld [vmem:[#allocation39_spill] sm:$0xff]  ;;  %v12031_v3 = vld [vmem:[#allocation29_spill] sm:$0xff]  ;;  %v12032_v30 = vld [vmem:[#allocation32_spill] sm:$0xff] }
 0x254   : > { %v3303_v49 = vmul.f32 %v12030_v62, %v4333_v32  ;;  %v3304_v43 = vmul.f32 %v12031_v3, %v4333_v32  ;;  %v3305_v56 = vmul.f32 %v12032_v30, %v4333_v32  ;;  %v12033_v19 = vld [vmem:[#allocation79_spill] sm:$0xff]  ;;  %v12034_v18 = vld [vmem:[#allocation105_spill] sm:$0xff]  ;;  %v12035_v21 = vld [vmem:[#allocation106_spill] sm:$0xff] }
 0x255   : > { %v3306_v10 = vmul.f32 %v12033_v19, %v4333_v32  ;;  %v3307_v7 = vmul.f32 %v12034_v18, %v4333_v32  ;;  %v3308_v20 = vmul.f32 %v12035_v21, %v4333_v32  ;;  %v12036_v8 = vld [vmem:[#allocation86_spill] sm:$0xff]  ;;  %v12037_v55 = vld [vmem:[#allocation107_spill] sm:$0xff]  ;;  %v12040_v1 = vld [vmem:[#allocation76_spill] sm:$0xff] }
 0x256   : > { %v3309_v15 = vmul.f32 %v12036_v8, %v4333_v32  ;;  %v3310_v35 = vmul.f32 %v12037_v55, %v4333_v32  ;;  %v12038_v27 = vld [vmem:[#allocation19_spill] sm:$0xff]  ;;  %v12039_v48 = vld [vmem:[#allocation6_spill] sm:$0xff]  ;;  %v3313_v62 = vmul.f32 %v12040_v1, %v4333_v32  ;;  %v12041_v13 = vld [vmem:[#allocation81_spill] sm:$0xff] }
 0x257   : > { %v3311_v38 = vmul.f32 %v12038_v27, %v4333_v32  ;;  %v3312_v37 = vmul.f32 %v12039_v48, %v4333_v32  ;;  %v3314_v3 = vmul.f32 %v12041_v13, %v4333_v32  ;;  %v9483_v29 = vld [vmem:[%s7415_s19 + $0x198] sm:$0xff]  ;;  %v9486_v30 = vld [vmem:[%s7415_s19 + $0x1a0] sm:$0xff]  ;;  %v12045_v44 = vld [vmem:[#allocation84_spill] sm:$0xff] }
 0x258   : > { %12042 = vst [vmem:[#allocation70_spill] sm:$0xff] %v9483_v29  ;;  %12043 = vst [vmem:[#allocation71_spill] sm:$0xff] %v9486_v30  ;;  %v12044_v19 = vld [vmem:[#allocation82_spill] sm:$0xff]  ;;  %v3316_v21 = vmul.f32 %v12045_v44, %v4333_v32  ;;  %v12046_v0 = vld [vmem:[#allocation88_spill] sm:$0xff] }
 0x259   : > { %v3315_v18 = vmul.f32 %v12044_v19, %v4333_v32  ;;  %v3317_v8 = vmul.f32 %v12046_v0, %v4333_v32  ;;  %v12047_v12 = vld [vmem:[#allocation90_spill] sm:$0xff]  ;;  %v12048_v41 = vld [vmem:[#allocation91_spill] sm:$0xff]  ;;  %v12051_v34 = vld [vmem:[#allocation85_spill] sm:$0xff] }
 0x25a   : > { %v3318_v55 = vmul.f32 %v12047_v12, %v4333_v32  ;;  %v3319_v27 = vmul.f32 %v12048_v41, %v4333_v32  ;;  %v12049_v36 = vld [vmem:[#allocation94_spill] sm:$0xff]  ;;  %v12050_v31 = vld [vmem:[#allocation95_spill] sm:$0xff]  ;;  %v3322_v13 = vmul.f32 %v12051_v34, %v4333_v32  ;;  %v12054_v6 = vld [vmem:[#allocation28_spill] sm:$0xff]  ;;  %v3328_v12 = vmul.f32 %v4333_v32, %v9483_v29 }
 0x25b   : > { %v3320_v48 = vmul.f32 %v12049_v36, %v4333_v32  ;;  %v3321_v1 = vmul.f32 %v12050_v31, %v4333_v32  ;;  %v12052_v63 = vld [vmem:[#allocation75_spill] sm:$0xff]  ;;  %v12053_v14 = vld [vmem:[#allocation34_spill] sm:$0xff]  ;;  %v3325_v19 = vmul.f32 %v12054_v6, %v4333_v32  ;;  %v12056_v59 = vld [vmem:[#allocation48_spill] sm:$0xff]  ;;  %v3329_v41 = vmul.f32 %v4333_v32, %v9486_v30 }
 0x25c   : > { %v3323_v22 = vmul.f32 %v12052_v63, %v4333_v32  ;;  %v3324_v23 = vmul.f32 %v12053_v14, %v4333_v32  ;;  %v12055_v58 = vld [vmem:[#allocation35_spill] sm:$0xff]  ;;  %v3327_v0 = vmul.f32 %v4333_v32, %v12056_v59  ;;  %v9504_v36 = vadd.f32 %v3298_v39, %v9365_v40  ;;  %v12074_v39 = vld [vmem:[#allocation21_spill] sm:$0xff] }
 0x25d   : > { %v3326_v44 = vmul.f32 %v4333_v32, %v12055_v58  ;;  %v9507_v31 = vadd.f32 %v3299_v45, %v9369_v33  ;;  %v9510_v63 = vadd.f32 %v3300_v9, %v9373_v4  ;;  %v9513_v14 = vadd.f32 %v3301_v42, %v9376_v47  ;;  %v12076_v45 = vld [vmem:[#allocation25_spill] sm:$0xff]  ;;  %v12078_v9 = vld [vmem:[#allocation26_spill] sm:$0xff]  ;;  %v12080_v42 = vld [vmem:[#allocation31_spill] sm:$0xff] }
 0x25e   : > { %v9516_v58 = vadd.f32 %v3302_v25, %v9379_v46  ;;  %v9519_v59 = vadd.f32 %v3303_v49, %v9382_v28  ;;  %v9522_v32 = vadd.f32 %v3304_v43, %v9385_v16  ;;  %v9525_v40 = vadd.f32 %v3305_v56, %v9388_v51  ;;  %v12082_v25 = vld [vmem:[#allocation51_spill] sm:$0xff]  ;;  %v12084_v49 = vld [vmem:[#allocation52_spill] sm:$0xff] }
 0x25f   : > { %v9528_v33 = vadd.f32 %v3306_v10, %v9391_v53  ;;  %v9531_v4 = vadd.f32 %v3307_v7, %v9394_v54  ;;  %v9534_v47 = vadd.f32 %v3308_v20, %v9397_v52  ;;  %v9537_v46 = vadd.f32 %v3309_v15, %v9400_v57  ;;  %v12086_v43 = vld [vmem:[#allocation23_spill] sm:$0xff]  ;;  %v12088_v10 = vld [vmem:[#allocation56_spill] sm:$0xff] }
 0x260   : > { %12057 = vst [vmem:[#allocation92_spill] sm:$0xff] %v9522_v32  ;;  %12058 = vst [vmem:[#allocation73_spill] sm:$0xff] %v9525_v40  ;;  %v9540_v28 = vadd.f32 %v3310_v35, %v9403_v5  ;;  %v9543_v16 = vadd.f32 %v3311_v38, %v9406_v17  ;;  %v9546_v51 = vadd.f32 %v3312_v37, %v9409_v50  ;;  %v9569_v50 = vld [vmem:[%s10458_s3 + $0x7] ss:$0 sm:$0xff]  ;;  %v12090_v7 = vld [vmem:[#allocation67_spill] sm:$0xff] }
 0x261   : > { %12059 = vst [vmem:[#allocation3_spill] sm:$0xff] %v9528_v33  ;;  %12060 = vst [vmem:[#allocation96_spill] sm:$0xff] %v9531_v4  ;;  %v9549_v53 = vadd.f32 %v3313_v62, %v9412_v24  ;;  %v9552_v54 = vadd.f32 %v3314_v3, %v9415_v2  ;;  %v9555_v52 = vadd.f32 %v3315_v18, %v9418_v61  ;;  %v12072_v24 = vld [vmem:[#allocation14_spill] sm:$0xff]  ;;  %v12101_v37 = vld [vmem:[#allocation39_spill] sm:$0xff] }
 0x262   : > { %12061 = vst [vmem:[#allocation4_spill] sm:$0xff] %v9534_v47  ;;  %12062 = vst [vmem:[#allocation15_spill] sm:$0xff] %v9537_v46  ;;  %v9558_v57 = vadd.f32 %v3316_v21, %v9421_v11  ;;  %v9561_v5 = vadd.f32 %v3317_v8, %v9424_v60  ;;  %v9564_v17 = vadd.f32 %v3318_v55, %v9427_v26  ;;  %v12100_v38 = vld [vmem:[#allocation30_spill] sm:$0xff]  ;;  %v12135_v47 = vld [vmem:[#allocation35_spill] sm:$0xff] }
 0x263   : > { %12063 = vst [vmem:[#allocation97_spill] sm:$0xff] %v9540_v28  ;;  %12064 = vst [vmem:[#allocation18_spill] sm:$0xff] %v9543_v16  ;;  %v9572_v2 = vadd.f32 %v3319_v27, %v12072_v24  ;;  %v9575_v61 = vadd.f32 %v3320_v48, %v12074_v39  ;;  %v9578_v11 = vadd.f32 %v3321_v1, %v12076_v45  ;;  %v12102_v24 = vld [vmem:[#allocation103_spill] sm:$0xff]  ;;  %v12103_v45 = vld [vmem:[#allocation29_spill] sm:$0xff] }
 0x264   : > { %12065 = vst [vmem:[#allocation11_spill] sm:$0xff] %v9546_v51  ;;  %12066 = vst [vmem:[#allocation98_spill] sm:$0xff] %v9549_v53  ;;  %v9581_v60 = vadd.f32 %v3322_v13, %v12078_v9  ;;  %v9584_v26 = vadd.f32 %v3323_v22, %v12080_v42  ;;  %v9587_v62 = vadd.f32 %v3324_v23, %v12082_v25  ;;  %v12092_v13 = vld [vmem:[#allocation24_spill] sm:$0xff]  ;;  %v12133_v16 = vld [vmem:[#allocation34_spill] sm:$0xff] }
 0x265   : > { %12067 = vst [vmem:[#allocation12_spill] sm:$0xff] %v9552_v54  ;;  %12068 = vst [vmem:[#allocation10_spill] sm:$0xff] %v9555_v52  ;;  %v9590_v3 = vadd.f32 %v3325_v19, %v12084_v49  ;;  %v9593_v56 = vadd.f32 %v3326_v44, %v12086_v43  ;;  %v9596_v18 = vadd.f32 %v3327_v0, %v12088_v10  ;;  %v12094_v22 = vld [vmem:[#allocation16_spill] sm:$0xff]  ;;  %v12096_v19 = vld [vmem:[#allocation101_spill] sm:$0xff] }
 0x266   : > { %12069 = vst [vmem:[#allocation99_spill] sm:$0xff] %v9558_v57  ;;  %12070 = vst [vmem:[#allocation33_spill] sm:$0xff] %v9561_v5  ;;  %v9599_v21 = vadd.f32 %v3328_v12, %v12090_v7  ;;  %v9602_v20 = vadd.f32 %v3329_v41, %v12092_v13  ;;  %v3367_v8 = vmul.f32 %v12094_v22, %v9569_v50  ;;  %v12095_v23 = vld [vmem:[#allocation20_spill] sm:$0xff]  ;;  %v12097_v44 = vld [vmem:[#allocation17_spill] sm:$0xff] }
 0x267   : > { %12071 = vst [vmem:[#allocation37_spill] sm:$0xff] %v9564_v17  ;;  %12073 = vst [vmem:[#allocation100_spill] sm:$0xff] %v9572_v2  ;;  %v3368_v15 = vmul.f32 %v12095_v23, %v9569_v50  ;;  %v3369_v55 = vmul.f32 %v12096_v19, %v9569_v50  ;;  %v9612_v35 = vmul.f32 %v12097_v44, %v9569_v50  ;;  %v12098_v0 = vld [vmem:[#allocation27_spill] sm:$0xff]  ;;  %v12099_v41 = vld [vmem:[#allocation102_spill] sm:$0xff] }
 0x268   : > { %12075 = vst [vmem:[#allocation14_spill] sm:$0xff] %v9575_v61  ;;  %12077 = vst [vmem:[#allocation21_spill] sm:$0xff] %v9578_v11  ;;  %v9616_v12 = vmul.f32 %v12098_v0, %v9569_v50  ;;  %v9620_v27 = vmul.f32 %v12099_v41, %v9569_v50  ;;  %v9624_v48 = vmul.f32 %v12100_v38, %v9569_v50  ;;  %v12104_v42 = vld [vmem:[#allocation32_spill] sm:$0xff]  ;;  %v12106_v10 = vld [vmem:[#allocation79_spill] sm:$0xff] }
 0x269   : > { %12079 = vst [vmem:[#allocation25_spill] sm:$0xff] %v9581_v60  ;;  %12081 = vst [vmem:[#allocation26_spill] sm:$0xff] %v9584_v26  ;;  %v9628_v1 = vmul.f32 %v12101_v37, %v9569_v50  ;;  %v9632_v39 = vmul.f32 %v12102_v24, %v9569_v50  ;;  %v9636_v9 = vmul.f32 %v12103_v45, %v9569_v50  ;;  %v12105_v49 = vld [vmem:[#allocation104_spill] sm:$0xff]  ;;  %v12107_v13 = vld [vmem:[#allocation105_spill] sm:$0xff]  ;;  %v3464_v51 = vrot.slane %v3368_v15, 1 }
 0x26a   : > { %12083 = vst [vmem:[#allocation31_spill] sm:$0xff] %v9587_v62  ;;  %12085 = vst [vmem:[#allocation51_spill] sm:$0xff] %v9590_v3  ;;  %v9640_v25 = vmul.f32 %v12104_v42, %v9569_v50  ;;  %v9644_v43 = vmul.f32 %v12105_v49, %v9569_v50  ;;  %v9648_v7 = vmul.f32 %v12106_v10, %v9569_v50  ;;  %v12108_v37 = vld [vmem:[#allocation80_spill] sm:$0xff]  ;;  %v12109_v38 = vld [vmem:[#allocation106_spill] sm:$0xff] }
 0x26b   : > { %12087 = vst [vmem:[#allocation52_spill] sm:$0xff] %v9593_v56  ;;  %12089 = vst [vmem:[#allocation23_spill] sm:$0xff] %v9596_v18  ;;  %v9652_v24 = vmul.f32 %v12107_v13, %v9569_v50  ;;  %v9656_v45 = vmul.f32 %v12108_v37, %v9569_v50  ;;  %v9660_v42 = vmul.f32 %v12109_v38, %v9569_v50  ;;  %v12110_v41 = vld [vmem:[#allocation86_spill] sm:$0xff]  ;;  %v12111_v0 = vld [vmem:[#allocation87_spill] sm:$0xff]  ;;  %v3474_v40 = vrot.slane %v9628_v1, 1 }
 0x26c   : > { %12091 = vst [vmem:[#allocation56_spill] sm:$0xff] %v9599_v21  ;;  %12093 = vst [vmem:[#allocation67_spill] sm:$0xff] %v9602_v20  ;;  %v9664_v49 = vmul.f32 %v12110_v41, %v9569_v50  ;;  %v9668_v10 = vmul.f32 %v12111_v0, %v9569_v50  ;;  %v12112_v44 = vld [vmem:[#allocation107_spill] sm:$0xff]  ;;  %v12114_v23 = vld [vmem:[#allocation5_spill] sm:$0xff]  ;;  %v9771_v4 = vmul.f32 %v9569_v50, %v12135_v47  ;;  %v3476_v32 = vrot.slane %v9632_v39, 1 }
 0x26d   : > { %v9672_v13 = vmul.f32 %v12112_v44, %v9569_v50  ;;  %v12113_v19 = vld [vmem:[#allocation19_spill] sm:$0xff]  ;;  %v9680_v38 = vmul.f32 %v12114_v23, %v9569_v50  ;;  %v12115_v22 = vld [vmem:[#allocation6_spill] sm:$0xff]  ;;  %v12116_v20 = vld [vmem:[#allocation76_spill] sm:$0xff] }
 0x26e   : > { %v9676_v37 = vmul.f32 %v12113_v19, %v9569_v50  ;;  %v9684_v41 = vmul.f32 %v12115_v22, %v9569_v50  ;;  %v9688_v0 = vmul.f32 %v12116_v20, %v9569_v50  ;;  %v12117_v44 = vld [vmem:[#allocation77_spill] sm:$0xff]  ;;  %v12119_v23 = vld [vmem:[#allocation82_spill] sm:$0xff]  ;;  %v12120_v22 = vld [vmem:[#allocation83_spill] sm:$0xff]  ;;  %v3489_v1 = vrot.slane %v9664_v49, 1 }
 0x26f   : > { %v9692_v21 = vmul.f32 %v12117_v44, %v9569_v50  ;;  %v12118_v19 = vld [vmem:[#allocation81_spill] sm:$0xff]  ;;  %v9700_v56 = vmul.f32 %v12119_v23, %v9569_v50  ;;  %v9704_v3 = vmul.f32 %v12120_v22, %v9569_v50  ;;  %v12121_v62 = vld [vmem:[#allocation84_spill] sm:$0xff]  ;;  %v12124_v11 = vld [vmem:[#allocation90_spill] sm:$0xff] }
 0x270   : > { %v9696_v18 = vmul.f32 %v12118_v19, %v9569_v50  ;;  %v9708_v20 = vmul.f32 %v12121_v62, %v9569_v50  ;;  %v12122_v26 = vld [vmem:[#allocation88_spill] sm:$0xff]  ;;  %v12123_v60 = vld [vmem:[#allocation89_spill] sm:$0xff]  ;;  %v9720_v23 = vmul.f32 %v12124_v11, %v9569_v50  ;;  %v12125_v61 = vld [vmem:[#allocation91_spill] sm:$0xff]  ;;  %v3494_v39 = vrot.slane %v9676_v37, 1 }
 0x271   : > { %v9712_v44 = vmul.f32 %v12122_v26, %v9569_v50  ;;  %v9716_v19 = vmul.f32 %v12123_v60, %v9569_v50  ;;  %v9724_v22 = vmul.f32 %v12125_v61, %v9569_v50  ;;  %v12126_v2 = vld [vmem:[#allocation93_spill] sm:$0xff]  ;;  %v12127_v17 = vld [vmem:[#allocation94_spill] sm:$0xff]  ;;  %v12128_v5 = vld [vmem:[#allocation95_spill] sm:$0xff]  ;;  %v9744_v61 = vmul.f32 %v12051_v34, %v9569_v50 }
 0x272   : > { %v9728_v62 = vmul.f32 %v12126_v2, %v9569_v50  ;;  %v9732_v26 = vmul.f32 %v12127_v17, %v9569_v50  ;;  %v9736_v60 = vmul.f32 %v12128_v5, %v9569_v50  ;;  %v12129_v57 = vld [vmem:[#allocation78_spill] sm:$0xff]  ;;  %v9747_v52 = vld [vmem:[%s7415_s19 + $0x1a8] sm:$0x3]  ;;  %v3463_v5 = vrot.slane %v3367_v8, 1  ;;  %v12134_v28 = vld [vmem:[#allocation13_spill] sm:$0xff] }
 0x273   : > { %v9740_v11 = vmul.f32 %v12129_v57, %v9569_v50  ;;  %12130 = vst [vmem:[#allocation24_spill] sm:$0xff] %v9747_v52  ;;  %v12131_v2 = vld [vmem:[#allocation75_spill] sm:$0xff]  ;;  %v9759_v57 = vmul.f32 %v12133_v16, %v9569_v50  ;;  %v9763_v34 = vmul.f32 %v12054_v6, %v9569_v50  ;;  %v9767_v46 = vmul.f32 %v12134_v28, %v9569_v50  ;;  %v12137_v15 = vld [vmem:[#allocation22_spill] sm:$0xff] }
 0x274   : > { %v9751_v54 = vmul.f32 %v12131_v2, %v9569_v50  ;;  %v12132_v17 = vld [vmem:[#allocation47_spill] sm:$0xff]  ;;  %v3466_v2 = vrot.slane %v3369_v55, 1  ;;  %v9779_v16 = vmul.f32 %v9569_v50, %v12137_v15  ;;  %v9783_v6 = vmul.f32 %v9569_v50, %v9483_v29 }
 0x275   : > { %v9755_v53 = vmul.f32 %v12132_v17, %v9569_v50  ;;  %v12136_v17 = vld [vmem:[#allocation48_spill] sm:$0xff]  ;;  %v9787_v28 = vmul.f32 %v9569_v50, %v9486_v30  ;;  %v9791_v47 = vmul.f32 %v9569_v50, %v9747_v52  ;;  %v3468_v55 = vrot.slane %v9612_v35, 1 }
 0x276   : > { %v9775_v8 = vmul.f32 %v9569_v50, %v12136_v17  ;;  %v3469_v17 = vrot.slane %v9616_v12, 1  ;;  %v9796_v33 = vsel %vm573_vm0, %v3463_v5, %v3464_v51  ;;  %v3471_v15 = vrot.slane %v9620_v27, 1 }
 0x277   : > { %v3473_v29 = vrot.slane %v9624_v48, 1  ;;  %v9802_v30 = vsel %vm573_vm0, %v3464_v51, %v3466_v2  ;;  %v3478_v50 = vrot.slane %v9636_v9, 1  ;;  %v3479_v35 = vrot.slane %v9640_v25, 1 }
 0x278   : > { %v3481_v12 = vrot.slane %v9644_v43, 1  ;;  %v3483_v5 = vrot.slane %v9648_v7, 1  ;;  %v3484_v52 = vrot.slane %v9652_v24, 1  ;;  %v3486_v27 = vrot.slane %v9656_v45, 1 }
 0x279   : > { %v3488_v48 = vrot.slane %v9660_v42, 1  ;;  %v3491_v51 = vrot.slane %v9668_v10, 1  ;;  %v3493_v2 = vrot.slane %v9672_v13, 1  ;;  %v3496_v9 = vrot.slane %v9680_v38, 1 }
 0x27a   : > { %v3498_v25 = vrot.slane %v9684_v41, 1  ;;  %v3499_v43 = vrot.slane %v9688_v0, 1  ;;  %v3470_v24 = vsel %vm573_vm0, %v3468_v55, %v3469_v17  ;;  %v3501_v45 = vrot.slane %v9692_v21, 1 }
 0x27b   : > { %v3503_v42 = vrot.slane %v9696_v18, 1  ;;  %v3504_v49 = vrot.slane %v9700_v56, 1  ;;  %v3472_v10 = vsel %vm573_vm0, %v3469_v17, %v3471_v15  ;;  %v3475_v7 = vsel %vm573_vm0, %v3473_v29, %v3474_v40 }
 0x27c   : > { %v3477_v37 = vsel %vm573_vm0, %v3474_v40, %v3476_v32  ;;  %v3480_v38 = vsel %vm573_vm0, %v3478_v50, %v3479_v35  ;;  %v3482_v41 = vsel %vm573_vm0, %v3479_v35, %v3481_v12  ;;  %v3485_v0 = vsel %vm573_vm0, %v3483_v5, %v3484_v52 }
 0x27d   : > { %v3487_v13 = vsel %vm573_vm0, %v3484_v52, %v3486_v27  ;;  %v3490_v21 = vsel %vm573_vm0, %v3488_v48, %v3489_v1  ;;  %v3492_v18 = vsel %vm573_vm0, %v3489_v1, %v3491_v51  ;;  %v3495_v56 = vsel %vm573_vm0, %v3493_v2, %v3494_v39 }
 0x27e   : > { %v3497_v55 = vsel %vm573_vm0, %v3494_v39, %v3496_v9  ;;  %v3500_v29 = vsel %vm573_vm0, %v3498_v25, %v3499_v43  ;;  %v3502_v32 = vsel %vm573_vm0, %v3499_v43, %v3501_v45  ;;  %v3505_v40 = vsel %vm573_vm0, %v3503_v42, %v3504_v49 }
 0x27f   : > { %v3506_v17 = vrot.slane %v9704_v3, 1  ;;  %v3508_v15 = vrot.slane %v9708_v20, 1  ;;  %v3509_v52 = vrot.slane %v9712_v44, 1  ;;  %v3511_v50 = vrot.slane %v9716_v19, 1 }
 0x280   : > { %v3513_v35 = vrot.slane %v9720_v23, 1  ;;  %v3514_v12 = vrot.slane %v9724_v22, 1  ;;  %v3516_v5 = vrot.slane %v9728_v62, 1  ;;  %v3518_v27 = vrot.slane %v9732_v26, 1 }
 0x281   : > { %v3519_v48 = vrot.slane %v9736_v60, 1  ;;  %v3521_v1 = vrot.slane %v9740_v11, 1  ;;  %v3523_v3 = vrot.slane %v9744_v61, 1  ;;  %v3524_v20 = vrot.slane %v9751_v54, 1 }
 0x282   : > { %v3526_v44 = vrot.slane %v9755_v53, 1  ;;  %v3528_v19 = vrot.slane %v9759_v57, 1  ;;  %v3529_v23 = vrot.slane %v9763_v34, 1  ;;  %v3531_v22 = vrot.slane %v9767_v46, 1 }
 0x283   : > { %v3533_v62 = vrot.slane %v9771_v4, 1  ;;  %v3534_v26 = vrot.slane %v9775_v8, 1  ;;  %v3507_v60 = vsel %vm573_vm0, %v3504_v49, %v3506_v17  ;;  %v3536_v11 = vrot.slane %v9779_v16, 1 }
 0x284   : > { %v3538_v61 = vrot.slane %v9783_v6, 1  ;;  %v3539_v54 = vrot.slane %v9787_v28, 1  ;;  %v3510_v53 = vsel %vm573_vm0, %v3508_v15, %v3509_v52  ;;  %v3512_v57 = vsel %vm573_vm0, %v3509_v52, %v3511_v50  ;;  %v12140_v52 = vld [vmem:[#allocation73_spill] sm:$0xff] }
 0x285   : > { %v3515_v34 = vsel %vm573_vm0, %v3513_v35, %v3514_v12  ;;  %v3541_v46 = vrot.slane %v9791_v47, 1  ;;  %v3517_v4 = vsel %vm573_vm0, %v3514_v12, %v3516_v5  ;;  %v3520_v8 = vsel %vm573_vm0, %v3518_v27, %v3519_v48 }
 0x286   : > { %v3522_v51 = vsel %vm573_vm0, %v3519_v48, %v3521_v1  ;;  %v3525_v16 = vsel %vm573_vm0, %v3523_v3, %v3524_v20  ;;  %v3527_v6 = vsel %vm573_vm0, %v3524_v20, %v3526_v44  ;;  %v3530_v28 = vsel %vm573_vm0, %v3528_v19, %v3529_v23  ;;  %v12170_v44 = vld [vmem:[#allocation14_spill] sm:$0xff] }
 0x287   : > { %v3532_v2 = vsel %vm573_vm0, %v3529_v23, %v3531_v22  ;;  %v3535_v39 = vsel %vm573_vm0, %v3533_v62, %v3534_v26  ;;  %v3537_v9 = vsel %vm573_vm0, %v3534_v26, %v3536_v11  ;;  %v3540_v47 = vsel %vm573_vm0, %v3538_v61, %v3539_v54  ;;  %v12172_v23 = vld [vmem:[#allocation21_spill] sm:$0xff]  ;;  %v12178_v61 = vld [vmem:[#allocation31_spill] sm:$0xff] }
 0x288   : > { %v9875_v25 = vadd.f32 %v9796_v33, %v9504_v36  ;;  %v9879_v43 = vadd.f32 %v9802_v30, %v9507_v31  ;;  %v3542_v45 = vsel %vm573_vm0, %v3539_v54, %v3541_v46  ;;  %v9883_v42 = vadd.f32 %v3470_v24, %v9510_v63  ;;  %v12138_v36 = vld [vmem:[#allocation92_spill] sm:$0xff]  ;;  %v12142_v30 = vld [vmem:[#allocation3_spill] sm:$0xff]  ;;  %v12174_v62 = vld [vmem:[#allocation25_spill] sm:$0xff] }
 0x289   : > { %v9886_v49 = vadd.f32 %v3472_v10, %v9513_v14  ;;  %v9889_v17 = vadd.f32 %v3475_v7, %v9516_v58  ;;  %v9892_v15 = vadd.f32 %v3477_v37, %v9519_v59  ;;  %v9895_v33 = vadd.f32 %v3480_v38, %v12138_v36  ;;  %v12144_v63 = vld [vmem:[#allocation96_spill] sm:$0xff]  ;;  %v12148_v58 = vld [vmem:[#allocation15_spill] sm:$0xff]  ;;  %v12150_v59 = vld [vmem:[#allocation97_spill] sm:$0xff] }
 0x28a   : > { %v9898_v31 = vadd.f32 %v3482_v41, %v12140_v52  ;;  %v9901_v50 = vadd.f32 %v3485_v0, %v12142_v30  ;;  %v9904_v24 = vadd.f32 %v3487_v13, %v12144_v63  ;;  %v12146_v14 = vld [vmem:[#allocation4_spill] sm:$0xff]  ;;  %v9910_v7 = vadd.f32 %v3492_v18, %v12148_v58  ;;  %v12152_v38 = vld [vmem:[#allocation18_spill] sm:$0xff]  ;;  %v12154_v41 = vld [vmem:[#allocation11_spill] sm:$0xff] }
 0x28b   : > { %12139 = vst [vmem:[#allocation35_spill] sm:$0xff] %v9895_v33  ;;  %v9907_v10 = vadd.f32 %v3490_v21, %v12146_v14  ;;  %v9913_v37 = vadd.f32 %v3495_v56, %v12150_v59  ;;  %v9916_v35 = vadd.f32 %v3497_v55, %v12152_v38  ;;  %v9919_v12 = vadd.f32 %v3500_v29, %v12154_v41  ;;  %v12156_v0 = vld [vmem:[#allocation98_spill] sm:$0xff]  ;;  %v12158_v13 = vld [vmem:[#allocation12_spill] sm:$0xff]  ;;  %v12162_v18 = vld [vmem:[#allocation99_spill] sm:$0xff] }
 0x28c   : > { %12141 = vst [vmem:[#allocation48_spill] sm:$0xff] %v9898_v31  ;;  %12143 = vst [vmem:[#allocation22_spill] sm:$0xff] %v9901_v50  ;;  %v9922_v5 = vadd.f32 %v3502_v32, %v12156_v0  ;;  %v9925_v27 = vadd.f32 %v3505_v40, %v12158_v13  ;;  %v12160_v21 = vld [vmem:[#allocation10_spill] sm:$0xff]  ;;  %v9931_v1 = vadd.f32 %v3510_v53, %v12162_v18  ;;  %v12164_v56 = vld [vmem:[#allocation33_spill] sm:$0xff] }
 0x28d   : > { %12145 = vst [vmem:[#allocation92_spill] sm:$0xff] %v9904_v24  ;;  %12147 = vst [vmem:[#allocation73_spill] sm:$0xff] %v9907_v10  ;;  %v9928_v48 = vadd.f32 %v3507_v60, %v12160_v21  ;;  %v9934_v3 = vadd.f32 %v3512_v57, %v12164_v56  ;;  %v12166_v55 = vld [vmem:[#allocation37_spill] sm:$0xff]  ;;  %v9942_v29 = vld [vmem:[%s10458_s3 + $0x8] ss:$0 sm:$0xff]  ;;  %v9948_v19 = vadd.f32 %v3520_v8, %v12170_v44 }
 0x28e   : > { %12149 = vst [vmem:[#allocation3_spill] sm:$0xff] %v9910_v7  ;;  %12151 = vst [vmem:[#allocation96_spill] sm:$0xff] %v9913_v37  ;;  %v9937_v20 = vadd.f32 %v3515_v34, %v12166_v55  ;;  %v12168_v32 = vld [vmem:[#allocation100_spill] sm:$0xff]  ;;  %v9951_v22 = vadd.f32 %v3522_v51, %v12172_v23  ;;  %v9954_v26 = vadd.f32 %v3525_v16, %v12174_v62  ;;  %v12176_v60 = vld [vmem:[#allocation26_spill] sm:$0xff] }
 0x28f   : > { %12153 = vst [vmem:[#allocation4_spill] sm:$0xff] %v9916_v35  ;;  %12155 = vst [vmem:[#allocation15_spill] sm:$0xff] %v9919_v12  ;;  %v9945_v40 = vadd.f32 %v3517_v4, %v12168_v32  ;;  %v9957_v11 = vadd.f32 %v3527_v6, %v12176_v60  ;;  %v9960_v54 = vadd.f32 %v3530_v28, %v12178_v61  ;;  %v12180_v53 = vld [vmem:[#allocation51_spill] sm:$0xff]  ;;  %v12182_v34 = vld [vmem:[#allocation52_spill] sm:$0xff] }
 0x290   : > { %12157 = vst [vmem:[#allocation97_spill] sm:$0xff] %v9922_v5  ;;  %12159 = vst [vmem:[#allocation18_spill] sm:$0xff] %v9925_v27  ;;  %v9963_v57 = vadd.f32 %v3532_v2, %v12180_v53  ;;  %v9966_v46 = vadd.f32 %v3535_v39, %v12182_v34  ;;  %v12184_v4 = vld [vmem:[#allocation23_spill] sm:$0xff]  ;;  %v12186_v51 = vld [vmem:[#allocation56_spill] sm:$0xff] }
 0x291   : > { %12161 = vst [vmem:[#allocation11_spill] sm:$0xff] %v9928_v48  ;;  %12163 = vst [vmem:[#allocation98_spill] sm:$0xff] %v9931_v1  ;;  %v9969_v8 = vadd.f32 %v3537_v9, %v12184_v4  ;;  %v9972_v36 = vadd.f32 %v3540_v47, %v12186_v51  ;;  %v12188_v16 = vld [vmem:[#allocation67_spill] sm:$0xff]  ;;  %v12190_v6 = vld [vmem:[#allocation16_spill] sm:$0xff] }
 0x292   : > { %12165 = vst [vmem:[#allocation12_spill] sm:$0xff] %v9934_v3  ;;  %12167 = vst [vmem:[#allocation10_spill] sm:$0xff] %v9937_v20  ;;  %v9975_v52 = vadd.f32 %v3542_v45, %v12188_v16  ;;  %v3612_v30 = vmul.f32 %v12190_v6, %v9942_v29  ;;  %v12191_v28 = vld [vmem:[#allocation20_spill] sm:$0xff]  ;;  %v12192_v2 = vld [vmem:[#allocation101_spill] sm:$0xff] }
 0x293   : > { %12169 = vst [vmem:[#allocation99_spill] sm:$0xff] %v9945_v40  ;;  %12171 = vst [vmem:[#allocation33_spill] sm:$0xff] %v9948_v19  ;;  %v3613_v63 = vmul.f32 %v12191_v28, %v9942_v29  ;;  %v3614_v14 = vmul.f32 %v12192_v2, %v9942_v29  ;;  %v12193_v39 = vld [vmem:[#allocation17_spill] sm:$0xff]  ;;  %v12194_v9 = vld [vmem:[#allocation27_spill] sm:$0xff] }
 0x294   : > { %12173 = vst [vmem:[#allocation37_spill] sm:$0xff] %v9951_v22  ;;  %12175 = vst [vmem:[#allocation100_spill] sm:$0xff] %v9954_v26  ;;  %v9985_v58 = vmul.f32 %v12193_v39, %v9942_v29  ;;  %v9989_v47 = vmul.f32 %v12194_v9, %v9942_v29  ;;  %v12195_v45 = vld [vmem:[#allocation102_spill] sm:$0xff]  ;;  %v12197_v0 = vld [vmem:[#allocation39_spill] sm:$0xff]  ;;  %v3708_v1 = vrot.slane %v3612_v30, 2 }
 0x295   : > { %12177 = vst [vmem:[#allocation14_spill] sm:$0xff] %v9957_v11  ;;  %12179 = vst [vmem:[#allocation21_spill] sm:$0xff] %v9960_v54  ;;  %v9993_v59 = vmul.f32 %v12195_v45, %v9942_v29  ;;  %v12196_v38 = vld [vmem:[#allocation30_spill] sm:$0xff]  ;;  %v10001_v13 = vmul.f32 %v12197_v0, %v9942_v29  ;;  %v12198_v21 = vld [vmem:[#allocation103_spill] sm:$0xff]  ;;  %v3709_v48 = vrot.slane %v3613_v63, 2 }
 0x296   : > { %12181 = vst [vmem:[#allocation25_spill] sm:$0xff] %v9963_v57  ;;  %12183 = vst [vmem:[#allocation26_spill] sm:$0xff] %v9966_v46  ;;  %v9997_v41 = vmul.f32 %v12196_v38, %v9942_v29  ;;  %v10005_v18 = vmul.f32 %v12198_v21, %v9942_v29  ;;  %v12199_v56 = vld [vmem:[#allocation29_spill] sm:$0xff]  ;;  %v12200_v32 = vld [vmem:[#allocation32_spill] sm:$0xff]  ;;  %v3713_v24 = vrot.slane %v9985_v58, 2 }
 0x297   : > { %12185 = vst [vmem:[#allocation31_spill] sm:$0xff] %v9969_v8  ;;  %12187 = vst [vmem:[#allocation51_spill] sm:$0xff] %v9972_v36  ;;  %v10009_v55 = vmul.f32 %v12199_v56, %v9942_v29  ;;  %v10013_v44 = vmul.f32 %v12200_v32, %v9942_v29  ;;  %v12201_v23 = vld [vmem:[#allocation104_spill] sm:$0xff]  ;;  %v12202_v60 = vld [vmem:[#allocation79_spill] sm:$0xff]  ;;  %v10166_v50 = vsel %vm819_vm1, %v3708_v1, %v3709_v48  ;;  %v3719_v31 = vrot.slane %v10001_v13, 2 }
 0x298   : > { %12189 = vst [vmem:[#allocation52_spill] sm:$0xff] %v9975_v52  ;;  %v10017_v62 = vmul.f32 %v12201_v23, %v9942_v29  ;;  %v10021_v61 = vmul.f32 %v12202_v60, %v9942_v29  ;;  %v12203_v53 = vld [vmem:[#allocation105_spill] sm:$0xff]  ;;  %v12204_v4 = vld [vmem:[#allocation80_spill] sm:$0xff]  ;;  %v12205_v16 = vld [vmem:[#allocation106_spill] sm:$0xff]  ;;  %v3721_v33 = vrot.slane %v10005_v18, 2 }
 0x299   : > { %v10025_v34 = vmul.f32 %v12203_v53, %v9942_v29  ;;  %v10029_v51 = vmul.f32 %v12204_v4, %v9942_v29  ;;  %v10033_v6 = vmul.f32 %v12205_v16, %v9942_v29  ;;  %v12206_v28 = vld [vmem:[#allocation86_spill] sm:$0xff]  ;;  %v12207_v39 = vld [vmem:[#allocation87_spill] sm:$0xff]  ;;  %v12210_v56 = vld [vmem:[#allocation5_spill] sm:$0xff]  ;;  %v3724_v58 = vrot.slane %v10013_v44, 2 }
 0x29a   : > { %v10037_v2 = vmul.f32 %v12206_v28, %v9942_v29  ;;  %v10041_v9 = vmul.f32 %v12207_v39, %v9942_v29  ;;  %v12208_v45 = vld [vmem:[#allocation107_spill] sm:$0xff]  ;;  %v10053_v32 = vmul.f32 %v12210_v56, %v9942_v29  ;;  %v12211_v23 = vld [vmem:[#allocation6_spill] sm:$0xff]  ;;  %v12212_v53 = vld [vmem:[#allocation76_spill] sm:$0xff]  ;;  %v3728_v1 = vrot.slane %v10021_v61, 2 }
 0x29b   : > { %v10045_v38 = vmul.f32 %v12208_v45, %v9942_v29  ;;  %v12209_v0 = vld [vmem:[#allocation19_spill] sm:$0xff]  ;;  %v10057_v60 = vmul.f32 %v12211_v23, %v9942_v29  ;;  %v10061_v4 = vmul.f32 %v12212_v53, %v9942_v29  ;;  %v12213_v16 = vld [vmem:[#allocation77_spill] sm:$0xff]  ;;  %v12217_v36 = vld [vmem:[#allocation84_spill] sm:$0xff] }
 0x29c   : > { %v10049_v21 = vmul.f32 %v12209_v0, %v9942_v29  ;;  %v10065_v28 = vmul.f32 %v12213_v16, %v9942_v29  ;;  %v12214_v39 = vld [vmem:[#allocation81_spill] sm:$0xff]  ;;  %v12215_v0 = vld [vmem:[#allocation82_spill] sm:$0xff]  ;;  %v12216_v52 = vld [vmem:[#allocation83_spill] sm:$0xff]  ;;  %v10081_v53 = vmul.f32 %v12217_v36, %v9942_v29  ;;  %v3734_v13 = vrot.slane %v10037_v2, 2 }
 0x29d   : > { %v10069_v45 = vmul.f32 %v12214_v39, %v9942_v29  ;;  %v10073_v56 = vmul.f32 %v12215_v0, %v9942_v29  ;;  %v10077_v23 = vmul.f32 %v12216_v52, %v9942_v29  ;;  %v12218_v8 = vld [vmem:[#allocation88_spill] sm:$0xff]  ;;  %v12219_v46 = vld [vmem:[#allocation89_spill] sm:$0xff]  ;;  %v12220_v57 = vld [vmem:[#allocation90_spill] sm:$0xff]  ;;  %v3738_v18 = vrot.slane %v10045_v38, 2 }
 0x29e   : > { %v10085_v16 = vmul.f32 %v12218_v8, %v9942_v29  ;;  %v10089_v39 = vmul.f32 %v12219_v46, %v9942_v29  ;;  %v10093_v0 = vmul.f32 %v12220_v57, %v9942_v29  ;;  %v12221_v52 = vld [vmem:[#allocation91_spill] sm:$0xff]  ;;  %v12222_v36 = vld [vmem:[#allocation93_spill] sm:$0xff]  ;;  %v12223_v8 = vld [vmem:[#allocation94_spill] sm:$0xff]  ;;  %v3741_v44 = vrot.slane %v10053_v32, 2 }
 0x29f   : > { %v10097_v54 = vmul.f32 %v12221_v52, %v9942_v29  ;;  %v10101_v11 = vmul.f32 %v12222_v36, %v9942_v29  ;;  %v10105_v26 = vmul.f32 %v12223_v8, %v9942_v29  ;;  %v12224_v46 = vld [vmem:[#allocation95_spill] sm:$0xff]  ;;  %v12225_v57 = vld [vmem:[#allocation78_spill] sm:$0xff]  ;;  %v12226_v52 = vld [vmem:[#allocation85_spill] sm:$0xff]  ;;  %v3744_v61 = vrot.slane %v10061_v4, 2 }
 0x2a0   : > { %v10109_v22 = vmul.f32 %v12224_v46, %v9942_v29  ;;  %v10113_v19 = vmul.f32 %v12225_v57, %v9942_v29  ;;  %v10117_v40 = vmul.f32 %v12226_v52, %v9942_v29  ;;  %v12227_v36 = vld [vmem:[#allocation75_spill] sm:$0xff]  ;;  %v12229_v46 = vld [vmem:[#allocation34_spill] sm:$0xff]  ;;  %v12230_v57 = vld [vmem:[#allocation28_spill] sm:$0xff]  ;;  %v3749_v2 = vrot.slane %v10073_v56, 2 }
 0x2a1   : > { %v10121_v20 = vmul.f32 %v12227_v36, %v9942_v29  ;;  %v12228_v8 = vld [vmem:[#allocation47_spill] sm:$0xff]  ;;  %v10129_v27 = vmul.f32 %v12229_v46, %v9942_v29  ;;  %v10133_v5 = vmul.f32 %v12230_v57, %v9942_v29  ;;  %v12231_v52 = vld [vmem:[#allocation13_spill] sm:$0xff]  ;;  %v3711_v36 = vrot.slane %v3614_v14, 2  ;;  %v4459_v35 = vld [vmem:[%s7415_s19 + $0x180] sm:$0xff] }
 0x2a2   : > { %v10125_v3 = vmul.f32 %v12228_v8, %v9942_v29  ;;  %v10137_v12 = vmul.f32 %v12231_v52, %v9942_v29  ;;  %v10141_v37 = vmul.f32 %v4459_v35, %v9942_v29  ;;  %v4460_v8 = vld [vmem:[%s7415_s19 + $0x188] sm:$0xff]  ;;  %v4461_v63 = vld [vmem:[%s7415_s19 + $0x190] sm:$0x3]  ;;  %v12232_v7 = vld [vmem:[#allocation70_spill] sm:$0xff] }
 0x2a3   : > { %v10145_v30 = vmul.f32 %v4460_v8, %v9942_v29  ;;  %v10149_v46 = vmul.f32 %v4461_v63, %v9942_v29  ;;  %v10153_v57 = vmul.f32 %v9942_v29, %v12232_v7  ;;  %v12233_v10 = vld [vmem:[#allocation71_spill] sm:$0xff]  ;;  %v12234_v14 = vld [vmem:[#allocation24_spill] sm:$0xff]  ;;  %v3714_v8 = vrot.slane %v9989_v47, 2 }
 0x2a4   : > { %v10157_v52 = vmul.f32 %v9942_v29, %v12233_v10  ;;  %v10161_v35 = vmul.f32 %v9942_v29, %v12234_v14  ;;  %v3716_v63 = vrot.slane %v9993_v59, 2  ;;  %v3718_v7 = vrot.slane %v9997_v41, 2 }
 0x2a5   : > { %v10172_v10 = vsel %vm819_vm1, %v3709_v48, %v3711_v36  ;;  %v3723_v29 = vrot.slane %v10009_v55, 2  ;;  %v3726_v47 = vrot.slane %v10017_v62, 2  ;;  %v3729_v14 = vrot.slane %v10025_v34, 2 }
 0x2a6   : > { %v3731_v59 = vrot.slane %v10029_v51, 2  ;;  %v3733_v41 = vrot.slane %v10033_v6, 2  ;;  %v3736_v48 = vrot.slane %v10041_v9, 2  ;;  %v3739_v55 = vrot.slane %v10049_v21, 2 }
 0x2a7   : > { %v3743_v62 = vrot.slane %v10057_v60, 2  ;;  %v3715_v34 = vsel %vm819_vm1, %v3713_v24, %v3714_v8  ;;  %v3746_v51 = vrot.slane %v10065_v28, 2  ;;  %v3748_v6 = vrot.slane %v10069_v45, 2 }
 0x2a8   : > { %v3717_v9 = vsel %vm819_vm1, %v3714_v8, %v3716_v63  ;;  %v3720_v38 = vsel %vm819_vm1, %v3718_v7, %v3719_v31  ;;  %v3722_v21 = vsel %vm819_vm1, %v3719_v31, %v3721_v33  ;;  %v3725_v32 = vsel %vm819_vm1, %v3723_v29, %v3724_v58 }
 0x2a9   : > { %v3727_v60 = vsel %vm819_vm1, %v3724_v58, %v3726_v47  ;;  %v3730_v4 = vsel %vm819_vm1, %v3728_v1, %v3729_v14  ;;  %v3732_v24 = vsel %vm819_vm1, %v3729_v14, %v3731_v59  ;;  %v3735_v28 = vsel %vm819_vm1, %v3733_v41, %v3734_v13 }
 0x2aa   : > { %v3737_v45 = vsel %vm819_vm1, %v3734_v13, %v3736_v48  ;;  %v3740_v56 = vsel %vm819_vm1, %v3738_v18, %v3739_v55  ;;  %v3742_v36 = vsel %vm819_vm1, %v3739_v55, %v3741_v44  ;;  %v3745_v8 = vsel %vm819_vm1, %v3743_v62, %v3744_v61 }
 0x2ab   : > { %v3747_v33 = vsel %vm819_vm1, %v3744_v61, %v3746_v51  ;;  %v3750_v31 = vsel %vm819_vm1, %v3748_v6, %v3749_v2  ;;  %v3751_v63 = vrot.slane %v10077_v23, 2  ;;  %v3753_v7 = vrot.slane %v10081_v53, 2 }
 0x2ac   : > { %v3754_v29 = vrot.slane %v10085_v16, 2  ;;  %v3756_v58 = vrot.slane %v10089_v39, 2  ;;  %v3758_v47 = vrot.slane %v10093_v0, 2  ;;  %v3759_v1 = vrot.slane %v10097_v54, 2 }
 0x2ad   : > { %v3761_v14 = vrot.slane %v10101_v11, 2  ;;  %v3763_v59 = vrot.slane %v10105_v26, 2  ;;  %v3764_v41 = vrot.slane %v10109_v22, 2  ;;  %v3766_v13 = vrot.slane %v10113_v19, 2 }
 0x2ae   : > { %v3768_v23 = vrot.slane %v10117_v40, 2  ;;  %v3769_v53 = vrot.slane %v10121_v20, 2  ;;  %v3771_v16 = vrot.slane %v10125_v3, 2  ;;  %v3773_v39 = vrot.slane %v10129_v27, 2 }
 0x2af   : > { %v3774_v0 = vrot.slane %v10133_v5, 2  ;;  %v3776_v54 = vrot.slane %v10137_v12, 2  ;;  %v3778_v11 = vrot.slane %v10141_v37, 2  ;;  %v3779_v26 = vrot.slane %v10145_v30, 2 }
 0x2b0   : > { %v3752_v22 = vsel %vm819_vm1, %v3749_v2, %v3751_v63  ;;  %v3781_v19 = vrot.slane %v10149_v46, 2  ;;  %v3783_v40 = vrot.slane %v10153_v57, 2  ;;  %v3784_v20 = vrot.slane %v10157_v52, 2 }
 0x2b1   : > { %v3755_v3 = vsel %vm819_vm1, %v3753_v7, %v3754_v29  ;;  %v3757_v27 = vsel %vm819_vm1, %v3754_v29, %v3756_v58  ;;  %v3760_v5 = vsel %vm819_vm1, %v3758_v47, %v3759_v1  ;;  %v3786_v12 = vrot.slane %v10161_v35, 2  ;;  %v12235_v29 = vld [vmem:[#allocation35_spill] sm:$0xff]  ;;  %v12236_v47 = vld [vmem:[#allocation48_spill] sm:$0xff] }
 0x2b2   : > { %v3762_v37 = vsel %vm819_vm1, %v3759_v1, %v3761_v14  ;;  %v3765_v30 = vsel %vm819_vm1, %v3763_v59, %v3764_v41  ;;  %v3767_v48 = vsel %vm819_vm1, %v3764_v41, %v3766_v13  ;;  %v3770_v46 = vsel %vm819_vm1, %v3768_v23, %v3769_v53  ;;  %v12237_v14 = vld [vmem:[#allocation22_spill] sm:$0xff]  ;;  %v12239_v41 = vld [vmem:[#allocation73_spill] sm:$0xff]  ;;  %v12241_v23 = vld [vmem:[#allocation96_spill] sm:$0xff] }
 0x2b3   : > { %v3772_v57 = vsel %vm819_vm1, %v3769_v53, %v3771_v16  ;;  %v3775_v52 = vsel %vm819_vm1, %v3773_v39, %v3774_v0  ;;  %v3777_v18 = vsel %vm819_vm1, %v3774_v0, %v3776_v54  ;;  %v3780_v55 = vsel %vm819_vm1, %v3778_v11, %v3779_v26  ;;  %v12246_v53 = vld [vmem:[#allocation11_spill] sm:$0xff]  ;;  %v12247_v16 = vld [vmem:[#allocation98_spill] sm:$0xff]  ;;  %v12248_v39 = vld [vmem:[#allocation12_spill] sm:$0xff] }
 0x2b4   : > { %v3782_v44 = vsel %vm819_vm1, %v3779_v26, %v3781_v19  ;;  %v3785_v35 = vsel %vm819_vm1, %v3783_v40, %v3784_v20  ;;  %v3820_v62 = vadd.f32 %v10166_v50, %v9875_v25  ;;  %v3821_v61 = vadd.f32 %v10172_v10, %v9879_v43  ;;  %v12238_v25 = vld [vmem:[#allocation92_spill] sm:$0xff]  ;;  %v12240_v10 = vld [vmem:[#allocation3_spill] sm:$0xff]  ;;  %v12249_v0 = vld [vmem:[#allocation10_spill] sm:$0xff] }
 0x2b5   : > { %v3787_v51 = vsel %vm819_vm1, %v3784_v20, %v3786_v12  ;;  %v3822_v6 = vadd.f32 %v3715_v34, %v9883_v42  ;;  %v3823_v2 = vadd.f32 %v3717_v9, %v9886_v49  ;;  %v3824_v63 = vadd.f32 %v3720_v38, %v9889_v17  ;;  %v12242_v34 = vld [vmem:[#allocation4_spill] sm:$0xff]  ;;  %v12243_v9 = vld [vmem:[#allocation15_spill] sm:$0xff]  ;;  %v12244_v38 = vld [vmem:[#allocation97_spill] sm:$0xff] }
 0x2b6   : > { %v3825_v7 = vadd.f32 %v3722_v21, %v9892_v15  ;;  %v3826_v58 = vadd.f32 %v3725_v32, %v12235_v29  ;;  %v3827_v1 = vadd.f32 %v3727_v60, %v12236_v47  ;;  %v3828_v59 = vadd.f32 %v3730_v4, %v12237_v14  ;;  %v12245_v21 = vld [vmem:[#allocation18_spill] sm:$0xff]  ;;  %v12255_v40 = vld [vmem:[#allocation21_spill] sm:$0xff]  ;;  %v12258_v29 = vld [vmem:[#allocation31_spill] sm:$0xff] }
 0x2b7   : > { %v3829_v50 = vadd.f32 %v3732_v24, %v12238_v25  ;;  %v3830_v43 = vadd.f32 %v3735_v28, %v12239_v41  ;;  %v3831_v13 = vadd.f32 %v3737_v45, %v12240_v10  ;;  %v3832_v42 = vadd.f32 %v3740_v56, %v12241_v23  ;;  %v10270_v45 = vld [vmem:[%s10460_s5] ss:$0 sm:$0xff]  ;;  %v12250_v56 = vld [vmem:[#allocation99_spill] sm:$0xff] }
 0x2b8   : > { %v3833_v49 = vadd.f32 %v3742_v36, %v12242_v34  ;;  %v3834_v17 = vadd.f32 %v3745_v8, %v12243_v9  ;;  %v3835_v15 = vadd.f32 %v3747_v33, %v12244_v38  ;;  %v3836_v32 = vadd.f32 %v3750_v31, %v12245_v21  ;;  %v12251_v8 = vld [vmem:[#allocation33_spill] sm:$0xff]  ;;  %v12253_v31 = vld [vmem:[#allocation100_spill] sm:$0xff]  ;;  %v12259_v14 = vld [vmem:[#allocation51_spill] sm:$0xff] }
 0x2b9   : > { %v3837_v60 = vadd.f32 %v3752_v22, %v12246_v53  ;;  %v3838_v4 = vadd.f32 %v3755_v3, %v12247_v16  ;;  %v3839_v24 = vadd.f32 %v3757_v27, %v12248_v39  ;;  %v3840_v28 = vadd.f32 %v3760_v5, %v12249_v0  ;;  %v12252_v33 = vld [vmem:[#allocation37_spill] sm:$0xff]  ;;  %v12254_v22 = vld [vmem:[#allocation14_spill] sm:$0xff]  ;;  %v12261_v38 = vld [vmem:[#allocation7_spill] sm:$0xff] }
 0x2ba   : > { %v3841_v36 = vadd.f32 %v3762_v37, %v12250_v56  ;;  %v3842_v54 = vadd.f32 %v3765_v30, %v12251_v8  ;;  %v3843_v11 = vadd.f32 %v3767_v48, %v12252_v33  ;;  %v3844_v26 = vadd.f32 %v3770_v46, %v12253_v31  ;;  %v12256_v3 = vld [vmem:[#allocation25_spill] sm:$0xff]  ;;  %v12257_v5 = vld [vmem:[#allocation26_spill] sm:$0xff]  ;;  %v12260_v37 = vld [vmem:[#allocation52_spill] sm:$0xff] }
 0x2bb   : > { %v3845_v19 = vadd.f32 %v3772_v57, %v12254_v22  ;;  %v3846_v20 = vadd.f32 %v3775_v52, %v12255_v40  ;;  %v3847_v27 = vadd.f32 %v3777_v18, %v12256_v3  ;;  %v3848_v12 = vadd.f32 %v3780_v55, %v12257_v5  ;;  %v12262_v21 = vld [vmem:[#allocation8_spill] sm:$0xff]  ;;  %v12263_v53 = vld [vmem:[#allocation9_spill] sm:$0xff]  ;;  %v12272_v3 = vld [vmem:[#allocation63_spill] sm:$0xff] }
 0x2bc   : > { %v3849_v47 = vadd.f32 %v3782_v44, %v12258_v29  ;;  %v10282_v25 = vadd.f32 %v3785_v35, %v12259_v14  ;;  %v10285_v41 = vadd.f32 %v3787_v51, %v12260_v37  ;;  %v3859_v30 = vadd.f32 %v10270_v45, %v3820_v62  ;;  %v12264_v16 = vld [vmem:[#allocation36_spill] sm:$0xff]  ;;  %v4174_v5 = vld [vmem:[%s10462_s7] sm:$0xff] }
 0x2bd   : > { %v3860_v48 = vadd.f32 %v10270_v45, %v3821_v61  ;;  %v3861_v46 = vadd.f32 %v10270_v45, %v3822_v6  ;;  %v3862_v57 = vadd.f32 %v10270_v45, %v3823_v2  ;;  %v3863_v52 = vadd.f32 %v10270_v45, %v3824_v63 }
 0x2be   : > { %v3864_v18 = vadd.f32 %v10270_v45, %v3825_v7  ;;  %v3865_v55 = vadd.f32 %v10270_v45, %v3826_v58  ;;  %v3866_v44 = vadd.f32 %v10270_v45, %v3827_v1  ;;  %v3867_v35 = vadd.f32 %v10270_v45, %v3828_v59 }
 0x2bf   : > { %v3868_v51 = vadd.f32 %v10270_v45, %v3829_v50  ;;  %v3869_v62 = vadd.f32 %v10270_v45, %v3830_v43  ;;  %v3870_v61 = vadd.f32 %v10270_v45, %v3831_v13  ;;  %v3871_v6 = vadd.f32 %v10270_v45, %v3832_v42 }
 0x2c0   : > { %v3872_v2 = vadd.f32 %v10270_v45, %v3833_v49  ;;  %v3873_v63 = vadd.f32 %v10270_v45, %v3834_v17  ;;  %v3874_v7 = vadd.f32 %v10270_v45, %v3835_v15  ;;  %v3875_v58 = vadd.f32 %v10270_v45, %v3836_v32 }
 0x2c1   : > { %v3876_v1 = vadd.f32 %v10270_v45, %v3837_v60  ;;  %v10306_v59 = vadd.f32 %v10270_v45, %v3838_v4  ;;  %v10309_v50 = vadd.f32 %v10270_v45, %v3839_v24  ;;  %v10312_v43 = vadd.f32 %v10270_v45, %v3840_v28  ;;  %v12265_v24 = vld [vmem:[#allocation40_spill] sm:$0xff]  ;;  %v12266_v28 = vld [vmem:[#allocation53_spill] sm:$0xff] }
 0x2c2   : > { %v10315_v10 = vadd.f32 %v10270_v45, %v3841_v36  ;;  %v10318_v13 = vadd.f32 %v10270_v45, %v3842_v54  ;;  %v10321_v23 = vadd.f32 %v10270_v45, %v3843_v11  ;;  %v10324_v42 = vadd.f32 %v10270_v45, %v3844_v26  ;;  %v12267_v36 = vld [vmem:[#allocation41_spill] sm:$0xff]  ;;  %v12268_v54 = vld [vmem:[#allocation44_spill] sm:$0xff]  ;;  %v12269_v11 = vld [vmem:[#allocation58_spill] sm:$0xff] }
 0x2c3   : > { %v10327_v34 = vadd.f32 %v10270_v45, %v3845_v19  ;;  %v10330_v49 = vadd.f32 %v10270_v45, %v3846_v20  ;;  %v10333_v9 = vadd.f32 %v10270_v45, %v3847_v27  ;;  %v10336_v17 = vadd.f32 %v10270_v45, %v3848_v12  ;;  %v12270_v26 = vld [vmem:[#allocation45_spill] sm:$0xff]  ;;  %v4100_v20 = vld [vmem:[%s10461_s6] sm:$0xff] }
 0x2c4   : > { %v3891_v15 = vmul.f32 %v3859_v30, %v12261_v38  ;;  %v3892_v32 = vmul.f32 %v3860_v48, %v12262_v21  ;;  %v3893_v60 = vmul.f32 %v3861_v46, %v12263_v53  ;;  %v3894_v4 = vmul.f32 %v3862_v57, %v12264_v16  ;;  %v12271_v19 = vld [vmem:[#allocation49_spill] sm:$0xff] }
 0x2c5   : > { %v10343_v39 = vadd.f32 %v10270_v45, %v3849_v47  ;;  %v3895_v0 = vmul.f32 %v3863_v52, %v12265_v24  ;;  %v3896_v56 = vmul.f32 %v3864_v18, %v12266_v28  ;;  %v3897_v8 = vmul.f32 %v3865_v55, %v12267_v36  ;;  %v12273_v52 = vld [vmem:[#allocation50_spill] sm:$0xff] }
 0x2c6   : > { %v3898_v33 = vmul.f32 %v3866_v44, %v12268_v54  ;;  %v3899_v31 = vmul.f32 %v3867_v35, %v12269_v11  ;;  %v3900_v22 = vmul.f32 %v3868_v51, %v12270_v26  ;;  %v3901_v40 = vmul.f32 %v3869_v62, %v12271_v19  ;;  %v12274_v51 = vld [vmem:[#allocation54_spill] sm:$0xff] }
 0x2c7   : > { %v3902_v27 = vmul.f32 %v3870_v61, %v12272_v3  ;;  %v3924_v12 = vsel %vm3923_vm2, %v3891_v15, 0.0  ;;  %v3925_v29 = vsel %vm3923_vm2, %v3892_v32, 0.0  ;;  %v3933_v47 = vsel %vm3923_vm2, %v3893_v60, 0.0  ;;  %v12275_v32 = vld [vmem:[#allocation68_spill] sm:$0xff] }
 0x2c8   : > { %v3934_v14 = vsel %vm3923_vm2, %v3894_v4, 0.0  ;;  %v4470_v37 = vmov 0.0   ;;  %v3926_v30 = vadd.f32 %v3925_v29, %v3924_v12  ;;  %v3942_v46 = vsel %vm3923_vm2, %v3895_v0, 0.0  ;;  %v12276_v0 = vld [vmem:[#allocation59_spill] sm:$0xff] }
 0x2c9   : > { %4345 = vmatprep.subr.mxu0 %v4470_v37  ;;  %4347 = vmatprep.mubr.msk.f32.mxu0 %vm4471_vm3, %v4470_v37  ;;  %v3935_v48 = vadd.f32 %v3934_v14, %v3933_v47  ;;  %v3943_v57 = vsel %vm3923_vm2, %v3896_v56, 0.0  ;;  %v3903_v18 = vmul.f32 %v3871_v6, %v12273_v52  ;;  %v3951_v44 = vsel %vm3923_vm2, %v3897_v8, 0.0  ;;  %v12277_v56 = vld [vmem:[#allocation72_spill] sm:$0xff] }
 0x2ca   : > { %4346 = vmatpush3.msra.mxu0 %v4100_v20  ;;  %4350 = vmatprep.subr.mxu1 %v4470_v37  ;;  %v3944_v55 = vadd.f32 %v3943_v57, %v3942_v46  ;;  %v3952_v35 = vsel %vm3923_vm2, %v3898_v33, 0.0  ;;  %v3904_v62 = vmul.f32 %v3872_v2, %v12274_v51  ;;  %v3927_v61 = vrot.slane %v3926_v30, 4  ;;  %v12278_v8 = vld [vmem:[#allocation60_spill] sm:$0xff]  ;;  %v12287_v46 = vld [vmem:[#allocation61_spill] sm:$0xff] }
 0x2cb   : > { %4351 = vmatpush3.msra.mxu1 %v4174_v5  ;;  %4352 = vmatprep.mubr.msk.f32.mxu1 %vm4471_vm3, %v4470_v37  ;;  %v3960_v38 = vsel %vm3923_vm2, %v3899_v31, 0.0  ;;  %v3961_v15 = vsel %vm3923_vm2, %v3900_v22, 0.0  ;;  %v3889_v21 = vadd.f32 %v10270_v45, %v10282_v25  ;;  %v3890_v6 = vadd.f32 %v10270_v45, %v10285_v41  ;;  %v12279_v25 = vld [vmem:[#allocation74_spill] sm:$0xff]  ;;  %v12280_v31 = vld [vmem:[#allocation65_spill] sm:$0xff] }
 0x2cc   : > { %v3905_v53 = vmul.f32 %v3873_v63, %v12275_v32  ;;  %v3936_v60 = vrot.slane %v3935_v48, 4  ;;  %v3945_v16 = vrot.slane %v3944_v55, 4  ;;  %v3953_v4 = vadd.f32 %v3952_v35, %v3951_v44  ;;  %v12281_v22 = vld [vmem:[#allocation69_spill] sm:$0xff]  ;;  %v12289_v35 = vld [vmem:[#allocation66_spill] sm:$0xff] }
 0x2cd   : > { %v3969_v24 = vsel %vm3923_vm2, %v3901_v40, 0.0  ;;  %v3970_v2 = vsel %vm3923_vm2, %v3902_v27, 0.0  ;;  %v3906_v28 = vmul.f32 %v3874_v7, %v12276_v0  ;;  %v3907_v36 = vmul.f32 %v3875_v58, %v12277_v56  ;;  %v12282_v58 = vld [vmem:[#allocation38_spill] sm:$0xff] }
 0x2ce   : > { %v3908_v54 = vmul.f32 %v3876_v1, %v12278_v8  ;;  %v3962_v33 = vadd.f32 %v3961_v15, %v3960_v38  ;;  %v3909_v11 = vmul.f32 %v10306_v59, %v12279_v25  ;;  %v3928_v45 = vadd.f32 %v3927_v61, %v3926_v30  ;;  %v12283_v27 = vld [vmem:[#allocation42_spill] sm:$0xff]  ;;  %v12286_v30 = vld [vmem:[#allocation57_spill] sm:$0xff]  ;;  %v12290_v61 = vld [vmem:[#allocation55_spill] sm:$0xff] }
 0x2cf   : > { %v3978_v41 = vsel %vm3923_vm2, %v3903_v18, 0.0  ;;  %v3979_v63 = vsel %vm3923_vm2, %v3904_v62, 0.0  ;;  %v3910_v26 = vmul.f32 %v10309_v50, %v12280_v31  ;;  %v3911_v19 = vmul.f32 %v10312_v43, %v12281_v22  ;;  %v12284_v50 = vld [vmem:[#allocation43_spill] sm:$0xff]  ;;  %v12285_v43 = vld [vmem:[#allocation46_spill] sm:$0xff]  ;;  %v12291_v38 = vld [vmem:[#allocation64_spill] sm:$0xff] }
 0x2d0   : > { %v3937_v7 = vadd.f32 %v3936_v60, %v3935_v48  ;;  %v3971_v40 = vadd.f32 %v3970_v2, %v3969_v24  ;;  %v3912_v1 = vmul.f32 %v10315_v10, %v12282_v58  ;;  %v3946_v20 = vadd.f32 %v3945_v16, %v3944_v55  ;;  %v12288_v55 = vld [vmem:[#allocation62_spill] sm:$0xff] }
 0x2d1   : > { %v3954_v3 = vrot.slane %v3953_v4, 4  ;;  %v3987_v59 = vsel %vm3923_vm2, %v3905_v53, 0.0  ;;  %v3913_v5 = vmul.f32 %v10318_v13, %v12283_v27  ;;  %v3963_v12 = vrot.slane %v3962_v33, 4  ;;  %v12292_v53 = vld [vmem:[#allocation2_spill] sm:$0xff] }
 0x2d2   : > { %v3980_v29 = vadd.f32 %v3979_v63, %v3978_v41  ;;  %v3988_v47 = vsel %vm3923_vm2, %v3906_v28, 0.0  ;;  %v3914_v14 = vmul.f32 %v10321_v23, %v12284_v50  ;;  %v3915_v37 = vmul.f32 %v10324_v42, %v12285_v43 }
 0x2d3   : > { %v3916_v10 = vmul.f32 %v10327_v34, %v12286_v30  ;;  %v3929_v48 = vrot.slane %v3928_v45, 2  ;;  %v3917_v57 = vmul.f32 %v10330_v49, %v12287_v46  ;;  %v3938_v52 = vrot.slane %v3937_v7, 2 }
 0x2d4   : > { %v3972_v18 = vrot.slane %v3971_v40, 4  ;;  %v3989_v13 = vadd.f32 %v3988_v47, %v3987_v59  ;;  %v3918_v44 = vmul.f32 %v10333_v9, %v12288_v55  ;;  %v3919_v51 = vmul.f32 %v10336_v17, %v12289_v35 }
 0x2d5   : > { %v3947_v23 = vrot.slane %v3946_v20, 2  ;;  %v3955_v62 = vadd.f32 %v3954_v3, %v3953_v4  ;;  %v3920_v42 = vmul.f32 %v10343_v39, %v12290_v61  ;;  %v3921_v34 = vmul.f32 %v3889_v21, %v12291_v38 }
 0x2d6   : > { %v3964_v15 = vadd.f32 %v3963_v12, %v3962_v33  ;;  %v3981_v32 = vrot.slane %v3980_v29, 4  ;;  %v3922_v49 = vmul.f32 %v3890_v6, %v12292_v53  ;;  %v3930_v60 = vadd.f32 %v3929_v48, %v3928_v45 }
 0x2d7   : > { %v3996_v16 = vsel %vm3923_vm2, %v3907_v36, 0.0  ;;  %v3997_v24 = vsel %vm3923_vm2, %v3908_v54, 0.0  ;;  %v3939_v9 = vadd.f32 %v3938_v52, %v3937_v7  ;;  %v3973_v2 = vadd.f32 %v3972_v18, %v3971_v40 }
 0x2d8   : > { %v3990_v0 = vrot.slane %v3989_v13, 4  ;;  %v3998_v17 = vadd.f32 %v3997_v24, %v3996_v16  ;;  %v3948_v28 = vadd.f32 %v3947_v23, %v3946_v20  ;;  %v3956_v4 = vrot.slane %v3955_v62, 2 }
 0x2d9   : > { %v4005_v56 = vsel %vm3923_vm2, %v3909_v11, 0.0  ;;  %v4006_v39 = vsel %vm3923_vm2, %v3910_v26, 0.0  ;;  %v3965_v21 = vrot.slane %v3964_v15, 2  ;;  %v3982_v8 = vadd.f32 %v3981_v32, %v3980_v29 }
 0x2da   : > { %v4007_v33 = vadd.f32 %v4006_v39, %v4005_v56  ;;  %v4014_v6 = vsel %vm3923_vm2, %v3911_v19, 0.0  ;;  %v3999_v25 = vrot.slane %v3998_v17, 4  ;;  %v4015_v36 = vsel %vm3923_vm2, %v3912_v1, 0.0 }
 0x2db   : > { %v4023_v54 = vsel %vm3923_vm2, %v3913_v5, 0.0  ;;  %v4024_v45 = vsel %vm3923_vm2, %v3914_v14, 0.0  ;;  %v3931_v41 = vrot.slane %v3930_v60, 1  ;;  %v3940_v63 = vrot.slane %v3939_v9, 1 }
 0x2dc   : > { %v3974_v31 = vrot.slane %v3973_v2, 2  ;;  %v3991_v22 = vadd.f32 %v3990_v0, %v3989_v13  ;;  %v4008_v7 = vrot.slane %v4007_v33, 4  ;;  %v4016_v11 = vadd.f32 %v4015_v36, %v4014_v6 }
 0x2dd   : > { %v4032_v26 = vsel %vm3923_vm2, %v3915_v37, 0.0  ;;  %v4033_v40 = vsel %vm3923_vm2, %v3916_v10, 0.0  ;;  %v3949_v58 = vrot.slane %v3948_v28, 1  ;;  %v3957_v20 = vadd.f32 %v3956_v4, %v3955_v62 }
 0x2de   : > { %v3966_v19 = vadd.f32 %v3965_v21, %v3964_v15  ;;  %v4025_v3 = vadd.f32 %v4024_v45, %v4023_v54  ;;  %v3983_v59 = vrot.slane %v3982_v8, 2  ;;  %v4000_v1 = vadd.f32 %v3999_v25, %v3998_v17 }
 0x2df   : > { %v4041_v27 = vsel %vm3923_vm2, %v3917_v57, 0.0  ;;  %v4042_v5 = vsel %vm3923_vm2, %v3918_v44, 0.0  ;;  %v3932_v12 = vadd.f32 %v3931_v41, %v3930_v60  ;;  %v3975_v29 = vadd.f32 %v3974_v31, %v3973_v2 }
 0x2e0   : > { %v4017_v47 = vrot.slane %v4016_v11, 4  ;;  %v4034_v50 = vadd.f32 %v4033_v40, %v4032_v26  ;;  %v3992_v14 = vrot.slane %v3991_v22, 2  ;;  %v4009_v43 = vadd.f32 %v4008_v7, %v4007_v33 }
 0x2e1   : > { %v4050_v37 = vsel %vm3923_vm2, %v3919_v51, 0.0  ;;  %v4051_v30 = vsel %vm3923_vm2, %v3920_v42, 0.0  ;;  %v3941_v10 = vadd.f32 %v3940_v63, %v3939_v9  ;;  %v3958_v48 = vrot.slane %v3957_v20, 1 }
 0x2e2   : > { %v4026_v46 = vrot.slane %v4025_v3, 4  ;;  %v4043_v52 = vadd.f32 %v4042_v5, %v4041_v27  ;;  %v3967_v18 = vrot.slane %v3966_v19, 1  ;;  %v3984_v13 = vadd.f32 %v3983_v59, %v3982_v8 }
 0x2e3   : > { %v4001_v55 = vrot.slane %v4000_v1, 2  ;;  %v4059_v57 = vsel %vm3923_vm2, %v3921_v34, 0.0  ;;  %v3950_v44 = vadd.f32 %v3949_v58, %v3948_v28  ;;  %v4018_v35 = vadd.f32 %v4017_v47, %v4016_v11 }
 0x2e4   : > { %v4035_v23 = vrot.slane %v4034_v50, 4  ;;  %v4052_v62 = vadd.f32 %v4051_v30, %v4050_v37  ;;  %v3976_v61 = vrot.slane %v3975_v29, 1  ;;  %v3993_v38 = vadd.f32 %v3992_v14, %v3991_v22 }
 0x2e5   : > { %v4010_v15 = vrot.slane %v4009_v43, 2  ;;  %v4060_v51 = vsel %vm3923_vm2, %v3922_v49, 0.0  ;;  %v3959_v32 = vadd.f32 %v3958_v48, %v3957_v20  ;;  %v4027_v42 = vadd.f32 %v4026_v46, %v4025_v3 }
 0x2e6   : > { %v4044_v53 = vrot.slane %v4043_v52, 4  ;;  %v4061_v60 = vadd.f32 %v4060_v51, %v4059_v57  ;;  %v3968_v16 = vadd.f32 %v3967_v18, %v3966_v19  ;;  %v3985_v24 = vrot.slane %v3984_v13, 1 }
 0x2e7   : > { %v4002_v9 = vadd.f32 %v4001_v55, %v4000_v1  ;;  %v4068_v2 = vsel %vm3923_vm2, %v3932_v12, 0.0  ;;  %v4019_v0 = vrot.slane %v4018_v35, 2  ;;  %v4036_v34 = vadd.f32 %v4035_v23, %v4034_v50 }
 0x2e8   : > { %v4053_v17 = vrot.slane %v4052_v62, 4  ;;  %v4069_v28 = vsel %vm3923_vm2, %v3941_v10, 0.0  ;;  %v3977_v4 = vadd.f32 %v3976_v61, %v3975_v29  ;;  %v3994_v56 = vrot.slane %v3993_v38, 1 }
 0x2e9   : > { %v4011_v39 = vadd.f32 %v4010_v15, %v4009_v43  ;;  %v4070_v21 = vadd.f32 %v4069_v28, %v4068_v2  ;;  %v4028_v8 = vrot.slane %v4027_v42, 2  ;;  %v4045_v49 = vadd.f32 %v4044_v53, %v4043_v52 }
 0x2ea   : > { %v4062_v33 = vrot.slane %v4061_v60, 4  ;;  %v4071_v6 = vsel %vm3923_vm2, %v3950_v44, 0.0  ;;  %v3986_v25 = vadd.f32 %v3985_v24, %v3984_v13  ;;  %v4003_v36 = vrot.slane %v4002_v9, 1 }
 0x2eb   : > { %v4072_v54 = vadd.f32 %v4071_v6, %v4070_v21  ;;  %v4073_v45 = vsel %vm3923_vm2, %v3959_v32, 0.0  ;;  %v4020_v41 = vadd.f32 %v4019_v0, %v4018_v35  ;;  %v4037_v63 = vrot.slane %v4036_v34, 2 }
 0x2ec   : > { %v4054_v31 = vadd.f32 %v4053_v17, %v4052_v62  ;;  %v4075_v22 = vsel %vm3923_vm2, %v3968_v16, 0.0  ;;  %v3995_v7 = vadd.f32 %v3994_v56, %v3993_v38  ;;  %v4012_v11 = vrot.slane %v4011_v39, 1 }
 0x2ed   : > { %v4074_v26 = vadd.f32 %v4073_v45, %v4072_v54  ;;  %v4029_v40 = vadd.f32 %v4028_v8, %v4027_v42  ;;  %v4046_v58 = vrot.slane %v4045_v49, 2  ;;  %v4063_v20 = vadd.f32 %v4062_v33, %v4061_v60  ;;  %v4175_v8 = vld [vmem:[%s10463_s8] sm:$0x1] }
 0x2ee   : > { %v4077_v19 = vsel %vm3923_vm2, %v3977_v4, 0.0  ;;  %v4004_v3 = vadd.f32 %v4003_v36, %v4002_v9  ;;  %v4021_v1 = vrot.slane %v4020_v41, 1  ;;  %v4038_v27 = vadd.f32 %v4037_v63, %v4036_v34 }
 0x2ef   : > { %v4076_v59 = vadd.f32 %v4075_v22, %v4074_v26  ;;  %v4055_v5 = vrot.slane %v4054_v31, 2  ;;  %v4079_v12 = vsel %vm3923_vm2, %v3986_v25, 0.0  ;;  %v4013_v29 = vadd.f32 %v4012_v11, %v4011_v39 }
 0x2f0   : > { %v4030_v50 = vrot.slane %v4029_v40, 1  ;;  %v4047_v14 = vadd.f32 %v4046_v58, %v4045_v49  ;;  %v4064_v43 = vrot.slane %v4063_v20, 2  ;;  %v4081_v37 = vsel %vm3923_vm2, %v3995_v7, 0.0 }
 0x2f1   : > { %v4078_v47 = vadd.f32 %v4077_v19, %v4076_v59  ;;  %v4022_v10 = vadd.f32 %v4021_v1, %v4020_v41  ;;  %v4039_v48 = vrot.slane %v4038_v27, 1  ;;  %v4056_v46 = vadd.f32 %v4055_v5, %v4054_v31 }
 0x2f2   : > { %v4083_v52 = vsel %vm3923_vm2, %v4004_v3, 0.0  ;;  %v4031_v13 = vadd.f32 %v4030_v50, %v4029_v40  ;;  %v4048_v55 = vrot.slane %v4047_v14, 1  ;;  %v4065_v57 = vadd.f32 %v4064_v43, %v4063_v20 }
 0x2f3   : > { %v4080_v30 = vadd.f32 %v4079_v12, %v4078_v47  ;;  %v4085_v44 = vsel %vm3923_vm2, %v4013_v29, 0.0  ;;  %v4040_v23 = vadd.f32 %v4039_v48, %v4038_v27  ;;  %v4057_v62 = vrot.slane %v4056_v46, 1 }
 0x2f4   : > { %v4087_v61 = vsel %vm3923_vm2, %v4022_v10, 0.0  ;;  %v4049_v15 = vadd.f32 %v4048_v55, %v4047_v14  ;;  %v4066_v51 = vrot.slane %v4065_v57, 1  ;;  %v4089_v32 = vsel %vm3923_vm2, %v4031_v13, 0.0 }
 0x2f5   : > { %v4082_v18 = vadd.f32 %v4081_v37, %v4080_v30  ;;  %v4058_v53 = vadd.f32 %v4057_v62, %v4056_v46  ;;  %v4091_v60 = vsel %vm3923_vm2, %v4040_v23, 0.0 }
 0x2f6   : > { %v4067_v24 = vadd.f32 %v4066_v51, %v4065_v57  ;;  %v4093_v9 = vsel %vm3923_vm2, %v4049_v15, 0.0 }
 0x2f7   : > { %v4084_v35 = vadd.f32 %v4083_v52, %v4082_v18  ;;  %v4095_v0 = vsel %vm3923_vm2, %v4058_v53, 0.0 }
 0x2f8   : > { %v4097_v17 = vsel %vm3923_vm2, %v4067_v24, 0.0 }
 0x2f9   : > { %v4086_v38 = vadd.f32 %v4085_v44, %v4084_v35 }
 0x2fb   : > { %v4088_v42 = vadd.f32 %v4087_v61, %v4086_v38 }
 0x2fd   : > { %v4090_v16 = vadd.f32 %v4089_v32, %v4088_v42 }
 0x2ff   : > { %v4092_v2 = vadd.f32 %v4091_v60, %v4090_v16 }
 0x301   : > { %v4094_v34 = vadd.f32 %v4093_v9, %v4092_v2 }
 0x303   : > { %v4096_v28 = vadd.f32 %v4095_v0, %v4094_v34 }
 0x305   : > { %v4098_v4 = vadd.f32 %v4097_v17, %v4096_v28 }
 0x307   : > { %v4099_v56 = vmul.f32 0.00390625, %v4098_v4 }
 0x309   : > { %4348 = vmatmul.mubr.msk.f32.vlgmr.msra.gmra.mrb[0].mxu0 %vm3923_vm2, %v4099_v56 }
 0x3dc   : > { %v4170_v39 = vpop.f32.mrb[0].mxu0 }
 0x3dd   : > { %v4349_v21 = vpop.f32.mrb[1].mxu0  ;;  %4353 = vmatmul.mubr.msk.f32.vlgmr.msra.gmra.mrb[0].mxu1 %vm3923_vm2, %v4170_v39 }
 0x4b0   : > { %v4245_v49 = vpop.f32.mrb[0].mxu1 }
 0x4b1   : > { %v4354_v33 = vpop.f32.mrb[1].mxu1  ;;  %v4246_v6 = vadd.f32 %v4245_v49, %v4175_v8 }
 0x4b3   : > { %4250 = vst.msk [vmem:[%s348_s28] sm:$0x1] %vm4249_vm4, %v4246_v6 }
 0x4b4 PF: > { %s19_s30 = sadd.s32 1, %s4468_s30  }
 0x4b5   : > { %p16_p4 = scmp.ge.s32.totalorder %s19_s30, 4  }
 0x4b7   :  { %18 = sbr.rel (!%p16_p4) target bundleno = 1 (0x1), region = 89 }

</bundles_post_ra>
